<compile_context>
chip_gen: v7x
topology: tpu7x:2x2x1
jax: 0.10.0
libtpu: 0.0.40
codegen_flags: <defaults>
</compile_context>

<pallas_src>
import functools

import jax
import jax.numpy as jnp
from jax import lax
from jax.experimental import pallas as pl
from jax.experimental.pallas import tpu as pltpu

_BN_EPS = 1e-5
_LANE = 128                       # channel slab width (lane-dense stores)
_VMEM_LIMIT = 32 * 1024 * 1024    # safe scoped-VMEM budget on v5e/v6e/v7x
_ELTWISE_TILE_ROWS = 1024         # ~85% of HBM roofline per measured data


def _round_up(x, n):
    return (x + n - 1) // n * n


def _row_tile(m):
    tm = 1
    while tm * 2 <= min(m, _ELTWISE_TILE_ROWS) and m % (tm * 2) == 0:
        tm *= 2
    if tm % 8:
        tm = m
    return tm


# ------------------------------------------------------------------ kernel bodies
def _conv3x3_kernel(*refs, h, w, cp, n_out, fuse_input_affine):
    """One batch element per grid step:
       [optionally BN-affine + ReLU the loaded activation (fused BN1+ReLU)]
       -> zero-bordered (h+2, w+2, cp) halo tile in VMEM scratch
       -> 9 accumulating K=cp bf16 MXU dots (f32 acc) + bias
       -> bf16 conv output + per-batch (2, n_out) BN sum / sum-of-squares."""
    if fuse_input_affine:
        x_ref, w_ref, b_ref, s_ref, t_ref, y_ref, stats_ref, xs_ref = refs
    else:
        x_ref, w_ref, b_ref, y_ref, stats_ref, xs_ref = refs

    xin = x_ref[...]                                        # (h, w, cp) bf16
    if fuse_input_affine:
        s3 = s_ref[...].reshape(1, 1, cp)
        t3 = t_ref[...].reshape(1, 1, cp)
        xin = jnp.maximum(xin.astype(jnp.float32) * s3 + t3, 0.0)
    xin = xin.astype(jnp.bfloat16)

    # Zero-padded halo tile built in VMEM; the border ring must be explicit
    # zeros (with the fused affine, relu(shift) != 0).  Spatial padding never
    # materializes in HBM.  (For large tiles, zero only the border ring.)
    xs_ref[...] = jnp.zeros((h + 2, w + 2, cp), jnp.bfloat16)
    xs_ref[1:h + 1, 1:w + 1, :] = xin

    hw = h * w
    acc = jnp.zeros((hw, n_out), jnp.float32)
    for dy in range(3):                                     # 9 K=cp MXU dots
        for dx in range(3):
            tap = xs_ref[dy:dy + h, dx:dx + w, :].reshape(hw, cp)
            acc = acc + jnp.dot(tap, w_ref[dy * 3 + dx],
                                preferred_element_type=jnp.float32)
    acc = acc + b_ref[...]                                  # f32 bias

    y_ref[...] = acc.astype(y_ref.dtype)                    # bf16 store
    s = jnp.sum(acc, axis=0, keepdims=True)
    ss = jnp.sum(acc * acc, axis=0, keepdims=True)
    stats_ref[0] = jnp.concatenate([s, ss], axis=0)         # per-batch stats


def _bn_add_relu_kernel(y_ref, sc_ref, s_ref, t_ref, ss_ref, ts_ref, o_ref):
    """BN2(main) + BN_s(shortcut) + add + ReLU (identity shortcut: ss=1, ts=0)."""
    main = y_ref[...].astype(jnp.float32) * s_ref[...] + t_ref[...]
    skip = sc_ref[...].astype(jnp.float32) * ss_ref[...] + ts_ref[...]
    o_ref[...] = jnp.maximum(main + skip, 0.0).astype(o_ref.dtype)


# ------------------------------------------------------------------ pallas wrappers
def _conv3x3_pass(x_img, w_taps, bias_row, s_in=None, t_in=None, *,
                  h, w, cp, n_out):
    """Batch-gridded fused conv pass.
    Returns (y (n*h*w, n_out) bf16, stats (n, 2, n_out) f32)."""
    n = x_img.shape[0]
    hw = h * w
    fuse = s_in is not None
    kernel = functools.partial(_conv3x3_kernel, h=h, w=w, cp=cp, n_out=n_out,
                               fuse_input_affine=fuse)

    in_specs = [
        pl.BlockSpec((None, h, w, cp), lambda i: (i, 0, 0, 0)),
        pl.BlockSpec((9, cp, n_out), lambda i: (0, 0, 0)),
        pl.BlockSpec((1, n_out), lambda i: (0, 0)),
    ]
    args = [x_img, w_taps, bias_row]
    if fuse:
        in_specs += [pl.BlockSpec((1, cp), lambda i: (0, 0)),
                     pl.BlockSpec((1, cp), lambda i: (0, 0))]
        args += [s_in, t_in]

    return pl.pallas_call(
        kernel,
        out_shape=(jax.ShapeDtypeStruct((n * hw, n_out), jnp.bfloat16),
                   jax.ShapeDtypeStruct((n, 2, n_out), jnp.float32)),
        grid_spec=pltpu.PrefetchScalarGridSpec(
            num_scalar_prefetch=0,
            grid=(n,),
            in_specs=in_specs,
            out_specs=[
                pl.BlockSpec((hw, n_out), lambda i: (i, 0)),
                pl.BlockSpec((1, 2, n_out), lambda i: (i, 0, 0)),
            ],
            scratch_shapes=[pltpu.VMEM((h + 2, w + 2, cp), jnp.bfloat16)]),
        compiler_params=pltpu.CompilerParams(
            dimension_semantics=("parallel",),       # per-batch stats -> no race
            vmem_limit_bytes=_VMEM_LIMIT),
    )(*args)


def _bn_add_relu(y2, sc, sc_col, s2, t2, ssc, tsc, out_dtype=jnp.float32):
    m, cp = y2.shape
    tm = _row_tile(m)
    return pl.pallas_call(
        _bn_add_relu_kernel,
        out_shape=jax.ShapeDtypeStruct((m, cp), out_dtype),
        grid_spec=pltpu.PrefetchScalarGridSpec(
            num_scalar_prefetch=0,
            grid=(m // tm,),
            in_specs=[pl.BlockSpec((tm, cp), lambda i: (i, 0)),
                      pl.BlockSpec((tm, cp), lambda i, c=sc_col: (i, c)),
                      pl.BlockSpec((1, cp), lambda i: (0, 0)),
                      pl.BlockSpec((1, cp), lambda i: (0, 0)),
                      pl.BlockSpec((1, cp), lambda i: (0, 0)),
                      pl.BlockSpec((1, cp), lambda i: (0, 0))],
            out_specs=pl.BlockSpec((tm, cp), lambda i: (i, 0))),
        compiler_params=pltpu.CompilerParams(
            dimension_semantics=("parallel",),
            vmem_limit_bytes=_VMEM_LIMIT),
    )(y2, sc, s2, t2, ssc, tsc)


# ------------------------------------------------------------------ packing helpers
def _pack_taps(w_main_oihw, w_short_oi11, cp):
    """(9, cp, n_out) bf16 tap weights.  If a 1x1 projection is given it is
    fused at the center tap into output columns [cp, cp+cout_s)."""
    co, ci = w_main_oihw.shape[:2]
    n_out = 2 * cp if w_short_oi11 is not None else cp
    taps = jnp.zeros((9, cp, n_out), jnp.float32)
    wm = jnp.transpose(w_main_oihw, (2, 3, 1, 0)).astype(jnp.float32)  # (3,3,ci,co)
    taps = taps.at[:, :ci, :co].set(wm.reshape(9, ci, co))
    if w_short_oi11 is not None:
        cos, cis = w_short_oi11.shape[:2]
        taps = taps.at[4, :cis, cp:cp + cos].set(
            jnp.transpose(w_short_oi11[:, :, 0, 0]).astype(jnp.float32))
    return taps.astype(jnp.bfloat16)


def _pack_bias(b_main, b_short, cp):
    n_out = 2 * cp if b_short is not None else cp
    row = jnp.zeros((1, n_out), jnp.float32)
    row = row.at[0, :b_main.shape[0]].set(b_main.astype(jnp.float32))
    if b_short is not None:
        row = row.at[0, cp:cp + b_short.shape[0]].set(b_short.astype(jnp.float32))
    return row


def _bn_affine(stats, gamma, beta, count, cp):
    """Finalize single-pass BN stats (sum, sumsq) into per-channel scale/shift."""
    g = jnp.pad(gamma.astype(jnp.float32), (0, cp - gamma.shape[0]))
    b = jnp.pad(beta.astype(jnp.float32), (0, cp - beta.shape[0]))
    mean = stats[0] / count
    var = jnp.maximum(stats[1] / count - mean * mean, 0.0)  # guard cancellation
    scale = g * lax.rsqrt(var + _BN_EPS)
    shift = b - mean * scale
    return scale.reshape(1, cp), shift.reshape(1, cp)


# ------------------------------------------------------------------ forward pass
def residual_block_pallas(x_nchw, params):
    n, cin, h, w = x_nchw.shape
    cout = params["w1"].shape[0]
    cp = _round_up(max(cin, cout, _LANE), _LANE)       # lane-dense channel slab
    m = n * h * w
    assert (h * w) % 8 == 0, "demo kernel requires h*w to be a multiple of 8"

    has_proj = "ws" in params
    n_out1 = 2 * cp if has_proj else cp

    x_img = jnp.transpose(x_nchw, (0, 2, 3, 1))                     # NHWC
    x_img = jnp.pad(x_img, ((0, 0), (0, 0), (0, 0), (0, cp - cin)))
    x_img = x_img.astype(jnp.bfloat16)                              # bf16 slab

    # --- conv1 (+ fused 1x1 projection) + per-batch BN stats ------------------
    y1, st1 = _conv3x3_pass(x_img,
                            _pack_taps(params["w1"], params.get("ws"), cp),
                            _pack_bias(params["b1"], params.get("bs"), cp),
                            h=h, w=w, cp=cp, n_out=n_out1)
    st1_sum = jnp.sum(st1, axis=0)                     # tiny (2, n_out1) f32
    s1, t1 = _bn_affine(st1_sum[:, :cp], params["g1"], params["beta1"],
                        float(m), cp)

    # --- conv2 with BN1+ReLU fused into its input path, + BN2 stats -----------
    y1_img = y1.reshape(n, h, w, n_out1)               # free view; cols [0, cp)
    y2, st2 = _conv3x3_pass(y1_img,
                            _pack_taps(params["w2"], None, cp),
                            _pack_bias(params["b2"], None, cp),
                            s1, t1, h=h, w=w, cp=cp, n_out=cp)
    s2, t2 = _bn_affine(jnp.sum(st2, axis=0), params["g2"], params["beta2"],
                        float(m), cp)

    # --- shortcut affine -------------------------------------------------------
    if has_proj:
        ssc, tsc = _bn_affine(st1_sum[:, cp:], params["gs"], params["betas"],
                              float(m), cp)
        sc, sc_col = y1, 1                              # right half of fused conv1
    else:
        sc, sc_col = x_img.reshape(m, cp), 0            # identity (bf16)
        ssc = jnp.ones((1, cp), jnp.float32)
        tsc = jnp.zeros((1, cp), jnp.float32)

    # --- BN2 + shortcut-BN + add + ReLU (single fused elementwise pass) -------
    out = _bn_add_relu(y2, sc, sc_col, s2, t2, ssc, tsc)
    out = out.reshape(n, h, w, cp)[..., :cout]
    # TODO(synk): small-C consumers could take the padded NHWC slab directly and
    #             skip this padded-f32 slice + NCHW transpose done in XLA.
    return jnp.transpose(out, (0, 3, 1, 2))


# ------------------------------------------------------------------ references
def residual_block_ref(x_nchw, params):
    """Pure f32 reference (PyTorch module semantics, training-mode BN)."""
    def conv(x, w, b, pad):
        y = lax.conv_general_dilated(
            x, w, window_strides=(1, 1), padding=[(pad, pad), (pad, pad)],
            dimension_numbers=("NCHW", "OIHW", "NCHW"))
        return y + b[None, :, None, None]

    def bn(y, g, beta):
        mean = jnp.mean(y, axis=(0, 2, 3), keepdims=True)
        var = jnp.mean((y - mean) ** 2, axis=(0, 2, 3), keepdims=True)
        return (y - mean) * lax.rsqrt(var + _BN_EPS) * g[None, :, None, None] \
               + beta[None, :, None, None]

    out = jax.nn.relu(bn(conv(x_nchw, params["w1"], params["b1"], 1),
                         params["g1"], params["beta1"]))
    out = bn(conv(out, params["w2"], params["b2"], 1),
             params["g2"], params["beta2"])
    if "ws" in params:
        sc = bn(conv(x_nchw, params["ws"], params["bs"], 0),
                params["gs"], params["betas"])
    else:
        sc = x_nchw
    return jax.nn.relu(out + sc)


def residual_block_ref_bf16(x_nchw, params):
    """Reference matching the kernel's precision (bf16 matmul operands and bf16
    storage of every intermediate, f32 accumulation / BN math)."""
    bf16 = jnp.bfloat16

    def conv(x, w, b, pad):
        y = lax.conv_general_dilated(
            x.astype(bf16), w.astype(bf16), window_strides=(1, 1),
            padding=[(pad, pad), (pad, pad)],
            dimension_numbers=("NCHW", "OIHW", "NCHW"),
            preferred_element_type=jnp.float32)
        y = y + b[None, :, None, None]
        return y.astype(bf16).astype(jnp.float32)       # bf16 intermediate store

    def bn(y, g, beta):
        mean = jnp.mean(y, axis=(0, 2, 3), keepdims=True)
        var = jnp.mean(y * y, axis=(0, 2, 3), keepdims=True) - mean * mean
        return (y - mean) * lax.rsqrt(var + _BN_EPS) * g[None, :, None, None] \
               + beta[None, :, None, None]

    a1 = jax.nn.relu(bn(conv(x_nchw, params["w1"], params["b1"], 1),
                        params["g1"], params["beta1"]))
    a1 = a1.astype(bf16).astype(jnp.float32)
    out = bn(conv(a1, params["w2"], params["b2"], 1),
             params["g2"], params["beta2"])
    if "ws" in params:
        sc = bn(conv(x_nchw, params["ws"], params["bs"], 0),
                params["gs"], params["betas"])
    else:
        sc = x_nchw.astype(bf16).astype(jnp.float32)
    return jax.nn.relu(out + sc)


def init_params(key, cin, cout):
    ks = jax.random.split(key, 12)
    p = {
        "w1": 0.2 * jax.random.normal(ks[0], (cout, cin, 3, 3), jnp.float32),
        "b1": 0.1 * jax.random.normal(ks[1], (cout,), jnp.float32),
        "g1": 1.0 + 0.1 * jax.random.normal(ks[2], (cout,), jnp.float32),
        "beta1": 0.1 * jax.random.normal(ks[3], (cout,), jnp.float32),
        "w2": 0.2 * jax.random.normal(ks[4], (cout, cout, 3, 3), jnp.float32),
        "b2": 0.1 * jax.random.normal(ks[5], (cout,), jnp.float32),
        "g2": 1.0 + 0.1 * jax.random.normal(ks[6], (cout,), jnp.float32),
        "beta2": 0.1 * jax.random.normal(ks[7], (cout,), jnp.float32),
    }
    if cin != cout:
        p.update({
            "ws": 0.2 * jax.random.normal(ks[8], (cout, cin, 1, 1), jnp.float32),
            "bs": 0.1 * jax.random.normal(ks[9], (cout,), jnp.float32),
            "gs": 1.0 + 0.1 * jax.random.normal(ks[10], (cout,), jnp.float32),
            "betas": 0.1 * jax.random.normal(ks[11], (cout,), jnp.float32),
        })
    return p


def _check(x, params):
    out = jax.block_until_ready(jax.jit(residual_block_pallas)(x, params))
    ref_b = residual_block_ref_bf16(x, params)   # precision-matched reference
    ref_f = residual_block_ref(x, params)        # full-f32 module reference
    assert out.shape == ref_f.shape, (out.shape, ref_f.shape)
    err_b = float(jnp.max(jnp.abs(out - ref_b)))
    err_f = float(jnp.max(jnp.abs(out - ref_f)))
    assert jnp.allclose(out, ref_b, atol=2e-2, rtol=2e-2), err_b
    assert jnp.allclose(out, ref_f, atol=1e-1, rtol=1e-1), err_f
    return out


if __name__ == "__main__":
    key = jax.random.PRNGKey(0)
    k_x1, k_p1, k_x2, k_p2 = jax.random.split(key, 4)

    # Projection-shortcut case (in_channels=4 != out_channels=8).
    x1 = jax.random.normal(k_x1, (2, 4, 16, 16), jnp.float32)
    p1 = init_params(k_p1, 4, 8)
    out1 = _check(x1, p1)
    assert out1.shape == (2, 8, 16, 16)

    # Identity-shortcut case (in_channels == out_channels == 8).
    x2 = jax.random.normal(k_x2, (2, 8, 16, 16), jnp.float32)
    p2 = init_params(k_p2, 8, 8)
    out2 = _check(x2, p2)
    assert out2.shape == (2, 8, 16, 16)

    print("KERNEL_OK")
</pallas_src>

<mosaic_0001>
module attributes {stable_mosaic.version = 11 : i64} {
  func.func @_conv3x3_kernel(%arg0: i32, %arg1: memref<1x16x16x128xbf16, #tpu.memory_space<vmem>>, %arg2: memref<9x128x256xbf16, #tpu.memory_space<vmem>>, %arg3: memref<1x256xf32, #tpu.memory_space<vmem>>, %arg4: memref<256x256xbf16, #tpu.memory_space<vmem>>, %arg5: memref<1x2x256xf32, #tpu.memory_space<vmem>>, %arg6: memref<18x18x128xbf16, #tpu.memory_space<vmem>>) attributes {dimension_semantics = [#tpu.dimension_semantics<parallel>], iteration_bounds = array<i64: 2>, scalar_prefetch = 0 : i64, scratch_operands = 1 : i64, tpu.core_type = #tpu.core_type<tc>, window_params = [{transform_indices = @transform_0, window_bounds = array<i64: 1, 16, 16, 128>}, {pipeline_mode = #tpu.pipeline_mode<synchronous>, transform_indices = @transform_1, window_bounds = array<i64: 9, 128, 256>}, {pipeline_mode = #tpu.pipeline_mode<synchronous>, transform_indices = @transform_2, window_bounds = array<i64: 1, 256>}, {transform_indices = @transform_3, window_bounds = array<i64: 256, 256>}, {transform_indices = @transform_4, window_bounds = array<i64: 1, 2, 256>}]} {
    %c0 = arith.constant 0 : index
    %c0_0 = arith.constant 0 : index
    %c0_1 = arith.constant 0 : index
    %c0_2 = arith.constant 0 : index
    %0 = vector.load %arg1[%c0, %c0_0, %c0_1, %c0_2] : memref<1x16x16x128xbf16, #tpu.memory_space<vmem>>, vector<1x16x16x128xbf16>
    %1 = vector.shape_cast %0 : vector<1x16x16x128xbf16> to vector<16x16x128xbf16>
    %cst = arith.constant 0.000000e+00 : bf16
    %2 = vector.broadcast %cst : bf16 to vector<18x18x128xbf16>
    %c0_3 = arith.constant 0 : index
    %c0_4 = arith.constant 0 : index
    %c0_5 = arith.constant 0 : index
    %3 = vector.load %arg6[%c0_3, %c0_4, %c0_5] : memref<18x18x128xbf16, #tpu.memory_space<vmem>>, vector<18x18x128xbf16>
    tpu.vector_store %arg6[%c0_3, %c0_4, %c0_5], %2 {strides = array<i32>} : memref<18x18x128xbf16, #tpu.memory_space<vmem>>, vector<18x18x128xbf16>,
    %c1 = arith.constant 1 : index
    %c1_6 = arith.constant 1 : index
    %c0_7 = arith.constant 0 : index
    %4 = vector.load %arg6[%c1, %c1_6, %c0_7] : memref<18x18x128xbf16, #tpu.memory_space<vmem>>, vector<16x16x128xbf16>
    tpu.vector_store %arg6[%c1, %c1_6, %c0_7], %1 {strides = array<i32>} : memref<18x18x128xbf16, #tpu.memory_space<vmem>>, vector<16x16x128xbf16>,
    %cst_8 = arith.constant 0.000000e+00 : f32
    %5 = vector.broadcast %cst_8 : f32 to vector<256x256xf32>
    %c0_9 = arith.constant 0 : index
    %c0_10 = arith.constant 0 : index
    %c0_11 = arith.constant 0 : index
    %6 = vector.load %arg6[%c0_9, %c0_10, %c0_11] : memref<18x18x128xbf16, #tpu.memory_space<vmem>>, vector<16x16x128xbf16>
    %7 = vector.shape_cast %6 : vector<16x16x128xbf16> to vector<256x128xbf16>
    %c0_12 = arith.constant 0 : index
    %c0_13 = arith.constant 0 : index
    %c0_14 = arith.constant 0 : index
    %8 = vector.load %arg2[%c0_12, %c0_13, %c0_14] : memref<9x128x256xbf16, #tpu.memory_space<vmem>>, vector<1x128x256xbf16>
    %9 = vector.shape_cast %8 : vector<1x128x256xbf16> to vector<128x256xbf16>
    %cst_15 = arith.constant dense<0.000000e+00> : vector<256x256xf32>
    %10 = tpu.matmul %7, %9, %cst_15 {dimension_numbers = #tpu.dot_dimension_numbers<[1], [0], [0], [1], [0, 0, 1, 1], [], []>} : vector<256x128xbf16>, vector<128x256xbf16>, vector<256x256xf32> -> vector<256x256xf32>
    %11 = arith.addf %5, %10 : vector<256x256xf32>
    %c0_16 = arith.constant 0 : index
    %c1_17 = arith.constant 1 : index
    %c0_18 = arith.constant 0 : index
    %12 = vector.load %arg6[%c0_16, %c1_17, %c0_18] : memref<18x18x128xbf16, #tpu.memory_space<vmem>>, vector<16x16x128xbf16>
    %13 = vector.shape_cast %12 : vector<16x16x128xbf16> to vector<256x128xbf16>
    %c1_19 = arith.constant 1 : index
    %c0_20 = arith.constant 0 : index
    %c0_21 = arith.constant 0 : index
    %14 = vector.load %arg2[%c1_19, %c0_20, %c0_21] : memref<9x128x256xbf16, #tpu.memory_space<vmem>>, vector<1x128x256xbf16>
    %15 = vector.shape_cast %14 : vector<1x128x256xbf16> to vector<128x256xbf16>
    %cst_22 = arith.constant dense<0.000000e+00> : vector<256x256xf32>
    %16 = tpu.matmul %13, %15, %cst_22 {dimension_numbers = #tpu.dot_dimension_numbers<[1], [0], [0], [1], [0, 0, 1, 1], [], []>} : vector<256x128xbf16>, vector<128x256xbf16>, vector<256x256xf32> -> vector<256x256xf32>
    %17 = arith.addf %11, %16 : vector<256x256xf32>
    %c0_23 = arith.constant 0 : index
    %c2 = arith.constant 2 : index
    %c0_24 = arith.constant 0 : index
    %18 = vector.load %arg6[%c0_23, %c2, %c0_24] : memref<18x18x128xbf16, #tpu.memory_space<vmem>>, vector<16x16x128xbf16>
    %19 = vector.shape_cast %18 : vector<16x16x128xbf16> to vector<256x128xbf16>
    %c2_25 = arith.constant 2 : index
    %c0_26 = arith.constant 0 : index
    %c0_27 = arith.constant 0 : index
    %20 = vector.load %arg2[%c2_25, %c0_26, %c0_27] : memref<9x128x256xbf16, #tpu.memory_space<vmem>>, vector<1x128x256xbf16>
    %21 = vector.shape_cast %20 : vector<1x128x256xbf16> to vector<128x256xbf16>
    %cst_28 = arith.constant dense<0.000000e+00> : vector<256x256xf32>
    %22 = tpu.matmul %19, %21, %cst_28 {dimension_numbers = #tpu.dot_dimension_numbers<[1], [0], [0], [1], [0, 0, 1, 1], [], []>} : vector<256x128xbf16>, vector<128x256xbf16>, vector<256x256xf32> -> vector<256x256xf32>
    %23 = arith.addf %17, %22 : vector<256x256xf32>
    %c1_29 = arith.constant 1 : index
    %c0_30 = arith.constant 0 : index
    %c0_31 = arith.constant 0 : index
    %24 = vector.load %arg6[%c1_29, %c0_30, %c0_31] : memref<18x18x128xbf16, #tpu.memory_space<vmem>>, vector<16x16x128xbf16>
    %25 = vector.shape_cast %24 : vector<16x16x128xbf16> to vector<256x128xbf16>
    %c3 = arith.constant 3 : index
    %c0_32 = arith.constant 0 : index
    %c0_33 = arith.constant 0 : index
    %26 = vector.load %arg2[%c3, %c0_32, %c0_33] : memref<9x128x256xbf16, #tpu.memory_space<vmem>>, vector<1x128x256xbf16>
    %27 = vector.shape_cast %26 : vector<1x128x256xbf16> to vector<128x256xbf16>
    %cst_34 = arith.constant dense<0.000000e+00> : vector<256x256xf32>
    %28 = tpu.matmul %25, %27, %cst_34 {dimension_numbers = #tpu.dot_dimension_numbers<[1], [0], [0], [1], [0, 0, 1, 1], [], []>} : vector<256x128xbf16>, vector<128x256xbf16>, vector<256x256xf32> -> vector<256x256xf32>
    %29 = arith.addf %23, %28 : vector<256x256xf32>
    %c1_35 = arith.constant 1 : index
    %c1_36 = arith.constant 1 : index
    %c0_37 = arith.constant 0 : index
    %30 = vector.load %arg6[%c1_35, %c1_36, %c0_37] : memref<18x18x128xbf16, #tpu.memory_space<vmem>>, vector<16x16x128xbf16>
    %31 = vector.shape_cast %30 : vector<16x16x128xbf16> to vector<256x128xbf16>
    %c4 = arith.constant 4 : index
    %c0_38 = arith.constant 0 : index
    %c0_39 = arith.constant 0 : index
    %32 = vector.load %arg2[%c4, %c0_38, %c0_39] : memref<9x128x256xbf16, #tpu.memory_space<vmem>>, vector<1x128x256xbf16>
    %33 = vector.shape_cast %32 : vector<1x128x256xbf16> to vector<128x256xbf16>
    %cst_40 = arith.constant dense<0.000000e+00> : vector<256x256xf32>
    %34 = tpu.matmul %31, %33, %cst_40 {dimension_numbers = #tpu.dot_dimension_numbers<[1], [0], [0], [1], [0, 0, 1, 1], [], []>} : vector<256x128xbf16>, vector<128x256xbf16>, vector<256x256xf32> -> vector<256x256xf32>
    %35 = arith.addf %29, %34 : vector<256x256xf32>
    %c1_41 = arith.constant 1 : index
    %c2_42 = arith.constant 2 : index
    %c0_43 = arith.constant 0 : index
    %36 = vector.load %arg6[%c1_41, %c2_42, %c0_43] : memref<18x18x128xbf16, #tpu.memory_space<vmem>>, vector<16x16x128xbf16>
    %37 = vector.shape_cast %36 : vector<16x16x128xbf16> to vector<256x128xbf16>
    %c5 = arith.constant 5 : index
    %c0_44 = arith.constant 0 : index
    %c0_45 = arith.constant 0 : index
    %38 = vector.load %arg2[%c5, %c0_44, %c0_45] : memref<9x128x256xbf16, #tpu.memory_space<vmem>>, vector<1x128x256xbf16>
    %39 = vector.shape_cast %38 : vector<1x128x256xbf16> to vector<128x256xbf16>
    %cst_46 = arith.constant dense<0.000000e+00> : vector<256x256xf32>
    %40 = tpu.matmul %37, %39, %cst_46 {dimension_numbers = #tpu.dot_dimension_numbers<[1], [0], [0], [1], [0, 0, 1, 1], [], []>} : vector<256x128xbf16>, vector<128x256xbf16>, vector<256x256xf32> -> vector<256x256xf32>
    %41 = arith.addf %35, %40 : vector<256x256xf32>
    %c2_47 = arith.constant 2 : index
    %c0_48 = arith.constant 0 : index
    %c0_49 = arith.constant 0 : index
    %42 = vector.load %arg6[%c2_47, %c0_48, %c0_49] : memref<18x18x128xbf16, #tpu.memory_space<vmem>>, vector<16x16x128xbf16>
    %43 = vector.shape_cast %42 : vector<16x16x128xbf16> to vector<256x128xbf16>
    %c6 = arith.constant 6 : index
    %c0_50 = arith.constant 0 : index
    %c0_51 = arith.constant 0 : index
    %44 = vector.load %arg2[%c6, %c0_50, %c0_51] : memref<9x128x256xbf16, #tpu.memory_space<vmem>>, vector<1x128x256xbf16>
    %45 = vector.shape_cast %44 : vector<1x128x256xbf16> to vector<128x256xbf16>
    %cst_52 = arith.constant dense<0.000000e+00> : vector<256x256xf32>
    %46 = tpu.matmul %43, %45, %cst_52 {dimension_numbers = #tpu.dot_dimension_numbers<[1], [0], [0], [1], [0, 0, 1, 1], [], []>} : vector<256x128xbf16>, vector<128x256xbf16>, vector<256x256xf32> -> vector<256x256xf32>
    %47 = arith.addf %41, %46 : vector<256x256xf32>
    %c2_53 = arith.constant 2 : index
    %c1_54 = arith.constant 1 : index
    %c0_55 = arith.constant 0 : index
    %48 = vector.load %arg6[%c2_53, %c1_54, %c0_55] : memref<18x18x128xbf16, #tpu.memory_space<vmem>>, vector<16x16x128xbf16>
    %49 = vector.shape_cast %48 : vector<16x16x128xbf16> to vector<256x128xbf16>
    %c7 = arith.constant 7 : index
    %c0_56 = arith.constant 0 : index
    %c0_57 = arith.constant 0 : index
    %50 = vector.load %arg2[%c7, %c0_56, %c0_57] : memref<9x128x256xbf16, #tpu.memory_space<vmem>>, vector<1x128x256xbf16>
    %51 = vector.shape_cast %50 : vector<1x128x256xbf16> to vector<128x256xbf16>
    %cst_58 = arith.constant dense<0.000000e+00> : vector<256x256xf32>
    %52 = tpu.matmul %49, %51, %cst_58 {dimension_numbers = #tpu.dot_dimension_numbers<[1], [0], [0], [1], [0, 0, 1, 1], [], []>} : vector<256x128xbf16>, vector<128x256xbf16>, vector<256x256xf32> -> vector<256x256xf32>
    %53 = arith.addf %47, %52 : vector<256x256xf32>
    %c2_59 = arith.constant 2 : index
    %c2_60 = arith.constant 2 : index
    %c0_61 = arith.constant 0 : index
    %54 = vector.load %arg6[%c2_59, %c2_60, %c0_61] : memref<18x18x128xbf16, #tpu.memory_space<vmem>>, vector<16x16x128xbf16>
    %55 = vector.shape_cast %54 : vector<16x16x128xbf16> to vector<256x128xbf16>
    %c8 = arith.constant 8 : index
    %c0_62 = arith.constant 0 : index
    %c0_63 = arith.constant 0 : index
    %56 = vector.load %arg2[%c8, %c0_62, %c0_63] : memref<9x128x256xbf16, #tpu.memory_space<vmem>>, vector<1x128x256xbf16>
    %57 = vector.shape_cast %56 : vector<1x128x256xbf16> to vector<128x256xbf16>
    %cst_64 = arith.constant dense<0.000000e+00> : vector<256x256xf32>
    %58 = tpu.matmul %55, %57, %cst_64 {dimension_numbers = #tpu.dot_dimension_numbers<[1], [0], [0], [1], [0, 0, 1, 1], [], []>} : vector<256x128xbf16>, vector<128x256xbf16>, vector<256x256xf32> -> vector<256x256xf32>
    %59 = arith.addf %53, %58 : vector<256x256xf32>
    %c0_65 = arith.constant 0 : index
    %c0_66 = arith.constant 0 : index
    %60 = vector.load %arg3[%c0_65, %c0_66] : memref<1x256xf32, #tpu.memory_space<vmem>>, vector<1x256xf32>
    %61 = vector.broadcast %60 : vector<1x256xf32> to vector<256x256xf32>
    %62 = arith.addf %59, %61 : vector<256x256xf32>
    %63 = arith.truncf %62 : vector<256x256xf32> to vector<256x256xbf16>
    %c0_67 = arith.constant 0 : index
    %c0_68 = arith.constant 0 : index
    %64 = vector.load %arg4[%c0_67, %c0_68] : memref<256x256xbf16, #tpu.memory_space<vmem>>, vector<256x256xbf16>
    tpu.vector_store %arg4[%c0_67, %c0_68], %63 {strides = array<i32>} : memref<256x256xbf16, #tpu.memory_space<vmem>>, vector<256x256xbf16>,
    %cst_69 = arith.constant dense<0.000000e+00> : vector<256xf32>
    %65 = vector.multi_reduction <add>, %62, %cst_69 [0] : vector<256x256xf32> to vector<256xf32>
    %66 = vector.shape_cast %65 : vector<256xf32> to vector<1x256xf32>
    %67 = arith.mulf %62, %62 : vector<256x256xf32>
    %cst_70 = arith.constant dense<0.000000e+00> : vector<256xf32>
    %68 = vector.multi_reduction <add>, %67, %cst_70 [0] : vector<256x256xf32> to vector<256xf32>
    %69 = vector.shape_cast %68 : vector<256xf32> to vector<1x256xf32>
    %70 = tpu.concatenate %66, %69 in 0 : vector<1x256xf32>, vector<1x256xf32> -> vector<2x256xf32>
    %c0_71 = arith.constant 0 : index
    %c0_72 = arith.constant 0 : index
    %c0_73 = arith.constant 0 : index
    %71 = vector.load %arg5[%c0_71, %c0_72, %c0_73] : memref<1x2x256xf32, #tpu.memory_space<vmem>>, vector<1x2x256xf32>
    %72 = vector.shape_cast %71 : vector<1x2x256xf32> to vector<2x256xf32>
    %73 = vector.shape_cast %70 : vector<2x256xf32> to vector<1x2x256xf32>
    tpu.vector_store %arg5[%c0_71, %c0_72, %c0_73], %73 {strides = array<i32>} : memref<1x2x256xf32, #tpu.memory_space<vmem>>, vector<1x2x256xf32>,
    return
  }
  func.func @transform_0(%arg0: i32) -> (i32, i32, i32, i32) {
    %c0_i32 = arith.constant 0 : i32
    %c0_i32_0 = arith.constant 0 : i32
    %c0_i32_1 = arith.constant 0 : i32
    %c0_i32_2 = arith.constant 0 : i32
    return %arg0, %c0_i32, %c0_i32_0, %c0_i32_1 : i32, i32, i32, i32
  }
  func.func @transform_1(%arg0: i32) -> (i32, i32, i32) {
    %c0_i32 = arith.constant 0 : i32
    %c0_i32_0 = arith.constant 0 : i32
    %c0_i32_1 = arith.constant 0 : i32
    %c0_i32_2 = arith.constant 0 : i32
    return %c0_i32, %c0_i32_0, %c0_i32_1 : i32, i32, i32
  }
  func.func @transform_2(%arg0: i32) -> (i32, i32) {
    %c0_i32 = arith.constant 0 : i32
    %c0_i32_0 = arith.constant 0 : i32
    %c0_i32_1 = arith.constant 0 : i32
    return %c0_i32, %c0_i32_0 : i32, i32
  }
  func.func @transform_3(%arg0: i32) -> (i32, i32) {
    %c0_i32 = arith.constant 0 : i32
    %c0_i32_0 = arith.constant 0 : i32
    return %arg0, %c0_i32 : i32, i32
  }
  func.func @transform_4(%arg0: i32) -> (i32, i32, i32) {
    %c0_i32 = arith.constant 0 : i32
    %c0_i32_0 = arith.constant 0 : i32
    %c0_i32_1 = arith.constant 0 : i32
    return %arg0, %c0_i32, %c0_i32_0 : i32, i32, i32
  }
}

module attributes {stable_mosaic.version = 11 : i64} {
  func.func @_bn_add_relu_kernel(%arg0: i32, %arg1: memref<512x128xbf16, #tpu.memory_space<vmem>>, %arg2: memref<512x128xbf16, #tpu.memory_space<vmem>>, %arg3: memref<1x128xf32, #tpu.memory_space<vmem>>, %arg4: memref<1x128xf32, #tpu.memory_space<vmem>>, %arg5: memref<1x128xf32, #tpu.memory_space<vmem>>, %arg6: memref<1x128xf32, #tpu.memory_space<vmem>>, %arg7: memref<512x128xf32, #tpu.memory_space<vmem>>) attributes {dimension_semantics = [#tpu.dimension_semantics<parallel>], iteration_bounds = array<i64: 1>, scalar_prefetch = 0 : i64, scratch_operands = 0 : i64, tpu.core_type = #tpu.core_type<tc>, window_params = [{transform_indices = @transform_0, window_bounds = array<i64: 512, 128>}, {transform_indices = @transform_1, window_bounds = array<i64: 512, 128>}, {pipeline_mode = #tpu.pipeline_mode<synchronous>, transform_indices = @transform_2, window_bounds = array<i64: 1, 128>}, {pipeline_mode = #tpu.pipeline_mode<synchronous>, transform_indices = @transform_3, window_bounds = array<i64: 1, 128>}, {pipeline_mode = #tpu.pipeline_mode<synchronous>, transform_indices = @transform_4, window_bounds = array<i64: 1, 128>}, {pipeline_mode = #tpu.pipeline_mode<synchronous>, transform_indices = @transform_5, window_bounds = array<i64: 1, 128>}, {transform_indices = @transform_6, window_bounds = array<i64: 512, 128>}]} {
    %c0 = arith.constant 0 : index
    %c0_0 = arith.constant 0 : index
    %0 = vector.load %arg1[%c0, %c0_0] : memref<512x128xbf16, #tpu.memory_space<vmem>>, vector<512x128xbf16>
    %1 = arith.extf %0 : vector<512x128xbf16> to vector<512x128xf32>
    %c0_1 = arith.constant 0 : index
    %c0_2 = arith.constant 0 : index
    %2 = vector.load %arg3[%c0_1, %c0_2] : memref<1x128xf32, #tpu.memory_space<vmem>>, vector<1x128xf32>
    %3 = vector.broadcast %2 : vector<1x128xf32> to vector<512x128xf32>
    %4 = arith.mulf %1, %3 : vector<512x128xf32>
    %c0_3 = arith.constant 0 : index
    %c0_4 = arith.constant 0 : index
    %5 = vector.load %arg4[%c0_3, %c0_4] : memref<1x128xf32, #tpu.memory_space<vmem>>, vector<1x128xf32>
    %6 = vector.broadcast %5 : vector<1x128xf32> to vector<512x128xf32>
    %7 = arith.addf %4, %6 : vector<512x128xf32>
    %c0_5 = arith.constant 0 : index
    %c0_6 = arith.constant 0 : index
    %8 = vector.load %arg2[%c0_5, %c0_6] : memref<512x128xbf16, #tpu.memory_space<vmem>>, vector<512x128xbf16>
    %9 = arith.extf %8 : vector<512x128xbf16> to vector<512x128xf32>
    %c0_7 = arith.constant 0 : index
    %c0_8 = arith.constant 0 : index
    %10 = vector.load %arg5[%c0_7, %c0_8] : memref<1x128xf32, #tpu.memory_space<vmem>>, vector<1x128xf32>
    %11 = vector.broadcast %10 : vector<1x128xf32> to vector<512x128xf32>
    %12 = arith.mulf %9, %11 : vector<512x128xf32>
    %c0_9 = arith.constant 0 : index
    %c0_10 = arith.constant 0 : index
    %13 = vector.load %arg6[%c0_9, %c0_10] : memref<1x128xf32, #tpu.memory_space<vmem>>, vector<1x128xf32>
    %14 = vector.broadcast %13 : vector<1x128xf32> to vector<512x128xf32>
    %15 = arith.addf %12, %14 : vector<512x128xf32>
    %16 = arith.addf %7, %15 : vector<512x128xf32>
    %cst = arith.constant 0.000000e+00 : f32
    %17 = vector.broadcast %cst : f32 to vector<512x128xf32>
    %18 = arith.maximumf %16, %17 : vector<512x128xf32>
    %c0_11 = arith.constant 0 : index
    %c0_12 = arith.constant 0 : index
    %19 = vector.load %arg7[%c0_11, %c0_12] : memref<512x128xf32, #tpu.memory_space<vmem>>, vector<512x128xf32>
    tpu.vector_store %arg7[%c0_11, %c0_12], %18 {strides = array<i32>} : memref<512x128xf32, #tpu.memory_space<vmem>>, vector<512x128xf32>,
    return
  }
  func.func @transform_0(%arg0: i32) -> (i32, i32) {
    %c0_i32 = arith.constant 0 : i32
    %c0_i32_0 = arith.constant 0 : i32
    return %arg0, %c0_i32 : i32, i32
  }
  func.func @transform_1(%arg0: i32) -> (i32, i32) {
    %c1_i32 = arith.constant 1 : i32
    %c0_i32 = arith.constant 0 : i32
    return %arg0, %c1_i32 : i32, i32
  }
  func.func @transform_2(%arg0: i32) -> (i32, i32) {
    %c0_i32 = arith.constant 0 : i32
    %c0_i32_0 = arith.constant 0 : i32
    %c0_i32_1 = arith.constant 0 : i32
    return %c0_i32, %c0_i32_0 : i32, i32
  }
  func.func @transform_3(%arg0: i32) -> (i32, i32) {
    %c0_i32 = arith.constant 0 : i32
    %c0_i32_0 = arith.constant 0 : i32
    %c0_i32_1 = arith.constant 0 : i32
    return %c0_i32, %c0_i32_0 : i32, i32
  }
  func.func @transform_4(%arg0: i32) -> (i32, i32) {
    %c0_i32 = arith.constant 0 : i32
    %c0_i32_0 = arith.constant 0 : i32
    %c0_i32_1 = arith.constant 0 : i32
    return %c0_i32, %c0_i32_0 : i32, i32
  }
  func.func @transform_5(%arg0: i32) -> (i32, i32) {
    %c0_i32 = arith.constant 0 : i32
    %c0_i32_0 = arith.constant 0 : i32
    %c0_i32_1 = arith.constant 0 : i32
    return %c0_i32, %c0_i32_0 : i32, i32
  }
  func.func @transform_6(%arg0: i32) -> (i32, i32) {
    %c0_i32 = arith.constant 0 : i32
    %c0_i32_0 = arith.constant 0 : i32
    return %arg0, %c0_i32 : i32, i32
  }
}

module attributes {stable_mosaic.version = 11 : i64} {
  func.func @_conv3x3_kernel(%arg0: i32, %arg1: memref<1x16x16x128xbf16, #tpu.memory_space<vmem>>, %arg2: memref<9x128x128xbf16, #tpu.memory_space<vmem>>, %arg3: memref<1x128xf32, #tpu.memory_space<vmem>>, %arg4: memref<1x128xf32, #tpu.memory_space<vmem>>, %arg5: memref<1x128xf32, #tpu.memory_space<vmem>>, %arg6: memref<256x128xbf16, #tpu.memory_space<vmem>>, %arg7: memref<1x2x128xf32, #tpu.memory_space<vmem>>, %arg8: memref<18x18x128xbf16, #tpu.memory_space<vmem>>) attributes {dimension_semantics = [#tpu.dimension_semantics<parallel>], iteration_bounds = array<i64: 2>, scalar_prefetch = 0 : i64, scratch_operands = 1 : i64, tpu.core_type = #tpu.core_type<tc>, window_params = [{transform_indices = @transform_0, window_bounds = array<i64: 1, 16, 16, 128>}, {pipeline_mode = #tpu.pipeline_mode<synchronous>, transform_indices = @transform_1, window_bounds = array<i64: 9, 128, 128>}, {pipeline_mode = #tpu.pipeline_mode<synchronous>, transform_indices = @transform_2, window_bounds = array<i64: 1, 128>}, {pipeline_mode = #tpu.pipeline_mode<synchronous>, transform_indices = @transform_3, window_bounds = array<i64: 1, 128>}, {pipeline_mode = #tpu.pipeline_mode<synchronous>, transform_indices = @transform_4, window_bounds = array<i64: 1, 128>}, {transform_indices = @transform_5, window_bounds = array<i64: 256, 128>}, {transform_indices = @transform_6, window_bounds = array<i64: 1, 2, 128>}]} {
    %c0 = arith.constant 0 : index
    %c0_0 = arith.constant 0 : index
    %c0_1 = arith.constant 0 : index
    %c0_2 = arith.constant 0 : index
    %0 = vector.load %arg1[%c0, %c0_0, %c0_1, %c0_2] : memref<1x16x16x128xbf16, #tpu.memory_space<vmem>>, vector<1x16x16x128xbf16>
    %1 = vector.shape_cast %0 : vector<1x16x16x128xbf16> to vector<16x16x128xbf16>
    %c0_3 = arith.constant 0 : index
    %c0_4 = arith.constant 0 : index
    %2 = vector.load %arg4[%c0_3, %c0_4] : memref<1x128xf32, #tpu.memory_space<vmem>>, vector<1x128xf32>
    %3 = vector.shape_cast %2 : vector<1x128xf32> to vector<1x1x128xf32>
    %c0_5 = arith.constant 0 : index
    %c0_6 = arith.constant 0 : index
    %4 = vector.load %arg5[%c0_5, %c0_6] : memref<1x128xf32, #tpu.memory_space<vmem>>, vector<1x128xf32>
    %5 = vector.shape_cast %4 : vector<1x128xf32> to vector<1x1x128xf32>
    %6 = arith.extf %1 : vector<16x16x128xbf16> to vector<16x16x128xf32>
    %7 = vector.broadcast %3 : vector<1x1x128xf32> to vector<16x16x128xf32>
    %8 = arith.mulf %6, %7 : vector<16x16x128xf32>
    %9 = vector.broadcast %5 : vector<1x1x128xf32> to vector<16x16x128xf32>
    %10 = arith.addf %8, %9 : vector<16x16x128xf32>
    %cst = arith.constant 0.000000e+00 : f32
    %11 = vector.broadcast %cst : f32 to vector<16x16x128xf32>
    %12 = arith.maximumf %10, %11 : vector<16x16x128xf32>
    %13 = arith.truncf %12 : vector<16x16x128xf32> to vector<16x16x128xbf16>
    %cst_7 = arith.constant 0.000000e+00 : bf16
    %14 = vector.broadcast %cst_7 : bf16 to vector<18x18x128xbf16>
    %c0_8 = arith.constant 0 : index
    %c0_9 = arith.constant 0 : index
    %c0_10 = arith.constant 0 : index
    %15 = vector.load %arg8[%c0_8, %c0_9, %c0_10] : memref<18x18x128xbf16, #tpu.memory_space<vmem>>, vector<18x18x128xbf16>
    tpu.vector_store %arg8[%c0_8, %c0_9, %c0_10], %14 {strides = array<i32>} : memref<18x18x128xbf16, #tpu.memory_space<vmem>>, vector<18x18x128xbf16>,
    %c1 = arith.constant 1 : index
    %c1_11 = arith.constant 1 : index
    %c0_12 = arith.constant 0 : index
    %16 = vector.load %arg8[%c1, %c1_11, %c0_12] : memref<18x18x128xbf16, #tpu.memory_space<vmem>>, vector<16x16x128xbf16>
    tpu.vector_store %arg8[%c1, %c1_11, %c0_12], %13 {strides = array<i32>} : memref<18x18x128xbf16, #tpu.memory_space<vmem>>, vector<16x16x128xbf16>,
    %cst_13 = arith.constant 0.000000e+00 : f32
    %17 = vector.broadcast %cst_13 : f32 to vector<256x128xf32>
    %c0_14 = arith.constant 0 : index
    %c0_15 = arith.constant 0 : index
    %c0_16 = arith.constant 0 : index
    %18 = vector.load %arg8[%c0_14, %c0_15, %c0_16] : memref<18x18x128xbf16, #tpu.memory_space<vmem>>, vector<16x16x128xbf16>
    %19 = vector.shape_cast %18 : vector<16x16x128xbf16> to vector<256x128xbf16>
    %c0_17 = arith.constant 0 : index
    %c0_18 = arith.constant 0 : index
    %c0_19 = arith.constant 0 : index
    %20 = vector.load %arg2[%c0_17, %c0_18, %c0_19] : memref<9x128x128xbf16, #tpu.memory_space<vmem>>, vector<1x128x128xbf16>
    %21 = vector.shape_cast %20 : vector<1x128x128xbf16> to vector<128x128xbf16>
    %cst_20 = arith.constant dense<0.000000e+00> : vector<256x128xf32>
    %22 = tpu.matmul %19, %21, %cst_20 {dimension_numbers = #tpu.dot_dimension_numbers<[1], [0], [0], [1], [0, 0, 1, 1], [], []>} : vector<256x128xbf16>, vector<128x128xbf16>, vector<256x128xf32> -> vector<256x128xf32>
    %23 = arith.addf %17, %22 : vector<256x128xf32>
    %c0_21 = arith.constant 0 : index
    %c1_22 = arith.constant 1 : index
    %c0_23 = arith.constant 0 : index
    %24 = vector.load %arg8[%c0_21, %c1_22, %c0_23] : memref<18x18x128xbf16, #tpu.memory_space<vmem>>, vector<16x16x128xbf16>
    %25 = vector.shape_cast %24 : vector<16x16x128xbf16> to vector<256x128xbf16>
    %c1_24 = arith.constant 1 : index
    %c0_25 = arith.constant 0 : index
    %c0_26 = arith.constant 0 : index
    %26 = vector.load %arg2[%c1_24, %c0_25, %c0_26] : memref<9x128x128xbf16, #tpu.memory_space<vmem>>, vector<1x128x128xbf16>
    %27 = vector.shape_cast %26 : vector<1x128x128xbf16> to vector<128x128xbf16>
    %cst_27 = arith.constant dense<0.000000e+00> : vector<256x128xf32>
    %28 = tpu.matmul %25, %27, %cst_27 {dimension_numbers = #tpu.dot_dimension_numbers<[1], [0], [0], [1], [0, 0, 1, 1], [], []>} : vector<256x128xbf16>, vector<128x128xbf16>, vector<256x128xf32> -> vector<256x128xf32>
    %29 = arith.addf %23, %28 : vector<256x128xf32>
    %c0_28 = arith.constant 0 : index
    %c2 = arith.constant 2 : index
    %c0_29 = arith.constant 0 : index
    %30 = vector.load %arg8[%c0_28, %c2, %c0_29] : memref<18x18x128xbf16, #tpu.memory_space<vmem>>, vector<16x16x128xbf16>
    %31 = vector.shape_cast %30 : vector<16x16x128xbf16> to vector<256x128xbf16>
    %c2_30 = arith.constant 2 : index
    %c0_31 = arith.constant 0 : index
    %c0_32 = arith.constant 0 : index
    %32 = vector.load %arg2[%c2_30, %c0_31, %c0_32] : memref<9x128x128xbf16, #tpu.memory_space<vmem>>, vector<1x128x128xbf16>
    %33 = vector.shape_cast %32 : vector<1x128x128xbf16> to vector<128x128xbf16>
    %cst_33 = arith.constant dense<0.000000e+00> : vector<256x128xf32>
    %34 = tpu.matmul %31, %33, %cst_33 {dimension_numbers = #tpu.dot_dimension_numbers<[1], [0], [0], [1], [0, 0, 1, 1], [], []>} : vector<256x128xbf16>, vector<128x128xbf16>, vector<256x128xf32> -> vector<256x128xf32>
    %35 = arith.addf %29, %34 : vector<256x128xf32>
    %c1_34 = arith.constant 1 : index
    %c0_35 = arith.constant 0 : index
    %c0_36 = arith.constant 0 : index
    %36 = vector.load %arg8[%c1_34, %c0_35, %c0_36] : memref<18x18x128xbf16, #tpu.memory_space<vmem>>, vector<16x16x128xbf16>
    %37 = vector.shape_cast %36 : vector<16x16x128xbf16> to vector<256x128xbf16>
    %c3 = arith.constant 3 : index
    %c0_37 = arith.constant 0 : index
    %c0_38 = arith.constant 0 : index
    %38 = vector.load %arg2[%c3, %c0_37, %c0_38] : memref<9x128x128xbf16, #tpu.memory_space<vmem>>, vector<1x128x128xbf16>
    %39 = vector.shape_cast %38 : vector<1x128x128xbf16> to vector<128x128xbf16>
    %cst_39 = arith.constant dense<0.000000e+00> : vector<256x128xf32>
    %40 = tpu.matmul %37, %39, %cst_39 {dimension_numbers = #tpu.dot_dimension_numbers<[1], [0], [0], [1], [0, 0, 1, 1], [], []>} : vector<256x128xbf16>, vector<128x128xbf16>, vector<256x128xf32> -> vector<256x128xf32>
    %41 = arith.addf %35, %40 : vector<256x128xf32>
    %c1_40 = arith.constant 1 : index
    %c1_41 = arith.constant 1 : index
    %c0_42 = arith.constant 0 : index
    %42 = vector.load %arg8[%c1_40, %c1_41, %c0_42] : memref<18x18x128xbf16, #tpu.memory_space<vmem>>, vector<16x16x128xbf16>
    %43 = vector.shape_cast %42 : vector<16x16x128xbf16> to vector<256x128xbf16>
    %c4 = arith.constant 4 : index
    %c0_43 = arith.constant 0 : index
    %c0_44 = arith.constant 0 : index
    %44 = vector.load %arg2[%c4, %c0_43, %c0_44] : memref<9x128x128xbf16, #tpu.memory_space<vmem>>, vector<1x128x128xbf16>
    %45 = vector.shape_cast %44 : vector<1x128x128xbf16> to vector<128x128xbf16>
    %cst_45 = arith.constant dense<0.000000e+00> : vector<256x128xf32>
    %46 = tpu.matmul %43, %45, %cst_45 {dimension_numbers = #tpu.dot_dimension_numbers<[1], [0], [0], [1], [0, 0, 1, 1], [], []>} : vector<256x128xbf16>, vector<128x128xbf16>, vector<256x128xf32> -> vector<256x128xf32>
    %47 = arith.addf %41, %46 : vector<256x128xf32>
    %c1_46 = arith.constant 1 : index
    %c2_47 = arith.constant 2 : index
    %c0_48 = arith.constant 0 : index
    %48 = vector.load %arg8[%c1_46, %c2_47, %c0_48] : memref<18x18x128xbf16, #tpu.memory_space<vmem>>, vector<16x16x128xbf16>
    %49 = vector.shape_cast %48 : vector<16x16x128xbf16> to vector<256x128xbf16>
    %c5 = arith.constant 5 : index
    %c0_49 = arith.constant 0 : index
    %c0_50 = arith.constant 0 : index
    %50 = vector.load %arg2[%c5, %c0_49, %c0_50] : memref<9x128x128xbf16, #tpu.memory_space<vmem>>, vector<1x128x128xbf16>
    %51 = vector.shape_cast %50 : vector<1x128x128xbf16> to vector<128x128xbf16>
    %cst_51 = arith.constant dense<0.000000e+00> : vector<256x128xf32>
    %52 = tpu.matmul %49, %51, %cst_51 {dimension_numbers = #tpu.dot_dimension_numbers<[1], [0], [0], [1], [0, 0, 1, 1], [], []>} : vector<256x128xbf16>, vector<128x128xbf16>, vector<256x128xf32> -> vector<256x128xf32>
    %53 = arith.addf %47, %52 : vector<256x128xf32>
    %c2_52 = arith.constant 2 : index
    %c0_53 = arith.constant 0 : index
    %c0_54 = arith.constant 0 : index
    %54 = vector.load %arg8[%c2_52, %c0_53, %c0_54] : memref<18x18x128xbf16, #tpu.memory_space<vmem>>, vector<16x16x128xbf16>
    %55 = vector.shape_cast %54 : vector<16x16x128xbf16> to vector<256x128xbf16>
    %c6 = arith.constant 6 : index
    %c0_55 = arith.constant 0 : index
    %c0_56 = arith.constant 0 : index
    %56 = vector.load %arg2[%c6, %c0_55, %c0_56] : memref<9x128x128xbf16, #tpu.memory_space<vmem>>, vector<1x128x128xbf16>
    %57 = vector.shape_cast %56 : vector<1x128x128xbf16> to vector<128x128xbf16>
    %cst_57 = arith.constant dense<0.000000e+00> : vector<256x128xf32>
    %58 = tpu.matmul %55, %57, %cst_57 {dimension_numbers = #tpu.dot_dimension_numbers<[1], [0], [0], [1], [0, 0, 1, 1], [], []>} : vector<256x128xbf16>, vector<128x128xbf16>, vector<256x128xf32> -> vector<256x128xf32>
    %59 = arith.addf %53, %58 : vector<256x128xf32>
    %c2_58 = arith.constant 2 : index
    %c1_59 = arith.constant 1 : index
    %c0_60 = arith.constant 0 : index
    %60 = vector.load %arg8[%c2_58, %c1_59, %c0_60] : memref<18x18x128xbf16, #tpu.memory_space<vmem>>, vector<16x16x128xbf16>
    %61 = vector.shape_cast %60 : vector<16x16x128xbf16> to vector<256x128xbf16>
    %c7 = arith.constant 7 : index
    %c0_61 = arith.constant 0 : index
    %c0_62 = arith.constant 0 : index
    %62 = vector.load %arg2[%c7, %c0_61, %c0_62] : memref<9x128x128xbf16, #tpu.memory_space<vmem>>, vector<1x128x128xbf16>
    %63 = vector.shape_cast %62 : vector<1x128x128xbf16> to vector<128x128xbf16>
    %cst_63 = arith.constant dense<0.000000e+00> : vector<256x128xf32>
    %64 = tpu.matmul %61, %63, %cst_63 {dimension_numbers = #tpu.dot_dimension_numbers<[1], [0], [0], [1], [0, 0, 1, 1], [], []>} : vector<256x128xbf16>, vector<128x128xbf16>, vector<256x128xf32> -> vector<256x128xf32>
    %65 = arith.addf %59, %64 : vector<256x128xf32>
    %c2_64 = arith.constant 2 : index
    %c2_65 = arith.constant 2 : index
    %c0_66 = arith.constant 0 : index
    %66 = vector.load %arg8[%c2_64, %c2_65, %c0_66] : memref<18x18x128xbf16, #tpu.memory_space<vmem>>, vector<16x16x128xbf16>
    %67 = vector.shape_cast %66 : vector<16x16x128xbf16> to vector<256x128xbf16>
    %c8 = arith.constant 8 : index
    %c0_67 = arith.constant 0 : index
    %c0_68 = arith.constant 0 : index
    %68 = vector.load %arg2[%c8, %c0_67, %c0_68] : memref<9x128x128xbf16, #tpu.memory_space<vmem>>, vector<1x128x128xbf16>
    %69 = vector.shape_cast %68 : vector<1x128x128xbf16> to vector<128x128xbf16>
    %cst_69 = arith.constant dense<0.000000e+00> : vector<256x128xf32>
    %70 = tpu.matmul %67, %69, %cst_69 {dimension_numbers = #tpu.dot_dimension_numbers<[1], [0], [0], [1], [0, 0, 1, 1], [], []>} : vector<256x128xbf16>, vector<128x128xbf16>, vector<256x128xf32> -> vector<256x128xf32>
    %71 = arith.addf %65, %70 : vector<256x128xf32>
    %c0_70 = arith.constant 0 : index
    %c0_71 = arith.constant 0 : index
    %72 = vector.load %arg3[%c0_70, %c0_71] : memref<1x128xf32, #tpu.memory_space<vmem>>, vector<1x128xf32>
    %73 = vector.broadcast %72 : vector<1x128xf32> to vector<256x128xf32>
    %74 = arith.addf %71, %73 : vector<256x128xf32>
    %75 = arith.truncf %74 : vector<256x128xf32> to vector<256x128xbf16>
    %c0_72 = arith.constant 0 : index
    %c0_73 = arith.constant 0 : index
    %76 = vector.load %arg6[%c0_72, %c0_73] : memref<256x128xbf16, #tpu.memory_space<vmem>>, vector<256x128xbf16>
    tpu.vector_store %arg6[%c0_72, %c0_73], %75 {strides = array<i32>} : memref<256x128xbf16, #tpu.memory_space<vmem>>, vector<256x128xbf16>,
    %cst_74 = arith.constant dense<0.000000e+00> : vector<128xf32>
    %77 = vector.multi_reduction <add>, %74, %cst_74 [0] : vector<256x128xf32> to vector<128xf32>
    %78 = vector.shape_cast %77 : vector<128xf32> to vector<1x128xf32>
    %79 = arith.mulf %74, %74 : vector<256x128xf32>
    %cst_75 = arith.constant dense<0.000000e+00> : vector<128xf32>
    %80 = vector.multi_reduction <add>, %79, %cst_75 [0] : vector<256x128xf32> to vector<128xf32>
    %81 = vector.shape_cast %80 : vector<128xf32> to vector<1x128xf32>
    %82 = tpu.concatenate %78, %81 in 0 : vector<1x128xf32>, vector<1x128xf32> -> vector<2x128xf32>
    %c0_76 = arith.constant 0 : index
    %c0_77 = arith.constant 0 : index
    %c0_78 = arith.constant 0 : index
    %83 = vector.load %arg7[%c0_76, %c0_77, %c0_78] : memref<1x2x128xf32, #tpu.memory_space<vmem>>, vector<1x2x128xf32>
    %84 = vector.shape_cast %83 : vector<1x2x128xf32> to vector<2x128xf32>
    %85 = vector.shape_cast %82 : vector<2x128xf32> to vector<1x2x128xf32>
    tpu.vector_store %arg7[%c0_76, %c0_77, %c0_78], %85 {strides = array<i32>} : memref<1x2x128xf32, #tpu.memory_space<vmem>>, vector<1x2x128xf32>,
    return
  }
  func.func @transform_0(%arg0: i32) -> (i32, i32, i32, i32) {
    %c0_i32 = arith.constant 0 : i32
    %c0_i32_0 = arith.constant 0 : i32
    %c0_i32_1 = arith.constant 0 : i32
    %c0_i32_2 = arith.constant 0 : i32
    return %arg0, %c0_i32, %c0_i32_0, %c0_i32_1 : i32, i32, i32, i32
  }
  func.func @transform_1(%arg0: i32) -> (i32, i32, i32) {
    %c0_i32 = arith.constant 0 : i32
    %c0_i32_0 = arith.constant 0 : i32
    %c0_i32_1 = arith.constant 0 : i32
    %c0_i32_2 = arith.constant 0 : i32
    return %c0_i32, %c0_i32_0, %c0_i32_1 : i32, i32, i32
  }
  func.func @transform_2(%arg0: i32) -> (i32, i32) {
    %c0_i32 = arith.constant 0 : i32
    %c0_i32_0 = arith.constant 0 : i32
    %c0_i32_1 = arith.constant 0 : i32
    return %c0_i32, %c0_i32_0 : i32, i32
  }
  func.func @transform_3(%arg0: i32) -> (i32, i32) {
    %c0_i32 = arith.constant 0 : i32
    %c0_i32_0 = arith.constant 0 : i32
    %c0_i32_1 = arith.constant 0 : i32
    return %c0_i32, %c0_i32_0 : i32, i32
  }
  func.func @transform_4(%arg0: i32) -> (i32, i32) {
    %c0_i32 = arith.constant 0 : i32
    %c0_i32_0 = arith.constant 0 : i32
    %c0_i32_1 = arith.constant 0 : i32
    return %c0_i32, %c0_i32_0 : i32, i32
  }
  func.func @transform_5(%arg0: i32) -> (i32, i32) {
    %c0_i32 = arith.constant 0 : i32
    %c0_i32_0 = arith.constant 0 : i32
    return %arg0, %c0_i32 : i32, i32
  }
  func.func @transform_6(%arg0: i32) -> (i32, i32, i32) {
    %c0_i32 = arith.constant 0 : i32
    %c0_i32_0 = arith.constant 0 : i32
    %c0_i32_1 = arith.constant 0 : i32
    return %arg0, %c0_i32, %c0_i32_0 : i32, i32, i32
  }
}

</mosaic_0001>

<bundles_post_ra>
// kernel: residual_block_pallas.5
= control target key start
LH: loop header
LB: loop body
LE: loop exit
PB: predicated region body
PF: predicated region fallthrough
CT: control target
= control target key end

     0   :  { %s2258_s0 = inlined_call_operand.vmem [shape: bf16[512,128], index: 0, kind: input, shape index: {}]   ;;  %s2259_s1 = inlined_call_operand.vmem [shape: bf16[512,256], index: 1, kind: input, shape index: {}]   ;;  %s2260_s2 = inlined_call_operand.vmem [shape: f32[1,128], index: 2, kind: input, shape index: {}]   ;;  %s2261_s3 = inlined_call_operand.vmem [shape: f32[1,128], index: 3, kind: input, shape index: {}]   ;;  %s2262_s4 = inlined_call_operand.vmem [shape: f32[1,128], index: 4, kind: input, shape index: {}]   ;;  %s2263_s5 = inlined_call_operand.vmem [shape: f32[1,128], index: 5, kind: input, shape index: {}]   ;;  %s2264_s6 = inlined_call_operand.vmem [shape: f32[512,128], index: 6, kind: output, shape index: {}]  }
   0x1   :  { %v1057_v0 = vld [vmem:[%s2259_s1 + $0x4] sm:$0xf]  ;;  %v1058_v1 = vld [vmem:[%s2259_s1 + $0xc] sm:$0xf]  ;;  %v1059_v2 = vld [vmem:[%s2259_s1 + $0x14] sm:$0xf] }
   0x2   :  { %32 = vst [vmem:[#allocation2] sm:$0xf] %v1057_v0  ;;  %34 = vst [vmem:[#allocation2 + $0x4] sm:$0xf] %v1058_v1  ;;  %v1060_v3 = vld [vmem:[%s2259_s1 + $0x1c] sm:$0xf] }
   0x3   :  { %36 = vst [vmem:[#allocation2 + $0x8] sm:$0xf] %v1059_v2  ;;  %v1061_v4 = vld [vmem:[%s2259_s1 + $0x24] sm:$0xf]  ;;  %v1062_v5 = vld [vmem:[%s2259_s1 + $0x2c] sm:$0xf] }
   0x4   :  { %38 = vst [vmem:[#allocation2 + $0xc] sm:$0xf] %v1060_v3  ;;  %40 = vst [vmem:[#allocation2 + $0x10] sm:$0xf] %v1061_v4  ;;  %v1063_v6 = vld [vmem:[%s2259_s1 + $0x34] sm:$0xf] }
   0x5   :  { %42 = vst [vmem:[#allocation2 + $0x14] sm:$0xf] %v1062_v5  ;;  %v1064_v7 = vld [vmem:[%s2259_s1 + $0x3c] sm:$0xf]  ;;  %v1065_v8 = vld [vmem:[%s2259_s1 + $0x44] sm:$0xf] }
   0x6   :  { %44 = vst [vmem:[#allocation2 + $0x18] sm:$0xf] %v1063_v6  ;;  %46 = vst [vmem:[#allocation2 + $0x1c] sm:$0xf] %v1064_v7  ;;  %v1066_v9 = vld [vmem:[%s2259_s1 + $0x4c] sm:$0xf] }
   0x7   :  { %48 = vst [vmem:[#allocation2 + $0x20] sm:$0xf] %v1065_v8  ;;  %v1067_v10 = vld [vmem:[%s2259_s1 + $0x54] sm:$0xf]  ;;  %v1068_v11 = vld [vmem:[%s2259_s1 + $0x5c] sm:$0xf] }
   0x8   :  { %50 = vst [vmem:[#allocation2 + $0x24] sm:$0xf] %v1066_v9  ;;  %52 = vst [vmem:[#allocation2 + $0x28] sm:$0xf] %v1067_v10  ;;  %v1069_v12 = vld [vmem:[%s2259_s1 + $0x64] sm:$0xf] }
   0x9   :  { %54 = vst [vmem:[#allocation2 + $0x2c] sm:$0xf] %v1068_v11  ;;  %v1070_v13 = vld [vmem:[%s2259_s1 + $0x6c] sm:$0xf]  ;;  %v1071_v14 = vld [vmem:[%s2259_s1 + $0x74] sm:$0xf] }
   0xa   :  { %56 = vst [vmem:[#allocation2 + $0x30] sm:$0xf] %v1069_v12  ;;  %58 = vst [vmem:[#allocation2 + $0x34] sm:$0xf] %v1070_v13  ;;  %v1072_v15 = vld [vmem:[%s2259_s1 + $0x7c] sm:$0xf] }
   0xb   :  { %60 = vst [vmem:[#allocation2 + $0x38] sm:$0xf] %v1071_v14  ;;  %v1073_v16 = vld [vmem:[%s2259_s1 + $0x84] sm:$0xf]  ;;  %v1074_v17 = vld [vmem:[%s2259_s1 + $0x8c] sm:$0xf] }
   0xc   :  { %62 = vst [vmem:[#allocation2 + $0x3c] sm:$0xf] %v1072_v15  ;;  %64 = vst [vmem:[#allocation2 + $0x40] sm:$0xf] %v1073_v16  ;;  %v1075_v18 = vld [vmem:[%s2259_s1 + $0x94] sm:$0xf] }
   0xd   :  { %66 = vst [vmem:[#allocation2 + $0x44] sm:$0xf] %v1074_v17  ;;  %v1076_v19 = vld [vmem:[%s2259_s1 + $0x9c] sm:$0xf]  ;;  %v1077_v20 = vld [vmem:[%s2259_s1 + $0xa4] sm:$0xf] }
   0xe   :  { %68 = vst [vmem:[#allocation2 + $0x48] sm:$0xf] %v1075_v18  ;;  %70 = vst [vmem:[#allocation2 + $0x4c] sm:$0xf] %v1076_v19  ;;  %v1078_v21 = vld [vmem:[%s2259_s1 + $0xac] sm:$0xf] }
   0xf   :  { %72 = vst [vmem:[#allocation2 + $0x50] sm:$0xf] %v1077_v20  ;;  %v1079_v22 = vld [vmem:[%s2259_s1 + $0xb4] sm:$0xf]  ;;  %v1080_v23 = vld [vmem:[%s2259_s1 + $0xbc] sm:$0xf] }
  0x10   :  { %74 = vst [vmem:[#allocation2 + $0x54] sm:$0xf] %v1078_v21  ;;  %76 = vst [vmem:[#allocation2 + $0x58] sm:$0xf] %v1079_v22  ;;  %v1081_v24 = vld [vmem:[%s2259_s1 + $0xc4] sm:$0xf] }
  0x11   :  { %78 = vst [vmem:[#allocation2 + $0x5c] sm:$0xf] %v1080_v23  ;;  %v1082_v25 = vld [vmem:[%s2259_s1 + $0xcc] sm:$0xf]  ;;  %v1083_v26 = vld [vmem:[%s2259_s1 + $0xd4] sm:$0xf] }
  0x12   :  { %80 = vst [vmem:[#allocation2 + $0x60] sm:$0xf] %v1081_v24  ;;  %82 = vst [vmem:[#allocation2 + $0x64] sm:$0xf] %v1082_v25  ;;  %v1084_v27 = vld [vmem:[%s2259_s1 + $0xdc] sm:$0xf] }
  0x13   :  { %84 = vst [vmem:[#allocation2 + $0x68] sm:$0xf] %v1083_v26  ;;  %v1085_v28 = vld [vmem:[%s2259_s1 + $0xe4] sm:$0xf]  ;;  %v1086_v29 = vld [vmem:[%s2259_s1 + $0xec] sm:$0xf] }
  0x14   :  { %86 = vst [vmem:[#allocation2 + $0x6c] sm:$0xf] %v1084_v27  ;;  %88 = vst [vmem:[#allocation2 + $0x70] sm:$0xf] %v1085_v28  ;;  %v1087_v30 = vld [vmem:[%s2259_s1 + $0xf4] sm:$0xf] }
  0x15   :  { %90 = vst [vmem:[#allocation2 + $0x74] sm:$0xf] %v1086_v29  ;;  %v1088_v31 = vld [vmem:[%s2259_s1 + $0xfc] sm:$0xf]  ;;  %v1089_v32 = vld [vmem:[%s2259_s1 + $0x104] sm:$0xf] }
  0x16   :  { %92 = vst [vmem:[#allocation2 + $0x78] sm:$0xf] %v1087_v30  ;;  %94 = vst [vmem:[#allocation2 + $0x7c] sm:$0xf] %v1088_v31  ;;  %v1090_v33 = vld [vmem:[%s2259_s1 + $0x10c] sm:$0xf] }
  0x17   :  { %96 = vst [vmem:[#allocation2 + $0x80] sm:$0xf] %v1089_v32  ;;  %v1091_v34 = vld [vmem:[%s2259_s1 + $0x114] sm:$0xf]  ;;  %v1092_v35 = vld [vmem:[%s2259_s1 + $0x11c] sm:$0xf] }
  0x18   :  { %98 = vst [vmem:[#allocation2 + $0x84] sm:$0xf] %v1090_v33  ;;  %100 = vst [vmem:[#allocation2 + $0x88] sm:$0xf] %v1091_v34  ;;  %v1093_v36 = vld [vmem:[%s2259_s1 + $0x124] sm:$0xf] }
  0x19   :  { %102 = vst [vmem:[#allocation2 + $0x8c] sm:$0xf] %v1092_v35  ;;  %v1094_v37 = vld [vmem:[%s2259_s1 + $0x12c] sm:$0xf]  ;;  %v1095_v38 = vld [vmem:[%s2259_s1 + $0x134] sm:$0xf] }
  0x1a   :  { %104 = vst [vmem:[#allocation2 + $0x90] sm:$0xf] %v1093_v36  ;;  %106 = vst [vmem:[#allocation2 + $0x94] sm:$0xf] %v1094_v37  ;;  %v1096_v39 = vld [vmem:[%s2259_s1 + $0x13c] sm:$0xf] }
  0x1b   :  { %108 = vst [vmem:[#allocation2 + $0x98] sm:$0xf] %v1095_v38  ;;  %v1097_v40 = vld [vmem:[%s2259_s1 + $0x144] sm:$0xf]  ;;  %v1098_v41 = vld [vmem:[%s2259_s1 + $0x14c] sm:$0xf] }
  0x1c   :  { %110 = vst [vmem:[#allocation2 + $0x9c] sm:$0xf] %v1096_v39  ;;  %112 = vst [vmem:[#allocation2 + $0xa0] sm:$0xf] %v1097_v40  ;;  %v1099_v42 = vld [vmem:[%s2259_s1 + $0x154] sm:$0xf] }
  0x1d   :  { %114 = vst [vmem:[#allocation2 + $0xa4] sm:$0xf] %v1098_v41  ;;  %v1100_v43 = vld [vmem:[%s2259_s1 + $0x15c] sm:$0xf]  ;;  %v1101_v44 = vld [vmem:[%s2259_s1 + $0x164] sm:$0xf] }
  0x1e   :  { %116 = vst [vmem:[#allocation2 + $0xa8] sm:$0xf] %v1099_v42  ;;  %118 = vst [vmem:[#allocation2 + $0xac] sm:$0xf] %v1100_v43  ;;  %v1102_v45 = vld [vmem:[%s2259_s1 + $0x16c] sm:$0xf] }
  0x1f   :  { %120 = vst [vmem:[#allocation2 + $0xb0] sm:$0xf] %v1101_v44  ;;  %v1103_v46 = vld [vmem:[%s2259_s1 + $0x174] sm:$0xf]  ;;  %v1104_v47 = vld [vmem:[%s2259_s1 + $0x17c] sm:$0xf] }
  0x20   :  { %122 = vst [vmem:[#allocation2 + $0xb4] sm:$0xf] %v1102_v45  ;;  %124 = vst [vmem:[#allocation2 + $0xb8] sm:$0xf] %v1103_v46  ;;  %v1105_v48 = vld [vmem:[%s2259_s1 + $0x184] sm:$0xf] }
  0x21   :  { %126 = vst [vmem:[#allocation2 + $0xbc] sm:$0xf] %v1104_v47  ;;  %v1106_v49 = vld [vmem:[%s2259_s1 + $0x18c] sm:$0xf]  ;;  %v1107_v50 = vld [vmem:[%s2259_s1 + $0x194] sm:$0xf] }
  0x22   :  { %128 = vst [vmem:[#allocation2 + $0xc0] sm:$0xf] %v1105_v48  ;;  %130 = vst [vmem:[#allocation2 + $0xc4] sm:$0xf] %v1106_v49  ;;  %v1108_v51 = vld [vmem:[%s2259_s1 + $0x19c] sm:$0xf] }
  0x23   :  { %132 = vst [vmem:[#allocation2 + $0xc8] sm:$0xf] %v1107_v50  ;;  %v1109_v52 = vld [vmem:[%s2259_s1 + $0x1a4] sm:$0xf]  ;;  %v1110_v53 = vld [vmem:[%s2259_s1 + $0x1ac] sm:$0xf] }
  0x24   :  { %134 = vst [vmem:[#allocation2 + $0xcc] sm:$0xf] %v1108_v51  ;;  %136 = vst [vmem:[#allocation2 + $0xd0] sm:$0xf] %v1109_v52  ;;  %v1111_v54 = vld [vmem:[%s2259_s1 + $0x1b4] sm:$0xf] }
  0x25   :  { %138 = vst [vmem:[#allocation2 + $0xd4] sm:$0xf] %v1110_v53  ;;  %v1112_v55 = vld [vmem:[%s2259_s1 + $0x1bc] sm:$0xf]  ;;  %v1113_v56 = vld [vmem:[%s2259_s1 + $0x1c4] sm:$0xf] }
  0x26   :  { %140 = vst [vmem:[#allocation2 + $0xd8] sm:$0xf] %v1111_v54  ;;  %142 = vst [vmem:[#allocation2 + $0xdc] sm:$0xf] %v1112_v55  ;;  %v1114_v57 = vld [vmem:[%s2259_s1 + $0x1cc] sm:$0xf] }
  0x27   :  { %144 = vst [vmem:[#allocation2 + $0xe0] sm:$0xf] %v1113_v56  ;;  %v1115_v58 = vld [vmem:[%s2259_s1 + $0x1d4] sm:$0xf]  ;;  %v1116_v59 = vld [vmem:[%s2259_s1 + $0x1dc] sm:$0xf] }
  0x28   :  { %146 = vst [vmem:[#allocation2 + $0xe4] sm:$0xf] %v1114_v57  ;;  %148 = vst [vmem:[#allocation2 + $0xe8] sm:$0xf] %v1115_v58  ;;  %v1117_v60 = vld [vmem:[%s2259_s1 + $0x1e4] sm:$0xf] }
  0x29   :  { %150 = vst [vmem:[#allocation2 + $0xec] sm:$0xf] %v1116_v59  ;;  %v1118_v61 = vld [vmem:[%s2259_s1 + $0x1ec] sm:$0xf]  ;;  %v1119_v62 = vld [vmem:[%s2259_s1 + $0x1f4] sm:$0xf] }
  0x2a   :  { %152 = vst [vmem:[#allocation2 + $0xf0] sm:$0xf] %v1117_v60  ;;  %154 = vst [vmem:[#allocation2 + $0xf4] sm:$0xf] %v1118_v61  ;;  %v1120_v63 = vld [vmem:[%s2259_s1 + $0x1fc] sm:$0xf] }
  0x2b   :  { %156 = vst [vmem:[#allocation2 + $0xf8] sm:$0xf] %v1119_v62  ;;  %v1126_v0 = vld [vmem:[%s2258_s0] sm:$0xff]   ;;  %158 = vst [vmem:[#allocation2 + $0xfc] sm:$0xf] %v1120_v63  ;;  %v1381_v9 = vld [vmem:[%s2258_s0 + $0x8] sm:$0xff]  }
  0x2c   :  { %v1680_v1 = vld [vmem:[%s2260_s2] ss:$0 sm:$0xff]  ;;  %v1127_v2 = vunpack.c.l.bf16 %v1126_v0  ;;  %v1128_v5 = vunpack.c.h.bf16 %v1126_v0  ;;  %v1412_v10 = vld [vmem:[#allocation2 + $0x8] sm:$0xff]   ;;  %v1131_v14 = vunpack.c.l.bf16 %v1381_v9  ;;  %v1132_v18 = vunpack.c.h.bf16 %v1381_v9  ;;  %v1382_v20 = vld [vmem:[%s2258_s0 + $0x10] sm:$0xff]  }
  0x2d   :  { %v1254_v3 = vld [vmem:[#allocation2] sm:$0xff]   ;;  %v1259_v15 = vunpack.c.l.bf16 %v1412_v10  ;;  %v1260_v19 = vunpack.c.h.bf16 %v1412_v10  ;;  %v1413_v21 = vld [vmem:[#allocation2 + $0x10] sm:$0xff]   ;;  %v1135_v32 = vunpack.c.l.bf16 %v1382_v20  ;;  %v1136_v41 = vunpack.c.h.bf16 %v1382_v20  ;;  %v1383_v42 = vld [vmem:[%s2258_s0 + $0x18] sm:$0xff]  }
  0x2e   :  { %v1685_v4 = vld [vmem:[%s2262_s4] ss:$0 sm:$0xff]  ;;  %v1255_v7 = vunpack.c.l.bf16 %v1254_v3  ;;  %v1256_v8 = vunpack.c.h.bf16 %v1254_v3  ;;  %v452_v11 = vmul.f32 %v1127_v2, %v1680_v1  ;;  %v453_v13 = vmul.f32 %v1128_v5, %v1680_v1  ;;  %v1414_v43 = vld [vmem:[#allocation2 + $0x18] sm:$0xff]  }
  0x2f   :  { %v1690_v6 = vld [vmem:[%s2261_s3] ss:$0 sm:$0xff]  ;;  %v454_v24 = vmul.f32 %v1131_v14, %v1680_v1  ;;  %v724_v25 = vmul.f32 %v1259_v15, %v1685_v4  ;;  %v455_v28 = vmul.f32 %v1132_v18, %v1680_v1  ;;  %v725_v29 = vmul.f32 %v1260_v19, %v1685_v4  ;;  %v1385_v14 = vld [vmem:[%s2258_s0 + $0x28] sm:$0xff]  }
  0x30   :  { %v1699_v12 = vld [vmem:[%s2263_s5] ss:$0 sm:$0xff]  ;;  %v722_v16 = vmul.f32 %v1255_v7, %v1685_v4  ;;  %v723_v17 = vmul.f32 %v1256_v8, %v1685_v4  ;;  %v523_v22 = vadd.f32 %v1690_v6, %v452_v11  ;;  %v524_v23 = vadd.f32 %v1690_v6, %v453_v13  ;;  %v1416_v19 = vld [vmem:[#allocation2 + $0x28] sm:$0xff]  }
  0x31   :  { %v525_v30 = vadd.f32 %v1690_v6, %v454_v24  ;;  %v795_v31 = vadd.f32 %v1699_v12, %v724_v25  ;;  %v1263_v33 = vunpack.c.l.bf16 %v1413_v21  ;;  %v526_v36 = vadd.f32 %v1690_v6, %v455_v28  ;;  %v1384_v52 = vld [vmem:[%s2258_s0 + $0x20] sm:$0xff]  }
  0x32   :  { %v793_v26 = vadd.f32 %v1699_v12, %v722_v16  ;;  %v794_v27 = vadd.f32 %v1699_v12, %v723_v17  ;;  %v796_v37 = vadd.f32 %v1699_v12, %v725_v29  ;;  %v456_v39 = vmul.f32 %v1135_v32, %v1680_v1  ;;  %v1415_v57 = vld [vmem:[#allocation2 + $0x20] sm:$0xff]   ;;  %v1386_v32 = vld [vmem:[%s2258_s0 + $0x30] sm:$0xff]  }
  0x33   :  { %v859_v38 = vadd.f32 %v795_v31, %v525_v30  ;;  %v726_v40 = vmul.f32 %v1263_v33, %v1685_v4  ;;  %v1264_v47 = vunpack.c.h.bf16 %v1413_v21  ;;  %v457_v51 = vmul.f32 %v1136_v41, %v1680_v1  ;;  %v1417_v33 = vld [vmem:[#allocation2 + $0x30] sm:$0xff]  }
  0x34   :  { %v857_v34 = vadd.f32 %v793_v26, %v523_v22  ;;  %v858_v35 = vadd.f32 %v794_v27, %v524_v23  ;;  %v860_v46 = vadd.f32 %v796_v37, %v526_v36  ;;  %v527_v49 = vadd.f32 %v1690_v6, %v456_v39 }
  0x35   :  { %v923_v48 = vmax.f32 %v859_v38, 0.0  ;;  %v797_v50 = vadd.f32 %v1699_v12, %v726_v40  ;;  %v727_v54 = vmul.f32 %v1264_v47, %v1685_v4  ;;  %v1139_v55 = vunpack.c.l.bf16 %v1383_v42 }
  0x36   :  { %v921_v44 = vmax.f32 %v857_v34, 0.0  ;;  %v922_v45 = vmax.f32 %v858_v35, 0.0  ;;  %v924_v53 = vmax.f32 %v860_v46, 0.0  ;;  %v1267_v56 = vunpack.c.l.bf16 %v1414_v43  ;;  %v1387_v46 = vld [vmem:[%s2258_s0 + $0x38] sm:$0xff]  }
  0x37   :  { %987 = vst [vmem:[%s2264_s6 + $0x10] sm:$0xff] %v923_v48  ;;  %v861_v58 = vadd.f32 %v797_v50, %v527_v49  ;;  %v528_v59 = vadd.f32 %v1690_v6, %v457_v51  ;;  %v1140_v60 = vunpack.c.h.bf16 %v1383_v42  ;;  %v1268_v61 = vunpack.c.h.bf16 %v1414_v43 }
  0x38   :  { %985 = vst [vmem:[%s2264_s6] sm:$0xff] %v921_v44  ;;  %986 = vst [vmem:[%s2264_s6 + $0x8] sm:$0xff] %v922_v45  ;;  %v798_v62 = vadd.f32 %v1699_v12, %v727_v54  ;;  %v458_v63 = vmul.f32 %v1139_v55, %v1680_v1  ;;  %v728_v0 = vmul.f32 %v1267_v56, %v1685_v4  ;;  %v1143_v2 = vunpack.c.l.bf16 %v1384_v52  ;;  %v1418_v55 = vld [vmem:[#allocation2 + $0x38] sm:$0xff]  }
  0x39   :  { %988 = vst [vmem:[%s2264_s6 + $0x18] sm:$0xff] %v924_v53  ;;  %v925_v3 = vmax.f32 %v861_v58, 0.0  ;;  %v459_v5 = vmul.f32 %v1140_v60, %v1680_v1  ;;  %v729_v7 = vmul.f32 %v1268_v61, %v1685_v4  ;;  %v1271_v8 = vunpack.c.l.bf16 %v1415_v57 }
  0x3a   :  { %v862_v9 = vadd.f32 %v798_v62, %v528_v59  ;;  %v529_v10 = vadd.f32 %v1690_v6, %v458_v63  ;;  %v799_v11 = vadd.f32 %v1699_v12, %v728_v0  ;;  %v460_v13 = vmul.f32 %v1143_v2, %v1680_v1 }
  0x3b   :  { %989 = vst [vmem:[%s2264_s6 + $0x20] sm:$0xff] %v925_v3  ;;  %v530_v15 = vadd.f32 %v1690_v6, %v459_v5  ;;  %v800_v16 = vadd.f32 %v1699_v12, %v729_v7  ;;  %v730_v17 = vmul.f32 %v1271_v8, %v1685_v4  ;;  %v1144_v18 = vunpack.c.h.bf16 %v1384_v52  ;;  %v1388_v7 = vld [vmem:[%s2258_s0 + $0x40] sm:$0xff]  }
  0x3c   :  { %v926_v20 = vmax.f32 %v862_v9, 0.0  ;;  %v863_v21 = vadd.f32 %v799_v11, %v529_v10  ;;  %v531_v22 = vadd.f32 %v1690_v6, %v460_v13  ;;  %v1272_v23 = vunpack.c.h.bf16 %v1415_v57  ;;  %v1419_v13 = vld [vmem:[#allocation2 + $0x40] sm:$0xff]  }
  0x3d   :  { %v864_v24 = vadd.f32 %v800_v16, %v530_v15  ;;  %v801_v25 = vadd.f32 %v1699_v12, %v730_v17  ;;  %v461_v26 = vmul.f32 %v1144_v18, %v1680_v1  ;;  %v1147_v27 = vunpack.c.l.bf16 %v1385_v14 }
  0x3e   :  { %990 = vst [vmem:[%s2264_s6 + $0x28] sm:$0xff] %v926_v20  ;;  %v927_v28 = vmax.f32 %v863_v21, 0.0  ;;  %v731_v29 = vmul.f32 %v1272_v23, %v1685_v4  ;;  %v1275_v30 = vunpack.c.l.bf16 %v1416_v19  ;;  %v1148_v31 = vunpack.c.h.bf16 %v1385_v14 }
  0x3f   :  { %v928_v34 = vmax.f32 %v864_v24, 0.0  ;;  %v865_v35 = vadd.f32 %v801_v25, %v531_v22  ;;  %v532_v36 = vadd.f32 %v1690_v6, %v461_v26  ;;  %v462_v37 = vmul.f32 %v1147_v27, %v1680_v1  ;;  %v1389_v26 = vld [vmem:[%s2258_s0 + $0x48] sm:$0xff]  }
  0x40   :  { %991 = vst [vmem:[%s2264_s6 + $0x30] sm:$0xff] %v927_v28  ;;  %v802_v38 = vadd.f32 %v1699_v12, %v731_v29  ;;  %v732_v39 = vmul.f32 %v1275_v30, %v1685_v4  ;;  %v463_v40 = vmul.f32 %v1148_v31, %v1680_v1  ;;  %v1276_v41 = vunpack.c.h.bf16 %v1416_v19  ;;  %v1420_v27 = vld [vmem:[#allocation2 + $0x48] sm:$0xff]  }
  0x41   :  { %992 = vst [vmem:[%s2264_s6 + $0x38] sm:$0xff] %v928_v34  ;;  %v929_v42 = vmax.f32 %v865_v35, 0.0  ;;  %v533_v43 = vadd.f32 %v1690_v6, %v462_v37  ;;  %v1151_v44 = vunpack.c.l.bf16 %v1386_v32  ;;  %v1279_v45 = vunpack.c.l.bf16 %v1417_v33 }
  0x42   :  { %v866_v47 = vadd.f32 %v802_v38, %v532_v36  ;;  %v803_v48 = vadd.f32 %v1699_v12, %v732_v39  ;;  %v534_v49 = vadd.f32 %v1690_v6, %v463_v40  ;;  %v733_v50 = vmul.f32 %v1276_v41, %v1685_v4  ;;  %v1390_v40 = vld [vmem:[%s2258_s0 + $0x50] sm:$0xff]  }
  0x43   :  { %993 = vst [vmem:[%s2264_s6 + $0x40] sm:$0xff] %v929_v42  ;;  %v464_v51 = vmul.f32 %v1151_v44, %v1680_v1  ;;  %v734_v52 = vmul.f32 %v1279_v45, %v1685_v4  ;;  %v1152_v53 = vunpack.c.h.bf16 %v1386_v32  ;;  %v1280_v54 = vunpack.c.h.bf16 %v1417_v33 }
  0x44   :  { %v930_v56 = vmax.f32 %v866_v47, 0.0  ;;  %v867_v57 = vadd.f32 %v803_v48, %v533_v43  ;;  %v804_v58 = vadd.f32 %v1699_v12, %v733_v50  ;;  %v1155_v59 = vunpack.c.l.bf16 %v1387_v46 }
  0x45   :  { %v535_v60 = vadd.f32 %v1690_v6, %v464_v51  ;;  %v805_v61 = vadd.f32 %v1699_v12, %v734_v52  ;;  %v465_v62 = vmul.f32 %v1152_v53, %v1680_v1  ;;  %v735_v63 = vmul.f32 %v1280_v54, %v1685_v4 }
  0x46   :  { %994 = vst [vmem:[%s2264_s6 + $0x48] sm:$0xff] %v930_v56  ;;  %v931_v0 = vmax.f32 %v867_v57, 0.0  ;;  %v868_v2 = vadd.f32 %v804_v58, %v534_v49  ;;  %v466_v3 = vmul.f32 %v1155_v59, %v1680_v1  ;;  %v1283_v5 = vunpack.c.l.bf16 %v1418_v55  ;;  %v1421_v49 = vld [vmem:[#allocation2 + $0x50] sm:$0xff]  }
  0x47   :  { %v869_v8 = vadd.f32 %v805_v61, %v535_v60  ;;  %v536_v9 = vadd.f32 %v1690_v6, %v465_v62  ;;  %v806_v10 = vadd.f32 %v1699_v12, %v735_v63  ;;  %v1156_v11 = vunpack.c.h.bf16 %v1387_v46  ;;  %v1391_v62 = vld [vmem:[%s2258_s0 + $0x58] sm:$0xff]  }
  0x48   :  { %995 = vst [vmem:[%s2264_s6 + $0x50] sm:$0xff] %v931_v0  ;;  %v932_v14 = vmax.f32 %v868_v2, 0.0  ;;  %v537_v15 = vadd.f32 %v1690_v6, %v466_v3  ;;  %v736_v16 = vmul.f32 %v1283_v5, %v1685_v4  ;;  %v1284_v17 = vunpack.c.h.bf16 %v1418_v55  ;;  %v1422_v63 = vld [vmem:[#allocation2 + $0x58] sm:$0xff]  }
  0x49   :  { %v933_v18 = vmax.f32 %v869_v8, 0.0  ;;  %v870_v19 = vadd.f32 %v806_v10, %v536_v9  ;;  %v467_v20 = vmul.f32 %v1156_v11, %v1680_v1  ;;  %v1159_v21 = vunpack.c.l.bf16 %v1388_v7 }
  0x4a   :  { %996 = vst [vmem:[%s2264_s6 + $0x58] sm:$0xff] %v932_v14  ;;  %v807_v22 = vadd.f32 %v1699_v12, %v736_v16  ;;  %v737_v23 = vmul.f32 %v1284_v17, %v1685_v4  ;;  %v1287_v24 = vunpack.c.l.bf16 %v1419_v13  ;;  %v1160_v25 = vunpack.c.h.bf16 %v1388_v7 }
  0x4b   :  { %997 = vst [vmem:[%s2264_s6 + $0x60] sm:$0xff] %v933_v18  ;;  %v934_v28 = vmax.f32 %v870_v19, 0.0  ;;  %v538_v29 = vadd.f32 %v1690_v6, %v467_v20  ;;  %v468_v30 = vmul.f32 %v1159_v21, %v1680_v1  ;;  %v1288_v31 = vunpack.c.h.bf16 %v1419_v13  ;;  %v1392_v20 = vld [vmem:[%s2258_s0 + $0x60] sm:$0xff]  }
  0x4c   :  { %v871_v32 = vadd.f32 %v807_v22, %v537_v15  ;;  %v808_v33 = vadd.f32 %v1699_v12, %v737_v23  ;;  %v738_v34 = vmul.f32 %v1287_v24, %v1685_v4  ;;  %v469_v35 = vmul.f32 %v1160_v25, %v1680_v1  ;;  %v1423_v25 = vld [vmem:[#allocation2 + $0x60] sm:$0xff]  }
  0x4d   :  { %998 = vst [vmem:[%s2264_s6 + $0x68] sm:$0xff] %v934_v28  ;;  %v539_v36 = vadd.f32 %v1690_v6, %v468_v30  ;;  %v739_v37 = vmul.f32 %v1288_v31, %v1685_v4  ;;  %v1163_v38 = vunpack.c.l.bf16 %v1389_v26  ;;  %v1291_v39 = vunpack.c.l.bf16 %v1420_v27 }
  0x4e   :  { %v935_v41 = vmax.f32 %v871_v32, 0.0  ;;  %v872_v42 = vadd.f32 %v808_v33, %v538_v29  ;;  %v809_v43 = vadd.f32 %v1699_v12, %v738_v34  ;;  %v540_v44 = vadd.f32 %v1690_v6, %v469_v35  ;;  %v1393_v34 = vld [vmem:[%s2258_s0 + $0x68] sm:$0xff]  }
  0x4f   :  { %v810_v45 = vadd.f32 %v1699_v12, %v739_v37  ;;  %v470_v46 = vmul.f32 %v1163_v38, %v1680_v1  ;;  %v740_v47 = vmul.f32 %v1291_v39, %v1685_v4  ;;  %v1164_v48 = vunpack.c.h.bf16 %v1389_v26 }
  0x50   :  { %999 = vst [vmem:[%s2264_s6 + $0x70] sm:$0xff] %v935_v41  ;;  %v936_v50 = vmax.f32 %v872_v42, 0.0  ;;  %v873_v51 = vadd.f32 %v809_v43, %v539_v36  ;;  %v1292_v52 = vunpack.c.h.bf16 %v1420_v27  ;;  %v1167_v53 = vunpack.c.l.bf16 %v1390_v40  ;;  %v1424_v43 = vld [vmem:[#allocation2 + $0x68] sm:$0xff]  }
  0x51   :  { %v874_v54 = vadd.f32 %v810_v45, %v540_v44  ;;  %v541_v55 = vadd.f32 %v1690_v6, %v470_v46  ;;  %v811_v56 = vadd.f32 %v1699_v12, %v740_v47  ;;  %v471_v57 = vmul.f32 %v1164_v48, %v1680_v1 }
  0x52   :  { %1000 = vst [vmem:[%s2264_s6 + $0x78] sm:$0xff] %v936_v50  ;;  %v937_v58 = vmax.f32 %v873_v51, 0.0  ;;  %v741_v59 = vmul.f32 %v1292_v52, %v1685_v4  ;;  %v472_v60 = vmul.f32 %v1167_v53, %v1680_v1  ;;  %v1295_v61 = vunpack.c.l.bf16 %v1421_v49 }
  0x53   :  { %v938_v0 = vmax.f32 %v874_v54, 0.0  ;;  %v875_v2 = vadd.f32 %v811_v56, %v541_v55  ;;  %v542_v3 = vadd.f32 %v1690_v6, %v471_v57  ;;  %v1168_v5 = vunpack.c.h.bf16 %v1390_v40  ;;  %v1394_v56 = vld [vmem:[%s2258_s0 + $0x70] sm:$0xff]  }
  0x54   :  { %1001 = vst [vmem:[%s2264_s6 + $0x80] sm:$0xff] %v937_v58  ;;  %v812_v7 = vadd.f32 %v1699_v12, %v741_v59  ;;  %v543_v8 = vadd.f32 %v1690_v6, %v472_v60  ;;  %v742_v9 = vmul.f32 %v1295_v61, %v1685_v4  ;;  %v1296_v10 = vunpack.c.h.bf16 %v1421_v49  ;;  %v1425_v57 = vld [vmem:[#allocation2 + $0x70] sm:$0xff]  }
  0x55   :  { %1002 = vst [vmem:[%s2264_s6 + $0x88] sm:$0xff] %v938_v0  ;;  %v939_v11 = vmax.f32 %v875_v2, 0.0  ;;  %v473_v13 = vmul.f32 %v1168_v5, %v1680_v1  ;;  %v1171_v14 = vunpack.c.l.bf16 %v1391_v62  ;;  %v1299_v15 = vunpack.c.l.bf16 %v1422_v63 }
  0x56   :  { %v876_v16 = vadd.f32 %v812_v7, %v542_v3  ;;  %v813_v17 = vadd.f32 %v1699_v12, %v742_v9  ;;  %v743_v18 = vmul.f32 %v1296_v10, %v1685_v4  ;;  %v1172_v19 = vunpack.c.h.bf16 %v1391_v62 }
  0x57   :  { %1003 = vst [vmem:[%s2264_s6 + $0x90] sm:$0xff] %v939_v11  ;;  %v544_v21 = vadd.f32 %v1690_v6, %v473_v13  ;;  %v474_v22 = vmul.f32 %v1171_v14, %v1680_v1  ;;  %v744_v23 = vmul.f32 %v1299_v15, %v1685_v4  ;;  %v1300_v24 = vunpack.c.h.bf16 %v1422_v63  ;;  %v1395_v14 = vld [vmem:[%s2258_s0 + $0x78] sm:$0xff]  }
  0x58   :  { %v940_v26 = vmax.f32 %v876_v16, 0.0  ;;  %v877_v27 = vadd.f32 %v813_v17, %v543_v8  ;;  %v814_v28 = vadd.f32 %v1699_v12, %v743_v18  ;;  %v475_v29 = vmul.f32 %v1172_v19, %v1680_v1  ;;  %v1426_v19 = vld [vmem:[#allocation2 + $0x78] sm:$0xff]  }
  0x59   :  { %v545_v30 = vadd.f32 %v1690_v6, %v474_v22  ;;  %v815_v31 = vadd.f32 %v1699_v12, %v744_v23  ;;  %v745_v32 = vmul.f32 %v1300_v24, %v1685_v4  ;;  %v1175_v33 = vunpack.c.l.bf16 %v1392_v20 }
  0x5a   :  { %1004 = vst [vmem:[%s2264_s6 + $0x98] sm:$0xff] %v940_v26  ;;  %v941_v35 = vmax.f32 %v877_v27, 0.0  ;;  %v878_v36 = vadd.f32 %v814_v28, %v544_v21  ;;  %v546_v37 = vadd.f32 %v1690_v6, %v475_v29  ;;  %v1303_v38 = vunpack.c.l.bf16 %v1423_v25  ;;  %v1396_v28 = vld [vmem:[%s2258_s0 + $0x80] sm:$0xff]  }
  0x5b   :  { %v879_v39 = vadd.f32 %v815_v31, %v545_v30  ;;  %v816_v40 = vadd.f32 %v1699_v12, %v745_v32  ;;  %v476_v41 = vmul.f32 %v1175_v33, %v1680_v1  ;;  %v1176_v42 = vunpack.c.h.bf16 %v1392_v20  ;;  %v1427_v33 = vld [vmem:[#allocation2 + $0x80] sm:$0xff]  }
  0x5c   :  { %1005 = vst [vmem:[%s2264_s6 + $0xa0] sm:$0xff] %v941_v35  ;;  %v942_v44 = vmax.f32 %v878_v36, 0.0  ;;  %v746_v45 = vmul.f32 %v1303_v38, %v1685_v4  ;;  %v1304_v46 = vunpack.c.h.bf16 %v1423_v25  ;;  %v1179_v47 = vunpack.c.l.bf16 %v1393_v34 }
  0x5d   :  { %v943_v48 = vmax.f32 %v879_v39, 0.0  ;;  %v880_v49 = vadd.f32 %v816_v40, %v546_v37  ;;  %v547_v50 = vadd.f32 %v1690_v6, %v476_v41  ;;  %v477_v51 = vmul.f32 %v1176_v42, %v1680_v1 }
  0x5e   :  { %1006 = vst [vmem:[%s2264_s6 + $0xa8] sm:$0xff] %v942_v44  ;;  %v817_v52 = vadd.f32 %v1699_v12, %v746_v45  ;;  %v747_v53 = vmul.f32 %v1304_v46, %v1685_v4  ;;  %v478_v54 = vmul.f32 %v1179_v47, %v1680_v1  ;;  %v1307_v55 = vunpack.c.l.bf16 %v1424_v43 }
  0x5f   :  { %1007 = vst [vmem:[%s2264_s6 + $0xb0] sm:$0xff] %v943_v48  ;;  %v944_v58 = vmax.f32 %v880_v49, 0.0  ;;  %v548_v59 = vadd.f32 %v1690_v6, %v477_v51  ;;  %v1180_v60 = vunpack.c.h.bf16 %v1393_v34  ;;  %v1308_v61 = vunpack.c.h.bf16 %v1424_v43 }
  0x60   :  { %v881_v62 = vadd.f32 %v817_v52, %v547_v50  ;;  %v818_v63 = vadd.f32 %v1699_v12, %v747_v53  ;;  %v549_v0 = vadd.f32 %v1690_v6, %v478_v54  ;;  %v748_v2 = vmul.f32 %v1307_v55, %v1685_v4  ;;  %v1397_v50 = vld [vmem:[%s2258_s0 + $0x88] sm:$0xff]  }
  0x61   :  { %1008 = vst [vmem:[%s2264_s6 + $0xb8] sm:$0xff] %v944_v58  ;;  %v479_v3 = vmul.f32 %v1180_v60, %v1680_v1  ;;  %v749_v5 = vmul.f32 %v1308_v61, %v1685_v4  ;;  %v1183_v7 = vunpack.c.l.bf16 %v1394_v56  ;;  %v1311_v8 = vunpack.c.l.bf16 %v1425_v57  ;;  %v1428_v55 = vld [vmem:[#allocation2 + $0x88] sm:$0xff]  }
  0x62   :  { %v945_v9 = vmax.f32 %v881_v62, 0.0  ;;  %v882_v10 = vadd.f32 %v818_v63, %v548_v59  ;;  %v819_v11 = vadd.f32 %v1699_v12, %v748_v2  ;;  %v1184_v13 = vunpack.c.h.bf16 %v1394_v56 }
  0x63   :  { %v550_v15 = vadd.f32 %v1690_v6, %v479_v3  ;;  %v820_v16 = vadd.f32 %v1699_v12, %v749_v5  ;;  %v480_v17 = vmul.f32 %v1183_v7, %v1680_v1  ;;  %v750_v18 = vmul.f32 %v1311_v8, %v1685_v4  ;;  %v1398_v7 = vld [vmem:[%s2258_s0 + $0x90] sm:$0xff]  }
  0x64   :  { %1009 = vst [vmem:[%s2264_s6 + $0xc0] sm:$0xff] %v945_v9  ;;  %v946_v20 = vmax.f32 %v882_v10, 0.0  ;;  %v883_v21 = vadd.f32 %v819_v11, %v549_v0  ;;  %v481_v22 = vmul.f32 %v1184_v13, %v1680_v1  ;;  %v1312_v23 = vunpack.c.h.bf16 %v1425_v57  ;;  %v1429_v13 = vld [vmem:[#allocation2 + $0x90] sm:$0xff]  }
  0x65   :  { %v884_v24 = vadd.f32 %v820_v16, %v550_v15  ;;  %v551_v25 = vadd.f32 %v1690_v6, %v480_v17  ;;  %v821_v26 = vadd.f32 %v1699_v12, %v750_v18  ;;  %v1187_v27 = vunpack.c.l.bf16 %v1395_v14 }
  0x66   :  { %1010 = vst [vmem:[%s2264_s6 + $0xc8] sm:$0xff] %v946_v20  ;;  %v947_v29 = vmax.f32 %v883_v21, 0.0  ;;  %v552_v30 = vadd.f32 %v1690_v6, %v481_v22  ;;  %v751_v31 = vmul.f32 %v1312_v23, %v1685_v4  ;;  %v1315_v32 = vunpack.c.l.bf16 %v1426_v19  ;;  %v1399_v22 = vld [vmem:[%s2258_s0 + $0x98] sm:$0xff]  }
  0x67   :  { %v948_v34 = vmax.f32 %v884_v24, 0.0  ;;  %v885_v35 = vadd.f32 %v821_v26, %v551_v25  ;;  %v482_v36 = vmul.f32 %v1187_v27, %v1680_v1  ;;  %v1188_v37 = vunpack.c.h.bf16 %v1395_v14  ;;  %v1430_v27 = vld [vmem:[#allocation2 + $0x98] sm:$0xff]  }
  0x68   :  { %1011 = vst [vmem:[%s2264_s6 + $0xd0] sm:$0xff] %v947_v29  ;;  %v822_v38 = vadd.f32 %v1699_v12, %v751_v31  ;;  %v752_v39 = vmul.f32 %v1315_v32, %v1685_v4  ;;  %v1316_v40 = vunpack.c.h.bf16 %v1426_v19  ;;  %v1191_v41 = vunpack.c.l.bf16 %v1396_v28 }
  0x69   :  { %1012 = vst [vmem:[%s2264_s6 + $0xd8] sm:$0xff] %v948_v34  ;;  %v949_v42 = vmax.f32 %v885_v35, 0.0  ;;  %v553_v43 = vadd.f32 %v1690_v6, %v482_v36  ;;  %v483_v44 = vmul.f32 %v1188_v37, %v1680_v1  ;;  %v1319_v45 = vunpack.c.l.bf16 %v1427_v33 }
  0x6a   :  { %v886_v46 = vadd.f32 %v822_v38, %v552_v30  ;;  %v823_v47 = vadd.f32 %v1699_v12, %v752_v39  ;;  %v753_v48 = vmul.f32 %v1316_v40, %v1685_v4  ;;  %v484_v49 = vmul.f32 %v1191_v41, %v1680_v1 }
  0x6b   :  { %1013 = vst [vmem:[%s2264_s6 + $0xe0] sm:$0xff] %v949_v42  ;;  %v554_v51 = vadd.f32 %v1690_v6, %v483_v44  ;;  %v754_v52 = vmul.f32 %v1319_v45, %v1685_v4  ;;  %v1192_v53 = vunpack.c.h.bf16 %v1396_v28  ;;  %v1320_v54 = vunpack.c.h.bf16 %v1427_v33  ;;  %v1400_v44 = vld [vmem:[%s2258_s0 + $0xa0] sm:$0xff]  }
  0x6c   :  { %v950_v56 = vmax.f32 %v886_v46, 0.0  ;;  %v887_v57 = vadd.f32 %v823_v47, %v553_v43  ;;  %v824_v58 = vadd.f32 %v1699_v12, %v753_v48  ;;  %v555_v59 = vadd.f32 %v1690_v6, %v484_v49  ;;  %v1431_v49 = vld [vmem:[#allocation2 + $0xa0] sm:$0xff]  }
  0x6d   :  { %v825_v60 = vadd.f32 %v1699_v12, %v754_v52  ;;  %v485_v61 = vmul.f32 %v1192_v53, %v1680_v1  ;;  %v755_v62 = vmul.f32 %v1320_v54, %v1685_v4  ;;  %v1195_v63 = vunpack.c.l.bf16 %v1397_v50 }
  0x6e   :  { %1014 = vst [vmem:[%s2264_s6 + $0xe8] sm:$0xff] %v950_v56  ;;  %v951_v0 = vmax.f32 %v887_v57, 0.0  ;;  %v888_v2 = vadd.f32 %v824_v58, %v554_v51  ;;  %v1323_v3 = vunpack.c.l.bf16 %v1428_v55  ;;  %v1196_v5 = vunpack.c.h.bf16 %v1397_v50 }
  0x6f   :  { %v889_v8 = vadd.f32 %v825_v60, %v555_v59  ;;  %v556_v9 = vadd.f32 %v1690_v6, %v485_v61  ;;  %v826_v10 = vadd.f32 %v1699_v12, %v755_v62  ;;  %v486_v11 = vmul.f32 %v1195_v63, %v1680_v1  ;;  %v1401_v62 = vld [vmem:[%s2258_s0 + $0xa8] sm:$0xff]  }
  0x70   :  { %1015 = vst [vmem:[%s2264_s6 + $0xf0] sm:$0xff] %v951_v0  ;;  %v952_v14 = vmax.f32 %v888_v2, 0.0  ;;  %v756_v15 = vmul.f32 %v1323_v3, %v1685_v4  ;;  %v487_v16 = vmul.f32 %v1196_v5, %v1680_v1  ;;  %v1324_v17 = vunpack.c.h.bf16 %v1428_v55  ;;  %v1432_v63 = vld [vmem:[#allocation2 + $0xa8] sm:$0xff]  }
  0x71   :  { %v953_v18 = vmax.f32 %v889_v8, 0.0  ;;  %v890_v19 = vadd.f32 %v826_v10, %v556_v9  ;;  %v557_v20 = vadd.f32 %v1690_v6, %v486_v11  ;;  %v1199_v21 = vunpack.c.l.bf16 %v1398_v7 }
  0x72   :  { %1016 = vst [vmem:[%s2264_s6 + $0xf8] sm:$0xff] %v952_v14  ;;  %v827_v23 = vadd.f32 %v1699_v12, %v756_v15  ;;  %v558_v24 = vadd.f32 %v1690_v6, %v487_v16  ;;  %v757_v25 = vmul.f32 %v1324_v17, %v1685_v4  ;;  %v1327_v26 = vunpack.c.l.bf16 %v1429_v13  ;;  %v1402_v16 = vld [vmem:[%s2258_s0 + $0xb0] sm:$0xff]  }
  0x73   :  { %1017 = vst [vmem:[%s2264_s6 + $0x100] sm:$0xff] %v953_v18  ;;  %v954_v28 = vmax.f32 %v890_v19, 0.0  ;;  %v488_v29 = vmul.f32 %v1199_v21, %v1680_v1  ;;  %v1200_v30 = vunpack.c.h.bf16 %v1398_v7  ;;  %v1328_v31 = vunpack.c.h.bf16 %v1429_v13 }
  0x74   :  { %v891_v32 = vadd.f32 %v827_v23, %v557_v20  ;;  %v828_v33 = vadd.f32 %v1699_v12, %v757_v25  ;;  %v758_v34 = vmul.f32 %v1327_v26, %v1685_v4  ;;  %v1203_v35 = vunpack.c.l.bf16 %v1399_v22  ;;  %v1433_v25 = vld [vmem:[#allocation2 + $0xb0] sm:$0xff]  }
  0x75   :  { %1018 = vst [vmem:[%s2264_s6 + $0x108] sm:$0xff] %v954_v28  ;;  %v559_v36 = vadd.f32 %v1690_v6, %v488_v29  ;;  %v489_v37 = vmul.f32 %v1200_v30, %v1680_v1  ;;  %v759_v38 = vmul.f32 %v1328_v31, %v1685_v4  ;;  %v1331_v39 = vunpack.c.l.bf16 %v1430_v27 }
  0x76   :  { %v955_v40 = vmax.f32 %v891_v32, 0.0  ;;  %v892_v41 = vadd.f32 %v828_v33, %v558_v24  ;;  %v829_v42 = vadd.f32 %v1699_v12, %v758_v34  ;;  %v490_v43 = vmul.f32 %v1203_v35, %v1680_v1 }
  0x77   :  { %v560_v45 = vadd.f32 %v1690_v6, %v489_v37  ;;  %v830_v46 = vadd.f32 %v1699_v12, %v759_v38  ;;  %v760_v47 = vmul.f32 %v1331_v39, %v1685_v4  ;;  %v1204_v48 = vunpack.c.h.bf16 %v1399_v22  ;;  %v1403_v38 = vld [vmem:[%s2258_s0 + $0xb8] sm:$0xff]  }
  0x78   :  { %1019 = vst [vmem:[%s2264_s6 + $0x110] sm:$0xff] %v955_v40  ;;  %v956_v50 = vmax.f32 %v892_v41, 0.0  ;;  %v893_v51 = vadd.f32 %v829_v42, %v559_v36  ;;  %v561_v52 = vadd.f32 %v1690_v6, %v490_v43  ;;  %v1332_v53 = vunpack.c.h.bf16 %v1430_v27  ;;  %v1434_v43 = vld [vmem:[#allocation2 + $0xb8] sm:$0xff]  }
  0x79   :  { %v894_v54 = vadd.f32 %v830_v46, %v560_v45  ;;  %v831_v55 = vadd.f32 %v1699_v12, %v760_v47  ;;  %v491_v56 = vmul.f32 %v1204_v48, %v1680_v1  ;;  %v1207_v57 = vunpack.c.l.bf16 %v1400_v44 }
  0x7a   :  { %1020 = vst [vmem:[%s2264_s6 + $0x118] sm:$0xff] %v956_v50  ;;  %v957_v58 = vmax.f32 %v893_v51, 0.0  ;;  %v761_v59 = vmul.f32 %v1332_v53, %v1685_v4  ;;  %v1335_v60 = vunpack.c.l.bf16 %v1431_v49  ;;  %v1208_v61 = vunpack.c.h.bf16 %v1400_v44 }
  0x7b   :  { %v958_v0 = vmax.f32 %v894_v54, 0.0  ;;  %v895_v2 = vadd.f32 %v831_v55, %v561_v52  ;;  %v562_v3 = vadd.f32 %v1690_v6, %v491_v56  ;;  %v492_v5 = vmul.f32 %v1207_v57, %v1680_v1  ;;  %v1404_v56 = vld [vmem:[%s2258_s0 + $0xc0] sm:$0xff]  }
  0x7c   :  { %1021 = vst [vmem:[%s2264_s6 + $0x120] sm:$0xff] %v957_v58  ;;  %v832_v7 = vadd.f32 %v1699_v12, %v761_v59  ;;  %v762_v8 = vmul.f32 %v1335_v60, %v1685_v4  ;;  %v493_v9 = vmul.f32 %v1208_v61, %v1680_v1  ;;  %v1336_v10 = vunpack.c.h.bf16 %v1431_v49  ;;  %v1435_v57 = vld [vmem:[#allocation2 + $0xc0] sm:$0xff]  }
  0x7d   :  { %1022 = vst [vmem:[%s2264_s6 + $0x128] sm:$0xff] %v958_v0  ;;  %v959_v11 = vmax.f32 %v895_v2, 0.0  ;;  %v563_v13 = vadd.f32 %v1690_v6, %v492_v5  ;;  %v1211_v14 = vunpack.c.l.bf16 %v1401_v62  ;;  %v1339_v15 = vunpack.c.l.bf16 %v1432_v63 }
  0x7e   :  { %v896_v17 = vadd.f32 %v832_v7, %v562_v3  ;;  %v833_v18 = vadd.f32 %v1699_v12, %v762_v8  ;;  %v564_v19 = vadd.f32 %v1690_v6, %v493_v9  ;;  %v763_v20 = vmul.f32 %v1336_v10, %v1685_v4  ;;  %v1405_v9 = vld [vmem:[%s2258_s0 + $0xc8] sm:$0xff]  }
  0x7f   :  { %1023 = vst [vmem:[%s2264_s6 + $0x130] sm:$0xff] %v959_v11  ;;  %v494_v21 = vmul.f32 %v1211_v14, %v1680_v1  ;;  %v764_v22 = vmul.f32 %v1339_v15, %v1685_v4  ;;  %v1212_v23 = vunpack.c.h.bf16 %v1401_v62  ;;  %v1340_v24 = vunpack.c.h.bf16 %v1432_v63 }
  0x80   :  { %v960_v26 = vmax.f32 %v896_v17, 0.0  ;;  %v897_v27 = vadd.f32 %v833_v18, %v563_v13  ;;  %v834_v28 = vadd.f32 %v1699_v12, %v763_v20  ;;  %v1215_v29 = vunpack.c.l.bf16 %v1402_v16 }
  0x81   :  { %v565_v30 = vadd.f32 %v1690_v6, %v494_v21  ;;  %v835_v31 = vadd.f32 %v1699_v12, %v764_v22  ;;  %v495_v32 = vmul.f32 %v1212_v23, %v1680_v1  ;;  %v765_v33 = vmul.f32 %v1340_v24, %v1685_v4 }
  0x82   :  { %1024 = vst [vmem:[%s2264_s6 + $0x138] sm:$0xff] %v960_v26  ;;  %v961_v34 = vmax.f32 %v897_v27, 0.0  ;;  %v898_v35 = vadd.f32 %v834_v28, %v564_v19  ;;  %v496_v36 = vmul.f32 %v1215_v29, %v1680_v1  ;;  %v1343_v37 = vunpack.c.l.bf16 %v1433_v25  ;;  %v1436_v19 = vld [vmem:[#allocation2 + $0xc8] sm:$0xff]  }
  0x83   :  { %v899_v39 = vadd.f32 %v835_v31, %v565_v30  ;;  %v566_v40 = vadd.f32 %v1690_v6, %v495_v32  ;;  %v836_v41 = vadd.f32 %v1699_v12, %v765_v33  ;;  %v1216_v42 = vunpack.c.h.bf16 %v1402_v16  ;;  %v1406_v32 = vld [vmem:[%s2258_s0 + $0xd0] sm:$0xff]  }
  0x84   :  { %1025 = vst [vmem:[%s2264_s6 + $0x140] sm:$0xff] %v961_v34  ;;  %v962_v44 = vmax.f32 %v898_v35, 0.0  ;;  %v567_v45 = vadd.f32 %v1690_v6, %v496_v36  ;;  %v766_v46 = vmul.f32 %v1343_v37, %v1685_v4  ;;  %v1344_v47 = vunpack.c.h.bf16 %v1433_v25  ;;  %v1437_v33 = vld [vmem:[#allocation2 + $0xd0] sm:$0xff]  }
  0x85   :  { %v963_v48 = vmax.f32 %v899_v39, 0.0  ;;  %v900_v49 = vadd.f32 %v836_v41, %v566_v40  ;;  %v497_v50 = vmul.f32 %v1216_v42, %v1680_v1  ;;  %v1219_v51 = vunpack.c.l.bf16 %v1403_v38 }
  0x86   :  { %1026 = vst [vmem:[%s2264_s6 + $0x148] sm:$0xff] %v962_v44  ;;  %v837_v52 = vadd.f32 %v1699_v12, %v766_v46  ;;  %v767_v53 = vmul.f32 %v1344_v47, %v1685_v4  ;;  %v1347_v54 = vunpack.c.l.bf16 %v1434_v43  ;;  %v1220_v55 = vunpack.c.h.bf16 %v1403_v38 }
  0x87   :  { %1027 = vst [vmem:[%s2264_s6 + $0x150] sm:$0xff] %v963_v48  ;;  %v964_v58 = vmax.f32 %v900_v49, 0.0  ;;  %v568_v59 = vadd.f32 %v1690_v6, %v497_v50  ;;  %v498_v60 = vmul.f32 %v1219_v51, %v1680_v1  ;;  %v1348_v61 = vunpack.c.h.bf16 %v1434_v43  ;;  %v2127_v48 = vld [vmem:[%s2262_s4] ss:$0 sm:$0xff]  ;;  %v1407_v49 = vld [vmem:[%s2258_s0 + $0xd8] sm:$0xff]  }
  0x88   :  { %v901_v62 = vadd.f32 %v837_v52, %v567_v45  ;;  %v838_v63 = vadd.f32 %v1699_v12, %v767_v53  ;;  %v768_v0 = vmul.f32 %v1347_v54, %v1685_v4  ;;  %v499_v2 = vmul.f32 %v1220_v55, %v1680_v1  ;;  %v2145_v50 = vld [vmem:[%s2260_s2] ss:$0 sm:$0xff]  ;;  %v1438_v54 = vld [vmem:[#allocation2 + $0xd8] sm:$0xff]  }
  0x89   :  { %1028 = vst [vmem:[%s2264_s6 + $0x158] sm:$0xff] %v964_v58  ;;  %v569_v3 = vadd.f32 %v1690_v6, %v498_v60  ;;  %v769_v5 = vmul.f32 %v1348_v61, %v1685_v4  ;;  %v1223_v7 = vunpack.c.l.bf16 %v1404_v56  ;;  %v1351_v8 = vunpack.c.l.bf16 %v1435_v57 }
  0x8a   :  { %v965_v10 = vmax.f32 %v901_v62, 0.0  ;;  %v902_v11 = vadd.f32 %v838_v63, %v568_v59  ;;  %v839_v13 = vadd.f32 %v1699_v12, %v768_v0  ;;  %v570_v14 = vadd.f32 %v1690_v6, %v499_v2  ;;  %v1408_v0 = vld [vmem:[%s2258_s0 + $0xe0] sm:$0xff]  }
  0x8b   :  { %v840_v15 = vadd.f32 %v1699_v12, %v769_v5  ;;  %v500_v16 = vmul.f32 %v1223_v7, %v1680_v1  ;;  %v770_v17 = vmul.f32 %v1351_v8, %v1685_v4  ;;  %v1224_v18 = vunpack.c.h.bf16 %v1404_v56 }
  0x8c   :  { %1029 = vst [vmem:[%s2264_s6 + $0x160] sm:$0xff] %v965_v10  ;;  %v966_v20 = vmax.f32 %v902_v11, 0.0  ;;  %v903_v21 = vadd.f32 %v839_v13, %v569_v3  ;;  %v1352_v22 = vunpack.c.h.bf16 %v1435_v57  ;;  %v1227_v23 = vunpack.c.l.bf16 %v1405_v9  ;;  %v2152_v57 = vld [vmem:[%s2263_s5] ss:$0 sm:$0xff] }
  0x8d   :  { %v904_v24 = vadd.f32 %v840_v15, %v570_v14  ;;  %v571_v25 = vadd.f32 %v1690_v6, %v500_v16  ;;  %v841_v26 = vadd.f32 %v1699_v12, %v770_v17  ;;  %v501_v27 = vmul.f32 %v1224_v18, %v1680_v1  ;;  %v1439_v13 = vld [vmem:[#allocation2 + $0xe0] sm:$0xff]  }
  0x8e   :  { %1030 = vst [vmem:[%s2264_s6 + $0x168] sm:$0xff] %v966_v20  ;;  %v967_v28 = vmax.f32 %v903_v21, 0.0  ;;  %v771_v29 = vmul.f32 %v1352_v22, %v1685_v4  ;;  %v502_v30 = vmul.f32 %v1227_v23, %v1680_v1  ;;  %v1355_v31 = vunpack.c.l.bf16 %v1436_v19 }
  0x8f   :  { %v968_v34 = vmax.f32 %v904_v24, 0.0  ;;  %v905_v35 = vadd.f32 %v841_v26, %v571_v25  ;;  %v572_v36 = vadd.f32 %v1690_v6, %v501_v27  ;;  %v1228_v37 = vunpack.c.h.bf16 %v1405_v9  ;;  %v1409_v26 = vld [vmem:[%s2258_s0 + $0xe8] sm:$0xff]  }
  0x90   :  { %1031 = vst [vmem:[%s2264_s6 + $0x170] sm:$0xff] %v967_v28  ;;  %v842_v38 = vadd.f32 %v1699_v12, %v771_v29  ;;  %v573_v39 = vadd.f32 %v1690_v6, %v502_v30  ;;  %v772_v40 = vmul.f32 %v1355_v31, %v1685_v4  ;;  %v1356_v41 = vunpack.c.h.bf16 %v1436_v19  ;;  %v1440_v27 = vld [vmem:[#allocation2 + $0xe8] sm:$0xff]  }
  0x91   :  { %1032 = vst [vmem:[%s2264_s6 + $0x178] sm:$0xff] %v968_v34  ;;  %v969_v42 = vmax.f32 %v905_v35, 0.0  ;;  %v503_v43 = vmul.f32 %v1228_v37, %v1680_v1  ;;  %v1231_v44 = vunpack.c.l.bf16 %v1406_v32  ;;  %v1359_v45 = vunpack.c.l.bf16 %v1437_v33  ;;  %v2139_v1 = vld [vmem:[%s2261_s3] ss:$0 sm:$0xff] }
  0x92   :  { %v906_v46 = vadd.f32 %v842_v38, %v572_v36  ;;  %v843_v47 = vadd.f32 %v1699_v12, %v772_v40  ;;  %v773_v4 = vmul.f32 %v2127_v48, %v1356_v41  ;;  %v1232_v6 = vunpack.c.h.bf16 %v1406_v32 }
  0x93   :  { %1033 = vst [vmem:[%s2264_s6 + $0x180] sm:$0xff] %v969_v42  ;;  %v574_v12 = vadd.f32 %v2139_v1, %v503_v43  ;;  %v504_v51 = vmul.f32 %v2145_v50, %v1231_v44  ;;  %v774_v52 = vmul.f32 %v2127_v48, %v1359_v45  ;;  %v1360_v53 = vunpack.c.h.bf16 %v1437_v33  ;;  %v1410_v44 = vld [vmem:[%s2258_s0 + $0xf0] sm:$0xff]  }
  0x94   :  { %v970_v55 = vmax.f32 %v906_v46, 0.0  ;;  %v907_v56 = vadd.f32 %v843_v47, %v573_v39  ;;  %v844_v58 = vadd.f32 %v2152_v57, %v773_v4  ;;  %v505_v59 = vmul.f32 %v2145_v50, %v1232_v6  ;;  %v1441_v6 = vld [vmem:[#allocation2 + $0xf0] sm:$0xff]  }
  0x95   :  { %v575_v60 = vadd.f32 %v2139_v1, %v504_v51  ;;  %v845_v61 = vadd.f32 %v2152_v57, %v774_v52  ;;  %v775_v62 = vmul.f32 %v2127_v48, %v1360_v53  ;;  %v1235_v63 = vunpack.c.l.bf16 %v1407_v49 }
  0x96   :  { %1034 = vst [vmem:[%s2264_s6 + $0x188] sm:$0xff] %v970_v55  ;;  %v971_v2 = vmax.f32 %v907_v56, 0.0  ;;  %v908_v3 = vadd.f32 %v844_v58, %v574_v12  ;;  %v576_v5 = vadd.f32 %v2139_v1, %v505_v59  ;;  %v1363_v7 = vunpack.c.l.bf16 %v1438_v54  ;;  %v1411_v58 = vld [vmem:[%s2258_s0 + $0xf8] sm:$0xff]  }
  0x97   :  { %v909_v8 = vadd.f32 %v845_v61, %v575_v60  ;;  %v846_v9 = vadd.f32 %v2152_v57, %v775_v62  ;;  %v506_v10 = vmul.f32 %v2145_v50, %v1235_v63  ;;  %v1236_v11 = vunpack.c.h.bf16 %v1407_v49  ;;  %v1442_v63 = vld [vmem:[#allocation2 + $0xf8] sm:$0xff]  }
  0x98   :  { %1035 = vst [vmem:[%s2264_s6 + $0x190] sm:$0xff] %v971_v2  ;;  %v972_v14 = vmax.f32 %v908_v3, 0.0  ;;  %v776_v15 = vmul.f32 %v2127_v48, %v1363_v7  ;;  %v1364_v16 = vunpack.c.h.bf16 %v1438_v54  ;;  %v1239_v17 = vunpack.c.l.bf16 %v1408_v0 }
  0x99   :  { %v973_v18 = vmax.f32 %v909_v8, 0.0  ;;  %v910_v19 = vadd.f32 %v846_v9, %v576_v5  ;;  %v577_v20 = vadd.f32 %v2139_v1, %v506_v10  ;;  %v507_v21 = vmul.f32 %v2145_v50, %v1236_v11 }
  0x9a   :  { %1036 = vst [vmem:[%s2264_s6 + $0x198] sm:$0xff] %v972_v14  ;;  %v847_v22 = vadd.f32 %v2152_v57, %v776_v15  ;;  %v777_v23 = vmul.f32 %v2127_v48, %v1364_v16  ;;  %v508_v24 = vmul.f32 %v2145_v50, %v1239_v17  ;;  %v1367_v25 = vunpack.c.l.bf16 %v1439_v13 }
  0x9b   :  { %1037 = vst [vmem:[%s2264_s6 + $0x1a0] sm:$0xff] %v973_v18  ;;  %v974_v28 = vmax.f32 %v910_v19, 0.0  ;;  %v578_v29 = vadd.f32 %v2139_v1, %v507_v21  ;;  %v1240_v30 = vunpack.c.h.bf16 %v1408_v0  ;;  %v1368_v31 = vunpack.c.h.bf16 %v1439_v13 }
  0x9c   :  { %v911_v32 = vadd.f32 %v847_v22, %v577_v20  ;;  %v848_v33 = vadd.f32 %v2152_v57, %v777_v23  ;;  %v579_v34 = vadd.f32 %v2139_v1, %v508_v24  ;;  %v778_v35 = vmul.f32 %v2127_v48, %v1367_v25 }
  0x9d   :  { %1038 = vst [vmem:[%s2264_s6 + $0x1a8] sm:$0xff] %v974_v28  ;;  %v509_v36 = vmul.f32 %v2145_v50, %v1240_v30  ;;  %v779_v37 = vmul.f32 %v2127_v48, %v1368_v31  ;;  %v1243_v38 = vunpack.c.l.bf16 %v1409_v26  ;;  %v1371_v39 = vunpack.c.l.bf16 %v1440_v27 }
  0x9e   :  { %v975_v40 = vmax.f32 %v911_v32, 0.0  ;;  %v912_v41 = vadd.f32 %v848_v33, %v578_v29  ;;  %v849_v42 = vadd.f32 %v2152_v57, %v778_v35  ;;  %v1244_v43 = vunpack.c.h.bf16 %v1409_v26 }
  0x9f   :  { %v580_v45 = vadd.f32 %v2139_v1, %v509_v36  ;;  %v850_v46 = vadd.f32 %v2152_v57, %v779_v37  ;;  %v510_v47 = vmul.f32 %v2145_v50, %v1243_v38  ;;  %v780_v4 = vmul.f32 %v2127_v48, %v1371_v39 }
  0xa0   :  { %1039 = vst [vmem:[%s2264_s6 + $0x1b0] sm:$0xff] %v975_v40  ;;  %v976_v49 = vmax.f32 %v912_v41, 0.0  ;;  %v913_v12 = vadd.f32 %v849_v42, %v579_v34  ;;  %v511_v51 = vmul.f32 %v2145_v50, %v1244_v43  ;;  %v1372_v52 = vunpack.c.h.bf16 %v1440_v27 }
  0xa1   :  { %v914_v53 = vadd.f32 %v850_v46, %v580_v45  ;;  %v581_v54 = vadd.f32 %v2139_v1, %v510_v47  ;;  %v851_v55 = vadd.f32 %v2152_v57, %v780_v4  ;;  %v1247_v56 = vunpack.c.l.bf16 %v1410_v44 }
  0xa2   :  { %1040 = vst [vmem:[%s2264_s6 + $0x1b8] sm:$0xff] %v976_v49  ;;  %v977_v59 = vmax.f32 %v913_v12, 0.0  ;;  %v582_v60 = vadd.f32 %v2139_v1, %v511_v51  ;;  %v781_v61 = vmul.f32 %v2127_v48, %v1372_v52  ;;  %v1375_v62 = vunpack.c.l.bf16 %v1441_v6 }
  0xa3   :  { %v978_v0 = vmax.f32 %v914_v53, 0.0  ;;  %v915_v2 = vadd.f32 %v851_v55, %v581_v54  ;;  %v512_v3 = vmul.f32 %v2145_v50, %v1247_v56  ;;  %v1248_v5 = vunpack.c.h.bf16 %v1410_v44 }
  0xa4   :  { %1041 = vst [vmem:[%s2264_s6 + $0x1c0] sm:$0xff] %v977_v59  ;;  %v852_v7 = vadd.f32 %v2152_v57, %v781_v61  ;;  %v782_v8 = vmul.f32 %v2127_v48, %v1375_v62  ;;  %v1376_v9 = vunpack.c.h.bf16 %v1441_v6  ;;  %v1251_v10 = vunpack.c.l.bf16 %v1411_v58 }
  0xa5   :  { %1042 = vst [vmem:[%s2264_s6 + $0x1c8] sm:$0xff] %v978_v0  ;;  %v979_v11 = vmax.f32 %v915_v2, 0.0  ;;  %v583_v13 = vadd.f32 %v2139_v1, %v512_v3  ;;  %v513_v14 = vmul.f32 %v2145_v50, %v1248_v5  ;;  %v1379_v15 = vunpack.c.l.bf16 %v1442_v63 }
  0xa6   :  { %v916_v16 = vadd.f32 %v852_v7, %v582_v60  ;;  %v853_v17 = vadd.f32 %v2152_v57, %v782_v8  ;;  %v783_v18 = vmul.f32 %v2127_v48, %v1376_v9  ;;  %v514_v19 = vmul.f32 %v2145_v50, %v1251_v10 }
  0xa7   :  { %1043 = vst [vmem:[%s2264_s6 + $0x1d0] sm:$0xff] %v979_v11  ;;  %v584_v20 = vadd.f32 %v2139_v1, %v513_v14  ;;  %v784_v21 = vmul.f32 %v2127_v48, %v1379_v15  ;;  %v1252_v22 = vunpack.c.h.bf16 %v1411_v58  ;;  %v1380_v23 = vunpack.c.h.bf16 %v1442_v63 }
  0xa8   :  { %v980_v24 = vmax.f32 %v916_v16, 0.0  ;;  %v917_v25 = vadd.f32 %v853_v17, %v583_v13  ;;  %v854_v26 = vadd.f32 %v2152_v57, %v783_v18  ;;  %v585_v27 = vadd.f32 %v2139_v1, %v514_v19 }
  0xa9   :  { %v855_v28 = vadd.f32 %v2152_v57, %v784_v21  ;;  %v515_v29 = vmul.f32 %v2145_v50, %v1252_v22  ;;  %v785_v30 = vmul.f32 %v2127_v48, %v1380_v23 }
  0xaa   :  { %1044 = vst [vmem:[%s2264_s6 + $0x1d8] sm:$0xff] %v980_v24  ;;  %v981_v31 = vmax.f32 %v917_v25, 0.0  ;;  %v918_v32 = vadd.f32 %v854_v26, %v584_v20 }
  0xab   :  { %v919_v33 = vadd.f32 %v855_v28, %v585_v27  ;;  %v586_v34 = vadd.f32 %v2139_v1, %v515_v29  ;;  %v856_v35 = vadd.f32 %v2152_v57, %v785_v30 }
  0xac   :  { %1045 = vst [vmem:[%s2264_s6 + $0x1e0] sm:$0xff] %v981_v31  ;;  %v982_v36 = vmax.f32 %v918_v32, 0.0 }
  0xad   :  { %v983_v37 = vmax.f32 %v919_v33, 0.0  ;;  %v920_v50 = vadd.f32 %v856_v35, %v586_v34 }
  0xae   :  { %1046 = vst [vmem:[%s2264_s6 + $0x1e8] sm:$0xff] %v982_v36 }
  0xaf   :  { %1047 = vst [vmem:[%s2264_s6 + $0x1f0] sm:$0xff] %v983_v37  ;;  %v984_v48 = vmax.f32 %v920_v50, 0.0 }
  0xb1   :  { %1048 = vst [vmem:[%s2264_s6 + $0x1f8] sm:$0xff] %v984_v48 }

// kernel: residual_block_pallas.3
= control target key start
LH: loop header
LB: loop body
LE: loop exit
PB: predicated region body
PF: predicated region fallthrough
CT: control target
= control target key end

     0   :  { %s8434_s15 = smov 0   ;;  %s10317_s0 = inlined_call_operand.vmem [shape: bf16[2,16,16,128], index: 0, kind: input, shape index: {}]   ;;  %s10318_s1 = inlined_call_operand.vmem [shape: bf16[9,128,256], index: 1, kind: input, shape index: {}]   ;;  %s10319_s2 = inlined_call_operand.vmem [shape: f32[1,256], index: 2, kind: input, shape index: {}]   ;;  %s10320_s3 = inlined_call_operand.vmem [shape: bf16[512,256], index: 3, kind: output, shape index: {0}]   ;;  %s10321_s4 = inlined_call_operand.vmem [shape: f32[2,2,256], index: 4, kind: output, shape index: {1}]  }
   0x1 LB: > { %s8440_s16 = sadd.s32 4294967295, %s8406_s15   ;;  %p6972_p0 = scmp.ge.s32.totalorder %s8406_s15, 1  ;;  %s8406_s15 = sphi %s8434_s15, %s15_s15  }
   0x2   : > { %p165_p1 = scmp.lt.s32.totalorder %s8406_s15, 3 }
   0x4   : > { %p166_p2 = pnand %p6972_p0, %p165_p1 }
   0x5   : > { %v8051_v0 = vld [vmem:[%s10318_s1 + $0x84] ss:$8 sps:$4 sm:$0xff] (!%p166_p2)   ;;  %v8408_v2 = vmov (!%p166_p2), 0   ;;  %v8055_v3 = vld [vmem:[%s10318_s1 + $0x80] ss:$8 sps:$4 sm:$0xff] (!%p166_p2)   ;;  %p197_p3 = scmp.lt.s32.totalorder (!%p166_p2), %s8440_s16, 1 }
   0x6   : > { %169 = sbr.rel (%p166_p2) target bundleno = 909 (0x38d), region = 32  ;;  %v8053_v1 = vld [vmem:[%s10318_s1 + $0x204] ss:$8 sps:$4 sm:$0xff] (!%p166_p2)   ;;  %1386 = vmatprep.mubr.bf16.mxu1 (!%p166_p2), %v8408_v2  ;;  %247 = vst [vmem:[#allocation2] sm:$0xf] (!%p166_p2), %v8408_v2  ;;  %3604 = vmatprep.mubr.bf16.mxu0 (!%p166_p2), %v8408_v2  ;;  %vm625_vm5 = vcmask (!%p166_p2), 1043456  }
   0x7   : > { %248 = vst [vmem:[#allocation2 + $0x4] sm:$0xf] (!%p166_p2), %v8408_v2  ;;  %249 = vst [vmem:[#allocation2 + $0x8] sm:$0x1] (!%p166_p2), %v8408_v2  ;;  %1354 = vmatprep.subr.bf16.mxu1 (!%p166_p2), %v8051_v0  ;;  %v8056_v4 = vld [vmem:[%s10318_s1 + $0x200] ss:$8 sps:$4 sm:$0xff] (!%p166_p2)   ;;  %3572 = vmatprep.subr.bf16.mxu0 (!%p166_p2), %v8053_v1 }
   0x8   : > { %250 = vst [vmem:[#allocation2 + $0xc] sm:$0xf] (!%p166_p2), %v8408_v2  ;;  %251 = vst [vmem:[#allocation2 + $0x10] sm:$0xf] (!%p166_p2), %v8408_v2  ;;  %v8057_v5 = vld [vmem:[%s10318_s1 + $0x94] ss:$8 sps:$4 sm:$0xff] (!%p166_p2)   ;;  %1355 = vmatpush1.bf16.msra.mxu1 (!%p166_p2), %v8055_v3  ;;  %3573 = vmatpush1.bf16.msra.mxu0 (!%p166_p2), %v8056_v4 }
   0x9   : > { %252 = vst [vmem:[#allocation2 + $0x14] sm:$0x1] (!%p166_p2), %v8408_v2  ;;  %253 = vst [vmem:[#allocation2 + $0x18] sm:$0xf] (!%p166_p2), %v8408_v2  ;;  %v8059_v6 = vld [vmem:[%s10318_s1 + $0x214] ss:$8 sps:$4 sm:$0xff] (!%p166_p2)   ;;  %1356 = vmatprep.subr.bf16.mxu1 (!%p166_p2), %v8057_v5 }
   0xa   : > { %254 = vst [vmem:[#allocation2 + $0x1c] sm:$0xf] (!%p166_p2), %v8408_v2  ;;  %255 = vst [vmem:[#allocation2 + $0x20] sm:$0x1] (!%p166_p2), %v8408_v2  ;;  %v8061_v7 = vld [vmem:[%s10318_s1 + $0x90] ss:$8 sps:$4 sm:$0xff] (!%p166_p2)   ;;  %3574 = vmatprep.subr.bf16.mxu0 (!%p166_p2), %v8059_v6 }
   0xb   : > { %256 = vst [vmem:[#allocation2 + $0x24] sm:$0xf] (!%p166_p2), %v8408_v2  ;;  %257 = vst [vmem:[#allocation2 + $0x28] sm:$0xf] (!%p166_p2), %v8408_v2  ;;  %v8062_v8 = vld [vmem:[%s10318_s1 + $0x210] ss:$8 sps:$4 sm:$0xff] (!%p166_p2)  }
   0xc   : > { %258 = vst [vmem:[#allocation2 + $0x2c] sm:$0x1] (!%p166_p2), %v8408_v2  ;;  %259 = vst [vmem:[#allocation2 + $0x30] sm:$0xf] (!%p166_p2), %v8408_v2  ;;  %v8063_v9 = vld [vmem:[%s10318_s1 + $0xa4] ss:$8 sps:$4 sm:$0xff] (!%p166_p2)   ;;  %1357 = vmatpush1.bf16.msra.mxu1 (!%p166_p2), %v8061_v7  ;;  %3575 = vmatpush1.bf16.msra.mxu0 (!%p166_p2), %v8062_v8 }
   0xd   : > { %260 = vst [vmem:[#allocation2 + $0x34] sm:$0xf] %v8408_v2  ;;  %261 = vst [vmem:[#allocation2 + $0x38] sm:$0x1] %v8408_v2  ;;  %v8065_v10 = vld [vmem:[%s10318_s1 + $0x224] ss:$8 sps:$4 sm:$0xff]   ;;  %1358 = vmatprep.subr.bf16.mxu1 %v8063_v9 }
   0xe   : > { %262 = vst [vmem:[#allocation2 + $0x3c] sm:$0xf] %v8408_v2  ;;  %263 = vst [vmem:[#allocation2 + $0x40] sm:$0xf] %v8408_v2  ;;  %v8067_v11 = vld [vmem:[%s10318_s1 + $0xa0] ss:$8 sps:$4 sm:$0xff]   ;;  %3576 = vmatprep.subr.bf16.mxu0 %v8065_v10 }
   0xf   : > { %264 = vst [vmem:[#allocation2 + $0x44] sm:$0x1] %v8408_v2  ;;  %265 = vst [vmem:[#allocation2 + $0x48] sm:$0xf] %v8408_v2  ;;  %v8068_v12 = vld [vmem:[%s10318_s1 + $0x220] ss:$8 sps:$4 sm:$0xff]  }
  0x10   : > { %266 = vst [vmem:[#allocation2 + $0x4c] sm:$0xf] %v8408_v2  ;;  %267 = vst [vmem:[#allocation2 + $0x50] sm:$0x1] %v8408_v2  ;;  %v8069_v13 = vld [vmem:[%s10318_s1 + $0xb4] ss:$8 sps:$4 sm:$0xff]   ;;  %1359 = vmatpush1.bf16.msra.mxu1 %v8067_v11  ;;  %3577 = vmatpush1.bf16.msra.mxu0 %v8068_v12 }
  0x11   : > { %268 = vst [vmem:[#allocation2 + $0x54] sm:$0xf] %v8408_v2  ;;  %269 = vst [vmem:[#allocation2 + $0x58] sm:$0xf] %v8408_v2  ;;  %v8071_v14 = vld [vmem:[%s10318_s1 + $0x234] ss:$8 sps:$4 sm:$0xff]   ;;  %1360 = vmatprep.subr.bf16.mxu1 %v8069_v13 }
  0x12   : > { %270 = vst [vmem:[#allocation2 + $0x5c] sm:$0x1] %v8408_v2  ;;  %271 = vst [vmem:[#allocation2 + $0x60] sm:$0xf] %v8408_v2  ;;  %v8073_v15 = vld [vmem:[%s10318_s1 + $0xb0] ss:$8 sps:$4 sm:$0xff]   ;;  %3578 = vmatprep.subr.bf16.mxu0 %v8071_v14 }
  0x13   : > { %272 = vst [vmem:[#allocation2 + $0x64] sm:$0xf] %v8408_v2  ;;  %273 = vst [vmem:[#allocation2 + $0x68] sm:$0x1] %v8408_v2  ;;  %v8074_v16 = vld [vmem:[%s10318_s1 + $0x230] ss:$8 sps:$4 sm:$0xff]  }
  0x14   : > { %274 = vst [vmem:[#allocation2 + $0x6c] sm:$0xf] %v8408_v2  ;;  %275 = vst [vmem:[#allocation2 + $0x70] sm:$0xf] %v8408_v2  ;;  %v8075_v17 = vld [vmem:[%s10318_s1 + $0xc4] ss:$8 sps:$4 sm:$0xff]   ;;  %1361 = vmatpush1.bf16.msra.mxu1 %v8073_v15  ;;  %3579 = vmatpush1.bf16.msra.mxu0 %v8074_v16 }
  0x15   : > { %276 = vst [vmem:[#allocation2 + $0x74] sm:$0x1] %v8408_v2  ;;  %277 = vst [vmem:[#allocation2 + $0x78] sm:$0xf] %v8408_v2  ;;  %v8077_v18 = vld [vmem:[%s10318_s1 + $0x244] ss:$8 sps:$4 sm:$0xff]   ;;  %1362 = vmatprep.subr.bf16.mxu1 %v8075_v17 }
  0x16   : > { %278 = vst [vmem:[#allocation2 + $0x7c] sm:$0xf] %v8408_v2  ;;  %279 = vst [vmem:[#allocation2 + $0x80] sm:$0x1] %v8408_v2  ;;  %s8556_s29 = scalar_select %p197_p3, %s8440_s16, 1  ;;  %3580 = vmatprep.subr.bf16.mxu0 %v8077_v18  ;;  %vm632_vm7 = vcmask 1040384  }
  0x17   : > { %280 = vst [vmem:[#allocation2 + $0x84] sm:$0xf] %v8408_v2  ;;  %281 = vst [vmem:[#allocation2 + $0x88] sm:$0xf] %v8408_v2  ;;  %v8079_v19 = vld [vmem:[%s10318_s1 + $0xc0] ss:$8 sps:$4 sm:$0xff]  }
  0x18   : > { %282 = vst [vmem:[#allocation2 + $0x8c] sm:$0x1] %v8408_v2  ;;  %283 = vst [vmem:[#allocation2 + $0x90] sm:$0xf] %v8408_v2  ;;  %v8080_v20 = vld [vmem:[%s10318_s1 + $0x240] ss:$8 sps:$4 sm:$0xff]   ;;  %1363 = vmatpush1.bf16.msra.mxu1 %v8079_v19 }
  0x19   : > { %284 = vst [vmem:[#allocation2 + $0x94] sm:$0xf] %v8408_v2  ;;  %285 = vst [vmem:[#allocation2 + $0x98] sm:$0x1] %v8408_v2  ;;  %v8081_v21 = vld [vmem:[%s10318_s1 + $0xd4] ss:$8 sps:$4 sm:$0xff]   ;;  %3581 = vmatpush1.bf16.msra.mxu0 %v8080_v20 }
  0x1a   : > { %286 = vst [vmem:[#allocation2 + $0x9c] sm:$0xf] %v8408_v2  ;;  %287 = vst [vmem:[#allocation2 + $0xa0] sm:$0xf] %v8408_v2  ;;  %vm806_vm0 = vsmask.f32 3328  ;;  %1364 = vmatprep.subr.bf16.mxu1 %v8081_v21 }
  0x1b   : > { %288 = vst [vmem:[#allocation2 + $0xa4] sm:$0x1] %v8408_v2  ;;  %289 = vst [vmem:[#allocation2 + $0xa8] sm:$0xf] %v8408_v2  ;;  %v8083_v22 = vld [vmem:[%s10318_s1 + $0x254] ss:$8 sps:$4 sm:$0xff]  }
  0x1c   : > { %290 = vst [vmem:[#allocation2 + $0xac] sm:$0xf] %v8408_v2  ;;  %291 = vst [vmem:[#allocation2 + $0xb0] sm:$0x1] %v8408_v2  ;;  %vm807_vm1 = vsmask.f32 7440  ;;  %3582 = vmatprep.subr.bf16.mxu0 %v8083_v22 }
  0x1d   : > { %292 = vst [vmem:[#allocation2 + $0xb4] sm:$0xf] %v8408_v2  ;;  %293 = vst [vmem:[#allocation2 + $0xb8] sm:$0xf] %v8408_v2  ;;  %s7479_s12 = sshll.u32 %s8556_s29, 7  ;;  %vm1964_vm11 = vcmask 1042432  }
  0x1e   : > { %294 = vst [vmem:[#allocation2 + $0xbc] sm:$0x1] %v8408_v2  ;;  %295 = vst [vmem:[#allocation2 + $0xc0] sm:$0xf] %v8408_v2  ;;  %vm301_vm2 = vsmask.f32 256  ;;  %s8592_s30 = scalar_lea.vmem %s10317_s0, %s7479_s12 }
  0x1f   : > { %296 = vst [vmem:[#allocation2 + $0xc4] sm:$0xf] %v8408_v2  ;;  %297 = vst [vmem:[#allocation2 + $0xc8] sm:$0x1] %v8408_v2  ;;  %vm302_vm3 = vsmask.f32 4368 }
  0x20   : > { %298 = vst [vmem:[#allocation2 + $0xcc] sm:$0xf] %v8408_v2  ;;  %299 = vst [vmem:[#allocation2 + $0xd0] sm:$0xf] %v8408_v2  ;;  %v8085_v23 = vld [vmem:[%s10318_s1 + $0xd0] ss:$8 sps:$4 sm:$0xff]  }
  0x21   : > { %300 = vst [vmem:[#allocation2 + $0xd4] sm:$0x1] %v8408_v2  ;;  %vm626_vm4 = vsmask.f32 7938  ;;  %v8086_v24 = vld [vmem:[%s10318_s1 + $0x250] ss:$8 sps:$4 sm:$0xff]   ;;  %1365 = vmatpush1.bf16.msra.mxu1 %v8085_v23  ;;  %vm8602_vm6 = vmor %vm806_vm0, %vm807_vm1 }
  0x22   : > { %v8087_v25 = vld [vmem:[%s10318_s1 + $0xe4] ss:$8 sps:$4 sm:$0xff]   ;;  %v742_v27 = vld [vmem:[#allocation2] sm:$0xf]  ;;  %v790_v31 = vld [vmem:[#allocation2 + $0x8] sm:$0x1]  ;;  %3583 = vmatpush1.bf16.msra.mxu0 %v8086_v24 }
  0x23   : > { %v8089_v26 = vld [vmem:[%s10318_s1 + $0x264] ss:$8 sps:$4 sm:$0xff]   ;;  %v8091_v29 = vld [vmem:[%s10318_s1 + $0xe0] ss:$8 sps:$4 sm:$0xff]   ;;  %v810_v32 = vshrl.u32 %v742_v27, 16  ;;  %v813_v33 = vshll.u32 %v742_v27, 16  ;;  %1366 = vmatprep.subr.bf16.mxu1 %v8087_v25  ;;  %vm8616_vm8 = vmor %vm301_vm2, %vm302_vm3 }
  0x24   : > { %v743_v28 = vld [vmem:[#allocation2 + $0x4] sm:$0xf]  ;;  %v8092_v30 = vld [vmem:[%s10318_s1 + $0x260] ss:$8 sps:$4 sm:$0xff]   ;;  %v8093_v36 = vld [vmem:[%s10318_s1 + $0xf4] ss:$8 sps:$4 sm:$0xff]   ;;  %3584 = vmatprep.subr.bf16.mxu0 %v8089_v26 }
  0x25   : > { %v819_v34 = vshll.u32 %v743_v28, 16  ;;  %v823_v35 = vshrl.u32 %v743_v28, 16  ;;  %v829_v37 = vshll.u32 %v790_v31, 16  ;;  %v8095_v38 = vld [vmem:[%s10318_s1 + $0x274] ss:$8 sps:$4 sm:$0xff]   ;;  %v812_v39 = vrot.slane %v810_v32, 4  ;;  %1367 = vmatpush1.bf16.msra.mxu1 %v8091_v29  ;;  %vm8625_vm9 = vmand %vm625_vm5, %vm626_vm4 }
  0x26   : > { %v815_v40 = vrot.slane %v813_v33, 5  ;;  %v215_v45 = vld [vmem:[%s8592_s30] sm:$0xf]  ;;  %v216_v46 = vld [vmem:[%s8592_s30 + $0x4] sm:$0xf]  ;;  %3585 = vmatpush1.bf16.msra.mxu0 %v8092_v30  ;;  %1368 = vmatprep.subr.bf16.mxu1 %v8093_v36  ;;  %vm8640_vm10 = vmand %vm632_vm7, %vm301_vm2  ;;  %vm1965_vm12 = vcmask 1046532  }
  0x27   : > { %v821_v41 = vrot.slane %v819_v34, 5  ;;  %v825_v42 = vrot.slane %v823_v35, 4  ;;  %v831_v44 = vrot.slane %v829_v37, 5  ;;  %v8097_v47 = vld [vmem:[%s10318_s1 + $0xf0] ss:$8 sps:$4 sm:$0xff]   ;;  %v305_v52 = vshrl.u32 %v215_v45, 16  ;;  %3586 = vmatprep.subr.bf16.mxu0 %v8095_v38  ;;  %vm8691_vm13 = vmor %vm1964_vm11, %vm1965_vm12 }
  0x28   : > { %v8098_v48 = vld [vmem:[%s10318_s1 + $0x270] ss:$8 sps:$4 sm:$0xff]   ;;  %v816_v49 = vor.u32 %v815_v40, %v812_v39  ;;  %v308_v53 = vshll.u32 %v215_v45, 16  ;;  %v8101_v54 = vld [vmem:[%s10318_s1 + $0x4] ss:$8 sps:$4 sm:$0xff]   ;;  %v313_v55 = vshrl.u32 %v216_v46, 16 }
  0x29   : > { %v826_v50 = vor.u32 %v825_v42, %v821_v41  ;;  %v316_v56 = vshll.u32 %v216_v46, 16  ;;  %v628_v57 = vld [vmem:[#allocation2 + $0xc] sm:$0xf]  ;;  %v307_v60 = vrot.slane %v305_v52, 7  ;;  %v217_v0 = vld [vmem:[%s8592_s30 + $0x8] sm:$0xf]  ;;  %1369 = vmatpush1.bf16.msra.mxu1 %v8097_v47 }
  0x2a   : > { %v817_v58 = vrot.slane %v816_v49, 4  ;;  %v8104_v62 = vld [vmem:[%s10318_s1 + $0x284] ss:$8 sps:$4 sm:$0xff]   ;;  %v315_v63 = vrot.slane %v313_v55, 7  ;;  %v634_v8 = vld [vmem:[#allocation2 + $0x14] sm:$0x1]  ;;  %3587 = vmatpush1.bf16.msra.mxu0 %v8098_v48  ;;  %1723 = vmatprep.subr.bf16.mxu1 %v8101_v54 }
  0x2b   : > { %v827_v59 = vrot.slane %v826_v50, 4  ;;  %v218_v1 = vld [vmem:[%s8592_s30 + $0xc] sm:$0xf]  ;;  %v310_v5 = vor.u32 %v308_v53, %v307_v60  ;;  %v311_v6 = vrot.slane %v307_v60, 4  ;;  %v8099_v10 = vld [vmem:[%s10318_s1] ss:$8 sps:$4 sm:$0xff]   ;;  %4166 = vmatprep.subr.bf16.mxu0 %v8104_v62 }
  0x2c   : > { %v822_v3 = vsel %vm8602_vm6, %v817_v58, %v821_v41  ;;  %v318_v11 = vor.u32 %v316_v56, %v315_v63  ;;  %v320_v12 = vrot.slane %v315_v63, 4  ;;  %v322_v13 = vshrl.u32 %v217_v0, 16  ;;  %v637_v18 = vld [vmem:[#allocation2 + $0x18] sm:$0xf]  ;;  %v8110_v22 = vld [vmem:[%s10318_s1 + $0x14] ss:$8 sps:$4 sm:$0xff]  }
  0x2d   : > { %v832_v4 = vsel %vm8602_vm6, %v827_v59, %v831_v44  ;;  %v629_v14 = vsel %vm8625_vm9, %v310_v5, %v628_v57  ;;  %v325_v15 = vshll.u32 %v217_v0, 16  ;;  %v330_v16 = vshrl.u32 %v218_v1, 16  ;;  %v219_v23 = vld [vmem:[%s8592_s30 + $0x10] sm:$0xf]  ;;  %v220_v25 = vld [vmem:[%s8592_s30 + $0x14] sm:$0xf] }
  0x2e   : > { %v6996_v9 = vcombine.low %v822_v3, %v832_v4  ;;  %v333_v17 = vshll.u32 %v218_v1, 16  ;;  %v319_v19 = vsel %vm8616_vm8, %v311_v6, %v318_v11  ;;  %630 = vst [vmem:[#allocation2 + $0xc] sm:$0xf] %v629_v14  ;;  %v635_v20 = vsel %vm8640_vm10, %v320_v12, %v634_v8  ;;  %v641_v30 = vld [vmem:[#allocation2 + $0x20] sm:$0x1]  ;;  %s6975_s22 = sshll.u32 %s8440_s16, 5 }
  0x2f   : > { %v324_v21 = vrot.slane %v322_v13, 7  ;;  %631 = vst [vmem:[#allocation2 + $0x10] sm:$0xf] %v319_v19  ;;  %636 = vst [vmem:[#allocation2 + $0x14] sm:$0x1] %v635_v20  ;;  %v332_v24 = vrot.slane %v330_v16, 7 }
  0x30   : > { %v339_v26 = vshrl.u32 %v219_v23, 16  ;;  %v342_v27 = vshll.u32 %v219_v23, 16  ;;  %1387 = vmatmul.mubr.bf16.vlgmr.msra.gmra.mrb[0].mxu1 %v6996_v9  ;;  %v347_v31 = vshrl.u32 %v220_v25, 16  ;;  %v350_v32 = vshll.u32 %v220_v25, 16  ;;  %v8108_v35 = vld [vmem:[%s10318_s1 + $0x10] ss:$8 sps:$4 sm:$0xff]  }
  0x31   : > { %v327_v28 = vor.u32 %v325_v15, %v324_v21  ;;  %v328_v29 = vrot.slane %v324_v21, 4  ;;  %1724 = vmatpush1.bf16.msra.mxu1 %v8099_v10  ;;  %1396 = vmatprep.mubr.bf16.mxu1 %v8408_v2  ;;  %v335_v33 = vor.u32 %v333_v17, %v332_v24  ;;  %v337_v34 = vrot.slane %v332_v24, 4  ;;  %v644_v39 = vld [vmem:[#allocation2 + $0x24] sm:$0xf]  ;;  %v8665_v40 = vld [vmem:[%s8592_s30 + $0x18] sm:$0xf] }
  0x32   : > { %v341_v36 = vrot.slane %v339_v26, 7  ;;  %1725 = vmatprep.subr.bf16.mxu1 %v8110_v22  ;;  %v349_v38 = vrot.slane %v347_v31, 7  ;;  %v648_v46 = vld [vmem:[#allocation2 + $0x2c] sm:$0x1]  ;;  %v8672_v47 = vld [vmem:[%s8592_s30 + $0x1c] sm:$0xf] }
  0x33   : > { %v638_v37 = vsel %vm8625_vm9, %v327_v28, %v637_v18  ;;  %v336_v41 = vsel %vm8616_vm8, %v328_v29, %v335_v33  ;;  %v642_v42 = vsel %vm8640_vm10, %v337_v34, %v641_v30  ;;  %v356_v50 = vshrl.u32 %v8665_v40, 16  ;;  %v8178_v61 = vld [vmem:[%s10318_s1 + $0x124] ss:$8 sps:$4 sm:$0xff]   ;;  %p203_p4 = scmp.lt.s32.totalorder %s6975_s22, 63  ;;  %s7481_s28 = sshll.u32 %s8556_s29, 2 }
  0x34   : > { %639 = vst [vmem:[#allocation2 + $0x18] sm:$0xf] %v638_v37  ;;  %v344_v44 = vor.u32 %v342_v27, %v341_v36  ;;  %v345_v45 = vrot.slane %v341_v36, 4  ;;  %640 = vst [vmem:[#allocation2 + $0x1c] sm:$0xf] %v336_v41  ;;  %v352_v48 = vor.u32 %v350_v32, %v349_v38  ;;  %v354_v49 = vrot.slane %v349_v38, 4  ;;  %s213_s6 = scalar_lea.vmem %s10321_s4, %s7481_s28 }
  0x35   : > { %643 = vst [vmem:[#allocation2 + $0x20] sm:$0x1] %v642_v42  ;;  %v359_v52 = vshll.u32 %v8665_v40, 16  ;;  %v2979_v53 = vld [vmem:[#allocation2 + $0xc] sm:$0xf]  ;;  %1726 = vmatpush1.bf16.msra.mxu1 %v8108_v35  ;;  %v364_v56 = vshrl.u32 %v8672_v47, 16 }
  0x36   : > { %v744_v54 = vld [vmem:[#allocation2 + $0xc] sm:$0xf]  ;;  %v645_v55 = vsel %vm8625_vm9, %v344_v44, %v644_v39  ;;  %v367_v57 = vshll.u32 %v8672_v47, 16  ;;  %v8680_v58 = vld [vmem:[#allocation2 + $0x10] sm:$0xf]  ;;  %v3028_v60 = vshrl.u32 %v2979_v53, 16  ;;  %v353_v63 = vsel %vm8616_vm8, %v345_v45, %v352_v48 }
  0x37   : > { %v2981_v59 = vld [vmem:[#allocation2 + $0x14] sm:$0x1]  ;;  %v3031_v62 = vshll.u32 %v2979_v53, 16  ;;  %646 = vst [vmem:[#allocation2 + $0x24] sm:$0xf] %v645_v55  ;;  %v649_v0 = vsel %vm8640_vm10, %v354_v49, %v648_v46  ;;  %v3037_v1 = vshll.u32 %v8680_v58, 16 }
  0x38   : > { %v3041_v3 = vshrl.u32 %v8680_v58, 16  ;;  %v3047_v4 = vshll.u32 %v2981_v59, 16  ;;  %v3895_v5 = vrot.slane %v8680_v58, 5  ;;  %v745_v6 = vld [vmem:[#allocation2 + $0x10] sm:$0xf]  ;;  %v3030_v8 = vrot.slane %v3028_v60, 4 }
  0x39   : > { %647 = vst [vmem:[#allocation2 + $0x28] sm:$0xf] %v353_v63  ;;  %650 = vst [vmem:[#allocation2 + $0x2c] sm:$0x1] %v649_v0  ;;  %v3033_v9 = vrot.slane %v3031_v62, 5  ;;  %v3898_v10 = vrot.slane %v2981_v59, 5 }
  0x3a   : > { %v791_v11 = vld [vmem:[#allocation2 + $0x14] sm:$0x1]  ;;  %v834_v12 = vshrl.u32 %v744_v54, 16  ;;  %v3039_v14 = vrot.slane %v3037_v1, 5  ;;  %v3043_v15 = vrot.slane %v3041_v3, 4  ;;  %v3049_v16 = vrot.slane %v3047_v4, 5 }
  0x3b   : > { %v3897_v17 = vrot.slane %v3895_v5, 4  ;;  %v3034_v18 = vor.u32 %v3033_v9, %v3030_v8  ;;  %v837_v20 = vshll.u32 %v744_v54, 16  ;;  %v843_v21 = vshll.u32 %v745_v6, 16  ;;  %v2982_v22 = vld [vmem:[#allocation2 + $0x18] sm:$0xf]  ;;  %s10333_s22 = smov (!%p203_p4, %s6975_s22), 63 }
  0x3c   : > { %v836_v19 = vrot.slane %v834_v12, 4  ;;  %v3044_v23 = vor.u32 %v3043_v15, %v3039_v14  ;;  %v847_v24 = vshrl.u32 %v745_v6, 16  ;;  %v853_v25 = vshll.u32 %v791_v11, 16  ;;  %v2983_v26 = vld [vmem:[#allocation2 + $0x1c] sm:$0xf]  ;;  %s7480_s16 = sshll.u32 %s10333_s22, 3 }
  0x3d   : > { %v8699_v27 = vsel %vm8691_vm13, %v3897_v17, %v3898_v10  ;;  %v3035_v28 = vrot.slane %v3034_v18, 4  ;;  %v839_v29 = vrot.slane %v837_v20, 5  ;;  %v845_v30 = vrot.slane %v843_v21, 5  ;;  %v2984_v35 = vld [vmem:[#allocation2 + $0x20] sm:$0x1]  ;;  %s10184_s27 = scalar_lea.vmem %s10320_s3, %s7480_s16 }
  0x3e   : > { %v3052_v31 = vshrl.u32 %v2982_v22, 16  ;;  %v3045_v32 = vrot.slane %v3044_v23, 4  ;;  %v849_v33 = vrot.slane %v847_v24, 4  ;;  %v855_v34 = vrot.slane %v853_v25, 5  ;;  %v746_v42 = vld [vmem:[#allocation2 + $0x18] sm:$0xf] }
  0x3f   : > { %v3055_v36 = vshll.u32 %v2982_v22, 16  ;;  %v3040_v37 = vsel %vm8602_vm6, %v3035_v28, %v3039_v14  ;;  %v840_v38 = vor.u32 %v839_v29, %v836_v19  ;;  %v3061_v41 = vshll.u32 %v2983_v26, 16  ;;  %v8102_v45 = vld [vmem:[%s10318_s1 + $0x280] ss:$8 sps:$4 sm:$0xff]   ;;  %v747_v53 = vld [vmem:[#allocation2 + $0x1c] sm:$0xf] }
  0x40   : > { %v3054_v39 = vrot.slane %v3052_v31, 4  ;;  %v3050_v44 = vsel %vm8602_vm6, %v3045_v32, %v3049_v16  ;;  %v850_v46 = vor.u32 %v849_v33, %v845_v30  ;;  %v3065_v49 = vshrl.u32 %v2983_v26, 16  ;;  %v8107_v62 = vld [vmem:[%s10318_s1 + $0x294] ss:$8 sps:$4 sm:$0xff]   ;;  %v8105_v3 = vld [vmem:[%s10318_s1 + $0x290] ss:$8 sps:$4 sm:$0xff]  }
  0x41   : > { %v3057_v48 = vrot.slane %v3055_v36, 5  ;;  %v7188_v54 = vcombine.low %v3040_v37, %v3050_v44  ;;  %v841_v55 = vrot.slane %v840_v38, 4  ;;  %v3063_v59 = vrot.slane %v3061_v41, 5  ;;  %v792_v4 = vld [vmem:[#allocation2 + $0x20] sm:$0x1] }
  0x42   : > { %v3071_v60 = vshll.u32 %v2984_v35, 16  ;;  %v851_v63 = vrot.slane %v850_v46, 4  ;;  %v3067_v1 = vrot.slane %v3065_v49, 4  ;;  %v858_v6 = vshrl.u32 %v746_v42, 16  ;;  %v2985_v12 = vld [vmem:[#allocation2 + $0x24] sm:$0xf] }
  0x43   : > { %v3058_v0 = vor.u32 %v3057_v48, %v3054_v39  ;;  %3605 = vmatmul.mubr.bf16.vlgmr.msra.gmra.mrb[0].mxu0 %v7188_v54  ;;  %v846_v8 = vsel %vm8602_vm6, %v841_v55, %v845_v30  ;;  %v861_v10 = vshll.u32 %v746_v42, 16  ;;  %v867_v11 = vshll.u32 %v747_v53, 16  ;;  %v8113_v14 = vld [vmem:[%s10318_s1 + $0x2a4] ss:$8 sps:$4 sm:$0xff]   ;;  %v2986_v19 = vld [vmem:[#allocation2 + $0x28] sm:$0xf] }
  0x44   : > { %v3073_v9 = vrot.slane %v3071_v60, 5  ;;  %4167 = vmatpush1.bf16.msra.mxu0 %v8102_v45  ;;  %3614 = vmatprep.mubr.bf16.mxu0 %v8408_v2  ;;  %v856_v15 = vsel %vm8602_vm6, %v851_v63, %v855_v34  ;;  %v3068_v17 = vor.u32 %v3067_v1, %v3063_v59  ;;  %v860_v18 = vrot.slane %v858_v6, 4  ;;  %v8117_v20 = vld [vmem:[%s10318_s1 + $0x20] ss:$8 sps:$4 sm:$0xff]   ;;  %v8119_v25 = vld [vmem:[%s10318_s1 + $0x24] ss:$8 sps:$4 sm:$0xff]  }
  0x45   : > { %v3059_v16 = vrot.slane %v3058_v0, 4  ;;  %v6997_v21 = vcombine.low %v846_v8, %v856_v15  ;;  %4168 = vmatprep.subr.bf16.mxu0 %v8107_v62  ;;  %v863_v22 = vrot.slane %v861_v10, 5  ;;  %v869_v23 = vrot.slane %v867_v11, 5  ;;  %v2987_v30 = vld [vmem:[#allocation2 + $0x2c] sm:$0x1]  ;;  %1727 = vmatprep.subr.bf16.mxu1 %v8119_v25 }
  0x46   : > { %v871_v24 = vshrl.u32 %v747_v53, 16  ;;  %v3069_v28 = vrot.slane %v3068_v17, 4  ;;  %v877_v29 = vshll.u32 %v792_v4, 16  ;;  %v3076_v31 = vshrl.u32 %v2985_v12, 16  ;;  %v748_v36 = vld [vmem:[#allocation2 + $0x24] sm:$0xf]  ;;  %1728 = vmatpush1.bf16.msra.mxu1 %v8117_v20 }
  0x47   : > { %v3064_v26 = vsel %vm8602_vm6, %v3059_v16, %v3063_v59  ;;  %1397 = vmatmul.mubr.bf16.gmra.mrb[4].mxu1 %v6997_v21  ;;  %v864_v32 = vor.u32 %v863_v22, %v860_v18  ;;  %v3079_v34 = vshll.u32 %v2985_v12, 16  ;;  %v3085_v35 = vshll.u32 %v2986_v19, 16  ;;  %v8111_v42 = vld [vmem:[%s10318_s1 + $0x2a0] ss:$8 sps:$4 sm:$0xff]   ;;  %v8116_v53 = vld [vmem:[%s10318_s1 + $0x2b4] ss:$8 sps:$4 sm:$0xff]  }
  0x48   : > { %v873_v33 = vrot.slane %v871_v24, 4  ;;  %v3074_v37 = vsel %vm8602_vm6, %v3069_v28, %v3073_v9  ;;  %4169 = vmatpush1.bf16.msra.mxu0 %v8105_v3  ;;  %1406 = vmatprep.mubr.bf16.mxu1 %v8408_v2  ;;  %v879_v38 = vrot.slane %v877_v29, 5  ;;  %v3078_v39 = vrot.slane %v3076_v31, 4  ;;  %v749_v49 = vld [vmem:[#allocation2 + $0x28] sm:$0xf] }
  0x49   : > { %v3089_v41 = vshrl.u32 %v2986_v19, 16  ;;  %v7189_v44 = vcombine.low %v3064_v26, %v3074_v37  ;;  %v865_v45 = vrot.slane %v864_v32, 4  ;;  %v3081_v48 = vrot.slane %v3079_v34, 5  ;;  %4170 = vmatprep.subr.bf16.mxu0 %v8113_v14  ;;  %v793_v1 = vld [vmem:[#allocation2 + $0x2c] sm:$0x1] }
  0x4a   : > { %v874_v46 = vor.u32 %v873_v33, %v869_v23  ;;  %v3087_v54 = vrot.slane %v3085_v35, 5  ;;  %v3095_v59 = vshll.u32 %v2987_v30, 16  ;;  %v882_v60 = vshrl.u32 %v748_v36, 16  ;;  %v8114_v4 = vld [vmem:[%s10318_s1 + $0x2b0] ss:$8 sps:$4 sm:$0xff]  }
  0x4b   : > { %v3091_v55 = vrot.slane %v3089_v41, 4  ;;  %3615 = vmatmul.mubr.bf16.gmra.mrb[4].mxu0 %v7189_v44  ;;  %v870_v62 = vsel %vm8602_vm6, %v865_v45, %v869_v23  ;;  %v3082_v0 = vor.u32 %v3081_v48, %v3078_v39  ;;  %v885_v3 = vshll.u32 %v748_v36, 16  ;;  %v223_v11 = vld [vmem:[%s8592_s30 + $0x20] sm:$0xf]  ;;  %v8122_v17 = vld [vmem:[%s10318_s1 + $0x2c4] ss:$8 sps:$4 sm:$0xff]  }
  0x4c   : > { %v875_v63 = vrot.slane %v874_v46, 4  ;;  %3624 = vmatprep.mubr.bf16.mxu0 %v8408_v2  ;;  %v3097_v8 = vrot.slane %v3095_v59, 5  ;;  %4171 = vmatpush1.bf16.msra.mxu0 %v8111_v42  ;;  %v884_v9 = vrot.slane %v882_v60, 4  ;;  %v891_v10 = vshll.u32 %v749_v49, 16  ;;  %v651_v22 = vld [vmem:[#allocation2 + $0x30] sm:$0xf] }
  0x4d   : > { %v3092_v6 = vor.u32 %v3091_v55, %v3087_v54  ;;  %v3083_v14 = vrot.slane %v3082_v0, 4  ;;  %v887_v15 = vrot.slane %v885_v3, 5  ;;  %v895_v16 = vshrl.u32 %v749_v49, 16  ;;  %4172 = vmatprep.subr.bf16.mxu0 %v8116_v53  ;;  %v655_v28 = vld [vmem:[#allocation2 + $0x38] sm:$0x1] }
  0x4e   : > { %v880_v12 = vsel %vm8602_vm6, %v875_v63, %v879_v38  ;;  %v893_v20 = vrot.slane %v891_v10, 5  ;;  %v901_v21 = vshll.u32 %v793_v1, 16  ;;  %v358_v26 = vrot.slane %v356_v50, 7  ;;  %v8120_v29 = vld [vmem:[%s10318_s1 + $0x2c0] ss:$8 sps:$4 sm:$0xff]  }
  0x4f   : > { %v6998_v18 = vcombine.low %v870_v62, %v880_v12  ;;  %v3093_v19 = vrot.slane %v3092_v6, 4  ;;  %v3088_v23 = vsel %vm8602_vm6, %v3083_v14, %v3087_v54  ;;  %v888_v24 = vor.u32 %v887_v15, %v884_v9  ;;  %v8126_v30 = vld [vmem:[%s10318_s1 + $0x30] ss:$8 sps:$4 sm:$0xff]   ;;  %v8128_v34 = vld [vmem:[%s10318_s1 + $0x34] ss:$8 sps:$4 sm:$0xff]  }
  0x50   : > { %v897_v25 = vrot.slane %v895_v16, 4  ;;  %v903_v32 = vrot.slane %v901_v21, 5  ;;  %v366_v33 = vrot.slane %v364_v56, 7  ;;  %4173 = vmatpush1.bf16.msra.mxu0 %v8114_v4  ;;  %v373_v50 = vshrl.u32 %v223_v11, 16  ;;  %v224_v39 = vld [vmem:[%s8592_s30 + $0x24] sm:$0xf]  ;;  %1729 = vmatprep.subr.bf16.mxu1 %v8128_v34 }
  0x51   : > { %1407 = vmatmul.mubr.bf16.gmra.mrb[8].mxu1 %v6998_v18  ;;  %v3098_v31 = vsel %vm8602_vm6, %v3093_v19, %v3097_v8  ;;  %v889_v36 = vrot.slane %v888_v24, 4  ;;  %v361_v38 = vor.u32 %v359_v52, %v358_v26  ;;  %4174 = vmatprep.subr.bf16.mxu0 %v8122_v17  ;;  %v8125_v56 = vld [vmem:[%s10318_s1 + $0x2d4] ss:$8 sps:$4 sm:$0xff]   ;;  %v362_v41 = vrot.slane %v358_v26, 4  ;;  %v225_v46 = vld [vmem:[%s8592_s30 + $0x28] sm:$0xf] }
  0x52   : > { %v7190_v35 = vcombine.low %v3088_v23, %v3098_v31  ;;  %1416 = vmatprep.mubr.bf16.mxu1 %v8408_v2  ;;  %v898_v37 = vor.u32 %v897_v25, %v893_v20  ;;  %v369_v42 = vor.u32 %v367_v57, %v366_v33  ;;  %v371_v44 = vrot.slane %v366_v33, 4  ;;  %v658_v53 = vld [vmem:[#allocation2 + $0x3c] sm:$0xf]  ;;  %v226_v54 = vld [vmem:[%s8592_s30 + $0x2c] sm:$0xf]  ;;  %1730 = vmatpush1.bf16.msra.mxu1 %v8126_v30 }
  0x53   : > { %v375_v45 = vrot.slane %v373_v50, 7  ;;  %v894_v40 = vsel %vm8602_vm6, %v889_v36, %v893_v20  ;;  %v652_v48 = vsel %vm8625_vm9, %v361_v38, %v651_v22  ;;  %v376_v49 = vshll.u32 %v223_v11, 16  ;;  %v8123_v60 = vld [vmem:[%s10318_s1 + $0x2d0] ss:$8 sps:$4 sm:$0xff]   ;;  %v662_v3 = vld [vmem:[#allocation2 + $0x44] sm:$0x1] }
  0x54   : > { %3625 = vmatmul.mubr.bf16.gmra.mrb[8].mxu0 %v7190_v35  ;;  %v899_v52 = vrot.slane %v898_v37, 4  ;;  %v370_v47 = vsel %vm8616_vm8, %v362_v41, %v369_v42  ;;  %653 = vst [vmem:[#allocation2 + $0x30] sm:$0xf] %v652_v48  ;;  %v656_v57 = vsel %vm8640_vm10, %v371_v44, %v655_v28  ;;  %v381_v59 = vshrl.u32 %v224_v39, 16  ;;  %v227_v62 = vld [vmem:[%s8592_s30 + $0x30] sm:$0xf] }
  0x55   : > { %3634 = vmatprep.mubr.bf16.mxu0 %v8408_v2  ;;  %v379_v55 = vrot.slane %v375_v45, 4  ;;  %4175 = vmatpush1.bf16.msra.mxu0 %v8120_v29  ;;  %654 = vst [vmem:[#allocation2 + $0x34] sm:$0xf] %v370_v47  ;;  %657 = vst [vmem:[#allocation2 + $0x38] sm:$0x1] %v656_v57  ;;  %v378_v0 = vor.u32 %v376_v49, %v375_v45  ;;  %v384_v1 = vshll.u32 %v224_v39, 16 }
  0x56   : > { %v904_v63 = vsel %vm8602_vm6, %v899_v52, %v903_v32  ;;  %v390_v4 = vshrl.u32 %v225_v46, 16  ;;  %4176 = vmatprep.subr.bf16.mxu0 %v8125_v56  ;;  %v8131_v6 = vld [vmem:[%s10318_s1 + $0x2e4] ss:$8 sps:$4 sm:$0xff]   ;;  %v383_v9 = vrot.slane %v381_v59, 7  ;;  %v393_v10 = vshll.u32 %v225_v46, 16 }
  0x57   : > { %v6999_v8 = vcombine.low %v894_v40, %v904_v63  ;;  %v398_v11 = vshrl.u32 %v226_v54, 16  ;;  %v665_v12 = vld [vmem:[#allocation2 + $0x48] sm:$0xf]  ;;  %v8798_v14 = vld [vmem:[%s8592_s30 + $0x34] sm:$0xf]  ;;  %v659_v15 = vsel %vm8625_vm9, %v378_v0, %v658_v53  ;;  %v401_v17 = vshll.u32 %v226_v54, 16 }
  0x58   : > { %v392_v16 = vrot.slane %v390_v4, 7  ;;  %v669_v18 = vld [vmem:[#allocation2 + $0x50] sm:$0x1]  ;;  %v407_v19 = vshrl.u32 %v227_v62, 16  ;;  %v8129_v20 = vld [vmem:[%s10318_s1 + $0x2e0] ss:$8 sps:$4 sm:$0xff]   ;;  %v386_v21 = vor.u32 %v384_v1, %v383_v9 }
  0x59   : > { %1417 = vmatmul.mubr.bf16.gmra.mrb[12].mxu1 %v6999_v8  ;;  %v388_v22 = vrot.slane %v383_v9, 4  ;;  %660 = vst [vmem:[#allocation2 + $0x3c] sm:$0xf] %v659_v15  ;;  %v400_v23 = vrot.slane %v398_v11, 7  ;;  %4177 = vmatpush1.bf16.msra.mxu0 %v8123_v60  ;;  %v410_v24 = vshll.u32 %v227_v62, 16  ;;  %v415_v30 = vshrl.u32 %v8798_v14, 16 }
  0x5a   : > { %v8134_v25 = vld [vmem:[%s10318_s1 + $0x2f4] ss:$8 sps:$4 sm:$0xff]   ;;  %1426 = vmatprep.mubr.bf16.mxu1 %v8408_v2  ;;  %v395_v26 = vor.u32 %v393_v10, %v392_v16  ;;  %v396_v28 = vrot.slane %v392_v16, 4  ;;  %v8809_v29 = vrot.slane %v407_v19, 7  ;;  %4178 = vmatprep.subr.bf16.mxu0 %v8131_v6  ;;  %v8135_v31 = vld [vmem:[%s10318_s1 + $0x40] ss:$8 sps:$4 sm:$0xff]   ;;  %v387_v32 = vsel %vm8616_vm8, %v379_v55, %v386_v21 }
  0x5b   : > { %v663_v33 = vsel %vm8640_vm10, %v388_v22, %v662_v3  ;;  %v403_v50 = vor.u32 %v401_v17, %v400_v23  ;;  %v405_v34 = vrot.slane %v400_v23, 4  ;;  %v8132_v35 = vld [vmem:[%s10318_s1 + $0x2f0] ss:$8 sps:$4 sm:$0xff]   ;;  %v8137_v36 = vld [vmem:[%s10318_s1 + $0x44] ss:$8 sps:$4 sm:$0xff]   ;;  %v8829_v42 = vrot.slane %v415_v30, 7 }
  0x5c   : > { %v2988_v37 = vld [vmem:[#allocation2 + $0x30] sm:$0xf]  ;;  %661 = vst [vmem:[#allocation2 + $0x40] sm:$0xf] %v387_v32  ;;  %664 = vst [vmem:[#allocation2 + $0x44] sm:$0x1] %v663_v33  ;;  %v666_v39 = vsel %vm8625_vm9, %v395_v26, %v665_v12  ;;  %v412_v56 = vor.u32 %v410_v24, %v8809_v29  ;;  %1731 = vmatprep.subr.bf16.mxu1 %v8137_v36 }
  0x5d   : > { %v750_v38 = vld [vmem:[#allocation2 + $0x30] sm:$0xf]  ;;  %v413_v41 = vrot.slane %v8809_v29, 4  ;;  %v8831_v44 = vld [vmem:[#allocation2 + $0x34] sm:$0xf]  ;;  %v3100_v46 = vshrl.u32 %v2988_v37, 16  ;;  %v404_v52 = vsel %vm8616_vm8, %v396_v28, %v403_v50  ;;  %v670_v48 = vsel %vm8640_vm10, %v405_v34, %v669_v18  ;;  %4179 = vmatpush1.bf16.msra.mxu0 %v8129_v20  ;;  %1732 = vmatpush1.bf16.msra.mxu1 %v8135_v31 }
  0x5e   : > { %v8833_v45 = vld [vmem:[#allocation2 + $0x38] sm:$0x1]  ;;  %v3103_v40 = vshll.u32 %v2988_v37, 16  ;;  %667 = vst [vmem:[#allocation2 + $0x48] sm:$0xf] %v666_v39  ;;  %v3109_v49 = vshll.u32 %v8831_v44, 16  ;;  %4180 = vmatprep.subr.bf16.mxu0 %v8134_v25 }
  0x5f   : > { %v3113_v53 = vshrl.u32 %v8831_v44, 16  ;;  %v3119_v54 = vshll.u32 %v8833_v45, 16  ;;  %v751_v47 = vld [vmem:[#allocation2 + $0x34] sm:$0xf]  ;;  %v906_v57 = vshrl.u32 %v750_v38, 16  ;;  %v3102_v59 = vrot.slane %v3100_v46, 4 }
  0x60   : > { %668 = vst [vmem:[#allocation2 + $0x4c] sm:$0xf] %v404_v52  ;;  %671 = vst [vmem:[#allocation2 + $0x50] sm:$0x1] %v670_v48  ;;  %v672_v55 = vld [vmem:[#allocation2 + $0x54] sm:$0xf] }
  0x61   : > { %v3105_v60 = vrot.slane %v3103_v40, 5  ;;  %v794_v62 = vld [vmem:[#allocation2 + $0x38] sm:$0x1]  ;;  %v909_v63 = vshll.u32 %v750_v38, 16  ;;  %v915_v0 = vshll.u32 %v751_v47, 16  ;;  %v3111_v1 = vrot.slane %v3109_v49, 5  ;;  %4181 = vmatpush1.bf16.msra.mxu0 %v8132_v35 }
  0x62   : > { %v3115_v3 = vrot.slane %v3113_v53, 4  ;;  %v3121_v4 = vrot.slane %v3119_v54, 5  ;;  %v908_v6 = vrot.slane %v906_v57, 4  ;;  %v2991_v8 = vld [vmem:[#allocation2 + $0x3c] sm:$0xf]  ;;  %v919_v12 = vshrl.u32 %v751_v47, 16 }
  0x63   : > { %v3106_v9 = vor.u32 %v3105_v60, %v3102_v59  ;;  %v911_v10 = vrot.slane %v909_v63, 5  ;;  %v917_v11 = vrot.slane %v915_v0, 5  ;;  %v925_v16 = vshll.u32 %v794_v62, 16  ;;  %v8842_v22 = vld [vmem:[#allocation2 + $0x40] sm:$0xf] }
  0x64   : > { %v3116_v15 = vor.u32 %v3115_v3, %v3111_v1  ;;  %v3124_v17 = vshrl.u32 %v2991_v8, 16  ;;  %v3127_v18 = vshll.u32 %v2991_v8, 16  ;;  %v921_v21 = vrot.slane %v919_v12, 4  ;;  %v8844_v23 = vld [vmem:[#allocation2 + $0x44] sm:$0x1] }
  0x65   : > { %v3107_v19 = vrot.slane %v3106_v9, 4  ;;  %v912_v20 = vor.u32 %v911_v10, %v908_v6  ;;  %v673_v24 = vsel %vm8625_vm9, %v412_v56, %v672_v55  ;;  %v927_v26 = vrot.slane %v925_v16, 5  ;;  %v752_v34 = vld [vmem:[#allocation2 + $0x3c] sm:$0xf]  ;;  %v753_v39 = vld [vmem:[#allocation2 + $0x40] sm:$0xf] }
  0x66   : > { %v3117_v25 = vrot.slane %v3116_v15, 4  ;;  %v3126_v28 = vrot.slane %v3124_v17, 4  ;;  %v3129_v30 = vrot.slane %v3127_v18, 5  ;;  %674 = vst [vmem:[#allocation2 + $0x54] sm:$0xf] %v673_v24  ;;  %v922_v33 = vor.u32 %v921_v21, %v917_v11 }
  0x67   : > { %v3112_v31 = vsel %vm8602_vm6, %v3107_v19, %v3111_v1  ;;  %v913_v32 = vrot.slane %v912_v20, 4  ;;  %v3133_v50 = vshll.u32 %v8842_v22, 16  ;;  %v3137_v37 = vshrl.u32 %v8842_v22, 16  ;;  %v795_v48 = vld [vmem:[#allocation2 + $0x44] sm:$0x1] }
  0x68   : > { %v3122_v35 = vsel %vm8602_vm6, %v3117_v25, %v3121_v4  ;;  %v3130_v36 = vor.u32 %v3129_v30, %v3126_v28  ;;  %v3143_v38 = vshll.u32 %v8844_v23, 16  ;;  %v923_v40 = vrot.slane %v922_v33, 4  ;;  %v2994_v49 = vld [vmem:[#allocation2 + $0x48] sm:$0xf]  ;;  %v8857_v55 = vld [vmem:[#allocation2 + $0x4c] sm:$0xf] }
  0x69   : > { %v7191_v56 = vcombine.low %v3112_v31, %v3122_v35  ;;  %v918_v46 = vsel %vm8602_vm6, %v913_v32, %v917_v11  ;;  %v3135_v52 = vrot.slane %v3133_v50, 5  ;;  %v3139_v54 = vrot.slane %v3137_v37, 4  ;;  %v8140_v0 = vld [vmem:[%s10318_s1 + $0x304] ss:$8 sps:$4 sm:$0xff]   ;;  %v8869_v21 = vld [vmem:[#allocation2 + $0x50] sm:$0x1] }
  0x6a   : > { %v3131_v53 = vrot.slane %v3130_v36, 4  ;;  %v3145_v47 = vrot.slane %v3143_v38, 5  ;;  %v930_v57 = vshrl.u32 %v752_v34, 16  ;;  %v928_v59 = vsel %vm8602_vm6, %v923_v40, %v927_v26  ;;  %4649 = vmatprep.subr.bf16.mxu0 %v8140_v0  ;;  %v754_v25 = vld [vmem:[#allocation2 + $0x48] sm:$0xf] }
  0x6b   : > { %3635 = vmatmul.mubr.bf16.gmra.mrb[12].mxu0 %v7191_v56  ;;  %v933_v60 = vshll.u32 %v752_v34, 16  ;;  %v939_v62 = vshll.u32 %v753_v39, 16  ;;  %v943_v63 = vshrl.u32 %v753_v39, 16  ;;  %v7000_v1 = vcombine.low %v918_v46, %v928_v59  ;;  %v755_v32 = vld [vmem:[#allocation2 + $0x4c] sm:$0xf] }
  0x6c   : > { %3644 = vmatprep.mubr.bf16.mxu0 %v8408_v2  ;;  %v3136_v3 = vsel %vm8602_vm6, %v3131_v53, %v3135_v52  ;;  %v3140_v4 = vor.u32 %v3139_v54, %v3135_v52  ;;  %v932_v6 = vrot.slane %v930_v57, 4  ;;  %v949_v11 = vshll.u32 %v795_v48, 16  ;;  %v796_v52 = vld [vmem:[#allocation2 + $0x50] sm:$0x1] }
  0x6d   : > { %v935_v8 = vrot.slane %v933_v60, 5  ;;  %v941_v9 = vrot.slane %v939_v62, 5  ;;  %v945_v10 = vrot.slane %v943_v63, 4  ;;  %1427 = vmatmul.mubr.bf16.gmra.mrb[16].mxu1 %v7000_v1  ;;  %v3148_v15 = vshrl.u32 %v2994_v49, 16  ;;  %v2997_v53 = vld [vmem:[#allocation2 + $0x54] sm:$0xf] }
  0x6e   : > { %v3141_v12 = vrot.slane %v3140_v4, 4  ;;  %v3151_v16 = vshll.u32 %v2994_v49, 16  ;;  %v3157_v17 = vshll.u32 %v8857_v55, 16  ;;  %1436 = vmatprep.mubr.bf16.mxu1 %v8408_v2  ;;  %v951_v20 = vrot.slane %v949_v11, 5  ;;  %v676_v49 = vld [vmem:[#allocation2 + $0x5c] sm:$0x1] }
  0x6f   : > { %v936_v18 = vor.u32 %v935_v8, %v932_v6  ;;  %v946_v19 = vor.u32 %v945_v10, %v941_v9  ;;  %v3161_v24 = vshrl.u32 %v8857_v55, 16  ;;  %v3150_v28 = vrot.slane %v3148_v15, 4  ;;  %v8141_v60 = vld [vmem:[%s10318_s1 + $0x50] ss:$8 sps:$4 sm:$0xff]  }
  0x70   : > { %v3146_v26 = vsel %vm8602_vm6, %v3141_v12, %v3145_v47  ;;  %v3153_v30 = vrot.slane %v3151_v16, 5  ;;  %v3159_v31 = vrot.slane %v3157_v17, 5  ;;  %v3167_v37 = vshll.u32 %v8869_v21, 16  ;;  %v756_v16 = vld [vmem:[#allocation2 + $0x54] sm:$0xf] }
  0x71   : > { %v7192_v33 = vcombine.low %v3136_v3, %v3146_v26  ;;  %v937_v50 = vrot.slane %v936_v18, 4  ;;  %v947_v34 = vrot.slane %v946_v19, 4  ;;  %v3163_v35 = vrot.slane %v3161_v24, 4  ;;  %v8143_v3 = vld [vmem:[%s10318_s1 + $0x54] ss:$8 sps:$4 sm:$0xff]  }
  0x72   : > { %v3154_v36 = vor.u32 %v3153_v30, %v3150_v28  ;;  %v954_v38 = vshrl.u32 %v754_v25, 16  ;;  %v957_v39 = vshll.u32 %v754_v25, 16  ;;  %v963_v48 = vshll.u32 %v755_v32, 16  ;;  %v229_v17 = vld [vmem:[%s8592_s30 + $0x38] sm:$0xf]  ;;  %1733 = vmatprep.subr.bf16.mxu1 %v8143_v3 }
  0x73   : > { %3645 = vmatmul.mubr.bf16.gmra.mrb[16].mxu0 %v7192_v33  ;;  %v942_v56 = vsel %vm8602_vm6, %v937_v50, %v941_v9  ;;  %v952_v46 = vsel %vm8602_vm6, %v947_v34, %v951_v20  ;;  %v3164_v40 = vor.u32 %v3163_v35, %v3159_v31  ;;  %v3169_v57 = vrot.slane %v3167_v37, 5  ;;  %1734 = vmatpush1.bf16.msra.mxu1 %v8141_v60  ;;  %v230_v30 = vld [vmem:[%s8592_s30 + $0x3c] sm:$0xf] }
  0x74   : > { %3654 = vmatprep.mubr.bf16.mxu0 %v8408_v2  ;;  %v7001_v54 = vcombine.low %v942_v56, %v952_v46  ;;  %v3155_v47 = vrot.slane %v3154_v36, 4  ;;  %v956_v59 = vrot.slane %v954_v38, 4  ;;  %v959_v63 = vrot.slane %v957_v39, 5  ;;  %v231_v56 = vld [vmem:[%s8592_s30 + $0x40] sm:$0xf] }
  0x75   : > { %v3165_v62 = vrot.slane %v3164_v40, 4  ;;  %v965_v0 = vrot.slane %v963_v48, 5  ;;  %v967_v1 = vshrl.u32 %v755_v32, 16  ;;  %v973_v6 = vshll.u32 %v796_v52, 16  ;;  %v679_v48 = vld [vmem:[#allocation2 + $0x60] sm:$0xf] }
  0x76   : > { %1437 = vmatmul.mubr.bf16.gmra.mrb[20].mxu1 %v7001_v54  ;;  %v3160_v4 = vsel %vm8602_vm6, %v3155_v47, %v3159_v31  ;;  %v418_v8 = vshll.u32 %v8798_v14, 16  ;;  %v422_v9 = vrot.slane %v8829_v42, 4  ;;  %v960_v11 = vor.u32 %v959_v63, %v956_v59  ;;  %v8147_v59 = vld [vmem:[%s10318_s1 + $0x60] ss:$8 sps:$4 sm:$0xff]  }
  0x77   : > { %v3170_v10 = vsel %vm8602_vm6, %v3165_v62, %v3169_v57  ;;  %1446 = vmatprep.mubr.bf16.mxu1 %v8408_v2  ;;  %v969_v12 = vrot.slane %v967_v1, 4  ;;  %v3172_v15 = vshrl.u32 %v2997_v53, 16  ;;  %v975_v19 = vrot.slane %v973_v6, 5  ;;  %v232_v57 = vld [vmem:[%s8592_s30 + $0x44] sm:$0xf] }
  0x78   : > { %v7193_v18 = vcombine.low %v3160_v4, %v3170_v10  ;;  %v420_v20 = vor.u32 %v418_v8, %v8829_v42  ;;  %v677_v14 = vsel %vm8640_vm10, %v422_v9, %v676_v49  ;;  %v961_v24 = vrot.slane %v960_v11, 4  ;;  %v3829_v42 = vld [vmem:[#allocation2 + $0xc] sm:$0xe] }
  0x79   : > { %v970_v25 = vor.u32 %v969_v12, %v965_v0  ;;  %678 = vst [vmem:[#allocation2 + $0x5c] sm:$0x1] %v677_v14  ;;  %v3174_v26 = vrot.slane %v3172_v15, 4  ;;  %v3175_v28 = vshll.u32 %v2997_v53, 16  ;;  %v978_v32 = vshrl.u32 %v756_v16, 16 }
  0x7a   : > { %v421_v31 = vsel %vm8616_vm8, %v413_v41, %v420_v20  ;;  %v981_v33 = vshll.u32 %v756_v16, 16  ;;  %v424_v50 = vshrl.u32 %v229_v17, 16  ;;  %v966_v34 = vsel %vm8602_vm6, %v961_v24, %v965_v0  ;;  %v8149_v1 = vld [vmem:[%s10318_s1 + $0x64] ss:$8 sps:$4 sm:$0xff]   ;;  %v683_v12 = vld [vmem:[#allocation2 + $0x68] sm:$0x1] }
  0x7b   : > { %3655 = vmatmul.mubr.bf16.gmra.mrb[20].mxu0 %v7193_v18  ;;  %v971_v35 = vrot.slane %v970_v25, 4  ;;  %675 = vst [vmem:[#allocation2 + $0x58] sm:$0xf] %v421_v31  ;;  %v3177_v36 = vrot.slane %v3175_v28, 5  ;;  %v427_v37 = vshll.u32 %v229_v17, 16  ;;  %v980_v29 = vrot.slane %v978_v32, 4  ;;  %1735 = vmatprep.subr.bf16.mxu1 %v8149_v1 }
  0x7c   : > { %3664 = vmatprep.mubr.bf16.mxu0 %v8408_v2  ;;  %v983_v38 = vrot.slane %v981_v33, 5  ;;  %v426_v39 = vrot.slane %v424_v50, 7  ;;  %v432_v41 = vshrl.u32 %v230_v30, 16  ;;  %v435_v52 = vshll.u32 %v230_v30, 16  ;;  %1736 = vmatpush1.bf16.msra.mxu1 %v8147_v59  ;;  %v686_v32 = vld [vmem:[#allocation2 + $0x6c] sm:$0xf] }
  0x7d   : > { %v976_v46 = vsel %vm8602_vm6, %v971_v35, %v975_v19  ;;  %v3178_v40 = vor.u32 %v3177_v36, %v3174_v26  ;;  %v7220_v49 = vrot.slane %v3829_v42, 9  ;;  %v441_v0 = vshrl.u32 %v231_v56, 16 }
  0x7e   : > { %v7002_v53 = vcombine.low %v966_v34, %v976_v46  ;;  %v984_v54 = vor.u32 %v983_v38, %v980_v29  ;;  %v429_v47 = vor.u32 %v427_v37, %v426_v39  ;;  %v430_v60 = vrot.slane %v426_v39, 4  ;;  %v690_v46 = vld [vmem:[#allocation2 + $0x74] sm:$0x1] }
  0x7f   : > { %v434_v62 = vrot.slane %v432_v41, 7  ;;  %v8916_v63 = vsel %vm8691_vm13, %v7220_v49, %v3895_v5  ;;  %v8923_v4 = vrot.slane %v3178_v40, 4  ;;  %v444_v15 = vshll.u32 %v231_v56, 16 }
  0x80   : > { %1447 = vmatmul.mubr.bf16.gmra.mrb[24].mxu1 %v7002_v53  ;;  %v8921_v3 = vld [vmem:[#allocation2 + $0x5c] sm:$0x1]  ;;  %v8925_v8 = vrot.slane %v984_v54, 4  ;;  %v680_v58 = vsel %vm8625_vm9, %v429_v47, %v679_v48  ;;  %v7252_v5 = vcombine.low %v8916_v63, %v8699_v27  ;;  %v443_v18 = vrot.slane %v441_v0, 7 }
  0x81   : > { %v797_v6 = vld [vmem:[#allocation2 + $0x5c] sm:$0x1]  ;;  %v3191_v9 = vshll.u32 %v8921_v3, 16  ;;  %1456 = vmatprep.mubr.bf16.mxu1 %v8408_v2  ;;  %v437_v10 = vor.u32 %v435_v52, %v434_v62  ;;  %v439_v11 = vrot.slane %v434_v62, 4  ;;  %681 = vst [vmem:[#allocation2 + $0x60] sm:$0xf] %v680_v58 }
  0x82   : > { %v8933_v16 = vld [vmem:[#allocation2 + $0x58] sm:$0xf]  ;;  %v449_v19 = vshrl.u32 %v232_v57, 16  ;;  %v997_v25 = vshll.u32 %v797_v6, 16  ;;  %v446_v34 = vor.u32 %v444_v15, %v443_v18  ;;  %v447_v36 = vrot.slane %v443_v18, 4 }
  0x83   : > { %v757_v17 = vld [vmem:[#allocation2 + $0x58] sm:$0xf]  ;;  %v3181_v20 = vshll.u32 %v8933_v16, 16  ;;  %v3185_v14 = vshrl.u32 %v8933_v16, 16  ;;  %v3193_v26 = vrot.slane %v3191_v9, 5  ;;  %v438_v30 = vsel %vm8616_vm8, %v430_v60, %v437_v10 }
  0x84   : > { %v987_v24 = vshll.u32 %v757_v17, 16  ;;  %v991_v28 = vshrl.u32 %v757_v17, 16  ;;  %v684_v31 = vsel %vm8640_vm10, %v439_v11, %v683_v12  ;;  %682 = vst [vmem:[#allocation2 + $0x64] sm:$0xf] %v438_v30  ;;  %v451_v37 = vrot.slane %v449_v19, 7 }
  0x85   : > { %v3183_v33 = vrot.slane %v3181_v20, 5  ;;  %v3187_v50 = vrot.slane %v3185_v14, 4  ;;  %685 = vst [vmem:[#allocation2 + $0x68] sm:$0x1] %v684_v31  ;;  %v452_v29 = vshll.u32 %v232_v57, 16  ;;  %v999_v41 = vrot.slane %v997_v25, 5 }
  0x86   : > { %v989_v42 = vrot.slane %v987_v24, 5  ;;  %v993_v35 = vrot.slane %v991_v28, 4  ;;  %v687_v56 = vsel %vm8625_vm9, %v446_v34, %v686_v32  ;;  %v456_v54 = vrot.slane %v451_v37, 4  ;;  %v8955_v10 = vld [vmem:[#allocation2 + $0x18] sm:$0xe] }
  0x87   : > { %v3184_v38 = vsel %vm8602_vm6, %v8923_v4, %v3183_v33  ;;  %v3188_v39 = vor.u32 %v3187_v50, %v3183_v33  ;;  %v454_v53 = vor.u32 %v452_v29, %v451_v37  ;;  %688 = vst [vmem:[#allocation2 + $0x6c] sm:$0xf] %v687_v56  ;;  %v8153_v11 = vld [vmem:[%s10318_s1 + $0x70] ss:$8 sps:$4 sm:$0xff]   ;;  %v8155_v28 = vld [vmem:[%s10318_s1 + $0x74] ss:$8 sps:$4 sm:$0xff]  }
  0x88   : > { %v990_v40 = vsel %vm8602_vm6, %v8925_v8, %v989_v42  ;;  %v994_v52 = vor.u32 %v993_v35, %v989_v42  ;;  %v3000_v48 = vld [vmem:[#allocation2 + $0x60] sm:$0xf]  ;;  %v691_v4 = vsel %vm8640_vm10, %v456_v54, %v690_v46  ;;  %1737 = vmatprep.subr.bf16.mxu1 %v8155_v28  ;;  %v3919_v27 = vrot.slane %v8833_v45, 5 }
  0x89   : > { %v758_v49 = vld [vmem:[#allocation2 + $0x60] sm:$0xf]  ;;  %v3189_v47 = vrot.slane %v3188_v39, 4  ;;  %v3196_v57 = vshrl.u32 %v3000_v48, 16  ;;  %v3199_v59 = vshll.u32 %v3000_v48, 16  ;;  %v455_v1 = vsel %vm8616_vm8, %v447_v36, %v454_v53  ;;  %1738 = vmatpush1.bf16.msra.mxu1 %v8153_v11 }
  0x8a   : > { %v1002_v60 = vshrl.u32 %v758_v49, 16  ;;  %v995_v62 = vrot.slane %v994_v52, 4  ;;  %v1005_v0 = vshll.u32 %v758_v49, 16  ;;  %689 = vst [vmem:[#allocation2 + $0x70] sm:$0xf] %v455_v1  ;;  %v7221_v39 = vrot.slane %v8955_v10, 9 }
  0x8b   : > { %v3194_v6 = vsel %vm8602_vm6, %v3189_v47, %v3193_v26  ;;  %v3198_v8 = vrot.slane %v3196_v57, 4  ;;  %v3201_v58 = vrot.slane %v3199_v59, 5  ;;  %692 = vst [vmem:[#allocation2 + $0x74] sm:$0x1] %v691_v4  ;;  %v8962_v17 = vld [vmem:[#allocation2 + $0x64] sm:$0xf] }
  0x8c   : > { %v1004_v9 = vrot.slane %v1002_v60, 4  ;;  %v7194_v12 = vcombine.low %v3184_v38, %v3194_v6  ;;  %v1000_v15 = vsel %vm8602_vm6, %v995_v62, %v999_v41  ;;  %v8964_v18 = vld [vmem:[#allocation2 + $0x68] sm:$0x1]  ;;  %v759_v19 = vld [vmem:[#allocation2 + $0x64] sm:$0xf]  ;;  %v3205_v24 = vshll.u32 %v8962_v17, 16 }
  0x8d   : > { %v7003_v20 = vcombine.low %v990_v40, %v1000_v15  ;;  %v3202_v14 = vor.u32 %v3201_v58, %v3198_v8  ;;  %v3209_v25 = vshrl.u32 %v8962_v17, 16  ;;  %v798_v26 = vld [vmem:[#allocation2 + $0x68] sm:$0x1]  ;;  %v3215_v30 = vshll.u32 %v8964_v18, 16  ;;  %v8315_v10 = vld [vmem:[#allocation2 + $0x1c] sm:$0xf] }
  0x8e   : > { %3665 = vmatmul.mubr.bf16.gmra.mrb[24].mxu0 %v7194_v12  ;;  %v1007_v31 = vrot.slane %v1005_v0, 5  ;;  %v1011_v32 = vshll.u32 %v759_v19, 16  ;;  %v1015_v33 = vshrl.u32 %v759_v19, 16  ;;  %v3207_v42 = vrot.slane %v3205_v24, 5  ;;  %v760_v36 = vld [vmem:[#allocation2 + $0x6c] sm:$0xf] }
  0x8f   : > { %3674 = vmatprep.mubr.bf16.mxu0 %v8408_v2  ;;  %1457 = vmatmul.mubr.bf16.gmra.mrb[28].mxu1 %v7003_v20  ;;  %v3203_v50 = vrot.slane %v3202_v14, 4  ;;  %v3211_v34 = vrot.slane %v3209_v25, 4  ;;  %v1021_v35 = vshll.u32 %v798_v26, 16  ;;  %v3217_v56 = vrot.slane %v3215_v30, 5  ;;  %v233_v12 = vld [vmem:[%s8592_s30 + $0x48] sm:$0xf] }
  0x90   : > { %1466 = vmatprep.mubr.bf16.mxu1 %v8408_v2  ;;  %v1008_v37 = vor.u32 %v1007_v31, %v1004_v9  ;;  %v1013_v29 = vrot.slane %v1011_v32, 5  ;;  %v1017_v38 = vrot.slane %v1015_v33, 4  ;;  %v1026_v40 = vshrl.u32 %v760_v36, 16  ;;  %v234_v24 = vld [vmem:[%s8592_s30 + $0x4c] sm:$0xf] }
  0x91   : > { %v3212_v41 = vor.u32 %v3211_v34, %v3207_v42  ;;  %v1023_v46 = vrot.slane %v1021_v35, 5  ;;  %v3208_v52 = vsel %vm8602_vm6, %v3203_v50, %v3207_v42  ;;  %v761_v53 = vld [vmem:[#allocation2 + $0x70] sm:$0xf]  ;;  %v1029_v47 = vshll.u32 %v760_v36, 16  ;;  %v8162_v31 = vld [vmem:[%s10318_s1 + $0x104] ss:$8 sps:$4 sm:$0xff]  }
  0x92   : > { %v1009_v48 = vrot.slane %v1008_v37, 4  ;;  %v1018_v49 = vor.u32 %v1017_v38, %v1013_v29  ;;  %v799_v54 = vld [vmem:[#allocation2 + $0x74] sm:$0x1]  ;;  %v1028_v59 = vrot.slane %v1026_v40, 4  ;;  %v1035_v60 = vshll.u32 %v761_v53, 16  ;;  %2240 = vmatprep.subr.bf16.mxu1 %v8162_v31 }
  0x93   : > { %v3213_v57 = vrot.slane %v3212_v41, 4  ;;  %v1039_v62 = vshrl.u32 %v761_v53, 16  ;;  %v1031_v4 = vrot.slane %v1029_v47, 5  ;;  %v1045_v6 = vshll.u32 %v799_v54, 16  ;;  %v8316_v33 = vld [vmem:[#allocation2 + $0x20] sm:$0x1] }
  0x94   : > { %v1014_v0 = vsel %vm8602_vm6, %v1009_v48, %v1013_v29  ;;  %v1019_v1 = vrot.slane %v1018_v49, 4  ;;  %v1037_v58 = vrot.slane %v1035_v60, 5  ;;  %v3902_v11 = vrot.slane %v8315_v10, 5  ;;  %v3831_v35 = vld [vmem:[#allocation2 + $0x24] sm:$0xe] }
  0x95   : > { %v3218_v8 = vsel %vm8602_vm6, %v3213_v57, %v3217_v56  ;;  %v1041_v9 = vrot.slane %v1039_v62, 4  ;;  %v1032_v20 = vor.u32 %v1031_v4, %v1028_v59  ;;  %v1047_v14 = vrot.slane %v1045_v6, 5  ;;  %v693_v56 = vld [vmem:[#allocation2 + $0x78] sm:$0xf]  ;;  %v8138_v48 = vld [vmem:[%s10318_s1 + $0x300] ss:$8 sps:$4 sm:$0xff]  }
  0x96   : > { %v7195_v15 = vcombine.low %v3208_v52, %v3218_v8  ;;  %v1024_v19 = vsel %vm8602_vm6, %v1019_v1, %v1023_v46  ;;  %v8987_v28 = vsel %vm8691_vm13, %v7221_v39, %v3902_v11  ;;  %v3904_v30 = vrot.slane %v3902_v11, 4  ;;  %v8317_v46 = vld [vmem:[#allocation2 + $0x28] sm:$0xf]  ;;  %v235_v52 = vld [vmem:[%s8592_s30 + $0x50] sm:$0xf] }
  0x97   : > { %v7004_v25 = vcombine.low %v1014_v0, %v1024_v19  ;;  %v1042_v26 = vor.u32 %v1041_v9, %v1037_v58  ;;  %v1033_v32 = vrot.slane %v1032_v20, 4  ;;  %v3905_v50 = vrot.slane %v8316_v33, 5  ;;  %v697_v47 = vld [vmem:[#allocation2 + $0x80] sm:$0x1]  ;;  %v236_v59 = vld [vmem:[%s8592_s30 + $0x54] sm:$0xf] }
  0x98   : > { %3675 = vmatmul.mubr.bf16.gmra.mrb[28].mxu0 %v7195_v15  ;;  %v458_v42 = vshrl.u32 %v233_v12, 16  ;;  %v461_v34 = vshll.u32 %v233_v12, 16  ;;  %v466_v37 = vshrl.u32 %v234_v24, 16  ;;  %v469_v29 = vshll.u32 %v234_v24, 16  ;;  %v8318_v1 = vld [vmem:[#allocation2 + $0x2c] sm:$0x1] }
  0x99   : > { %4198 = vmatprep.mubr.bf16.mxu0 %v8408_v2  ;;  %1467 = vmatmul.mubr.bf16.gmra.mrb[32].mxu1 %v7004_v25  ;;  %v1043_v36 = vrot.slane %v1042_v26, 4  ;;  %v1038_v38 = vsel %vm8602_vm6, %v1033_v32, %v1037_v58  ;;  %v8998_v39 = vsel %vm8691_vm13, %v3904_v30, %v3905_v50  ;;  %v3909_v40 = vrot.slane %v8317_v46, 5  ;;  %v8146_v6 = vld [vmem:[%s10318_s1 + $0x314] ss:$8 sps:$4 sm:$0xff]   ;;  %v3832_v11 = vld [vmem:[#allocation2 + $0x30] sm:$0xe] }
  0x9a   : > { %1476 = vmatprep.mubr.bf16.mxu1 %v8408_v2  ;;  %v460_v41 = vrot.slane %v458_v42, 7  ;;  %v7253_v53 = vcombine.low %v8987_v28, %v8998_v39  ;;  %v468_v54 = vrot.slane %v466_v37, 7  ;;  %v7222_v57 = vrot.slane %v3831_v35, 9  ;;  %v8144_v30 = vld [vmem:[%s10318_s1 + $0x310] ss:$8 sps:$4 sm:$0xff]  }
  0x9b   : > { %v1048_v49 = vsel %vm8602_vm6, %v1043_v36, %v1047_v14  ;;  %v3912_v4 = vrot.slane %v8318_v1, 5  ;;  %v3911_v9 = vrot.slane %v3909_v40, 4  ;;  %v475_v10 = vshrl.u32 %v235_v52, 16  ;;  %v237_v14 = vld [vmem:[%s8592_s30 + $0x58] sm:$0xf] }
  0x9c   : > { %v7005_v60 = vcombine.low %v1038_v38, %v1048_v49  ;;  %v463_v62 = vor.u32 %v461_v34, %v460_v41  ;;  %v464_v0 = vrot.slane %v460_v41, 4  ;;  %v471_v8 = vor.u32 %v469_v29, %v468_v54  ;;  %v700_v32 = vld [vmem:[#allocation2 + $0x84] sm:$0xf]  ;;  %v238_v35 = vld [vmem:[%s8592_s30 + $0x5c] sm:$0xf] }
  0x9d   : > { %v473_v58 = vrot.slane %v468_v54, 4  ;;  %v478_v15 = vshll.u32 %v235_v52, 16  ;;  %v483_v19 = vshrl.u32 %v236_v59, 16  ;;  %v486_v20 = vshll.u32 %v236_v59, 16  ;;  %v704_v29 = vld [vmem:[#allocation2 + $0x8c] sm:$0x1] }
  0x9e   : > { %v694_v12 = vsel %vm8625_vm9, %v463_v62, %v693_v56  ;;  %v472_v24 = vsel %vm8616_vm8, %v464_v0, %v471_v8  ;;  %v9021_v26 = vsel %vm8691_vm13, %v7222_v57, %v3909_v40  ;;  %v477_v31 = vrot.slane %v475_v10, 7  ;;  %v9041_v56 = vld [vmem:[#allocation2 + $0x3c] sm:$0xe]  ;;  %v8152_v46 = vld [vmem:[%s10318_s1 + $0x324] ss:$8 sps:$4 sm:$0xff]  }
  0x9f   : > { %695 = vst [vmem:[#allocation2 + $0x78] sm:$0xf] %v694_v12  ;;  %v698_v25 = vsel %vm8640_vm10, %v473_v58, %v697_v47  ;;  %696 = vst [vmem:[#allocation2 + $0x7c] sm:$0xf] %v472_v24  ;;  %v9031_v33 = vsel %vm8691_vm13, %v3911_v9, %v3912_v4  ;;  %v485_v50 = vrot.slane %v483_v19, 7  ;;  %v7223_v42 = vrot.slane %v3832_v11, 9 }
  0xa0   : > { %4199 = vmatmul.mubr.bf16.vlgmr.msra.gmra.mrb[0].mxu0 %v7252_v5  ;;  %699 = vst [vmem:[#allocation2 + $0x80] sm:$0x1] %v698_v25  ;;  %v3916_v34 = vrot.slane %v8831_v44, 5  ;;  %v480_v36 = vor.u32 %v478_v15, %v477_v31  ;;  %v481_v37 = vrot.slane %v477_v31, 4  ;;  %v492_v63 = vshrl.u32 %v237_v14, 16 }
  0xa1   : > { %4650 = vmatpush1.bf16.msra.mxu0 %v8138_v48  ;;  %4208 = vmatprep.mubr.bf16.mxu0 %v8408_v2  ;;  %v488_v5 = vor.u32 %v486_v20, %v485_v50  ;;  %v490_v38 = vrot.slane %v485_v50, 4  ;;  %v495_v52 = vshll.u32 %v237_v14, 16  ;;  %v500_v48 = vshrl.u32 %v238_v35, 16  ;;  %v9050_v49 = vld [vmem:[%s8592_s30 + $0x60] sm:$0xf] }
  0xa2   : > { %1477 = vmatmul.mubr.bf16.gmra.mrb[36].mxu1 %v7005_v60  ;;  %4651 = vmatprep.subr.bf16.mxu0 %v8146_v6  ;;  %v9039_v41 = vsel %vm8691_vm13, %v7223_v42, %v3916_v34  ;;  %v3918_v44 = vrot.slane %v3916_v34, 4  ;;  %v701_v45 = vsel %vm8625_vm9, %v480_v36, %v700_v32  ;;  %v494_v40 = vrot.slane %v492_v63, 7  ;;  %v707_v60 = vld [vmem:[#allocation2 + $0x90] sm:$0xf]  ;;  %v8150_v62 = vld [vmem:[%s10318_s1 + $0x320] ss:$8 sps:$4 sm:$0xff]  }
  0xa3   : > { %1486 = vmatprep.mubr.bf16.mxu1 %v8408_v2  ;;  %v489_v54 = vsel %vm8616_vm8, %v481_v37, %v488_v5  ;;  %702 = vst [vmem:[#allocation2 + $0x84] sm:$0xf] %v701_v45  ;;  %v705_v47 = vsel %vm8640_vm10, %v490_v38, %v704_v29  ;;  %v503_v59 = vshll.u32 %v238_v35, 16  ;;  %v7254_v0 = vcombine.low %v9021_v26, %v9031_v33  ;;  %v711_v8 = vld [vmem:[#allocation2 + $0x98] sm:$0x1] }
  0xa4   : > { %v9058_v57 = vsel %vm8691_vm13, %v3918_v44, %v3919_v27  ;;  %703 = vst [vmem:[#allocation2 + $0x88] sm:$0xf] %v489_v54  ;;  %706 = vst [vmem:[#allocation2 + $0x8c] sm:$0x1] %v705_v47  ;;  %v497_v1 = vor.u32 %v495_v52, %v494_v40  ;;  %v498_v4 = vrot.slane %v494_v40, 4  ;;  %v502_v6 = vrot.slane %v500_v48, 7 }
  0xa5   : > { %4652 = vmatpush1.bf16.msra.mxu0 %v8144_v30  ;;  %v8158_v58 = vld [vmem:[%s10318_s1 + $0x334] ss:$8 sps:$4 sm:$0xff]   ;;  %v7255_v10 = vcombine.low %v9039_v41, %v9058_v57  ;;  %v7224_v11 = vrot.slane %v9041_v56, 9  ;;  %v3923_v12 = vrot.slane %v8842_v22, 5  ;;  %v509_v15 = vshrl.u32 %v9050_v49, 16 }
  0xa6   : > { %v762_v9 = vld [vmem:[#allocation2 + $0x78] sm:$0xf]  ;;  %4653 = vmatprep.subr.bf16.mxu0 %v8152_v46  ;;  %v763_v19 = vld [vmem:[#allocation2 + $0x7c] sm:$0xf]  ;;  %v505_v25 = vor.u32 %v503_v59, %v502_v6  ;;  %v708_v30 = vsel %vm8625_vm9, %v497_v1, %v707_v60  ;;  %v507_v42 = vrot.slane %v502_v6, 4  ;;  %v3926_v36 = vrot.slane %v8844_v23, 5 }
  0xa7   : > { %v800_v20 = vld [vmem:[#allocation2 + $0x80] sm:$0x1]  ;;  %v1050_v14 = vshrl.u32 %v762_v9, 16  ;;  %v1053_v24 = vshll.u32 %v762_v9, 16  ;;  %v1059_v31 = vshll.u32 %v763_v19, 16  ;;  %v1063_v32 = vshrl.u32 %v763_v19, 16 }
  0xa8   : > { %4209 = vmatmul.mubr.bf16.gmra.mrb[4].mxu0 %v7253_v53  ;;  %v1069_v50 = vshll.u32 %v800_v20, 16  ;;  %709 = vst [vmem:[#allocation2 + $0x90] sm:$0xf] %v708_v30  ;;  %v506_v35 = vsel %vm8616_vm8, %v498_v4, %v505_v25  ;;  %v8156_v28 = vld [vmem:[%s10318_s1 + $0x330] ss:$8 sps:$4 sm:$0xff]   ;;  %v712_v29 = vsel %vm8640_vm10, %v507_v42, %v711_v8  ;;  %v3925_v23 = vrot.slane %v3923_v12, 4 }
  0xa9   : > { %4218 = vmatprep.mubr.bf16.mxu0 %v8408_v2  ;;  %v1052_v22 = vrot.slane %v1050_v14, 4  ;;  %v1055_v34 = vrot.slane %v1053_v24, 5  ;;  %4654 = vmatpush1.bf16.msra.mxu0 %v8150_v62  ;;  %v1061_v39 = vrot.slane %v1059_v31, 5  ;;  %v1065_v53 = vrot.slane %v1063_v32, 4  ;;  %710 = vst [vmem:[#allocation2 + $0x94] sm:$0xf] %v506_v35 }
  0xaa   : > { %v1071_v37 = vrot.slane %v1069_v50, 5  ;;  %4655 = vmatprep.subr.bf16.mxu0 %v8158_v58  ;;  %v8165_v27 = vld [vmem:[%s10318_s1 + $0x344] ss:$8 sps:$4 sm:$0xff]   ;;  %713 = vst [vmem:[#allocation2 + $0x98] sm:$0x1] %v712_v29  ;;  %v9090_v38 = vrot.slane %v509_v15, 7  ;;  %v9095_v48 = vsel %vm8691_vm13, %v7224_v11, %v3923_v12  ;;  %v9102_v6 = vsel %vm8691_vm13, %v3925_v23, %v3926_v36 }
  0xab   : > { %v1056_v63 = vor.u32 %v1055_v34, %v1052_v22  ;;  %v764_v5 = vld [vmem:[#allocation2 + $0x84] sm:$0xf]  ;;  %v512_v44 = vshll.u32 %v9050_v49, 16  ;;  %v1066_v56 = vor.u32 %v1065_v53, %v1061_v39  ;;  %v765_v46 = vld [vmem:[#allocation2 + $0x88] sm:$0xf]  ;;  %v7256_v50 = vcombine.low %v9095_v48, %v9102_v6 }
  0xac   : > { %v801_v45 = vld [vmem:[#allocation2 + $0x8c] sm:$0x1]  ;;  %v1074_v40 = vshrl.u32 %v764_v5, 16  ;;  %v1077_v52 = vshll.u32 %v764_v5, 16  ;;  %v1083_v47 = vshll.u32 %v765_v46, 16  ;;  %v1087_v59 = vshrl.u32 %v765_v46, 16 }
  0xad   : > { %v1057_v54 = vrot.slane %v1056_v63, 4  ;;  %v1093_v60 = vshll.u32 %v801_v45, 16  ;;  %4656 = vmatpush1.bf16.msra.mxu0 %v8156_v28  ;;  %v8163_v62 = vld [vmem:[%s10318_s1 + $0x340] ss:$8 sps:$4 sm:$0xff]   ;;  %v1067_v1 = vrot.slane %v1066_v56, 4  ;;  %v514_v42 = vor.u32 %v512_v44, %v9090_v38 }
  0xae   : > { %v1076_v49 = vrot.slane %v1074_v40, 4  ;;  %v1079_v4 = vrot.slane %v1077_v52, 5  ;;  %4657 = vmatprep.subr.bf16.mxu0 %v8165_v27  ;;  %v8173_v8 = vld [vmem:[%s10318_s1 + $0x354] ss:$8 sps:$4 sm:$0xff]   ;;  %v1085_v9 = vrot.slane %v1083_v47, 5  ;;  %v1089_v11 = vrot.slane %v1087_v59, 4 }
  0xaf   : > { %v1062_v58 = vsel %vm8602_vm6, %v1057_v54, %v1061_v39  ;;  %v1095_v12 = vrot.slane %v1093_v60, 5  ;;  %v766_v15 = vld [vmem:[#allocation2 + $0x90] sm:$0xf]  ;;  %v1072_v19 = vsel %vm8602_vm6, %v1067_v1, %v1071_v37  ;;  %v240_v25 = vld [vmem:[%s8592_s30 + $0x64] sm:$0xf]  ;;  %v515_v29 = vrot.slane %v9090_v38, 4 }
  0xb0   : > { %4219 = vmatmul.mubr.bf16.gmra.mrb[8].mxu0 %v7254_v0  ;;  %v1080_v20 = vor.u32 %v1079_v4, %v1076_v49  ;;  %v1098_v14 = vshrl.u32 %v766_v15, 16  ;;  %v1101_v24 = vshll.u32 %v766_v15, 16  ;;  %v7006_v30 = vcombine.low %v1062_v58, %v1072_v19  ;;  %v767_v32 = vld [vmem:[#allocation2 + $0x94] sm:$0xf]  ;;  %v714_v22 = vld [vmem:[#allocation2 + $0x9c] sm:$0xf] }
  0xb1   : > { %4228 = vmatprep.mubr.bf16.mxu0 %v8408_v2  ;;  %v1090_v31 = vor.u32 %v1089_v11, %v1085_v9  ;;  %v8171_v26 = vld [vmem:[%s10318_s1 + $0x350] ss:$8 sps:$4 sm:$0xff]   ;;  %v1107_v36 = vshll.u32 %v767_v32, 16  ;;  %v3834_v28 = vld [vmem:[#allocation2 + $0x48] sm:$0xe]  ;;  %4658 = vmatpush1.bf16.msra.mxu0 %v8163_v62  ;;  %v1111_v53 = vshrl.u32 %v767_v32, 16  ;;  %v715_v1 = vsel %vm8625_vm9, %v514_v42, %v714_v22 }
  0xb2   : > { %v1081_v33 = vrot.slane %v1080_v20, 4  ;;  %v802_v0 = vld [vmem:[#allocation2 + $0x98] sm:$0x1]  ;;  %v1100_v34 = vrot.slane %v1098_v14, 4  ;;  %v1103_v35 = vrot.slane %v1101_v24, 5  ;;  %1487 = vmatmul.mubr.bf16.gmra.mrb[40].mxu1 %v7006_v30  ;;  %4659 = vmatprep.subr.bf16.mxu0 %v8173_v8  ;;  %v517_v44 = vshrl.u32 %v240_v25, 16 }
  0xb3   : > { %v1091_v39 = vrot.slane %v1090_v31, 4  ;;  %v1117_v37 = vshll.u32 %v802_v0, 16  ;;  %v8181_v27 = vld [vmem:[%s10318_s1 + $0x364] ss:$8 sps:$4 sm:$0xff]   ;;  %1496 = vmatprep.mubr.bf16.mxu1 %v8408_v2  ;;  %v1109_v23 = vrot.slane %v1107_v36, 5  ;;  %v1113_v45 = vrot.slane %v1111_v53, 4 }
  0xb4   : > { %v1086_v63 = vsel %vm8602_vm6, %v1081_v33, %v1085_v9  ;;  %v1104_v5 = vor.u32 %v1103_v35, %v1100_v34  ;;  %v241_v56 = vld [vmem:[%s8592_s30 + $0x68] sm:$0xf]  ;;  %v520_v38 = vshll.u32 %v240_v25, 16  ;;  %v718_v52 = vld [vmem:[#allocation2 + $0xa4] sm:$0x1]  ;;  %v519_v62 = vrot.slane %v517_v44, 7 }
  0xb5   : > { %v1096_v46 = vsel %vm8602_vm6, %v1091_v39, %v1095_v12  ;;  %v1119_v40 = vrot.slane %v1117_v37, 5  ;;  %v242_v54 = vld [vmem:[%s8592_s30 + $0x6c] sm:$0xf]  ;;  %v8179_v47 = vld [vmem:[%s10318_s1 + $0x360] ss:$8 sps:$4 sm:$0xff]   ;;  %4660 = vmatpush1.bf16.msra.mxu0 %v8171_v26  ;;  %v1114_v4 = vor.u32 %v1113_v45, %v1109_v23  ;;  %v7225_v8 = vrot.slane %v3834_v28, 9 }
  0xb6   : > { %v7007_v59 = vcombine.low %v1086_v63, %v1096_v46  ;;  %v1105_v60 = vrot.slane %v1104_v5, 4  ;;  %v9138_v49 = vld [vmem:[#allocation2 + $0x54] sm:$0xe]  ;;  %716 = vst [vmem:[#allocation2 + $0x9c] sm:$0xf] %v715_v1  ;;  %v3930_v58 = vrot.slane %v8857_v55, 5  ;;  %4661 = vmatprep.subr.bf16.mxu0 %v8181_v27  ;;  %v522_v15 = vor.u32 %v520_v38, %v519_v62 }
  0xb7   : > { %v3933_v9 = vrot.slane %v8869_v21, 5  ;;  %v8189_v11 = vld [vmem:[%s10318_s1 + $0x374] ss:$8 sps:$4 sm:$0xff]   ;;  %v524_v19 = vrot.slane %v519_v62, 4  ;;  %v526_v20 = vshrl.u32 %v241_v56, 16  ;;  %v1115_v55 = vrot.slane %v1114_v4, 4 }
  0xb8   : > { %4229 = vmatmul.mubr.bf16.gmra.mrb[12].mxu0 %v7255_v10  ;;  %v1110_v12 = vsel %vm8602_vm6, %v1105_v60, %v1109_v23  ;;  %v9151_v14 = vld [vmem:[%s8592_s30 + $0x70] sm:$0xf]  ;;  %v9156_v21 = vsel %vm8691_vm13, %v7225_v8, %v3930_v58  ;;  %v3932_v24 = vrot.slane %v3930_v58, 4  ;;  %v529_v25 = vshll.u32 %v241_v56, 16  ;;  %v721_v30 = vld [vmem:[#allocation2 + $0xa8] sm:$0xf] }
  0xb9   : > { %4238 = vmatprep.mubr.bf16.mxu0 %v8408_v2  ;;  %v244_v41 = vld [vmem:[%s8592_s30 + $0x74] sm:$0xf]  ;;  %v523_v57 = vsel %vm8616_vm8, %v515_v29, %v522_v15  ;;  %v719_v10 = vsel %vm8640_vm10, %v524_v19, %v718_v52  ;;  %v528_v31 = vrot.slane %v526_v20, 7  ;;  %v534_v32 = vshrl.u32 %v242_v54, 16  ;;  %4662 = vmatpush1.bf16.msra.mxu0 %v8179_v47  ;;  %v8187_v42 = vld [vmem:[%s10318_s1 + $0x370] ss:$8 sps:$4 sm:$0xff]  }
  0xba   : > { %v8198_v22 = vld [vmem:[%s10318_s1 + $0x384] ss:$8 sps:$4 sm:$0xff]   ;;  %1497 = vmatmul.mubr.bf16.gmra.mrb[44].mxu1 %v7007_v59  ;;  %v1120_v26 = vsel %vm8602_vm6, %v1115_v55, %v1119_v40  ;;  %717 = vst [vmem:[#allocation2 + $0xa0] sm:$0xf] %v523_v57  ;;  %720 = vst [vmem:[#allocation2 + $0xa4] sm:$0x1] %v719_v10  ;;  %v9173_v33 = vsel %vm8691_vm13, %v3932_v24, %v3933_v9  ;;  %4663 = vmatprep.subr.bf16.mxu0 %v8189_v11 }
  0xbb   : > { %v537_v0 = vshll.u32 %v242_v54, 16  ;;  %v7226_v34 = vrot.slane %v9138_v49, 9  ;;  %1506 = vmatprep.mubr.bf16.mxu1 %v8408_v2  ;;  %v7008_v35 = vcombine.low %v1110_v12, %v1120_v26  ;;  %v7257_v36 = vcombine.low %v9156_v21, %v9173_v33  ;;  %v725_v53 = vld [vmem:[#allocation2 + $0xb0] sm:$0x1]  ;;  %v732_v4 = vld [vmem:[#allocation2 + $0xbc] sm:$0x1] }
  0xbc   : > { %v531_v28 = vor.u32 %v529_v25, %v528_v31  ;;  %v532_v39 = vrot.slane %v528_v31, 4  ;;  %v536_v37 = vrot.slane %v534_v32, 7  ;;  %v3937_v29 = vrot.slane %v8933_v16, 5  ;;  %v3836_v20 = vld [vmem:[#allocation2 + $0x60] sm:$0xe] }
  0xbd   : > { %v3940_v27 = vrot.slane %v8921_v3, 5  ;;  %v543_v63 = vshrl.u32 %v9151_v14, 16  ;;  %v9182_v5 = vld [vmem:[#allocation2 + $0x9c] sm:$0xf]  ;;  %v546_v44 = vshll.u32 %v9151_v14, 16  ;;  %v551_v56 = vshrl.u32 %v244_v41, 16  ;;  %4664 = vmatpush1.bf16.msra.mxu0 %v8187_v42 }
  0xbe   : > { %v722_v23 = vsel %vm8625_vm9, %v531_v28, %v721_v30  ;;  %v554_v46 = vshll.u32 %v244_v41, 16  ;;  %v1122_v45 = vshrl.u32 %v9182_v5, 16  ;;  %v1125_v40 = vshll.u32 %v9182_v5, 16  ;;  %v728_v3 = vld [vmem:[#allocation2 + $0xb4] sm:$0xf]  ;;  %5499 = vmatprep.subr.bf16.mxu0 %v8198_v22 }
  0xbf   : > { %v539_v38 = vor.u32 %v537_v0, %v536_v37  ;;  %v541_v16 = vrot.slane %v536_v37, 4  ;;  %723 = vst [vmem:[#allocation2 + $0xa8] sm:$0xf] %v722_v23  ;;  %v9194_v52 = vsel %vm8691_vm13, %v7226_v34, %v3937_v29  ;;  %v3939_v54 = vrot.slane %v3937_v29, 4  ;;  %v3014_v51 = vld [vmem:[#allocation2 + $0x98] sm:$0x1] }
  0xc0   : > { %4239 = vmatmul.mubr.bf16.gmra.mrb[16].mxu0 %v7256_v50  ;;  %v545_v47 = vrot.slane %v543_v63, 7  ;;  %v553_v59 = vrot.slane %v551_v56, 7  ;;  %v1124_v60 = vrot.slane %v1122_v45, 4  ;;  %v1127_v62 = vrot.slane %v1125_v40, 5 }
  0xc1   : > { %4248 = vmatprep.mubr.bf16.mxu0 %v8408_v2  ;;  %v540_v1 = vsel %vm8616_vm8, %v532_v39, %v539_v38  ;;  %v726_v49 = vsel %vm8640_vm10, %v541_v16, %v725_v53  ;;  %v9201_v48 = vld [vmem:[#allocation2 + $0xa0] sm:$0xf]  ;;  %v803_v6 = vld [vmem:[#allocation2 + $0xa4] sm:$0x1]  ;;  %v9205_v50 = vsel %vm8691_vm13, %v3939_v54, %v3940_v27  ;;  %v7227_v42 = vrot.slane %v3836_v20, 9 }
  0xc2   : > { %724 = vst [vmem:[#allocation2 + $0xac] sm:$0xf] %v540_v1  ;;  %727 = vst [vmem:[#allocation2 + $0xb0] sm:$0x1] %v726_v49  ;;  %v548_v8 = vor.u32 %v546_v44, %v545_v47  ;;  %v549_v58 = vrot.slane %v545_v47, 4  ;;  %v556_v9 = vor.u32 %v554_v46, %v553_v59  ;;  %1507 = vmatmul.mubr.bf16.gmra.mrb[48].mxu1 %v7008_v35  ;;  %v1131_v12 = vshll.u32 %v9201_v48, 16 }
  0xc3   : > { %v1128_v11 = vor.u32 %v1127_v62, %v1124_v60  ;;  %v1135_v15 = vshrl.u32 %v9201_v48, 16  ;;  %v1141_v19 = vshll.u32 %v803_v6, 16  ;;  %1516 = vmatprep.mubr.bf16.mxu1 %v8408_v2  ;;  %v7258_v14 = vcombine.low %v9194_v52, %v9205_v50 }
  0xc4   : > { %v557_v55 = vsel %vm8616_vm8, %v549_v58, %v556_v9  ;;  %v558_v24 = vrot.slane %v553_v59, 4  ;;  %v729_v25 = vsel %vm8625_vm9, %v548_v8, %v728_v3  ;;  %v1133_v41 = vrot.slane %v1131_v12, 5  ;;  %v3004_v8 = vld [vmem:[#allocation2 + $0x70] sm:$0xf]  ;;  %v3005_v12 = vld [vmem:[#allocation2 + $0x74] sm:$0x1] }
  0xc5   : > { %v1129_v30 = vrot.slane %v1128_v11, 4  ;;  %v1137_v57 = vrot.slane %v1135_v15, 4  ;;  %730 = vst [vmem:[#allocation2 + $0xb4] sm:$0xf] %v729_v25  ;;  %731 = vst [vmem:[#allocation2 + $0xb8] sm:$0xf] %v557_v55 }
  0xc6   : > { %v1143_v10 = vrot.slane %v1141_v19, 5  ;;  %v9216_v31 = vld [vmem:[#allocation2 + $0xa8] sm:$0xf]  ;;  %v733_v32 = vsel %vm8640_vm10, %v558_v24, %v732_v4  ;;  %v3944_v22 = vrot.slane %v8962_v17, 5  ;;  %v3947_v35 = vrot.slane %v8964_v18, 5 }
  0xc7   : > { %v1138_v26 = vor.u32 %v1137_v57, %v1133_v41  ;;  %v1146_v0 = vshrl.u32 %v9216_v31, 16  ;;  %v1149_v34 = vshll.u32 %v9216_v31, 16  ;;  %734 = vst [vmem:[#allocation2 + $0xbc] sm:$0x1] %v733_v32  ;;  %v1134_v39 = vsel %vm8602_vm6, %v1129_v30, %v1133_v41  ;;  %v3837_v19 = vld [vmem:[#allocation2 + $0x6c] sm:$0xe] }
  0xc8   : > { %4249 = vmatmul.mubr.bf16.gmra.mrb[20].mxu0 %v7257_v36  ;;  %v3946_v28 = vrot.slane %v3944_v22, 4  ;;  %v3945_v33 = vsel %vm8691_vm13, %v7227_v42, %v3944_v22  ;;  %v3951_v24 = vrot.slane %v3004_v8, 5  ;;  %v3007_v42 = vld [vmem:[#allocation2 + $0x7c] sm:$0xf] }
  0xc9   : > { %v1139_v53 = vrot.slane %v1138_v26, 4  ;;  %4258 = vmatprep.mubr.bf16.mxu0 %v8408_v2  ;;  %v9230_v17 = vld [vmem:[#allocation2 + $0xac] sm:$0xf]  ;;  %v804_v37 = vld [vmem:[#allocation2 + $0xb0] sm:$0x1]  ;;  %v1148_v29 = vrot.slane %v1146_v0, 4 }
  0xca   : > { %v1151_v27 = vrot.slane %v1149_v34, 5  ;;  %v1155_v63 = vshll.u32 %v9230_v17, 16  ;;  %v1159_v18 = vshrl.u32 %v9230_v17, 16  ;;  %v1165_v23 = vshll.u32 %v804_v37, 16  ;;  %v3008_v0 = vld [vmem:[#allocation2 + $0x80] sm:$0x1] }
  0xcb   : > { %v1144_v21 = vsel %vm8602_vm6, %v1139_v53, %v1143_v10  ;;  %v3948_v36 = vsel %vm8691_vm13, %v3946_v28, %v3947_v35  ;;  %v7228_v10 = vrot.slane %v3837_v19, 9  ;;  %v3953_v32 = vrot.slane %v3951_v24, 4  ;;  %v3838_v28 = vld [vmem:[#allocation2 + $0x78] sm:$0xe] }
  0xcc   : > { %v7009_v44 = vcombine.low %v1134_v39, %v1144_v21  ;;  %v1152_v56 = vor.u32 %v1151_v27, %v1148_v29  ;;  %v1157_v46 = vrot.slane %v1155_v63, 5  ;;  %v1161_v45 = vrot.slane %v1159_v18, 4  ;;  %v9240_v40 = vld [vmem:[#allocation2 + $0xb4] sm:$0xf]  ;;  %v9242_v38 = vld [vmem:[#allocation2 + $0xb8] sm:$0xf] }
  0xcd   : > { %v1167_v16 = vrot.slane %v1165_v23, 5  ;;  %v1170_v3 = vshrl.u32 %v9240_v40, 16  ;;  %v1173_v52 = vshll.u32 %v9240_v40, 16  ;;  %v1179_v54 = vshll.u32 %v9242_v38, 16  ;;  %v245_v37 = vld [vmem:[%s8592_s30 + $0x78] sm:$0xf] }
  0xce   : > { %1517 = vmatmul.mubr.bf16.gmra.mrb[52].mxu1 %v7009_v44  ;;  %v1153_v47 = vrot.slane %v1152_v56, 4  ;;  %v1162_v59 = vor.u32 %v1161_v45, %v1157_v46  ;;  %v805_v60 = vld [vmem:[#allocation2 + $0xbc] sm:$0x1]  ;;  %v1183_v62 = vshrl.u32 %v9242_v38, 16  ;;  %v7259_v1 = vcombine.low %v3945_v33, %v3948_v36  ;;  %v3010_v18 = vld [vmem:[#allocation2 + $0x88] sm:$0xf] }
  0xcf   : > { %1526 = vmatprep.mubr.bf16.mxu1 %v8408_v2  ;;  %v1172_v49 = vrot.slane %v1170_v3, 4  ;;  %v1175_v4 = vrot.slane %v1173_v52, 5  ;;  %v1181_v6 = vrot.slane %v1179_v54, 5  ;;  %v1189_v50 = vshll.u32 %v805_v60, 16  ;;  %v246_v29 = vld [vmem:[%s8592_s30 + $0x7c] sm:$0xf] }
  0xd0   : > { %v1158_v58 = vsel %vm8602_vm6, %v1153_v47, %v1157_v46  ;;  %v1163_v9 = vrot.slane %v1162_v59, 4  ;;  %4259 = vmatmul.mubr.bf16.gmra.mrb[24].mxu0 %v7258_v14  ;;  %v1185_v11 = vrot.slane %v1183_v62, 4  ;;  %v3954_v14 = vrot.slane %v3005_v12, 5  ;;  %v3839_v33 = vld [vmem:[#allocation2 + $0x84] sm:$0xe] }
  0xd1   : > { %4268 = vmatprep.mubr.bf16.mxu0 %v8408_v2  ;;  %v1176_v15 = vor.u32 %v1175_v4, %v1172_v49  ;;  %v1191_v41 = vrot.slane %v1189_v50, 5  ;;  %v3952_v34 = vsel %vm8691_vm13, %v7228_v10, %v3951_v24  ;;  %v3958_v39 = vrot.slane %v3007_v42, 5  ;;  %v3011_v56 = vld [vmem:[#allocation2 + $0x8c] sm:$0x1]  ;;  %v8160_v3 = vld [vmem:[%s10318_s1 + $0x100] ss:$8 sps:$4 sm:$0xff]  }
  0xd2   : > { %v1168_v20 = vsel %vm8602_vm6, %v1163_v9, %v1167_v16  ;;  %v1186_v55 = vor.u32 %v1185_v11, %v1181_v6  ;;  %v3955_v35 = vsel %vm8691_vm13, %v3953_v32, %v3954_v14  ;;  %v7229_v63 = vrot.slane %v3838_v28, 9  ;;  %v735_v16 = vld [vmem:[#allocation2 + $0xc0] sm:$0xf]  ;;  %v739_v60 = vld [vmem:[#allocation2 + $0xc8] sm:$0x1] }
  0xd3   : > { %v7010_v25 = vcombine.low %v1158_v58, %v1168_v20  ;;  %v1177_v30 = vrot.slane %v1176_v15, 4  ;;  %v7260_v27 = vcombine.low %v3952_v34, %v3955_v35  ;;  %v3960_v23 = vrot.slane %v3958_v39, 4  ;;  %v8319_v62 = vld [vmem:[#allocation2] sm:$0xf]  ;;  %v8170_v4 = vld [vmem:[%s10318_s1 + $0x114] ss:$8 sps:$4 sm:$0xff]  }
  0xd4   : > { %v1187_v57 = vrot.slane %v1186_v55, 4  ;;  %v3961_v21 = vrot.slane %v3008_v0, 5  ;;  %v560_v36 = vshrl.u32 %v245_v37, 16  ;;  %v563_v44 = vshll.u32 %v245_v37, 16  ;;  %v3013_v55 = vld [vmem:[#allocation2 + $0x94] sm:$0xf] }
  0xd5   : > { %v1182_v22 = vsel %vm8602_vm6, %v1177_v30, %v1181_v6  ;;  %v568_v46 = vshrl.u32 %v246_v29, 16  ;;  %v571_v45 = vshll.u32 %v246_v29, 16  ;;  %v3959_v52 = vsel %vm8691_vm13, %v7229_v63, %v3958_v39  ;;  %v8168_v30 = vld [vmem:[%s10318_s1 + $0x110] ss:$8 sps:$4 sm:$0xff]   ;;  %v8176_v32 = vld [vmem:[%s10318_s1 + $0x120] ss:$8 sps:$4 sm:$0xff]  }
  0xd6   : > { %1527 = vmatmul.mubr.bf16.gmra.mrb[56].mxu1 %v7010_v25  ;;  %v1192_v26 = vsel %vm8602_vm6, %v1187_v57, %v1191_v41  ;;  %v3962_v54 = vsel %vm8691_vm13, %v3960_v23, %v3961_v21  ;;  %v3965_v47 = vrot.slane %v3010_v18, 5  ;;  %v562_v59 = vrot.slane %v560_v36, 7  ;;  %v3840_v41 = vld [vmem:[#allocation2 + $0x90] sm:$0xe]  ;;  %v8321_v14 = vld [vmem:[#allocation2 + $0xc] sm:$0xf] }
  0xd7   : > { %1536 = vmatprep.mubr.bf16.mxu1 %v8408_v2  ;;  %v7011_v53 = vcombine.low %v1182_v22, %v1192_v26  ;;  %v570_v6 = vrot.slane %v568_v46, 7  ;;  %v7261_v58 = vcombine.low %v3959_v52, %v3962_v54  ;;  %v7230_v9 = vrot.slane %v3839_v33, 9  ;;  %v9302_v42 = vld [vmem:[#allocation2 + $0x10] sm:$0xf]  ;;  %v8186_v26 = vld [vmem:[%s10318_s1 + $0x134] ss:$8 sps:$4 sm:$0xff]  }
  0xd8   : > { %4269 = vmatmul.mubr.bf16.gmra.mrb[28].mxu0 %v7259_v1  ;;  %v9275_v1 = vld [vmem:[#allocation2 + $0x4] sm:$0xf]  ;;  %v565_v50 = vor.u32 %v563_v44, %v562_v59  ;;  %v566_v8 = vrot.slane %v562_v59, 4  ;;  %v3967_v15 = vrot.slane %v3965_v47, 4  ;;  %v3968_v19 = vrot.slane %v3011_v56, 5 }
  0xd9   : > { %4278 = vmatprep.mubr.bf16.mxu0 %v8408_v2  ;;  %v7028_v49 = vcombine.low %v8319_v62, %v9275_v1  ;;  %v573_v11 = vor.u32 %v571_v45, %v570_v6  ;;  %v575_v12 = vrot.slane %v570_v6, 4  ;;  %v3966_v7 = vsel %vm8691_vm13, %v7230_v9, %v3965_v47  ;;  %v3016_v35 = vld [vmem:[#allocation2 + $0xa0] sm:$0xf]  ;;  %v3017_v37 = vld [vmem:[#allocation2 + $0xa4] sm:$0x1] }
  0xda   : > { %v736_v20 = vsel %vm8625_vm9, %v565_v50, %v735_v16  ;;  %v3969_v57 = vsel %vm8691_vm13, %v3967_v15, %v3968_v19  ;;  %v3972_v10 = vrot.slane %v3013_v55, 5  ;;  %v7029_v22 = vcombine.low %v8321_v14, %v9302_v42  ;;  %v8184_v29 = vld [vmem:[%s10318_s1 + $0x130] ss:$8 sps:$4 sm:$0xff]   ;;  %v8192_v33 = vld [vmem:[%s10318_s1 + $0x140] ss:$8 sps:$4 sm:$0xff]  }
  0xdb   : > { %v574_v24 = vsel %vm8616_vm8, %v566_v8, %v573_v11  ;;  %737 = vst [vmem:[#allocation2 + $0xc0] sm:$0xf] %v736_v20  ;;  %v740_v25 = vsel %vm8640_vm10, %v575_v12, %v739_v60  ;;  %v7262_v0 = vcombine.low %v3966_v7, %v3969_v57  ;;  %v7231_v34 = vrot.slane %v3840_v41, 9  ;;  %v8323_v36 = vld [vmem:[#allocation2 + $0x18] sm:$0xf] }
  0xdc   : > { %738 = vst [vmem:[#allocation2 + $0xc4] sm:$0xf] %v574_v24  ;;  %741 = vst [vmem:[#allocation2 + $0xc8] sm:$0x1] %v740_v25  ;;  %v3974_v28 = vrot.slane %v3972_v10, 4  ;;  %v3975_v39 = vrot.slane %v3014_v51, 5 }
  0xdd   : > { %v3979_v63 = vrot.slane %v3016_v35, 5  ;;  %v3973_v18 = vsel %vm8691_vm13, %v7231_v34, %v3972_v10  ;;  %v9323_v44 = vld [vmem:[#allocation2 + $0x1c] sm:$0xf]  ;;  %v3019_v52 = vld [vmem:[#allocation2 + $0xac] sm:$0xf] }
  0xde   : > { %1537 = vmatmul.mubr.bf16.gmra.mrb[60].mxu1 %v7011_v53  ;;  %v3841_v53 = vld [vmem:[#allocation2 + $0x9c] sm:$0xe]  ;;  %v3976_v23 = vsel %vm8691_vm13, %v3974_v28, %v3975_v39  ;;  %v7030_v56 = vcombine.low %v8323_v36, %v9323_v44  ;;  %v8202_v54 = vld [vmem:[%s10318_s1 + $0x150] ss:$8 sps:$4 sm:$0xff]   ;;  %v3842_v47 = vld [vmem:[#allocation2 + $0xa8] sm:$0xe] }
  0xdf   : > { %1755 = vmatprep.mubr.bf16.mxu1 %v8408_v2  ;;  %v7232_v21 = vrot.slane %v3841_v53, 9  ;;  %v8204_v46 = vld [vmem:[%s10318_s1 + $0x154] ss:$8 sps:$4 sm:$0xff]   ;;  %v7263_v45 = vcombine.low %v3973_v18, %v3976_v23  ;;  %v3981_v16 = vrot.slane %v3979_v63, 4  ;;  %v8214_v59 = vld [vmem:[%s10318_s1 + $0x164] ss:$8 sps:$4 sm:$0xff]  }
  0xe0   : > { %4279 = vmatmul.mubr.bf16.gmra.mrb[32].mxu0 %v7260_v27  ;;  %v8194_v27 = vld [vmem:[%s10318_s1 + $0x144] ss:$8 sps:$4 sm:$0xff]   ;;  %v9341_v6 = vld [vmem:[#allocation2 + $0x28] sm:$0xf]  ;;  %v3020_v8 = vld [vmem:[#allocation2 + $0xb0] sm:$0x1] }
  0xe1   : > { %4288 = vmatprep.mubr.bf16.mxu0 %v8408_v2  ;;  %v3980_v60 = vsel %vm8691_vm13, %v7232_v21, %v3979_v63  ;;  %v8224_v11 = vld [vmem:[%s10318_s1 + $0x174] ss:$8 sps:$4 sm:$0xff]   ;;  %v7233_v12 = vrot.slane %v3842_v47, 9  ;;  %v3989_v19 = vrot.slane %v3020_v8, 5  ;;  %v3022_v20 = vld [vmem:[#allocation2 + $0xb8] sm:$0xf] }
  0xe2   : > { %v8222_v55 = vld [vmem:[%s10318_s1 + $0x170] ss:$8 sps:$4 sm:$0xff]   ;;  %v8233_v24 = vld [vmem:[%s10318_s1 + $0x184] ss:$8 sps:$4 sm:$0xff]   ;;  %v3993_v41 = vrot.slane %v3022_v20, 5 }
  0xe3   : > { %v9362_v51 = vld [vmem:[#allocation2 + $0x34] sm:$0xf]  ;;  %v3023_v57 = vld [vmem:[#allocation2 + $0xbc] sm:$0x1]  ;;  %v9371_v53 = vld [vmem:[#allocation2 + $0x40] sm:$0xf] }
  0xe4   : > { %v3843_v10 = vld [vmem:[#allocation2 + $0xb4] sm:$0xe]  ;;  %v8329_v39 = vld [vmem:[#allocation2 + $0x3c] sm:$0xf]  ;;  %v8218_v8 = vld [vmem:[%s10318_s1 + $0x3a4] ss:$8 sps:$4 sm:$0xff]  }
  0xe5   : > { %v7234_v14 = vrot.slane %v3843_v10, 9  ;;  %v8195_v47 = vld [vmem:[#allocation2 + $0x18] sm:$0xff]   ;;  %v8253_v10 = vld [vmem:[%s10318_s1 + $0x3e4] ss:$8 sps:$4 sm:$0xff]  }
  0xe6   : > { %1756 = vmatmul.mubr.bf16.vlgmr.msra.gmra.mrb[0].mxu1 %v7028_v49  ;;  %v3986_v49 = vrot.slane %v3019_v52, 5  ;;  %v9385_v52 = vld [vmem:[#allocation2 + $0x58] sm:$0xf] }
  0xe7   : > { %2241 = vmatpush1.bf16.msra.mxu1 %v8160_v3  ;;  %1765 = vmatprep.mubr.bf16.mxu1 %v8408_v2  ;;  %v3982_v3 = vrot.slane %v3017_v37, 5  ;;  %v3994_v34 = vsel %vm8691_vm13, %v7234_v14, %v3993_v41  ;;  %v7033_v37 = vcombine.low %v8329_v39, %v9371_v53  ;;  %v8251_v14 = vld [vmem:[%s10318_s1 + $0x3e0] ss:$8 sps:$4 sm:$0xff]  }
  0xe8   : > { %4289 = vmatmul.mubr.bf16.gmra.mrb[36].mxu0 %v7261_v58  ;;  %2242 = vmatprep.subr.bf16.mxu1 %v8170_v4  ;;  %v8325_v4 = vld [vmem:[#allocation2 + $0x24] sm:$0xf]  ;;  %v8212_v58 = vld [vmem:[%s10318_s1 + $0x160] ss:$8 sps:$4 sm:$0xff]   ;;  %v3988_v15 = vrot.slane %v3986_v49, 4  ;;  %v3987_v25 = vsel %vm8691_vm13, %v7233_v12, %v3986_v49 }
  0xe9   : > { %4298 = vmatprep.mubr.bf16.mxu0 %v8408_v2  ;;  %v3983_v62 = vsel %vm8691_vm13, %v3981_v16, %v3982_v3  ;;  %v7031_v50 = vcombine.low %v8325_v4, %v9341_v6  ;;  %v8333_v3 = vld [vmem:[#allocation2 + $0x54] sm:$0xf]  ;;  %v8335_v49 = vld [vmem:[#allocation2 + $0x60] sm:$0xf]  ;;  %v9399_v4 = vld [vmem:[#allocation2 + $0x64] sm:$0xf] }
  0xea   : > { %v7264_v9 = vcombine.low %v3980_v60, %v3983_v62  ;;  %v8208_v60 = vld [vmem:[%s10318_s1 + $0x394] ss:$8 sps:$4 sm:$0xff]   ;;  %v8206_v62 = vld [vmem:[%s10318_s1 + $0x390] ss:$8 sps:$4 sm:$0xff]   ;;  %v8215_v39 = vld [vmem:[#allocation2 + $0x48] sm:$0xff]  }
  0xeb   : > { %2243 = vmatpush1.bf16.msra.mxu1 %v8168_v30  ;;  %v3990_v30 = vsel %vm8691_vm13, %v3988_v15, %v3989_v19  ;;  %v8226_v12 = vld [vmem:[%s10318_s1 + $0x3b0] ss:$8 sps:$4 sm:$0xff]   ;;  %v8337_v15 = vld [vmem:[#allocation2 + $0x6c] sm:$0xf] }
  0xec   : > { %2244 = vmatprep.subr.bf16.mxu1 %v8178_v61  ;;  %v8327_v61 = vld [vmem:[#allocation2 + $0x30] sm:$0xf] }
  0xed   : > { %v7032_v7 = vcombine.low %v8327_v61, %v9362_v51  ;;  %v9416_v19 = vld [vmem:[#allocation2 + $0x70] sm:$0xf]  ;;  %v8339_v61 = vld [vmem:[#allocation2 + $0x78] sm:$0xf] }
  0xee   : > { %1766 = vmatmul.mubr.bf16.gmra.mrb[4].mxu1 %v7029_v22  ;;  %v3995_v22 = vrot.slane %v3993_v41, 4  ;;  %v7037_v20 = vcombine.low %v8337_v15, %v9416_v19  ;;  %v8243_v41 = vld [vmem:[%s10318_s1 + $0x3d0] ss:$8 sps:$4 sm:$0xff]   ;;  %v8249_v15 = vld [vmem:[%s10318_s1 + $0x1a4] ss:$8 sps:$4 sm:$0xff]  }
  0xef   : > { %1775 = vmatprep.mubr.bf16.mxu1 %v8408_v2  ;;  %2245 = vmatpush1.bf16.msra.mxu1 %v8176_v32  ;;  %v7265_v32 = vcombine.low %v3987_v25, %v3990_v30  ;;  %v8235_v25 = vld [vmem:[%s10318_s1 + $0x3c0] ss:$8 sps:$4 sm:$0xff]   ;;  %v8245_v30 = vld [vmem:[%s10318_s1 + $0x3d4] ss:$8 sps:$4 sm:$0xff]  }
  0xf0   : > { %4299 = vmatmul.mubr.bf16.gmra.mrb[40].mxu0 %v7262_v0  ;;  %2246 = vmatprep.subr.bf16.mxu1 %v8186_v26  ;;  %v3996_v26 = vrot.slane %v3023_v57, 5  ;;  %v3025_v0 = vld [vmem:[#allocation2 + $0xc4] sm:$0xf] }
  0xf1   : > { %4308 = vmatprep.mubr.bf16.mxu0 %v8408_v2  ;;  %v4000_v28 = vrot.slane %v3025_v0, 5  ;;  %v8341_v0 = vld [vmem:[#allocation2 + $0x84] sm:$0xf] }
  0xf2   : > { %v3997_v35 = vsel %vm8691_vm13, %v3995_v22, %v3996_v26  ;;  %v8261_v22 = vld [vmem:[%s10318_s1 + $0x3f4] ss:$8 sps:$4 sm:$0xff]   ;;  %v8259_v26 = vld [vmem:[%s10318_s1 + $0x3f0] ss:$8 sps:$4 sm:$0xff]  }
  0xf3   : > { %2247 = vmatpush1.bf16.msra.mxu1 %v8184_v29  ;;  %v3026_v29 = vld [vmem:[#allocation2 + $0xc8] sm:$0x1]  ;;  %v7266_v63 = vcombine.low %v3994_v34, %v3997_v35  ;;  %v4002_v23 = vrot.slane %v4000_v28, 4 }
  0xf4   : > { %2248 = vmatprep.subr.bf16.mxu1 %v8194_v27  ;;  %v3844_v27 = vld [vmem:[#allocation2 + $0xc0] sm:$0xe]  ;;  %v4003_v21 = vrot.slane %v3026_v29, 5  ;;  %v9450_v34 = vld [vmem:[#allocation2 + $0x88] sm:$0xf] }
  0xf5   : > { %v7235_v18 = vrot.slane %v3844_v27, 9  ;;  %v7039_v35 = vcombine.low %v8341_v0, %v9450_v34  ;;  %v9458_v29 = vld [vmem:[#allocation2 + $0x94] sm:$0xf] }
  0xf6   : > { %1776 = vmatmul.mubr.bf16.gmra.mrb[8].mxu1 %v7030_v56  ;;  %v4004_v36 = vsel %vm8691_vm13, %v4002_v23, %v4003_v21  ;;  %v8331_v56 = vld [vmem:[#allocation2 + $0x48] sm:$0xf]  ;;  %v8225_v23 = vld [vmem:[#allocation2 + $0x60] sm:$0xff]   ;;  %v7042_v21 = vcombine.low %v9216_v31, %v9230_v17 }
  0xf7   : > { %1785 = vmatprep.mubr.bf16.mxu1 %v8408_v2  ;;  %2249 = vmatpush1.bf16.msra.mxu1 %v8192_v33  ;;  %v4001_v33 = vsel %vm8691_vm13, %v7235_v18, %v4000_v28  ;;  %v8268_v28 = vld [vmem:[%s10318_s1 + $0x404] ss:$8 sps:$4 sm:$0xff]   ;;  %v7041_v18 = vcombine.low %v9182_v5, %v9201_v48  ;;  %v7043_v5 = vcombine.low %v9240_v40, %v9242_v38  ;;  %v8345_v48 = vld [vmem:[#allocation2 + $0x8] sm:$0x1] }
  0xf8   : > { %4309 = vmatmul.mubr.bf16.gmra.mrb[44].mxu0 %v7263_v45  ;;  %2250 = vmatprep.subr.bf16.mxu1 %v8204_v46  ;;  %v9380_v46 = vld [vmem:[#allocation2 + $0x4c] sm:$0xf]  ;;  %v7267_v16 = vcombine.low %v4001_v33, %v4004_v36  ;;  %v1969_v36 = vrot.slane %v9275_v1, 5  ;;  %v1976_v1 = vrot.slane %v9302_v42, 5  ;;  %v8231_v38 = vld [vmem:[%s10318_s1 + $0x180] ss:$8 sps:$4 sm:$0xff]  }
  0xf9   : > { %4318 = vmatprep.mubr.bf16.mxu0 %v8408_v2  ;;  %v7034_v45 = vcombine.low %v8331_v56, %v9380_v46  ;;  %v8230_v33 = vld [vmem:[#allocation2 + $0x6c] sm:$0xff]   ;;  %v1916_v56 = vld [vmem:[#allocation2] sm:$0xe] }
  0xfb   : > { %2251 = vmatpush1.bf16.msra.mxu1 %v8202_v54  ;;  %v7035_v54 = vcombine.low %v8333_v3, %v9385_v52  ;;  %v1971_v3 = vrot.slane %v1969_v36, 4 }
  0xfc   : > { %2252 = vmatprep.subr.bf16.mxu1 %v8214_v59  ;;  %v8196_v59 = vld [vmem:[%s10318_s1 + $0x380] ss:$8 sps:$4 sm:$0xff]  }
  0xfe   : > { %1786 = vmatmul.mubr.bf16.gmra.mrb[12].mxu1 %v7031_v50  ;;  %v7036_v50 = vcombine.low %v8335_v49, %v9399_v4 }
  0xff   : > { %1795 = vmatprep.mubr.bf16.mxu1 %v8408_v2  ;;  %2253 = vmatpush1.bf16.msra.mxu1 %v8212_v58  ;;  %v8200_v58 = vld [vmem:[#allocation2 + $0x24] sm:$0xff]  }
 0x100   : > { %4319 = vmatmul.mubr.bf16.gmra.mrb[48].mxu0 %v7264_v9  ;;  %2254 = vmatprep.subr.bf16.mxu1 %v8224_v11  ;;  %v8216_v9 = vld [vmem:[%s10318_s1 + $0x3a0] ss:$8 sps:$4 sm:$0xff]   ;;  %v8228_v11 = vld [vmem:[%s10318_s1 + $0x3b4] ss:$8 sps:$4 sm:$0xff]  }
 0x101   : > { %4328 = vmatprep.mubr.bf16.mxu0 %v8408_v2 }
 0x103   : > { %2255 = vmatpush1.bf16.msra.mxu1 %v8222_v55  ;;  %v8237_v55 = vld [vmem:[%s10318_s1 + $0x3c4] ss:$8 sps:$4 sm:$0xff]  }
 0x104   : > { %2722 = vmatprep.subr.bf16.mxu1 %v8233_v24  ;;  %v8205_v24 = vld [vmem:[#allocation2 + $0x30] sm:$0xff]  }
 0x106   : > { %1796 = vmatmul.mubr.bf16.gmra.mrb[16].mxu1 %v7032_v7  ;;  %v9433_v7 = vld [vmem:[#allocation2 + $0x7c] sm:$0xf] }
 0x107   : > { %1805 = vmatprep.mubr.bf16.mxu1 %v8408_v2  ;;  %v7038_v57 = vcombine.low %v8339_v61, %v9433_v7  ;;  %v8257_v61 = vld [vmem:[%s10318_s1 + $0x1b4] ss:$8 sps:$4 sm:$0xff]  }
 0x108   : > { %4329 = vmatmul.mubr.bf16.gmra.mrb[52].mxu0 %v7265_v32  ;;  %v8210_v32 = vld [vmem:[#allocation2 + $0x3c] sm:$0xff]  }
 0x109   : > { %4338 = vmatprep.mubr.bf16.mxu0 %v8408_v2 }
 0x10e   : > { %1806 = vmatmul.mubr.bf16.gmra.mrb[20].mxu1 %v7033_v37  ;;  %v8343_v37 = vld [vmem:[#allocation2 + $0x90] sm:$0xf] }
 0x10f   : > { %1815 = vmatprep.mubr.bf16.mxu1 %v8408_v2  ;;  %v7040_v27 = vcombine.low %v8343_v37, %v9458_v29 }
 0x110   : > { %4339 = vmatmul.mubr.bf16.gmra.mrb[56].mxu0 %v7266_v63  ;;  %v8220_v63 = vld [vmem:[#allocation2 + $0x54] sm:$0xff]  }
 0x111   : > { %4348 = vmatprep.mubr.bf16.mxu0 %v8408_v2 }
 0x116   : > { %1816 = vmatmul.mubr.bf16.gmra.mrb[24].mxu1 %v7034_v45  ;;  %v1972_v45 = vrot.slane %v8345_v48, 5 }
 0x117   : > { %1825 = vmatprep.mubr.bf16.mxu1 %v8408_v2 }
 0x118   : > { %4349 = vmatmul.mubr.bf16.gmra.mrb[60].mxu0 %v7267_v16  ;;  %v7060_v16 = vrot.slane %v1916_v56, 9  ;;  %v1973_v17 = vsel %vm8691_vm13, %v1971_v3, %v1972_v45  ;;  %v8277_v56 = vld [vmem:[%s10318_s1 + $0x1e4] ss:$8 sps:$4 sm:$0xff]  }
 0x119   : > { %4681 = vmatprep.mubr.bf16.mxu0 %v8408_v2 }
 0x11a   : > { %v1970_v31 = vsel %vm8691_vm13, %v7060_v16, %v1969_v36  ;;  %v1920_v36 = vld [vmem:[#allocation2 + $0x30] sm:$0xe]  ;;  %v8349_v16 = vld [vmem:[#allocation2 + $0x38] sm:$0x1] }
 0x11b   : > { %v7092_v40 = vcombine.low %v1970_v31, %v1973_v17  ;;  %v7064_v48 = vrot.slane %v1920_v36, 9  ;;  %v2000_v3 = vrot.slane %v8349_v16, 5  ;;  %v8283_v31 = vld [vmem:[%s10318_s1 + $0x1f4] ss:$8 sps:$4 sm:$0xff]  }
 0x11c   : > { %v1921_v17 = vld [vmem:[#allocation2 + $0x3c] sm:$0xe] }
 0x11e   : > { %1826 = vmatmul.mubr.bf16.gmra.mrb[28].mxu1 %v7035_v54  ;;  %v8234_v54 = vld [vmem:[#allocation2 + $0x78] sm:$0xff]  }
 0x11f   : > { %1835 = vmatprep.mubr.bf16.mxu1 %v8408_v2 }
 0x120   : > { %4682 = vmatmul.mubr.bf16.vlgmr.msra.gmra.mrb[0].mxu0 %v8195_v47  ;;  %v1917_v47 = vld [vmem:[#allocation2 + $0xc] sm:$0xe] }
 0x121   : > { %5500 = vmatpush1.bf16.msra.mxu0 %v8196_v59  ;;  %4691 = vmatprep.mubr.bf16.mxu0 %v8408_v2  ;;  %v7061_v59 = vrot.slane %v1917_v47, 9 }
 0x122   : > { %5501 = vmatprep.subr.bf16.mxu0 %v8208_v60  ;;  %v1978_v60 = vrot.slane %v1976_v1, 4 }
 0x123   : > { %v1977_v42 = vsel %vm8691_vm13, %v7061_v59, %v1976_v1  ;;  %v2004_v1 = vrot.slane %v9371_v53, 5  ;;  %v7065_v59 = vrot.slane %v1921_v17, 9  ;;  %v8262_v17 = vld [vmem:[#allocation2 + $0xcc] sm:$0xff]  }
 0x125   : > { %5502 = vmatpush1.bf16.msra.mxu0 %v8206_v62  ;;  %v8346_v62 = vld [vmem:[#allocation2 + $0x14] sm:$0x1]  ;;  %v2006_v53 = vrot.slane %v2004_v1, 4 }
 0x126   : > { %1836 = vmatmul.mubr.bf16.gmra.mrb[32].mxu1 %v7036_v50  ;;  %5503 = vmatprep.subr.bf16.mxu0 %v8218_v8  ;;  %v1979_v49 = vrot.slane %v8346_v62, 5  ;;  %v8238_v50 = vld [vmem:[#allocation2 + $0x84] sm:$0xff]   ;;  %v8241_v8 = vld [vmem:[%s10318_s1 + $0x194] ss:$8 sps:$4 sm:$0xff]  }
 0x127   : > { %1845 = vmatprep.mubr.bf16.mxu1 %v8408_v2  ;;  %v8350_v62 = vld [vmem:[#allocation2 + $0x44] sm:$0x1] }
 0x128   : > { %4692 = vmatmul.mubr.bf16.gmra.mrb[4].mxu0 %v8200_v58  ;;  %v1980_v58 = vsel %vm8691_vm13, %v1978_v60, %v1979_v49  ;;  %v2007_v49 = vrot.slane %v8350_v62, 5 }
 0x129   : > { %4701 = vmatprep.mubr.bf16.mxu0 %v8408_v2  ;;  %5504 = vmatpush1.bf16.msra.mxu0 %v8216_v9  ;;  %v1983_v9 = vrot.slane %v9323_v44, 5  ;;  %v8247_v44 = vld [vmem:[%s10318_s1 + $0x1a0] ss:$8 sps:$4 sm:$0xff]  }
 0x12a   : > { %5505 = vmatprep.subr.bf16.mxu0 %v8228_v11  ;;  %v8239_v11 = vld [vmem:[%s10318_s1 + $0x190] ss:$8 sps:$4 sm:$0xff]  }
 0x12d   : > { %5506 = vmatpush1.bf16.msra.mxu0 %v8226_v12  ;;  %v1918_v12 = vld [vmem:[#allocation2 + $0x18] sm:$0xe] }
 0x12e   : > { %1846 = vmatmul.mubr.bf16.gmra.mrb[36].mxu1 %v7037_v20  ;;  %5507 = vmatprep.subr.bf16.mxu0 %v8237_v55  ;;  %v7093_v20 = vcombine.low %v1977_v42, %v1980_v58  ;;  %v7062_v55 = vrot.slane %v1918_v12, 9  ;;  %v4907_v42 = vld [vmem:[#allocation2 + $0x1c] sm:$0xf]  ;;  %v8351_v58 = vld [vmem:[%s10318_s1 + $0x204] ss:$8 sps:$4 sm:$0xff]   ;;  %v2011_v12 = vrot.slane %v9380_v46, 5 }
 0x12f   : > { %1855 = vmatprep.mubr.bf16.mxu1 %v8408_v2  ;;  %v8258_v46 = vld [vmem:[#allocation2 + $0xc0] sm:$0xff]  }
 0x130   : > { %4702 = vmatmul.mubr.bf16.gmra.mrb[8].mxu0 %v8205_v24  ;;  %v1985_v24 = vrot.slane %v1983_v9, 4 }
 0x131   : > { %4711 = vmatprep.mubr.bf16.mxu0 %v8408_v2  ;;  %5508 = vmatpush1.bf16.msra.mxu0 %v8235_v25  ;;  %v8347_v25 = vld [vmem:[#allocation2 + $0x20] sm:$0x1] }
 0x132   : > { %5509 = vmatprep.subr.bf16.mxu0 %v8245_v30  ;;  %v1986_v30 = vrot.slane %v8347_v25, 5  ;;  %v4968_v25 = vshrl.u32 %v4907_v42, 16 }
 0x135   : > { %5510 = vmatpush1.bf16.msra.mxu0 %v8243_v41  ;;  %v8242_v41 = vld [vmem:[#allocation2 + $0x90] sm:$0xff]  }
 0x136   : > { %1856 = vmatmul.mubr.bf16.gmra.mrb[40].mxu1 %v7038_v57  ;;  %5511 = vmatprep.subr.bf16.mxu0 %v8253_v10  ;;  %v1984_v57 = vsel %vm8691_vm13, %v7062_v55, %v1983_v9  ;;  %v1987_v10 = vsel %vm8691_vm13, %v1985_v24, %v1986_v30  ;;  %v2005_v9 = vsel %vm8691_vm13, %v7065_v59, %v2004_v1  ;;  %v1922_v55 = vld [vmem:[#allocation2 + $0x48] sm:$0xe]  ;;  %v4964_v24 = vshll.u32 %v4907_v42, 16 }
 0x137   : > { %1865 = vmatprep.mubr.bf16.mxu1 %v8408_v2  ;;  %v7094_v0 = vcombine.low %v1984_v57, %v1987_v10  ;;  %v2013_v57 = vrot.slane %v2011_v12, 4 }
 0x138   : > { %4712 = vmatmul.mubr.bf16.gmra.mrb[12].mxu0 %v8210_v32  ;;  %v1990_v32 = vrot.slane %v9341_v6, 5  ;;  %v8263_v6 = vld [vmem:[%s10318_s1 + $0x1c0] ss:$8 sps:$4 sm:$0xff]  }
 0x139   : > { %4721 = vmatprep.mubr.bf16.mxu0 %v8408_v2  ;;  %5512 = vmatpush1.bf16.msra.mxu0 %v8251_v14  ;;  %v8255_v14 = vld [vmem:[%s10318_s1 + $0x1b0] ss:$8 sps:$4 sm:$0xff]  }
 0x13a   : > { %5513 = vmatprep.subr.bf16.mxu0 %v8261_v22  ;;  %v1919_v22 = vld [vmem:[#allocation2 + $0x24] sm:$0xe] }
 0x13d   : > { %5514 = vmatpush1.bf16.msra.mxu0 %v8259_v26  ;;  %v8265_v26 = vld [vmem:[%s10318_s1 + $0x1c4] ss:$8 sps:$4 sm:$0xff]  }
 0x13e   : > { %1866 = vmatmul.mubr.bf16.gmra.mrb[44].mxu1 %v7039_v35  ;;  %6093 = vmatprep.subr.bf16.mxu0 %v8268_v28  ;;  %v7063_v35 = vrot.slane %v1919_v22, 9  ;;  %v1992_v28 = vrot.slane %v1990_v32, 4  ;;  %v4970_v22 = vrot.slane %v4968_v25, 4  ;;  %v8354_v25 = vld [vmem:[#allocation2 + $0x68] sm:$0x1] }
 0x13f   : > { %1875 = vmatprep.mubr.bf16.mxu1 %v8408_v2 }
 0x140   : > { %4722 = vmatmul.mubr.bf16.gmra.mrb[16].mxu0 %v8215_v39  ;;  %v8348_v39 = vld [vmem:[#allocation2 + $0x2c] sm:$0x1] }
 0x141   : > { %4731 = vmatprep.mubr.bf16.mxu0 %v8408_v2  ;;  %v1993_v37 = vrot.slane %v8348_v39, 5 }
 0x146   : > { %1876 = vmatmul.mubr.bf16.gmra.mrb[48].mxu1 %v7040_v27  ;;  %v8246_v27 = vld [vmem:[#allocation2 + $0x9c] sm:$0xff]  }
 0x147   : > { %1885 = vmatprep.mubr.bf16.mxu1 %v8408_v2 }
 0x148   : > { %4732 = vmatmul.mubr.bf16.gmra.mrb[20].mxu0 %v8220_v63  ;;  %v8271_v63 = vld [vmem:[%s10318_s1 + $0x1d4] ss:$8 sps:$4 sm:$0xff]  }
 0x149   : > { %4741 = vmatprep.mubr.bf16.mxu0 %v8408_v2 }
 0x14e   : > { %1886 = vmatmul.mubr.bf16.gmra.mrb[52].mxu1 %v7041_v18  ;;  %v1991_v18 = vsel %vm8691_vm13, %v7063_v35, %v1990_v32  ;;  %v4910_v35 = vld [vmem:[#allocation2 + $0x28] sm:$0xf] }
 0x14f   : > { %1895 = vmatprep.mubr.bf16.mxu1 %v8408_v2  ;;  %v4992_v36 = vshrl.u32 %v4910_v35, 16 }
 0x150   : > { %4742 = vmatmul.mubr.bf16.gmra.mrb[24].mxu0 %v8225_v23  ;;  %v1994_v23 = vsel %vm8691_vm13, %v1992_v28, %v1993_v37  ;;  %v2018_v37 = vrot.slane %v9385_v52, 5 }
 0x151   : > { %4751 = vmatprep.mubr.bf16.mxu0 %v8408_v2 }
 0x156   : > { %1896 = vmatmul.mubr.bf16.gmra.mrb[56].mxu1 %v7042_v21  ;;  %v1997_v21 = vrot.slane %v9362_v51, 5  ;;  %v8275_v51 = vld [vmem:[%s10318_s1 + $0x1e0] ss:$8 sps:$4 sm:$0xff]  }
 0x157   : > { %1905 = vmatprep.mubr.bf16.mxu1 %v8408_v2 }
 0x158   : > { %4752 = vmatmul.mubr.bf16.gmra.mrb[28].mxu0 %v8230_v33  ;;  %v8269_v33 = vld [vmem:[%s10318_s1 + $0x1d0] ss:$8 sps:$4 sm:$0xff]   ;;  %v1999_v45 = vrot.slane %v1997_v21, 4  ;;  %v1998_v47 = vsel %vm8691_vm13, %v7064_v48, %v1997_v21  ;;  %v2020_v48 = vrot.slane %v2018_v37, 4 }
 0x159   : > { %4761 = vmatprep.mubr.bf16.mxu0 %v8408_v2 }
 0x15e   : > { %1906 = vmatmul.mubr.bf16.gmra.mrb[60].mxu1 %v7043_v5  ;;  %v7095_v5 = vcombine.low %v1991_v18, %v1994_v23 }
 0x15f   : > { %2272 = vmatprep.mubr.bf16.mxu1 %v8408_v2 }
 0x160   : > { %4762 = vmatmul.mubr.bf16.gmra.mrb[32].mxu0 %v8234_v54  ;;  %v8250_v54 = vld [vmem:[#allocation2 + $0xa8] sm:$0xff]  }
 0x161   : > { %4771 = vmatprep.mubr.bf16.mxu0 %v8408_v2 }
 0x166   : > { %2273 = vmatmul.mubr.bf16.vlgmr.msra.gmra.mrb[0].mxu1 %v7092_v40  ;;  %v2001_v40 = vsel %vm8691_vm13, %v1999_v45, %v2000_v3  ;;  %v8353_v45 = vld [vmem:[#allocation2 + $0x5c] sm:$0x1] }
 0x167   : > { %2723 = vmatpush1.bf16.msra.mxu1 %v8231_v38  ;;  %2282 = vmatprep.mubr.bf16.mxu1 %v8408_v2  ;;  %v8281_v38 = vld [vmem:[%s10318_s1 + $0x1f0] ss:$8 sps:$4 sm:$0xff]   ;;  %v7096_v60 = vcombine.low %v1998_v47, %v2001_v40  ;;  %v2021_v16 = vrot.slane %v8353_v45, 5  ;;  %v4994_v47 = vrot.slane %v4992_v36, 4  ;;  %v9573_v40 = vld [vmem:[#allocation2 + $0x2c] sm:$0x1] }
 0x168   : > { %4772 = vmatmul.mubr.bf16.gmra.mrb[36].mxu0 %v8238_v50  ;;  %2724 = vmatprep.subr.bf16.mxu1 %v8241_v8  ;;  %v4906_v50 = vld [vmem:[#allocation2 + $0x18] sm:$0xf] }
 0x169   : > { %4781 = vmatprep.mubr.bf16.mxu0 %v8408_v2  ;;  %v8254_v8 = vld [vmem:[#allocation2 + $0xb4] sm:$0xff]   ;;  %v2022_v62 = vsel %vm8691_vm13, %v2020_v48, %v2021_v16 }
 0x16a   : > { %v8272_v16 = vld [vmem:[%s10318_s1 + $0x410] ss:$8 sps:$4 sm:$0xff]  }
 0x16b   : > { %2725 = vmatpush1.bf16.msra.mxu1 %v8239_v11  ;;  %v2008_v11 = vsel %vm8691_vm13, %v2006_v53, %v2007_v49  ;;  %v4913_v53 = vld [vmem:[#allocation2 + $0x34] sm:$0xf]  ;;  %v1924_v49 = vld [vmem:[#allocation2 + $0x60] sm:$0xe] }
 0x16c   : > { %2726 = vmatprep.subr.bf16.mxu1 %v8249_v15  ;;  %v4955_v15 = vshrl.u32 %v4906_v50, 16  ;;  %v7097_v30 = vcombine.low %v2005_v9, %v2008_v11  ;;  %v4998_v9 = vshll.u32 %v9573_v40, 16 }
 0x16e   : > { %2283 = vmatmul.mubr.bf16.gmra.mrb[4].mxu1 %v7093_v20  ;;  %v4958_v20 = vshll.u32 %v4906_v50, 16  ;;  %v4957_v10 = vrot.slane %v4955_v15, 4  ;;  %v5016_v15 = vshrl.u32 %v4913_v53, 16 }
 0x16f   : > { %2292 = vmatprep.mubr.bf16.mxu1 %v8408_v2  ;;  %2727 = vmatpush1.bf16.msra.mxu1 %v8247_v44  ;;  %v8352_v44 = vld [vmem:[#allocation2 + $0x50] sm:$0x1] }
 0x170   : > { %4782 = vmatmul.mubr.bf16.gmra.mrb[40].mxu0 %v8242_v41  ;;  %2728 = vmatprep.subr.bf16.mxu1 %v8257_v61  ;;  %v2014_v41 = vrot.slane %v8352_v44, 5  ;;  %v7066_v61 = vrot.slane %v1922_v55, 9  ;;  %v4960_v32 = vrot.slane %v4958_v20, 5  ;;  %v7068_v55 = vrot.slane %v1924_v49, 9 }
 0x171   : > { %4791 = vmatprep.mubr.bf16.mxu0 %v8408_v2 }
 0x172   : > { %v2012_v28 = vsel %vm8691_vm13, %v7066_v61, %v2011_v12  ;;  %v2015_v39 = vsel %vm8691_vm13, %v2013_v57, %v2014_v41  ;;  %v5012_v12 = vshll.u32 %v4913_v53, 16  ;;  %v2032_v41 = vrot.slane %v9416_v19, 5  ;;  %v1925_v57 = vld [vmem:[#allocation2 + $0x6c] sm:$0xe] }
 0x173   : > { %2729 = vmatpush1.bf16.msra.mxu1 %v8255_v14  ;;  %v4966_v14 = vrot.slane %v4964_v24, 5 }
 0x174   : > { %2730 = vmatprep.subr.bf16.mxu1 %v8265_v26  ;;  %v4908_v26 = vld [vmem:[#allocation2 + $0x20] sm:$0x1] }
 0x175   : > { %v4974_v18 = vshll.u32 %v4908_v26, 16  ;;  %v9592_v26 = vrot.slane %v5012_v12, 5  ;;  %v1926_v12 = vld [vmem:[#allocation2 + $0x78] sm:$0xe] }
 0x176   : > { %2293 = vmatmul.mubr.bf16.gmra.mrb[8].mxu1 %v7094_v0  ;;  %v4909_v0 = vld [vmem:[#allocation2 + $0x24] sm:$0xf] }
 0x177   : > { %2302 = vmatprep.mubr.bf16.mxu1 %v8408_v2  ;;  %2731 = vmatpush1.bf16.msra.mxu1 %v8263_v6  ;;  %v4961_v6 = vor.u32 %v4960_v32, %v4957_v10  ;;  %v4979_v23 = vshrl.u32 %v4909_v0, 16  ;;  %v4982_v21 = vshll.u32 %v4909_v0, 16  ;;  %v5000_v32 = vrot.slane %v4998_v9, 5  ;;  %v9634_v9 = vld [vmem:[#allocation2 + $0x44] sm:$0x1] }
 0x178   : > { %4792 = vmatmul.mubr.bf16.gmra.mrb[44].mxu0 %v8246_v27  ;;  %2732 = vmatprep.subr.bf16.mxu1 %v8271_v63  ;;  %v1923_v27 = vld [vmem:[#allocation2 + $0x54] sm:$0xe]  ;;  %v4971_v63 = vor.u32 %v4970_v22, %v4966_v14  ;;  %v5018_v0 = vrot.slane %v5016_v15, 4 }
 0x179   : > { %4801 = vmatprep.mubr.bf16.mxu0 %v8408_v2  ;;  %v4962_v3 = vrot.slane %v4961_v6, 4  ;;  %v9603_v6 = vld [vmem:[#allocation2 + $0x40] sm:$0xf] }
 0x17a   : > { %v4972_v52 = vrot.slane %v4971_v63, 4  ;;  %v2034_v63 = vrot.slane %v2032_v41, 4  ;;  %v5019_v48 = vor.u32 %v5018_v0, %v9592_v26 }
 0x17b   : > { %2733 = vmatpush1.bf16.msra.mxu1 %v8269_v33  ;;  %v4988_v33 = vshll.u32 %v4910_v35, 16  ;;  %v4967_v50 = vsel %vm8602_vm6, %v4962_v3, %v4966_v14  ;;  %v4915_v35 = vld [vmem:[#allocation2 + $0x3c] sm:$0xf]  ;;  %v5036_v3 = vshll.u32 %v9603_v6, 16 }
 0x17c   : > { %2734 = vmatprep.subr.bf16.mxu1 %v8277_v56  ;;  %v7098_v56 = vcombine.low %v2012_v28, %v2015_v39  ;;  %v9598_v39 = vld [vmem:[#allocation2 + $0x38] sm:$0x1]  ;;  %v5020_v49 = vrot.slane %v5019_v48, 4  ;;  %v8295_v48 = vld [vmem:[%s10318_s1 + $0x454] ss:$8 sps:$4 sm:$0xff]  }
 0x17d   : > { %v9571_v1 = vrot.slane %v4988_v33, 5  ;;  %v5022_v45 = vshll.u32 %v9598_v39, 16 }
 0x17e   : > { %2303 = vmatmul.mubr.bf16.gmra.mrb[12].mxu1 %v7095_v5  ;;  %v7067_v5 = vrot.slane %v1923_v27, 9  ;;  %v7069_v27 = vrot.slane %v1925_v57, 9  ;;  %v5046_v57 = vshll.u32 %v9634_v9, 16 }
 0x17f   : > { %2312 = vmatprep.mubr.bf16.mxu1 %v8408_v2  ;;  %2735 = vmatpush1.bf16.msra.mxu1 %v8275_v51  ;;  %v4976_v51 = vrot.slane %v4974_v18, 5  ;;  %v8355_v18 = vld [vmem:[#allocation2 + $0x74] sm:$0x1] }
 0x180   : > { %4802 = vmatmul.mubr.bf16.gmra.mrb[48].mxu0 %v8250_v54  ;;  %2736 = vmatprep.subr.bf16.mxu1 %v8283_v31  ;;  %v4981_v54 = vrot.slane %v4979_v23, 4  ;;  %v4984_v31 = vrot.slane %v4982_v21, 5  ;;  %v2019_v59 = vsel %vm8691_vm13, %v7067_v5, %v2018_v37  ;;  %v8274_v37 = vld [vmem:[%s10318_s1 + $0x414] ss:$8 sps:$4 sm:$0xff]   ;;  %v2035_v23 = vrot.slane %v8355_v18, 5 }
 0x181   : > { %4811 = vmatprep.mubr.bf16.mxu0 %v8408_v2  ;;  %v7099_v20 = vcombine.low %v2019_v59, %v2022_v62  ;;  %v5030_v5 = vshll.u32 %v4915_v35, 16  ;;  %v9627_v62 = vld [vmem:[#allocation2 + $0x4c] sm:$0xf]  ;;  %v5048_v18 = vrot.slane %v5046_v57, 5  ;;  %v1928_v57 = vld [vmem:[#allocation2 + $0x90] sm:$0xe] }
 0x182   : > { %v4985_v42 = vor.u32 %v4984_v31, %v4981_v54  ;;  %v8280_v54 = vld [vmem:[%s10318_s1 + $0x424] ss:$8 sps:$4 sm:$0xff]   ;;  %v2033_v31 = vsel %vm8691_vm13, %v7069_v27, %v2032_v41  ;;  %v5060_v15 = vshll.u32 %v9627_v62, 16  ;;  %v4921_v27 = vld [vmem:[#allocation2 + $0x54] sm:$0xf] }
 0x183   : > { %2737 = vmatpush1.bf16.msra.mxu1 %v8281_v38  ;;  %v4912_v38 = vld [vmem:[#allocation2 + $0x30] sm:$0xf]  ;;  %v5032_v53 = vrot.slane %v5030_v5, 5 }
 0x184   : > { %7514 = vmatprep.subr.bf16.mxu1 %v8351_v58  ;;  %v4995_v58 = vor.u32 %v4994_v47, %v9571_v1  ;;  %v5006_v11 = vshll.u32 %v4912_v38, 16  ;;  %v4986_v61 = vrot.slane %v4985_v42, 4  ;;  %v4918_v47 = vld [vmem:[#allocation2 + $0x48] sm:$0xf]  ;;  %v9656_v0 = vrot.slane %v5060_v15, 5 }
 0x185   : > { %v4924_v15 = vld [vmem:[#allocation2 + $0x60] sm:$0xf] }
 0x186   : > { %2313 = vmatmul.mubr.bf16.gmra.mrb[16].mxu1 %v7096_v60  ;;  %v2025_v60 = vrot.slane %v9399_v4, 5  ;;  %v5003_v4 = vshrl.u32 %v4912_v38, 16  ;;  %v4996_v10 = vrot.slane %v4995_v58, 4  ;;  %v5008_v22 = vrot.slane %v5006_v11, 5  ;;  %v8278_v58 = vld [vmem:[%s10318_s1 + $0x420] ss:$8 sps:$4 sm:$0xff]  }
 0x187   : > { %2322 = vmatprep.mubr.bf16.mxu1 %v8408_v2  ;;  %v4991_v21 = vsel %vm8602_vm6, %v4986_v61, %v9571_v1  ;;  %v2039_v38 = vrot.slane %v9433_v7, 5  ;;  %v5054_v7 = vshll.u32 %v4918_v47, 16  ;;  %v8286_v11 = vld [vmem:[%s10318_s1 + $0x434] ss:$8 sps:$4 sm:$0xff]  }
 0x188   : > { %4812 = vmatmul.mubr.bf16.gmra.mrb[52].mxu0 %v8254_v8  ;;  %v4977_v8 = vsel %vm8602_vm6, %v4972_v52, %v4976_v51  ;;  %v2027_v24 = vrot.slane %v2025_v60, 4  ;;  %v5005_v14 = vrot.slane %v5003_v4, 4  ;;  %v2026_v28 = vsel %vm8691_vm13, %v7068_v55, %v2025_v60 }
 0x189   : > { %4821 = vmatprep.mubr.bf16.mxu0 %v8408_v2  ;;  %v7348_v44 = vcombine.low %v4967_v50, %v4977_v8  ;;  %v5001_v33 = vsel %vm8602_vm6, %v4996_v10, %v5000_v32  ;;  %v5040_v52 = vshrl.u32 %v9603_v6, 16  ;;  %v5024_v50 = vrot.slane %v5022_v45, 5  ;;  %v8284_v10 = vld [vmem:[%s10318_s1 + $0x430] ss:$8 sps:$4 sm:$0xff]   ;;  %v1927_v45 = vld [vmem:[#allocation2 + $0x84] sm:$0xe] }
 0x18a   : > { %v5009_v36 = vor.u32 %v5008_v22, %v5005_v14  ;;  %v7349_v1 = vcombine.low %v4991_v21, %v5001_v33  ;;  %v9629_v8 = vrot.slane %v5036_v3, 5  ;;  %v5051_v4 = vshrl.u32 %v4918_v47, 16  ;;  %v8288_v21 = vld [vmem:[%s10318_s1 + $0x440] ss:$8 sps:$4 sm:$0xff]   ;;  %v8293_v47 = vld [vmem:[%s10318_s1 + $0x450] ss:$8 sps:$4 sm:$0xff]  }
 0x18b   : > { %v5042_v42 = vrot.slane %v5040_v52, 4  ;;  %v5025_v41 = vsel %vm8602_vm6, %v5020_v49, %v5024_v50  ;;  %v7070_v32 = vrot.slane %v1926_v12, 9  ;;  %v2041_v14 = vrot.slane %v2039_v38, 4  ;;  %v8300_v50 = vld [vmem:[%s10318_s1 + $0x464] ss:$8 sps:$4 sm:$0xff]  }
 0x18c   : > { %v5010_v59 = vrot.slane %v5009_v36, 4  ;;  %v5053_v22 = vrot.slane %v5051_v4, 4  ;;  %v5075_v52 = vshrl.u32 %v4921_v27, 16 }
 0x18d   : > { %v5043_v61 = vor.u32 %v5042_v42, %v9629_v8  ;;  %v2040_v33 = vsel %vm8691_vm13, %v7070_v32, %v2039_v38  ;;  %v7071_v38 = vrot.slane %v1927_v45, 9 }
 0x18e   : > { %2323 = vmatmul.mubr.bf16.gmra.mrb[20].mxu1 %v7097_v30  ;;  %v2028_v30 = vrot.slane %v8354_v25, 5 }
 0x18f   : > { %2332 = vmatprep.mubr.bf16.mxu1 %v8408_v2 }
 0x190   : > { %4822 = vmatmul.mubr.bf16.gmra.mrb[56].mxu0 %v8258_v46  ;;  %v8266_v46 = vld [vmem:[%s10318_s1 + $0x400] ss:$8 sps:$4 sm:$0xff]   ;;  %v2029_v19 = vsel %vm8691_vm13, %v2027_v24, %v2028_v30 }
 0x191   : > { %4831 = vmatprep.mubr.bf16.mxu0 %v8408_v2  ;;  %v7100_v51 = vcombine.low %v2026_v28, %v2029_v19  ;;  %v8356_v24 = vld [vmem:[#allocation2 + $0x80] sm:$0x1] }
 0x192   : > { %v2042_v25 = vrot.slane %v8356_v24, 5  ;;  %v8298_v24 = vld [vmem:[%s10318_s1 + $0x460] ss:$8 sps:$4 sm:$0xff]  }
 0x194   : > { %v2043_v36 = vsel %vm8691_vm13, %v2041_v14, %v2042_v25  ;;  %v5099_v14 = vshrl.u32 %v4924_v15, 16 }
 0x196   : > { %2333 = vmatmul.mubr.bf16.gmra.mrb[24].mxu1 %v7098_v56  ;;  %v5027_v56 = vshrl.u32 %v4915_v35, 16 }
 0x197   : > { %2342 = vmatprep.mubr.bf16.mxu1 %v8408_v2 }
 0x198   : > { %4832 = vmatmul.mubr.bf16.gmra.mrb[60].mxu0 %v8262_v17  ;;  %v2036_v17 = vsel %vm8691_vm13, %v2034_v63, %v2035_v23  ;;  %v5029_v60 = vrot.slane %v5027_v56, 4  ;;  %v5044_v63 = vrot.slane %v5043_v61, 4  ;;  %v9660_v23 = vld [vmem:[#allocation2 + $0x58] sm:$0xf]  ;;  %v2046_v56 = vrot.slane %v9450_v34, 5 }
 0x199   : > { %5531 = vmatprep.mubr.bf16.mxu0 %v8408_v2  ;;  %v7101_v55 = vcombine.low %v2033_v31, %v2036_v17  ;;  %v5088_v34 = vshrl.u32 %v9660_v23, 16  ;;  %v7102_v31 = vcombine.low %v2040_v33, %v2043_v36  ;;  %v8305_v61 = vld [vmem:[%s10318_s1 + $0x474] ss:$8 sps:$4 sm:$0xff]   ;;  %v5101_v36 = vrot.slane %v5099_v14, 4 }
 0x19a   : > { %v5033_v30 = vor.u32 %v5032_v53, %v5029_v60  ;;  %v8357_v60 = vld [vmem:[#allocation2 + $0x8c] sm:$0x1]  ;;  %v2047_v25 = vsel %vm8691_vm13, %v7071_v38, %v2046_v56 }
 0x19b   : > { %v2049_v53 = vrot.slane %v8357_v60, 5  ;;  %v5090_v12 = vrot.slane %v5088_v34, 4  ;;  %v9725_v34 = vld [vmem:[#allocation2 + $0x70] sm:$0xf] }
 0x19c   : > { %v5034_v19 = vrot.slane %v5033_v30, 4 }
 0x19e   : > { %2343 = vmatmul.mubr.bf16.gmra.mrb[28].mxu1 %v7099_v20  ;;  %v5064_v20 = vshrl.u32 %v9627_v62, 16  ;;  %v5039_v17 = vsel %vm8602_vm6, %v5034_v19, %v9629_v8  ;;  %v7072_v19 = vrot.slane %v1928_v57, 9  ;;  %v9742_v57 = vld [vmem:[#allocation2 + $0x7c] sm:$0xf] }
 0x19f   : > { %2352 = vmatprep.mubr.bf16.mxu1 %v8408_v2 }
 0x1a0   : > { %5532 = vmatmul.mubr.bf16.vlgmr.msra.gmra.mrb[0].mxu0 %v7348_v44  ;;  %v5015_v44 = vsel %vm8602_vm6, %v5010_v59, %v9592_v26  ;;  %v8290_v26 = vld [vmem:[%s10318_s1 + $0x444] ss:$8 sps:$4 sm:$0xff]   ;;  %v5066_v35 = vrot.slane %v5064_v20, 4  ;;  %v2048_v59 = vrot.slane %v2046_v56, 4  ;;  %v9692_v20 = vld [vmem:[#allocation2 + $0x5c] sm:$0x1] }
 0x1a1   : > { %6094 = vmatpush1.bf16.msra.mxu0 %v8266_v46  ;;  %5541 = vmatprep.mubr.bf16.mxu0 %v8408_v2  ;;  %v5056_v46 = vrot.slane %v5054_v7, 5  ;;  %v7350_v28 = vcombine.low %v5015_v44, %v5025_v41  ;;  %v2053_v44 = vrot.slane %v9458_v29, 5 }
 0x1a2   : > { %6095 = vmatprep.subr.bf16.mxu0 %v8274_v37  ;;  %v9658_v37 = vld [vmem:[#allocation2 + $0x50] sm:$0x1]  ;;  %v2050_v30 = vsel %vm8691_vm13, %v2048_v59, %v2049_v53 }
 0x1a3   : > { %v5057_v5 = vor.u32 %v5056_v46, %v5053_v22  ;;  %v5070_v3 = vshll.u32 %v9658_v37, 16  ;;  %v5102_v22 = vshll.u32 %v4924_v15, 16  ;;  %v5094_v46 = vshll.u32 %v9692_v20, 16  ;;  %v8361_v15 = vld [vmem:[#allocation2 + $0xac] sm:$0xf] }
 0x1a5   : > { %6096 = vmatpush1.bf16.msra.mxu0 %v8272_v16  ;;  %v5067_v16 = vor.u32 %v5066_v35, %v9656_v0  ;;  %v5058_v49 = vrot.slane %v5057_v5, 4  ;;  %v5072_v8 = vrot.slane %v5070_v3, 5  ;;  %v8303_v35 = vld [vmem:[%s10318_s1 + $0x470] ss:$8 sps:$4 sm:$0xff]   ;;  %v5104_v56 = vrot.slane %v5102_v22, 5 }
 0x1a6   : > { %2353 = vmatmul.mubr.bf16.gmra.mrb[32].mxu1 %v7100_v51  ;;  %6097 = vmatprep.subr.bf16.mxu0 %v8280_v54  ;;  %v5078_v51 = vshll.u32 %v4921_v27, 16  ;;  %v5084_v54 = vshll.u32 %v9660_v23, 16  ;;  %v2055_v27 = vrot.slane %v2053_v44, 4  ;;  %v9723_v3 = vld [vmem:[#allocation2 + $0x68] sm:$0x1] }
 0x1a7   : > { %2362 = vmatprep.mubr.bf16.mxu1 %v8408_v2  ;;  %v5068_v42 = vrot.slane %v5067_v16, 4  ;;  %v5063_v41 = vsel %vm8602_vm6, %v5058_v49, %v9656_v0  ;;  %v5118_v53 = vshll.u32 %v9723_v3, 16 }
 0x1a8   : > { %5542 = vmatmul.mubr.bf16.gmra.mrb[4].mxu0 %v7349_v1  ;;  %v5049_v1 = vsel %vm8602_vm6, %v5044_v63, %v5048_v18  ;;  %v5080_v4 = vrot.slane %v5078_v51, 5  ;;  %v8358_v63 = vld [vmem:[#allocation2 + $0x98] sm:$0x1] }
 0x1a9   : > { %5551 = vmatprep.mubr.bf16.mxu0 %v8408_v2  ;;  %6098 = vmatpush1.bf16.msra.mxu0 %v8278_v58  ;;  %v5077_v58 = vrot.slane %v5075_v52, 4  ;;  %v7351_v7 = vcombine.low %v5039_v17, %v5049_v1  ;;  %v2056_v18 = vrot.slane %v8358_v63, 5  ;;  %v8359_v52 = vld [vmem:[#allocation2 + $0xa0] sm:$0xf]  ;;  %v1929_v1 = vld [vmem:[#allocation2 + $0x9c] sm:$0xe] }
 0x1aa   : > { %6099 = vmatprep.subr.bf16.mxu0 %v8286_v11  ;;  %v9690_v11 = vrot.slane %v5084_v54, 5  ;;  %v2060_v51 = vrot.slane %v8359_v52, 5  ;;  %v4927_v54 = vld [vmem:[#allocation2 + $0x6c] sm:$0xf] }
 0x1ab   : > { %v5081_v32 = vor.u32 %v5080_v4, %v5077_v58  ;;  %v2057_v17 = vsel %vm8691_vm13, %v2055_v27, %v2056_v18  ;;  %v5123_v49 = vshrl.u32 %v4927_v54, 16  ;;  %v7073_v4 = vrot.slane %v1929_v1, 9 }
 0x1ac   : > { %v5091_v29 = vor.u32 %v5090_v12, %v9690_v11  ;;  %v8360_v12 = vld [vmem:[#allocation2 + $0xa4] sm:$0x1]  ;;  %v5160_v27 = vshrl.u32 %v9742_v57, 16 }
 0x1ad   : > { %6100 = vmatpush1.bf16.msra.mxu0 %v8284_v10  ;;  %v5073_v10 = vsel %vm8602_vm6, %v5068_v42, %v5072_v8  ;;  %v5082_v33 = vrot.slane %v5081_v32, 4  ;;  %v5132_v42 = vshll.u32 %v9725_v34, 16  ;;  %v5136_v8 = vshrl.u32 %v9725_v34, 16 }
 0x1ae   : > { %2363 = vmatmul.mubr.bf16.gmra.mrb[36].mxu1 %v7101_v55  ;;  %6101 = vmatprep.subr.bf16.mxu0 %v8290_v26  ;;  %v9694_v55 = vld [vmem:[#allocation2 + $0x64] sm:$0xf]  ;;  %v5092_v5 = vrot.slane %v5091_v29, 4  ;;  %v5125_v32 = vrot.slane %v5123_v49, 4  ;;  %v5162_v1 = vrot.slane %v5160_v27, 4 }
 0x1af   : > { %2372 = vmatprep.mubr.bf16.mxu1 %v8408_v2  ;;  %v5108_v26 = vshll.u32 %v9694_v55, 16  ;;  %v5112_v0 = vshrl.u32 %v9694_v55, 16  ;;  %v5087_v38 = vsel %vm8602_vm6, %v5082_v33, %v9690_v11  ;;  %v2063_v11 = vrot.slane %v8360_v12, 5  ;;  %v9769_v49 = vld [vmem:[#allocation2 + $0x88] sm:$0xf] }
 0x1b0   : > { %5552 = vmatmul.mubr.bf16.gmra.mrb[8].mxu0 %v7350_v28  ;;  %v7103_v28 = vcombine.low %v2047_v25, %v2050_v30  ;;  %v9744_v22 = vrot.slane %v5132_v42, 5  ;;  %v5138_v29 = vrot.slane %v5136_v8, 4 }
 0x1b1   : > { %5561 = vmatprep.mubr.bf16.mxu0 %v8408_v2  ;;  %6102 = vmatpush1.bf16.msra.mxu0 %v8288_v21  ;;  %v7352_v21 = vcombine.low %v5063_v41, %v5073_v10  ;;  %v9721_v45 = vrot.slane %v5108_v26, 5  ;;  %v5114_v16 = vrot.slane %v5112_v0, 4  ;;  %v5120_v41 = vrot.slane %v5118_v53, 5  ;;  %v1930_v10 = vld [vmem:[#allocation2 + $0xa8] sm:$0xe] }
 0x1b2   : > { %6103 = vmatprep.subr.bf16.mxu0 %v8295_v48  ;;  %v5096_v48 = vrot.slane %v5094_v46, 5  ;;  %v2061_v46 = vsel %vm8691_vm13, %v7073_v4, %v2060_v51  ;;  %v9750_v0 = vld [vmem:[#allocation2 + $0x74] sm:$0x1]  ;;  %v7074_v63 = vrot.slane %v1930_v10, 9  ;;  %v1931_v4 = vld [vmem:[#allocation2 + $0xb4] sm:$0xe] }
 0x1b3   : > { %v5115_v60 = vor.u32 %v5114_v16, %v9721_v45  ;;  %v5142_v16 = vshll.u32 %v9750_v0, 16 }
 0x1b4   : > { %v5097_v59 = vsel %vm8602_vm6, %v5092_v5, %v5096_v48  ;;  %v5139_v48 = vor.u32 %v5138_v29, %v9744_v22  ;;  %v8365_v29 = vld [vmem:[#allocation2 + $0xbc] sm:$0x1] }
 0x1b5   : > { %6104 = vmatpush1.bf16.msra.mxu0 %v8293_v47  ;;  %v5105_v47 = vor.u32 %v5104_v56, %v5101_v36  ;;  %v7353_v30 = vcombine.low %v5087_v38, %v5097_v59 }
 0x1b6   : > { %2373 = vmatmul.mubr.bf16.gmra.mrb[40].mxu1 %v7102_v31  ;;  %6105 = vmatprep.subr.bf16.mxu0 %v8300_v50  ;;  %v2054_v31 = vsel %vm8691_vm13, %v7072_v19, %v2053_v44  ;;  %v5126_v50 = vshll.u32 %v4927_v54, 16  ;;  %v5116_v44 = vrot.slane %v5115_v60, 4  ;;  %v5156_v19 = vshll.u32 %v9742_v57, 16 }
 0x1b7   : > { %2382 = vmatprep.mubr.bf16.mxu1 %v8408_v2  ;;  %v7104_v58 = vcombine.low %v2054_v31, %v2057_v17  ;;  %v5106_v25 = vrot.slane %v5105_v47, 4  ;;  %v4933_v47 = vld [vmem:[#allocation2 + $0x84] sm:$0xf]  ;;  %v5140_v8 = vrot.slane %v5139_v48, 4 }
 0x1b8   : > { %5562 = vmatmul.mubr.bf16.gmra.mrb[12].mxu0 %v7351_v7  ;;  %v2062_v7 = vrot.slane %v2060_v51, 4  ;;  %v5128_v14 = vrot.slane %v5126_v50, 5  ;;  %v5121_v56 = vsel %vm8602_vm6, %v5116_v44, %v5120_v41  ;;  %v9763_v51 = vld [vmem:[#allocation2 + $0x80] sm:$0x1]  ;;  %v9765_v17 = vrot.slane %v5156_v19, 5 }
 0x1b9   : > { %5571 = vmatprep.mubr.bf16.mxu0 %v8408_v2  ;;  %6106 = vmatpush1.bf16.msra.mxu0 %v8298_v24  ;;  %v2067_v24 = vrot.slane %v8361_v15, 5  ;;  %v5111_v36 = vsel %vm8602_vm6, %v5106_v25, %v9721_v45  ;;  %v8363_v45 = vld [vmem:[#allocation2 + $0x70] sm:$0xf]  ;;  %v5171_v15 = vshrl.u32 %v4933_v47, 16  ;;  %v5174_v25 = vshll.u32 %v4933_v47, 16 }
 0x1ba   : > { %6107 = vmatprep.subr.bf16.mxu0 %v8305_v61  ;;  %v4930_v61 = vld [vmem:[#allocation2 + $0x78] sm:$0xf]  ;;  %v2064_v26 = vsel %vm8691_vm13, %v2062_v7, %v2063_v11  ;;  %v5129_v5 = vor.u32 %v5128_v14, %v5125_v32  ;;  %v3229_v38 = vshll.u32 %v8363_v45, 16  ;;  %v3233_v59 = vshrl.u32 %v8363_v45, 16 }
 0x1bb   : > { %v2069_v18 = vrot.slane %v2067_v24, 4  ;;  %v7105_v52 = vcombine.low %v2061_v46, %v2064_v26  ;;  %v2068_v60 = vsel %vm8691_vm13, %v7074_v63, %v2067_v24  ;;  %v7354_v53 = vcombine.low %v5111_v36, %v5121_v56  ;;  %v8364_v7 = vld [vmem:[#allocation2 + $0xb8] sm:$0xf] }
 0x1bc   : > { %v5130_v42 = vrot.slane %v5129_v5, 4  ;;  %v2074_v12 = vrot.slane %v8364_v7, 5  ;;  %v5166_v11 = vshll.u32 %v9763_v51, 16  ;;  %v5180_v44 = vshll.u32 %v9769_v49, 16  ;;  %v9786_v5 = vld [vmem:[#allocation2 + $0x8c] sm:$0x1] }
 0x1bd   : > { %6108 = vmatpush1.bf16.msra.mxu0 %v8303_v35  ;;  %v5147_v35 = vshrl.u32 %v4930_v61, 16  ;;  %v5184_v41 = vshrl.u32 %v9769_v49, 16  ;;  %v3235_v10 = vrot.slane %v3233_v59, 4  ;;  %v7075_v14 = vrot.slane %v1931_v4, 9 }
 0x1be   : > { %2383 = vmatmul.mubr.bf16.gmra.mrb[44].mxu1 %v7103_v28  ;;  %v5150_v28 = vshll.u32 %v4930_v61, 16  ;;  %v9778_v61 = vrot.slane %v3229_v38, 5  ;;  %v2077_v46 = vrot.slane %v8365_v29, 5  ;;  %v5135_v26 = vsel %vm8602_vm6, %v5130_v42, %v9744_v22  ;;  %v8366_v22 = vld [vmem:[#allocation2 + $0x74] sm:$0x1] }
 0x1bf   : > { %2392 = vmatprep.mubr.bf16.mxu1 %v8408_v2  ;;  %v5149_v54 = vrot.slane %v5147_v35, 4  ;;  %v5168_v19 = vrot.slane %v5166_v11, 5  ;;  %v5173_v27 = vrot.slane %v5171_v15, 4  ;;  %v5176_v63 = vrot.slane %v5174_v25, 5  ;;  %v3003_v11 = vld [vmem:[#allocation2 + $0x6c] sm:$0xf] }
 0x1c0   : > { %5572 = vmatmul.mubr.bf16.gmra.mrb[16].mxu0 %v7352_v21  ;;  %v8362_v21 = vld [vmem:[#allocation2 + $0xb0] sm:$0x1]  ;;  %v5152_v31 = vrot.slane %v5150_v28, 5  ;;  %v2076_v28 = vrot.slane %v2074_v12, 4  ;;  %v5186_v36 = vrot.slane %v5184_v41, 4  ;;  %v3236_v48 = vor.u32 %v3235_v10, %v9778_v61 }
 0x1c1   : > { %5581 = vmatprep.mubr.bf16.mxu0 %v8408_v2  ;;  %v2070_v33 = vrot.slane %v8362_v21, 5  ;;  %v5177_v47 = vor.u32 %v5176_v63, %v5173_v27  ;;  %v4939_v29 = vld [vmem:[#allocation2 + $0x9c] sm:$0xf] }
 0x1c2   : > { %v5153_v24 = vor.u32 %v5152_v31, %v5149_v54  ;;  %v3239_v54 = vshll.u32 %v8366_v22, 16  ;;  %v2075_v31 = vsel %vm8691_vm13, %v7075_v14, %v2074_v12  ;;  %v9807_v14 = vld [vmem:[#allocation2 + $0x98] sm:$0x1] }
 0x1c3   : > { %v2071_v50 = vsel %vm8691_vm13, %v2069_v18, %v2070_v33  ;;  %v5182_v33 = vrot.slane %v5180_v44, 5 }
 0x1c4   : > { %v7106_v32 = vcombine.low %v2068_v60, %v2071_v50  ;;  %v5154_v18 = vrot.slane %v5153_v24, 4  ;;  %v5190_v60 = vshll.u32 %v9786_v5, 16  ;;  %v3241_v4 = vrot.slane %v3239_v54, 5  ;;  %v8287_v54 = vld [vmem:[#allocation2 + $0xc] sm:$0xff]  }
 0x1c5   : > { %v5187_v59 = vor.u32 %v5186_v36, %v5182_v33  ;;  %v3220_v24 = vshrl.u32 %v3003_v11, 16  ;;  %v5214_v36 = vshll.u32 %v9807_v14, 16 }
 0x1c6   : > { %2393 = vmatmul.mubr.bf16.gmra.mrb[48].mxu1 %v7104_v58  ;;  %v5144_v58 = vrot.slane %v5142_v16, 5  ;;  %v4936_v16 = vld [vmem:[#allocation2 + $0x90] sm:$0xf]  ;;  %v5159_v45 = vsel %vm8602_vm6, %v5154_v18, %v9765_v17  ;;  %v5192_v25 = vrot.slane %v5190_v60, 5 }
 0x1c7   : > { %2402 = vmatprep.mubr.bf16.mxu1 %v8408_v2  ;;  %v5198_v50 = vshll.u32 %v4936_v16, 16  ;;  %v5188_v15 = vrot.slane %v5187_v59, 4  ;;  %v5216_v60 = vrot.slane %v5214_v36, 5 }
 0x1c8   : > { %5582 = vmatmul.mubr.bf16.gmra.mrb[20].mxu0 %v7353_v30  ;;  %v5163_v30 = vor.u32 %v5162_v1, %v9765_v17  ;;  %v5145_v35 = vsel %vm8602_vm6, %v5140_v8, %v5144_v58  ;;  %v2078_v1 = vsel %vm8691_vm13, %v2076_v28, %v2077_v46  ;;  %v3237_v58 = vrot.slane %v3236_v48, 4 }
 0x1c9   : > { %5591 = vmatprep.mubr.bf16.mxu0 %v8408_v2  ;;  %v7355_v56 = vcombine.low %v5135_v26, %v5145_v35  ;;  %v7107_v7 = vcombine.low %v2075_v31, %v2078_v1  ;;  %v5178_v17 = vrot.slane %v5177_v47, 4  ;;  %v5200_v41 = vrot.slane %v5198_v50, 5  ;;  %v9809_v35 = vld [vmem:[#allocation2 + $0xa0] sm:$0xf]  ;;  %v4942_v1 = vld [vmem:[#allocation2 + $0xa8] sm:$0xf] }
 0x1ca   : > { %v5164_v21 = vrot.slane %v5163_v30, 4  ;;  %v3223_v30 = vshll.u32 %v3003_v11, 16  ;;  %v3222_v46 = vrot.slane %v3220_v24, 4  ;;  %v3242_v63 = vsel %vm8602_vm6, %v3237_v58, %v3241_v4  ;;  %v9823_v47 = vld [vmem:[#allocation2 + $0xac] sm:$0xf] }
 0x1cb   : > { %v5183_v28 = vsel %vm8602_vm6, %v5178_v17, %v5182_v33  ;;  %v5222_v48 = vshll.u32 %v4939_v29, 16  ;;  %v5232_v33 = vshrl.u32 %v9809_v35, 16  ;;  %v9832_v4 = vld [vmem:[#allocation2 + $0xa4] sm:$0x1]  ;;  %v5252_v17 = vshll.u32 %v9823_v47, 16 }
 0x1cc   : > { %v5169_v38 = vsel %vm8602_vm6, %v5164_v21, %v5168_v19  ;;  %v3225_v26 = vrot.slane %v3223_v30, 5  ;;  %v5193_v19 = vsel %vm8602_vm6, %v5188_v15, %v5192_v25  ;;  %v5256_v11 = vshrl.u32 %v9823_v47, 16  ;;  %v8368_v15 = vld [vmem:[%s10318_s1 + $0x214] ss:$8 sps:$4 sm:$0xff]  }
 0x1cd   : > { %v7356_v12 = vcombine.low %v5159_v45, %v5169_v38  ;;  %v7357_v31 = vcombine.low %v5183_v28, %v5193_v19  ;;  %v5234_v58 = vrot.slane %v5232_v33, 4  ;;  %v9856_v19 = vld [vmem:[#allocation2 + $0xb0] sm:$0x1] }
 0x1ce   : > { %2403 = vmatmul.mubr.bf16.gmra.mrb[52].mxu1 %v7105_v52  ;;  %v9789_v52 = vld [vmem:[#allocation2 + $0x94] sm:$0xf]  ;;  %v3226_v27 = vor.u32 %v3225_v26, %v3222_v46  ;;  %v9851_v26 = vrot.slane %v5252_v17, 5  ;;  %v5258_v28 = vrot.slane %v5256_v11, 4 }
 0x1cf   : > { %2412 = vmatprep.mubr.bf16.mxu1 %v8408_v2  ;;  %v5204_v42 = vshll.u32 %v9789_v52, 16  ;;  %v5208_v8 = vshrl.u32 %v9789_v52, 16 }
 0x1d0   : > { %5592 = vmatmul.mubr.bf16.gmra.mrb[24].mxu0 %v7354_v53  ;;  %v5195_v53 = vshrl.u32 %v4936_v16, 16  ;;  %v5228_v16 = vshll.u32 %v9809_v35, 16  ;;  %v3227_v22 = vrot.slane %v3226_v27, 4  ;;  %v5259_v33 = vor.u32 %v5258_v28, %v9851_v26 }
 0x1d1   : > { %5601 = vmatprep.mubr.bf16.mxu0 %v8408_v2  ;;  %v9805_v10 = vrot.slane %v5204_v42, 5  ;;  %v5224_v42 = vrot.slane %v5222_v48, 5 }
 0x1d2   : > { %v5197_v44 = vrot.slane %v5195_v53, 4  ;;  %v3232_v45 = vsel %vm8602_vm6, %v3227_v22, %v9778_v61  ;;  %v8367_v61 = vld [vmem:[%s10318_s1 + $0x200] ss:$8 sps:$4 sm:$0xff]   ;;  %v5262_v22 = vshll.u32 %v9856_v19, 16 }
 0x1d3   : > { %v9828_v53 = vcombine.low %v3232_v45, %v3242_v63  ;;  %v8370_v63 = vld [vmem:[%s10318_s1 + $0x224] ss:$8 sps:$4 sm:$0xff]  }
 0x1d4   : > { %v5201_v18 = vor.u32 %v5200_v41, %v5197_v44  ;;  %v5238_v41 = vshll.u32 %v9832_v4, 16 }
 0x1d6   : > { %2413 = vmatmul.mubr.bf16.gmra.mrb[56].mxu1 %v7106_v32  ;;  %v5210_v32 = vrot.slane %v5208_v8, 4  ;;  %v5202_v38 = vrot.slane %v5201_v18, 4  ;;  %v9830_v8 = vrot.slane %v5228_v16, 5  ;;  %v4945_v18 = vld [vmem:[#allocation2 + $0xb4] sm:$0xf]  ;;  %v5240_v48 = vrot.slane %v5238_v41, 5 }
 0x1d7   : > { %2422 = vmatprep.mubr.bf16.mxu1 %v8408_v2  ;;  %v9890_v41 = vld [vmem:[#allocation2 + $0xc4] sm:$0xf] }
 0x1d8   : > { %5602 = vmatmul.mubr.bf16.gmra.mrb[28].mxu0 %v7355_v56  ;;  %v5211_v21 = vor.u32 %v5210_v32, %v9805_v10  ;;  %v5219_v56 = vshrl.u32 %v4939_v29, 16  ;;  %v5207_v25 = vsel %vm8602_vm6, %v5202_v38, %v9805_v10  ;;  %v5235_v44 = vor.u32 %v5234_v58, %v9830_v8  ;;  %v8291_v32 = vld [vmem:[#allocation2 + $0x18] sm:$0xff]  }
 0x1d9   : > { %5611 = vmatprep.mubr.bf16.mxu0 %v8408_v2  ;;  %v8369_v10 = vld [vmem:[%s10318_s1 + $0x210] ss:$8 sps:$4 sm:$0xff]  }
 0x1da   : > { %v5212_v59 = vrot.slane %v5211_v21, 4  ;;  %v5221_v50 = vrot.slane %v5219_v56, 4  ;;  %v9861_v21 = vld [vmem:[#allocation2 + $0xb8] sm:$0xf]  ;;  %v5236_v56 = vrot.slane %v5235_v44, 4 }
 0x1db   : > { %v5276_v45 = vshll.u32 %v9861_v21, 16  ;;  %v5280_v38 = vshrl.u32 %v9861_v21, 16  ;;  %v4948_v44 = vld [vmem:[#allocation2 + $0xc0] sm:$0xf] }
 0x1dc   : > { %v5217_v24 = vsel %vm8602_vm6, %v5212_v59, %v5216_v60  ;;  %v5225_v30 = vor.u32 %v5224_v42, %v5221_v50  ;;  %v8372_v59 = vld [vmem:[%s10318_s1 + $0x234] ss:$8 sps:$4 sm:$0xff]   ;;  %v5241_v50 = vsel %vm8602_vm6, %v5236_v56, %v5240_v48  ;;  %v8292_v42 = vld [vmem:[#allocation2 + $0x24] sm:$0xff]  }
 0x1dd   : > { %v7358_v27 = vcombine.low %v5207_v25, %v5217_v24  ;;  %v8373_v25 = vld [vmem:[%s10318_s1 + $0x230] ss:$8 sps:$4 sm:$0xff]   ;;  %v8376_v56 = vld [vmem:[%s10318_s1 + $0x254] ss:$8 sps:$4 sm:$0xff]  }
 0x1de   : > { %2423 = vmatmul.mubr.bf16.gmra.mrb[60].mxu1 %v7107_v7  ;;  %v5243_v7 = vshrl.u32 %v4942_v1, 16  ;;  %v5226_v36 = vrot.slane %v5225_v30, 4  ;;  %v9885_v30 = vld [vmem:[#allocation2 + $0xbc] sm:$0x1]  ;;  %v8296_v48 = vld [vmem:[#allocation2 + $0x30] sm:$0xff]  }
 0x1df   : > { %2754 = vmatprep.mubr.bf16.mxu1 %v8408_v2 }
 0x1e0   : > { %5612 = vmatmul.mubr.bf16.gmra.mrb[32].mxu0 %v7356_v12  ;;  %v5246_v12 = vshll.u32 %v4942_v1, 16  ;;  %v5245_v29 = vrot.slane %v5243_v7, 4  ;;  %v5270_v1 = vshll.u32 %v4945_v18, 16  ;;  %v5231_v60 = vsel %vm8602_vm6, %v5226_v36, %v9830_v8  ;;  %v8374_v8 = vld [vmem:[%s10318_s1 + $0x244] ss:$8 sps:$4 sm:$0xff]  }
 0x1e1   : > { %5621 = vmatprep.mubr.bf16.mxu0 %v8408_v2  ;;  %v5260_v7 = vrot.slane %v5259_v33, 4  ;;  %v7359_v24 = vcombine.low %v5231_v60, %v5241_v50  ;;  %v5304_v36 = vshrl.u32 %v9890_v41, 16  ;;  %v8378_v60 = vld [vmem:[%s10318_s1 + $0x264] ss:$8 sps:$4 sm:$0xff]   ;;  %v9915_v50 = vld [vmem:[#allocation2 + $0xc8] sm:$0x1] }
 0x1e2   : > { %v5248_v46 = vrot.slane %v5246_v12, 5  ;;  %v5264_v12 = vrot.slane %v5262_v22, 5  ;;  %v5272_v11 = vrot.slane %v5270_v1, 5 }
 0x1e4   : > { %v5249_v16 = vor.u32 %v5248_v46, %v5245_v29  ;;  %v5265_v29 = vsel %vm8602_vm6, %v5260_v7, %v5264_v12  ;;  %v8379_v12 = vld [vmem:[%s10318_s1 + $0x260] ss:$8 sps:$4 sm:$0xff]  }
 0x1e6   : > { %2755 = vmatmul.mubr.bf16.vlgmr.msra.gmra.mrb[0].mxu1 %v8287_v54  ;;  %v8371_v54 = vld [vmem:[%s10318_s1 + $0x220] ss:$8 sps:$4 sm:$0xff]   ;;  %v5250_v58 = vrot.slane %v5249_v16, 4 }
 0x1e7   : > { %7522 = vmatpush1.bf16.msra.mxu1 %v8367_v61  ;;  %2764 = vmatprep.mubr.bf16.mxu1 %v8408_v2  ;;  %v9880_v61 = vrot.slane %v5276_v45, 5 }
 0x1e8   : > { %5622 = vmatmul.mubr.bf16.gmra.mrb[36].mxu0 %v7357_v31  ;;  %7515 = vmatprep.subr.bf16.mxu1 %v8368_v15  ;;  %v5267_v31 = vshrl.u32 %v4945_v18, 16  ;;  %v5282_v15 = vrot.slane %v5280_v38, 4  ;;  %v5294_v18 = vshll.u32 %v4948_v44, 16 }
 0x1e9   : > { %5631 = vmatprep.mubr.bf16.mxu0 %v8408_v2 }
 0x1ea   : > { %v5269_v17 = vrot.slane %v5267_v31, 4  ;;  %v5283_v28 = vor.u32 %v5282_v15, %v9880_v61  ;;  %v8377_v31 = vld [vmem:[%s10318_s1 + $0x250] ss:$8 sps:$4 sm:$0xff]   ;;  %v5296_v45 = vrot.slane %v5294_v18, 5 }
 0x1eb   : > { %7523 = vmatpush1.bf16.msra.mxu1 %v8369_v10  ;;  %v5286_v10 = vshll.u32 %v9885_v30, 16 }
 0x1ec   : > { %7516 = vmatprep.subr.bf16.mxu1 %v8370_v63  ;;  %v5273_v46 = vor.u32 %v5272_v11, %v5269_v17  ;;  %v5291_v63 = vshrl.u32 %v4948_v44, 16  ;;  %v5284_v22 = vrot.slane %v5283_v28, 4 }
 0x1ee   : > { %2765 = vmatmul.mubr.bf16.gmra.mrb[4].mxu1 %v8291_v32  ;;  %v5255_v32 = vsel %vm8602_vm6, %v5250_v58, %v9851_v26  ;;  %v5300_v26 = vshll.u32 %v9890_v41, 16  ;;  %v5274_v33 = vrot.slane %v5273_v46, 4  ;;  %v5293_v1 = vrot.slane %v5291_v63, 4  ;;  %v9917_v58 = vld [vmem:[#allocation2 + $0xd0] sm:$0xf] }
 0x1ef   : > { %2774 = vmatprep.mubr.bf16.mxu1 %v8408_v2  ;;  %7524 = vmatpush1.bf16.msra.mxu1 %v8371_v54  ;;  %v7360_v16 = vcombine.low %v5255_v32, %v5265_v29  ;;  %v5288_v54 = vrot.slane %v5286_v10, 5  ;;  %v5324_v44 = vshll.u32 %v9917_v58, 16  ;;  %v5328_v32 = vshrl.u32 %v9917_v58, 16  ;;  %v8297_v29 = vld [vmem:[#allocation2 + $0x3c] sm:$0xff]   ;;  %v8381_v46 = vld [vmem:[%s10318_s1 + $0x270] ss:$8 sps:$4 sm:$0xff]  }
 0x1f0   : > { %5632 = vmatmul.mubr.bf16.gmra.mrb[40].mxu0 %v7358_v27  ;;  %7517 = vmatprep.subr.bf16.mxu1 %v8372_v59  ;;  %v8375_v27 = vld [vmem:[%s10318_s1 + $0x240] ss:$8 sps:$4 sm:$0xff]   ;;  %v5302_v38 = vrot.slane %v5300_v26, 5  ;;  %v5306_v59 = vrot.slane %v5304_v36, 4  ;;  %v5279_v7 = vsel %vm8602_vm6, %v5274_v33, %v9880_v61  ;;  %v5297_v11 = vor.u32 %v5296_v45, %v5293_v1 }
 0x1f1   : > { %5641 = vmatprep.mubr.bf16.mxu0 %v8408_v2  ;;  %v5289_v17 = vsel %vm8602_vm6, %v5284_v22, %v5288_v54  ;;  %v5326_v36 = vrot.slane %v5324_v44, 5  ;;  %v8301_v1 = vld [vmem:[#allocation2 + $0x48] sm:$0xff]  }
 0x1f2   : > { %v5307_v15 = vor.u32 %v5306_v59, %v5302_v38  ;;  %v7361_v28 = vcombine.low %v5279_v7, %v5289_v17  ;;  %v5298_v10 = vrot.slane %v5297_v11, 4  ;;  %v8302_v11 = vld [vmem:[#allocation2 + $0x54] sm:$0xff]  }
 0x1f3   : > { %7525 = vmatpush1.bf16.msra.mxu1 %v8373_v25  ;;  %v5310_v25 = vshll.u32 %v9915_v50, 16 }
 0x1f4   : > { %7518 = vmatprep.subr.bf16.mxu1 %v8374_v8 }
 0x1f5   : > { %v5312_v63 = vrot.slane %v5310_v25, 5 }
 0x1f6   : > { %2775 = vmatmul.mubr.bf16.gmra.mrb[8].mxu1 %v8292_v42  ;;  %v4951_v42 = vld [vmem:[#allocation2 + $0xcc] sm:$0xf] }
 0x1f7   : > { %2784 = vmatprep.mubr.bf16.mxu1 %v8408_v2  ;;  %7526 = vmatpush1.bf16.msra.mxu1 %v8375_v27  ;;  %v5315_v61 = vshrl.u32 %v4951_v42, 16  ;;  %v5318_v8 = vshll.u32 %v4951_v42, 16  ;;  %v5308_v27 = vrot.slane %v5307_v15, 4  ;;  %v5756_v15 = vld [vmem:[#allocation2 + $0x18] sm:$0xe] }
 0x1f8   : > { %5642 = vmatmul.mubr.bf16.gmra.mrb[44].mxu0 %v7359_v24  ;;  %7519 = vmatprep.subr.bf16.mxu1 %v8376_v56  ;;  %v8380_v24 = vld [vmem:[%s10318_s1 + $0x274] ss:$8 sps:$4 sm:$0xff]   ;;  %v5330_v56 = vrot.slane %v5328_v32, 4 }
 0x1f9   : > { %5651 = vmatprep.mubr.bf16.mxu0 %v8408_v2  ;;  %v5317_v18 = vrot.slane %v5315_v61, 4  ;;  %v5320_v26 = vrot.slane %v5318_v8, 5  ;;  %v5313_v33 = vsel %vm8602_vm6, %v5308_v27, %v5312_v63  ;;  %v8383_v8 = vld [vmem:[#allocation2 + $0x20] sm:$0x1]  ;;  %v5757_v27 = vld [vmem:[#allocation2 + $0x24] sm:$0xe] }
 0x1fa   : > { %v5331_v54 = vor.u32 %v5330_v56, %v5326_v36  ;;  %v5825_v44 = vrot.slane %v8383_v8, 5  ;;  %v5760_v8 = vld [vmem:[#allocation2 + $0x48] sm:$0xe] }
 0x1fb   : > { %7527 = vmatpush1.bf16.msra.mxu1 %v8377_v31  ;;  %v5321_v22 = vor.u32 %v5320_v26, %v5317_v18  ;;  %v7381_v18 = vrot.slane %v5757_v27, 9  ;;  %v5761_v27 = vld [vmem:[#allocation2 + $0x54] sm:$0xe] }
 0x1fc   : > { %7520 = vmatprep.subr.bf16.mxu1 %v8378_v60  ;;  %v5332_v60 = vrot.slane %v5331_v54, 4  ;;  %v8307_v54 = vld [vmem:[#allocation2 + $0x6c] sm:$0xff]  }
 0x1fd   : > { %v5322_v59 = vrot.slane %v5321_v22, 4 }
 0x1fe   : > { %2785 = vmatmul.mubr.bf16.gmra.mrb[12].mxu1 %v8296_v48  ;;  %v9938_v48 = vld [vmem:[#allocation2 + $0xd4] sm:$0x1] }
 0x1ff   : > { %2794 = vmatprep.mubr.bf16.mxu1 %v8408_v2  ;;  %7528 = vmatpush1.bf16.msra.mxu1 %v8379_v12  ;;  %v5334_v31 = vshll.u32 %v9938_v48, 16  ;;  %v8382_v12 = vld [vmem:[#allocation2 + $0x1c] sm:$0xf] }
 0x200   : > { %5652 = vmatmul.mubr.bf16.gmra.mrb[48].mxu0 %v7360_v16  ;;  %7521 = vmatprep.subr.bf16.mxu1 %v8380_v24  ;;  %v5303_v16 = vsel %vm8602_vm6, %v5298_v10, %v5302_v38  ;;  %v5327_v38 = vsel %vm8602_vm6, %v5322_v59, %v5326_v36  ;;  %v5822_v17 = vrot.slane %v8382_v12, 5  ;;  %v7380_v24 = vrot.slane %v5756_v15, 9  ;;  %v8306_v10 = vld [vmem:[#allocation2 + $0x60] sm:$0xff]   ;;  %v5759_v12 = vld [vmem:[#allocation2 + $0x3c] sm:$0xe] }
 0x201   : > { %5661 = vmatprep.mubr.bf16.mxu0 %v8408_v2  ;;  %v7362_v45 = vcombine.low %v5303_v16, %v5313_v33  ;;  %v5336_v42 = vrot.slane %v5334_v31, 5  ;;  %v5832_v36 = vrot.slane %v9573_v40, 5  ;;  %v8385_v33 = vld [vmem:[#allocation2 + $0x34] sm:$0xf]  ;;  %v5758_v31 = vld [vmem:[#allocation2 + $0x30] sm:$0xe] }
 0x202   : > { %v5824_v61 = vrot.slane %v5822_v17, 4  ;;  %v5823_v32 = vsel %vm8691_vm13, %v7380_v24, %v5822_v17  ;;  %v5836_v22 = vrot.slane %v8385_v33, 5  ;;  %v5839_v40 = vrot.slane %v9598_v39, 5  ;;  %v5762_v33 = vld [vmem:[#allocation2 + $0x60] sm:$0xe] }
 0x203   : > { %7529 = vmatpush1.bf16.msra.mxu1 %v8381_v46  ;;  %v5337_v7 = vsel %vm8602_vm6, %v5332_v60, %v5336_v42  ;;  %v8384_v46 = vld [vmem:[#allocation2 + $0x28] sm:$0xf]  ;;  %v5846_v39 = vrot.slane %v9634_v9, 5  ;;  %v5853_v9 = vrot.slane %v9658_v37, 5  ;;  %v5860_v37 = vrot.slane %v9692_v20, 5 }
 0x204   : > { %v7363_v25 = vcombine.low %v5327_v38, %v5337_v7  ;;  %v5838_v59 = vrot.slane %v5836_v22, 4  ;;  %v5843_v38 = vrot.slane %v9603_v6, 5  ;;  %v8308_v7 = vld [vmem:[#allocation2 + $0x78] sm:$0xff]   ;;  %v5850_v6 = vrot.slane %v9627_v62, 5 }
 0x205   : > { %v5857_v62 = vrot.slane %v9660_v23, 5  ;;  %v5864_v23 = vrot.slane %v9694_v55, 5  ;;  %v5867_v20 = vrot.slane %v9723_v3, 5  ;;  %v5874_v3 = vrot.slane %v9750_v0, 5 }
 0x206   : > { %2795 = vmatmul.mubr.bf16.gmra.mrb[16].mxu1 %v8297_v29  ;;  %v5826_v29 = vsel %vm8691_vm13, %v5824_v61, %v5825_v44  ;;  %v5840_v42 = vsel %vm8691_vm13, %v5838_v59, %v5839_v40  ;;  %v5845_v15 = vrot.slane %v5843_v38, 4  ;;  %v8309_v61 = vld [vmem:[#allocation2 + $0x84] sm:$0xff]   ;;  %v5763_v59 = vld [vmem:[#allocation2 + $0x6c] sm:$0xe] }
 0x207   : > { %2804 = vmatprep.mubr.bf16.mxu1 %v8408_v2  ;;  %v7412_v63 = vcombine.low %v5823_v32, %v5826_v29  ;;  %v7384_v32 = vrot.slane %v5760_v8, 9  ;;  %v5852_v29 = vrot.slane %v5850_v6, 4  ;;  %v8312_v40 = vld [vmem:[#allocation2 + $0xa8] sm:$0xff]   ;;  %v8386_v8 = vld [vmem:[#allocation2 + $0x7c] sm:$0xf] }
 0x208   : > { %5662 = vmatmul.mubr.bf16.gmra.mrb[52].mxu0 %v7361_v28  ;;  %v5829_v28 = vrot.slane %v8384_v46, 5  ;;  %v5847_v24 = vsel %vm8691_vm13, %v5845_v15, %v5846_v39  ;;  %v8313_v15 = vld [vmem:[#allocation2 + $0xb4] sm:$0xff]  }
 0x209   : > { %5671 = vmatprep.mubr.bf16.mxu0 %v8408_v2  ;;  %v5851_v46 = vsel %vm8691_vm13, %v7384_v32, %v5850_v6  ;;  %v3257_v32 = vshrl.u32 %v8386_v8, 16 }
 0x20a   : > { %v5831_v26 = vrot.slane %v5829_v28, 4  ;;  %v5830_v56 = vsel %vm8691_vm13, %v7381_v18, %v5829_v28  ;;  %v5854_v28 = vsel %vm8691_vm13, %v5852_v29, %v5853_v9  ;;  %v7385_v18 = vrot.slane %v5761_v27, 9 }
 0x20b   : > { %v3259_v27 = vrot.slane %v3257_v32, 4 }
 0x20c   : > { %v5833_v16 = vsel %vm8691_vm13, %v5831_v26, %v5832_v36  ;;  %v5859_v26 = vrot.slane %v5857_v62, 4  ;;  %v5858_v36 = vsel %vm8691_vm13, %v7385_v18, %v5857_v62  ;;  %v8314_v62 = vld [vmem:[#allocation2 + $0xc0] sm:$0xff]  }
 0x20e   : > { %2805 = vmatmul.mubr.bf16.gmra.mrb[20].mxu1 %v8301_v1  ;;  %v7413_v1 = vcombine.low %v5830_v56, %v5833_v16  ;;  %v5861_v56 = vsel %vm8691_vm13, %v5859_v26, %v5860_v37  ;;  %v8311_v16 = vld [vmem:[#allocation2 + $0x9c] sm:$0xff]  }
 0x20f   : > { %2814 = vmatprep.mubr.bf16.mxu1 %v8408_v2 }
 0x210   : > { %5672 = vmatmul.mubr.bf16.gmra.mrb[56].mxu0 %v7362_v45  ;;  %v7382_v45 = vrot.slane %v5758_v31, 9  ;;  %v5866_v31 = vrot.slane %v5864_v23, 4 }
 0x211   : > { %5681 = vmatprep.mubr.bf16.mxu0 %v8408_v2 }
 0x212   : > { %v5837_v60 = vsel %vm8691_vm13, %v7382_v45, %v5836_v22  ;;  %v7417_v22 = vcombine.low %v5858_v36, %v5861_v56  ;;  %v5868_v55 = vsel %vm8691_vm13, %v5866_v31, %v5867_v20  ;;  %v5888_v56 = vrot.slane %v9786_v5, 5  ;;  %v8388_v31 = vld [vmem:[#allocation2 + $0x80] sm:$0x1] }
 0x213   : > { %v7414_v17 = vcombine.low %v5837_v60, %v5840_v42  ;;  %v7387_v42 = vrot.slane %v5763_v59, 9  ;;  %v3263_v20 = vshll.u32 %v8388_v31, 16  ;;  %v5766_v59 = vld [vmem:[#allocation2 + $0x90] sm:$0xe] }
 0x216   : > { %2815 = vmatmul.mubr.bf16.gmra.mrb[24].mxu1 %v8302_v11  ;;  %v7383_v11 = vrot.slane %v5759_v12, 9  ;;  %v5764_v12 = vld [vmem:[#allocation2 + $0x78] sm:$0xe] }
 0x217   : > { %2824 = vmatprep.mubr.bf16.mxu1 %v8408_v2 }
 0x218   : > { %5682 = vmatmul.mubr.bf16.gmra.mrb[60].mxu0 %v7363_v25  ;;  %v5844_v25 = vsel %vm8691_vm13, %v7383_v11, %v5843_v38  ;;  %v3006_v11 = vld [vmem:[#allocation2 + $0x78] sm:$0xf] }
 0x219   : > { %6125 = vmatprep.mubr.bf16.mxu0 %v8408_v2  ;;  %v7415_v44 = vcombine.low %v5844_v25, %v5847_v24  ;;  %v7388_v25 = vrot.slane %v5764_v12, 9  ;;  %v5881_v24 = vrot.slane %v9763_v51, 5  ;;  %v3244_v6 = vshrl.u32 %v3006_v11, 16  ;;  %v5765_v51 = vld [vmem:[#allocation2 + $0x84] sm:$0xe] }
 0x21a   : > { %v7389_v37 = vrot.slane %v5765_v51, 9  ;;  %v5895_v12 = vrot.slane %v9807_v14, 5 }
 0x21b   : > { %v3246_v9 = vrot.slane %v3244_v6, 4 }
 0x21e   : > { %2825 = vmatmul.mubr.bf16.gmra.mrb[28].mxu1 %v8306_v10  ;;  %v8310_v10 = vld [vmem:[#allocation2 + $0x90] sm:$0xff]  }
 0x21f   : > { %2834 = vmatprep.mubr.bf16.mxu1 %v8408_v2 }
 0x220   : > { %6126 = vmatmul.mubr.bf16.vlgmr.msra.gmra.mrb[0].mxu0 %v7412_v63  ;;  %v7416_v63 = vcombine.low %v5851_v46, %v5854_v28  ;;  %v5885_v28 = vrot.slane %v9769_v49, 5 }
 0x221   : > { %6135 = vmatprep.mubr.bf16.mxu0 %v8408_v2 }
 0x222   : > { %v5887_v36 = vrot.slane %v5885_v28, 4 }
 0x224   : > { %v5889_v5 = vsel %vm8691_vm13, %v5887_v36, %v5888_v56 }
 0x226   : > { %2835 = vmatmul.mubr.bf16.gmra.mrb[32].mxu1 %v8307_v54  ;;  %v7386_v54 = vrot.slane %v5762_v33, 9  ;;  %v8387_v33 = vld [vmem:[#allocation2 + $0x88] sm:$0xf] }
 0x227   : > { %2844 = vmatprep.mubr.bf16.mxu1 %v8408_v2 }
 0x228   : > { %6136 = vmatmul.mubr.bf16.gmra.mrb[4].mxu0 %v7413_v1  ;;  %v5871_v1 = vrot.slane %v9725_v34, 5  ;;  %v5865_v45 = vsel %vm8691_vm13, %v7386_v54, %v5864_v23  ;;  %v3281_v54 = vshrl.u32 %v8387_v33, 16 }
 0x229   : > { %6145 = vmatprep.mubr.bf16.mxu0 %v8408_v2  ;;  %v7418_v60 = vcombine.low %v5865_v45, %v5868_v55  ;;  %v5886_v55 = vsel %vm8691_vm13, %v7389_v37, %v5885_v28 }
 0x22a   : > { %v5873_v38 = vrot.slane %v5871_v1, 4  ;;  %v5872_v34 = vsel %vm8691_vm13, %v7387_v42, %v5871_v1  ;;  %v5892_v1 = vrot.slane %v9789_v52, 5 }
 0x22c   : > { %v5894_v52 = vrot.slane %v5892_v1, 4 }
 0x22e   : > { %2845 = vmatmul.mubr.bf16.gmra.mrb[36].mxu1 %v8308_v7  ;;  %v5875_v7 = vsel %vm8691_vm13, %v5873_v38, %v5874_v3  ;;  %v3283_v38 = vrot.slane %v3281_v54, 4 }
 0x22f   : > { %2854 = vmatprep.mubr.bf16.mxu1 %v8408_v2  ;;  %v7419_v39 = vcombine.low %v5872_v34, %v5875_v7  ;;  %v3265_v34 = vrot.slane %v3263_v20, 5  ;;  %v7390_v7 = vrot.slane %v5766_v59, 9  ;;  %v8392_v20 = vld [vmem:[#allocation2 + $0x98] sm:$0x1] }
 0x230   : > { %6146 = vmatmul.mubr.bf16.gmra.mrb[8].mxu0 %v7414_v17  ;;  %v5878_v17 = vrot.slane %v9742_v57, 5 }
 0x231   : > { %6155 = vmatprep.mubr.bf16.mxu0 %v8408_v2  ;;  %v5893_v14 = vsel %vm8691_vm13, %v7390_v7, %v5892_v1  ;;  %v3311_v1 = vshll.u32 %v8392_v20, 16 }
 0x232   : > { %v5880_v0 = vrot.slane %v5878_v17, 4  ;;  %v5879_v57 = vsel %vm8691_vm13, %v7388_v25, %v5878_v17  ;;  %v3012_v17 = vld [vmem:[#allocation2 + $0x90] sm:$0xf] }
 0x234   : > { %v5882_v29 = vsel %vm8691_vm13, %v5880_v0, %v5881_v24  ;;  %v8389_v0 = vld [vmem:[#allocation2 + $0x8c] sm:$0x1] }
 0x235   : > { %v7420_v18 = vcombine.low %v5879_v57, %v5882_v29  ;;  %v3287_v24 = vshll.u32 %v8389_v0, 16  ;;  %v5896_v57 = vsel %vm8691_vm13, %v5894_v52, %v5895_v12  ;;  %v3313_v12 = vrot.slane %v3311_v1, 5  ;;  %v8396_v1 = vld [vmem:[#allocation2 + $0xb8] sm:$0xf] }
 0x236   : > { %2855 = vmatmul.mubr.bf16.gmra.mrb[40].mxu1 %v8309_v61  ;;  %v3247_v61 = vshll.u32 %v3006_v11, 16  ;;  %v7421_v11 = vcombine.low %v5886_v55, %v5889_v5 }
 0x237   : > { %2864 = vmatprep.mubr.bf16.mxu1 %v8408_v2 }
 0x238   : > { %6156 = vmatmul.mubr.bf16.gmra.mrb[12].mxu0 %v7415_v44  ;;  %v3253_v44 = vshll.u32 %v8386_v8, 16  ;;  %v3249_v46 = vrot.slane %v3247_v61, 5  ;;  %v3292_v61 = vshrl.u32 %v3012_v17, 16  ;;  %v3295_v8 = vshll.u32 %v3012_v17, 16 }
 0x239   : > { %6165 = vmatprep.mubr.bf16.mxu0 %v8408_v2 }
 0x23a   : > { %v3250_v26 = vor.u32 %v3249_v46, %v3246_v9  ;;  %v5767_v9 = vld [vmem:[#allocation2 + $0x9c] sm:$0xe] }
 0x23b   : > { %v3015_v46 = vld [vmem:[#allocation2 + $0x9c] sm:$0xf]  ;;  %v7391_v36 = vrot.slane %v5767_v9, 9 }
 0x23c   : > { %v3251_v45 = vrot.slane %v3250_v26, 4  ;;  %v3316_v56 = vshrl.u32 %v3015_v46, 16 }
 0x23e   : > { %2865 = vmatmul.mubr.bf16.gmra.mrb[44].mxu1 %v8310_v10  ;;  %v3255_v10 = vrot.slane %v3253_v44, 5  ;;  %v8390_v44 = vld [vmem:[#allocation2 + $0x94] sm:$0xf]  ;;  %v3318_v5 = vrot.slane %v3316_v56, 4 }
 0x23f   : > { %2874 = vmatprep.mubr.bf16.mxu1 %v8408_v2  ;;  %v3301_v32 = vshll.u32 %v8390_v44, 16  ;;  %v3305_v29 = vshrl.u32 %v8390_v44, 16  ;;  %v5909_v44 = vrot.slane %v9856_v19, 5 }
 0x240   : > { %6166 = vmatmul.mubr.bf16.gmra.mrb[16].mxu0 %v7416_v63  ;;  %v3009_v63 = vld [vmem:[#allocation2 + $0x84] sm:$0xf]  ;;  %v3260_v49 = vor.u32 %v3259_v27, %v3255_v10  ;;  %v7422_v27 = vcombine.low %v5893_v14, %v5896_v57 }
 0x241   : > { %6175 = vmatprep.mubr.bf16.mxu0 %v8408_v2  ;;  %v3268_v23 = vshrl.u32 %v3009_v63, 16  ;;  %v10046_v26 = vrot.slane %v3301_v32, 5  ;;  %v3307_v37 = vrot.slane %v3305_v29, 4  ;;  %v8394_v32 = vld [vmem:[#allocation2 + $0xac] sm:$0xf] }
 0x242   : > { %v3261_v3 = vrot.slane %v3260_v49, 4  ;;  %v3349_v14 = vshll.u32 %v8394_v32, 16  ;;  %v3353_v57 = vshrl.u32 %v8394_v32, 16  ;;  %v8398_v32 = vld [vmem:[#allocation2 + $0xc4] sm:$0xf] }
 0x243   : > { %v3308_v55 = vor.u32 %v3307_v37, %v10046_v26 }
 0x244   : > { %v3266_v6 = vsel %vm8602_vm6, %v3261_v3, %v3265_v34  ;;  %v5906_v3 = vrot.slane %v9823_v47, 5  ;;  %v3018_v34 = vld [vmem:[#allocation2 + $0xa8] sm:$0xf] }
 0x245   : > { %v3309_v17 = vrot.slane %v3308_v55, 4  ;;  %v3377_v55 = vshrl.u32 %v8396_v1, 16 }
 0x246   : > { %2875 = vmatmul.mubr.bf16.gmra.mrb[48].mxu1 %v8311_v16  ;;  %v3271_v16 = vshll.u32 %v3009_v63, 16  ;;  %v3294_v63 = vrot.slane %v3292_v61, 4  ;;  %v3343_v61 = vshll.u32 %v3018_v34, 16 }
 0x247   : > { %2884 = vmatprep.mubr.bf16.mxu1 %v8408_v2  ;;  %v3314_v29 = vsel %vm8602_vm6, %v3309_v17, %v3313_v12  ;;  %v3024_v17 = vld [vmem:[#allocation2 + $0xc0] sm:$0xf] }
 0x248   : > { %6176 = vmatmul.mubr.bf16.gmra.mrb[20].mxu0 %v7417_v22  ;;  %v3277_v22 = vshll.u32 %v8387_v33, 16  ;;  %v5902_v33 = vrot.slane %v9832_v4, 5 }
 0x249   : > { %6185 = vmatprep.mubr.bf16.mxu0 %v8408_v2 }
 0x24a   : > { %v10030_v42 = vrot.slane %v3277_v22, 5 }
 0x24c   : > { %v3284_v25 = vor.u32 %v3283_v38, %v10030_v42  ;;  %v5768_v38 = vld [vmem:[#allocation2 + $0xa8] sm:$0xe] }
 0x24e   : > { %2885 = vmatmul.mubr.bf16.gmra.mrb[52].mxu1 %v8312_v40  ;;  %v3270_v40 = vrot.slane %v3268_v23, 4  ;;  %v3319_v23 = vshll.u32 %v3015_v46, 16 }
 0x24f   : > { %2894 = vmatprep.mubr.bf16.mxu1 %v8408_v2 }
 0x250   : > { %6186 = vmatmul.mubr.bf16.gmra.mrb[24].mxu0 %v7418_v60  ;;  %v3273_v60 = vrot.slane %v3271_v16, 5  ;;  %v3321_v4 = vrot.slane %v3319_v23, 5 }
 0x251   : > { %6195 = vmatprep.mubr.bf16.mxu0 %v8408_v2 }
 0x256   : > { %2895 = vmatmul.mubr.bf16.gmra.mrb[56].mxu1 %v8313_v15  ;;  %v3256_v15 = vsel %vm8602_vm6, %v3251_v45, %v3255_v10  ;;  %v3289_v10 = vrot.slane %v3287_v24, 5  ;;  %v7392_v24 = vrot.slane %v5768_v38, 9 }
 0x257   : > { %2904 = vmatprep.mubr.bf16.mxu1 %v8408_v2  ;;  %v7197_v28 = vcombine.low %v3256_v15, %v3266_v6  ;;  %v3322_v15 = vor.u32 %v3321_v4, %v3318_v5  ;;  %v3340_v6 = vshrl.u32 %v3018_v34, 16 }
 0x258   : > { %6196 = vmatmul.mubr.bf16.gmra.mrb[28].mxu0 %v7419_v39  ;;  %v3274_v39 = vor.u32 %v3273_v60, %v3270_v40  ;;  %v5907_v19 = vsel %vm8691_vm13, %v7392_v24, %v5906_v3 }
 0x259   : > { %6205 = vmatprep.mubr.bf16.mxu0 %v8408_v2  ;;  %v3323_v9 = vrot.slane %v3322_v15, 4 }
 0x25a   : > { %v3275_v51 = vrot.slane %v3274_v39, 4  ;;  %v8393_v39 = vld [vmem:[#allocation2 + $0xa4] sm:$0x1] }
 0x25c   : > { %v3280_v49 = vsel %vm8602_vm6, %v3275_v51, %v10030_v42  ;;  %v3345_v51 = vrot.slane %v3343_v61, 5 }
 0x25e   : > { %2905 = vmatmul.mubr.bf16.gmra.mrb[60].mxu1 %v8314_v62  ;;  %v3285_v62 = vrot.slane %v3284_v25, 4  ;;  %v3335_v25 = vshll.u32 %v8393_v39, 16 }
 0x25f   : > { %3684 = vmatprep.mubr.bf16.mxu1 %v8408_v2 }
 0x260   : > { %6206 = vmatmul.mubr.bf16.gmra.mrb[32].mxu0 %v7420_v18  ;;  %v3297_v18 = vrot.slane %v3295_v8, 5  ;;  %v3290_v45 = vsel %vm8602_vm6, %v3285_v62, %v3289_v10  ;;  %v5908_v8 = vrot.slane %v5906_v3, 4  ;;  %v3351_v10 = vrot.slane %v3349_v14, 5 }
 0x261   : > { %6215 = vmatprep.mubr.bf16.mxu0 %v8408_v2  ;;  %v7198_v7 = vcombine.low %v3280_v49, %v3290_v45  ;;  %v3373_v45 = vshll.u32 %v8396_v1, 16  ;;  %v3397_v14 = vshll.u32 %v8398_v32, 16 }
 0x262   : > { %v3298_v31 = vor.u32 %v3297_v18, %v3294_v63  ;;  %v5910_v62 = vsel %vm8691_vm13, %v5908_v8, %v5909_v44  ;;  %v5913_v63 = vrot.slane %v9861_v21, 5  ;;  %v3388_v8 = vshrl.u32 %v3024_v17, 16 }
 0x263   : > { %v7424_v23 = vcombine.low %v5907_v19, %v5910_v62  ;;  %v3375_v34 = vrot.slane %v3373_v45, 5  ;;  %v3391_v44 = vshll.u32 %v3024_v17, 16 }
 0x264   : > { %v3299_v52 = vrot.slane %v3298_v31, 4  ;;  %v5915_v49 = vrot.slane %v5913_v63, 4  ;;  %v5916_v31 = vrot.slane %v9885_v30, 5 }
 0x265   : > { %v3393_v62 = vrot.slane %v3391_v44, 5 }
 0x266   : > { %3685 = vmatmul.mubr.bf16.vlgmr.msra.gmra.mrb[32].mxu1 %v9828_v53  ;;  %v5899_v53 = vrot.slane %v9809_v35, 5  ;;  %v8391_v35 = vld [vmem:[#allocation2 + $0xa0] sm:$0xf]  ;;  %v3304_v47 = vsel %vm8602_vm6, %v3299_v52, %v10046_v26  ;;  %v5769_v26 = vld [vmem:[#allocation2 + $0xb4] sm:$0xe]  ;;  %v5917_v30 = vsel %vm8691_vm13, %v5915_v49, %v5916_v31 }
 0x267   : > { %3694 = vmatprep.mubr.bf16.mxu1 %v8408_v2  ;;  %v3325_v22 = vshll.u32 %v8391_v35, 16  ;;  %v3329_v54 = vshrl.u32 %v8391_v35, 16  ;;  %v7199_v18 = vcombine.low %v3304_v47, %v3314_v29  ;;  %v5770_v52 = vld [vmem:[#allocation2 + $0xc0] sm:$0xe]  ;;  %v5927_v29 = vrot.slane %v9917_v58, 5 }
 0x268   : > { %6216 = vmatmul.mubr.bf16.gmra.mrb[36].mxu0 %v7421_v11  ;;  %v5901_v16 = vrot.slane %v5899_v53, 4  ;;  %v5900_v59 = vsel %vm8691_vm13, %v7391_v36, %v5899_v53  ;;  %v3337_v53 = vrot.slane %v3335_v25, 5  ;;  %v3021_v36 = vld [vmem:[#allocation2 + $0xb4] sm:$0xf]  ;;  %v7394_v15 = vrot.slane %v5770_v52, 9 }
 0x269   : > { %6225 = vmatprep.mubr.bf16.mxu0 %v8408_v2  ;;  %v3327_v60 = vrot.slane %v3325_v22, 5  ;;  %v3331_v42 = vrot.slane %v3329_v54, 4  ;;  %v7393_v54 = vrot.slane %v5769_v26, 9  ;;  %v3364_v21 = vshrl.u32 %v3021_v36, 16 }
 0x26a   : > { %v5903_v40 = vsel %vm8691_vm13, %v5901_v16, %v5902_v33  ;;  %v8395_v33 = vld [vmem:[#allocation2 + $0xb0] sm:$0x1]  ;;  %v3367_v20 = vshll.u32 %v3021_v36, 16  ;;  %v5923_v25 = vrot.slane %v9915_v50, 5  ;;  %v5929_v26 = vrot.slane %v5927_v29, 4 }
 0x26b   : > { %v7423_v11 = vcombine.low %v5900_v59, %v5903_v40  ;;  %v3332_v0 = vor.u32 %v3331_v42, %v3327_v60  ;;  %v3328_v37 = vsel %vm8602_vm6, %v3323_v9, %v3327_v60  ;;  %v3359_v35 = vshll.u32 %v8395_v33, 16 }
 0x26c   : > { %v5914_v60 = vsel %vm8691_vm13, %v7393_v54, %v5913_v63  ;;  %v5920_v42 = vrot.slane %v9890_v41, 5  ;;  %v3366_v38 = vrot.slane %v3364_v21, 4  ;;  %v3369_v3 = vrot.slane %v3367_v20, 5 }
 0x26d   : > { %v3333_v46 = vrot.slane %v3332_v0, 4  ;;  %v3361_v59 = vrot.slane %v3359_v35, 5  ;;  %v7425_v12 = vcombine.low %v5914_v60, %v5917_v30 }
 0x26e   : > { %3695 = vmatmul.mubr.bf16.gmra.mrb[36].mxu1 %v7197_v28  ;;  %v3342_v28 = vrot.slane %v3340_v6, 4  ;;  %v5922_v39 = vrot.slane %v5920_v42, 4  ;;  %v3370_v24 = vor.u32 %v3369_v3, %v3366_v38  ;;  %v8397_v6 = vld [vmem:[#allocation2 + $0xbc] sm:$0x1]  ;;  %v5921_v50 = vsel %vm8691_vm13, %v7394_v15, %v5920_v42 }
 0x26f   : > { %3704 = vmatprep.mubr.bf16.mxu1 %v8408_v2  ;;  %v3338_v56 = vsel %vm8602_vm6, %v3333_v46, %v3337_v53  ;;  %v3383_v61 = vshll.u32 %v8397_v6, 16 }
 0x270   : > { %6226 = vmatmul.mubr.bf16.gmra.mrb[40].mxu0 %v7422_v27  ;;  %v3355_v27 = vrot.slane %v3353_v57, 4  ;;  %v3346_v16 = vor.u32 %v3345_v51, %v3342_v28  ;;  %v7200_v5 = vcombine.low %v3328_v37, %v3338_v56  ;;  %v3401_v57 = vshrl.u32 %v8398_v32, 16  ;;  %v5771_v28 = vld [vmem:[#allocation2 + $0xcc] sm:$0xe] }
 0x271   : > { %6235 = vmatprep.mubr.bf16.mxu0 %v8408_v2  ;;  %v5924_v47 = vsel %vm8691_vm13, %v5922_v39, %v5923_v25  ;;  %v3371_v53 = vrot.slane %v3370_v24, 4  ;;  %v3385_v19 = vrot.slane %v3383_v61, 5  ;;  %v3390_v51 = vrot.slane %v3388_v8, 4 }
 0x272   : > { %v3356_v22 = vor.u32 %v3355_v27, %v3351_v10  ;;  %v3347_v4 = vrot.slane %v3346_v16, 4  ;;  %v3403_v27 = vrot.slane %v3401_v57, 4  ;;  %v7426_v63 = vcombine.low %v5921_v50, %v5924_v47  ;;  %v8399_v16 = vld [vmem:[#allocation2 + $0xc8] sm:$0x1]  ;;  %v6350_v57 = vld [vmem:[%s10319_s2] sm:$0x3] }
 0x273   : > { %v5930_v37 = vrot.slane %v9938_v48, 5  ;;  %v3376_v36 = vsel %vm8602_vm6, %v3371_v53, %v3375_v34  ;;  %v3394_v56 = vor.u32 %v3393_v62, %v3390_v51  ;;  %v3407_v33 = vshll.u32 %v8399_v16, 16 }
 0x274   : > { %v3357_v40 = vrot.slane %v3356_v22, 4 }
 0x275   : > { %v5931_v48 = vsel %vm8691_vm13, %v5929_v26, %v5930_v37  ;;  %v3395_v54 = vrot.slane %v3394_v56, 4  ;;  %v3409_v31 = vrot.slane %v3407_v33, 5 }
 0x276   : > { %3705 = vmatmul.mubr.bf16.gmra.mrb[40].mxu1 %v7198_v7  ;;  %v3379_v7 = vrot.slane %v3377_v55, 4  ;;  %v3362_v0 = vsel %vm8602_vm6, %v3357_v40, %v3361_v59 }
 0x277   : > { %3714 = vmatprep.mubr.bf16.mxu1 %v8408_v2 }
 0x278   : > { %6236 = vmatmul.mubr.bf16.gmra.mrb[44].mxu0 %v7423_v11  ;;  %v3352_v11 = vsel %vm8602_vm6, %v3347_v4, %v3351_v10  ;;  %v3380_v41 = vor.u32 %v3379_v7, %v3375_v34  ;;  %v3399_v10 = vrot.slane %v3397_v14, 5 }
 0x279   : > { %6245 = vmatprep.mubr.bf16.mxu0 %v8408_v2  ;;  %v7201_v9 = vcombine.low %v3352_v11, %v3362_v0 }
 0x27a   : > { %v3381_v46 = vrot.slane %v3380_v41, 4  ;;  %v3400_v20 = vsel %vm8602_vm6, %v3395_v54, %v3399_v10  ;;  %v6352_v41 = vlaneseq }
 0x27c   : > { %v3386_v58 = vsel %vm8602_vm6, %v3381_v46, %v3385_v19  ;;  %v6353_v8 = vshrl.u32 %v6352_v41, 7 }
 0x27d   : > { %v7202_v22 = vcombine.low %v3376_v36, %v3386_v58 }
 0x27e   : > { %3715 = vmatmul.mubr.bf16.gmra.mrb[44].mxu1 %v7199_v18  ;;  %v7395_v18 = vrot.slane %v5771_v28, 9  ;;  %v6354_v14 = vsub.s32 0, %v6353_v8  ;;  %v6358_v50 = vsub.s32 1, %v6353_v8 }
 0x27f   : > { %3724 = vmatprep.mubr.bf16.mxu1 %v8408_v2 }
 0x280   : > { %6246 = vmatmul.mubr.bf16.gmra.mrb[48].mxu0 %v7424_v23  ;;  %v3404_v23 = vor.u32 %v3403_v27, %v3399_v10  ;;  %v5928_v35 = vsel %vm8691_vm13, %v7395_v18, %v5927_v29  ;;  %v10175_v19 = vrot.slane %v6350_v57, %v6358_v50 }
 0x281   : > { %6255 = vmatprep.mubr.bf16.mxu0 %v8408_v2  ;;  %v7427_v21 = vcombine.low %v5928_v35, %v5931_v48 }
 0x282   : > { %v3405_v49 = vrot.slane %v3404_v23, 4 }
 0x284   : > { %v3410_v1 = vsel %vm8602_vm6, %v3405_v49, %v3409_v31 }
 0x285   : > { %v7203_v45 = vcombine.low %v3400_v20, %v3410_v1 }
 0x286   : > { %3725 = vmatmul.mubr.bf16.gmra.mrb[48].mxu1 %v7200_v5 }
 0x287   : > { %3734 = vmatprep.mubr.bf16.mxu1 %v8408_v2 }
 0x288   : > { %6256 = vmatmul.mubr.bf16.gmra.mrb[52].mxu0 %v7425_v12 }
 0x289   : > { %6265 = vmatprep.mubr.bf16.mxu0 %v8408_v2 }
 0x28e   : > { %3735 = vmatmul.mubr.bf16.gmra.mrb[52].mxu1 %v7201_v9  ;;  %v10171_v9 = vrot.slane %v6350_v57, %v6354_v14 }
 0x28f   : > { %3744 = vmatprep.mubr.bf16.mxu1 %v8408_v2 }
 0x290   : > { %6266 = vmatmul.mubr.bf16.gmra.mrb[56].mxu0 %v7426_v63 }
 0x291   : > { %6275 = vmatprep.mubr.bf16.mxu0 %v8408_v2 }
 0x296   : > { %3745 = vmatmul.mubr.bf16.gmra.mrb[56].mxu1 %v7202_v22 }
 0x297   : > { %3754 = vmatprep.mubr.bf16.mxu1 %v8408_v2 }
 0x298   : > { %6276 = vmatmul.mubr.bf16.gmra.mrb[60].mxu0 %v7427_v21 }
 0x29e   : > { %3755 = vmatmul.mubr.bf16.gmra.mrb[60].mxu1 %v7203_v45 }
 0x2b9   : > { %v2756_v55 = vpop.f32.mrb[0].mxu1 }
 0x2ba   : > { %v2758_v13 = vpop.f32.mrb[1].mxu1 }
 0x2bb   : > { %v2760_v5 = vpop.f32.mrb[2].mxu1 }
 0x2bc   : > { %v2762_v4 = vpop.f32.mrb[3].mxu1 }
 0x2c1   : > { %v10115_v59 = vpop.f32.mrb[4].mxu1 }
 0x2c2   : > { %v10117_v40 = vpop.f32.mrb[5].mxu1 }
 0x2c3   : > { %v10119_v60 = vpop.f32.mrb[6].mxu1 }
 0x2c4   : > { %v10121_v2 = vpop.f32.mrb[7].mxu1 }
 0x2c9   : > { %v10123_v30 = vpop.f32.mrb[8].mxu1 }
 0x2ca   : > { %v10125_v42 = vpop.f32.mrb[9].mxu1 }
 0x2cb   : > { %v10127_v43 = vpop.f32.mrb[10].mxu1 }
 0x2cc   : > { %v10129_v38 = vpop.f32.mrb[11].mxu1 }
 0x2d1   : > { %v10131_v3 = vpop.f32.mrb[12].mxu1 }
 0x2d2   : > { %v10133_v34 = vpop.f32.mrb[13].mxu1 }
 0x2d3   : > { %v10135_v7 = vpop.f32.mrb[14].mxu1 }
 0x2d4   : > { %v10137_v52 = vpop.f32.mrb[15].mxu1 }
 0x2d9   : > { %v10139_v12 = vpop.f32.mrb[16].mxu1 }
 0x2da   : > { %v10141_v17 = vpop.f32.mrb[17].mxu1 }
 0x2db   : > { %v10143_v11 = vpop.f32.mrb[18].mxu1 }
 0x2dc   : > { %v10145_v15 = vpop.f32.mrb[19].mxu1 }
 0x2e1   : > { %v10147_v39 = vpop.f32.mrb[20].mxu1 }
 0x2e2   : > { %v10149_v25 = vpop.f32.mrb[21].mxu1 }
 0x2e3   : > { %v10151_v0 = vpop.f32.mrb[22].mxu1 }
 0x2e4   : > { %v10153_v24 = vpop.f32.mrb[23].mxu1 }
 0x2e9   : > { %v10155_v6 = vpop.f32.mrb[24].mxu1 }
 0x2ea   : > { %v10157_v61 = vpop.f32.mrb[25].mxu1 }
 0x2eb   : > { %v10160_v44 = vpop.f32.mrb[26].mxu1 }
 0x2ec   : > { %v10162_v32 = vpop.f32.mrb[27].mxu1 }
 0x2f1   : > { %v10167_v47 = vpop.f32.mrb[28].mxu1 }
 0x2f2   : > { %v10169_v29 = vpop.f32.mrb[29].mxu1 }
 0x2f3   : > { %v10173_v53 = vpop.f32.mrb[30].mxu1  ;;  %v6127_v46 = vpop.f32.mrb[0].mxu0 }
 0x2f4   : > { %v10177_v28 = vpop.f32.mrb[31].mxu1  ;;  %v7530_v51 = vadd.f32 %v6127_v46, %v2756_v55  ;;  %v6129_v62 = vpop.f32.mrb[1].mxu0 }
 0x2f5   : > { %v7531_v10 = vadd.f32 %v6129_v62, %v2758_v13  ;;  %v6131_v27 = vpop.f32.mrb[2].mxu0 }
 0x2f6   : > { %v6362_v63 = vadd.f32 %v7530_v51, %v10171_v9  ;;  %v7532_v18 = vadd.f32 %v6131_v27, %v2760_v5  ;;  %v6133_v26 = vpop.f32.mrb[3].mxu0 }
 0x2f7   : > { %v6363_v37 = vadd.f32 %v7531_v10, %v10175_v19  ;;  %v7533_v36 = vadd.f32 %v6133_v26, %v2762_v4 }
 0x2f8   : > { %v6364_v58 = vadd.f32 %v7532_v18, %v10171_v9  ;;  %v6724_v16 = vmul.f32 %v6362_v63, %v6362_v63 }
 0x2f9   : > { %v7482_v56 = vpack.c.bf16 %v6363_v37, %v6362_v63  ;;  %v6365_v23 = vadd.f32 %v7533_v36, %v10175_v19  ;;  %v6725_v48 = vmul.f32 %v6363_v37, %v6363_v37 }
 0x2fa   : > { %v6650_v33 = vadd.f32 %v6364_v58, %v6362_v63  ;;  %v6726_v35 = vmul.f32 %v6364_v58, %v6364_v58 }
 0x2fb   : > { %6618 = vst [vmem:[%s10184_s27] sm:$0xff] %v7482_v56  ;;  %v7483_v22 = vpack.c.bf16 %v6365_v23, %v6364_v58  ;;  %v6687_v54 = vadd.f32 %v6365_v23, %v6363_v37  ;;  %v6727_v49 = vmul.f32 %v6365_v23, %v6365_v23  ;;  %v6137_v31 = vpop.f32.mrb[4].mxu0 }
 0x2fc   : > { %v6788_v21 = vadd.f32 %v6726_v35, %v6724_v16  ;;  %v7534_v20 = vadd.f32 %v6137_v31, %v10115_v59  ;;  %v6139_v1 = vpop.f32.mrb[5].mxu0 }
 0x2fd   : > { %6619 = vst [vmem:[%s10184_s27 + $0x8] sm:$0xff] %v7483_v22  ;;  %v6825_v45 = vadd.f32 %v6727_v49, %v6725_v48  ;;  %v7535_v55 = vadd.f32 %v6139_v1, %v10117_v40  ;;  %v6141_v13 = vpop.f32.mrb[6].mxu0 }
 0x2fe   : > { %v6366_v5 = vadd.f32 %v7534_v20, %v10171_v9  ;;  %v7536_v4 = vadd.f32 %v6141_v13, %v10119_v60  ;;  %v6143_v41 = vpop.f32.mrb[7].mxu0 }
 0x2ff   : > { %v6367_v8 = vadd.f32 %v7535_v55, %v10175_v19  ;;  %v7537_v14 = vadd.f32 %v6143_v41, %v10121_v2 }
 0x300   : > { %v6651_v57 = vadd.f32 %v6650_v33, %v6366_v5  ;;  %v6728_v50 = vmul.f32 %v6366_v5, %v6366_v5  ;;  %v6368_v59 = vadd.f32 %v7536_v4, %v10171_v9 }
 0x301   : > { %v7484_v46 = vpack.c.bf16 %v6367_v8, %v6366_v5  ;;  %v6688_v51 = vadd.f32 %v6687_v54, %v6367_v8  ;;  %v6729_v62 = vmul.f32 %v6367_v8, %v6367_v8  ;;  %v6369_v40 = vadd.f32 %v7537_v14, %v10175_v19 }
 0x302   : > { %v6789_v10 = vadd.f32 %v6788_v21, %v6728_v50  ;;  %v6652_v27 = vadd.f32 %v6651_v57, %v6368_v59  ;;  %v6730_v63 = vmul.f32 %v6368_v59, %v6368_v59 }
 0x303   : > { %6620 = vst [vmem:[%s10184_s27 + $0x10] sm:$0xff] %v7484_v46  ;;  %v6826_v60 = vadd.f32 %v6825_v45, %v6729_v62  ;;  %v7485_v18 = vpack.c.bf16 %v6369_v40, %v6368_v59  ;;  %v6689_v26 = vadd.f32 %v6688_v51, %v6369_v40  ;;  %v6731_v37 = vmul.f32 %v6369_v40, %v6369_v40  ;;  %v6147_v36 = vpop.f32.mrb[8].mxu0 }
 0x304   : > { %v6790_v2 = vadd.f32 %v6789_v10, %v6730_v63  ;;  %v7538_v58 = vadd.f32 %v6147_v36, %v10123_v30  ;;  %v6149_v56 = vpop.f32.mrb[9].mxu0 }
 0x305   : > { %6621 = vst [vmem:[%s10184_s27 + $0x18] sm:$0xff] %v7485_v18  ;;  %v6827_v23 = vadd.f32 %v6826_v60, %v6731_v37  ;;  %v7539_v16 = vadd.f32 %v6149_v56, %v10125_v42  ;;  %v6151_v33 = vpop.f32.mrb[10].mxu0 }
 0x306   : > { %v6370_v35 = vadd.f32 %v7538_v58, %v10171_v9  ;;  %v7540_v48 = vadd.f32 %v6151_v33, %v10127_v43  ;;  %v6153_v22 = vpop.f32.mrb[11].mxu0 }
 0x307   : > { %v6371_v54 = vadd.f32 %v7539_v16, %v10175_v19  ;;  %v7541_v49 = vadd.f32 %v6153_v22, %v10129_v38 }
 0x308   : > { %v6653_v31 = vadd.f32 %v6652_v27, %v6370_v35  ;;  %v6732_v21 = vmul.f32 %v6370_v35, %v6370_v35  ;;  %v6372_v30 = vadd.f32 %v7540_v48, %v10171_v9 }
 0x309   : > { %v7486_v20 = vpack.c.bf16 %v6371_v54, %v6370_v35  ;;  %v6690_v1 = vadd.f32 %v6689_v26, %v6371_v54  ;;  %v6733_v45 = vmul.f32 %v6371_v54, %v6371_v54  ;;  %v6373_v42 = vadd.f32 %v7541_v49, %v10175_v19 }
 0x30a   : > { %v6791_v55 = vadd.f32 %v6790_v2, %v6732_v21  ;;  %v6654_v13 = vadd.f32 %v6653_v31, %v6372_v30  ;;  %v6734_v5 = vmul.f32 %v6372_v30, %v6372_v30 }
 0x30b   : > { %6622 = vst [vmem:[%s10184_s27 + $0x20] sm:$0xff] %v7486_v20  ;;  %v6828_v43 = vadd.f32 %v6827_v23, %v6733_v45  ;;  %v7487_v4 = vpack.c.bf16 %v6373_v42, %v6372_v30  ;;  %v6691_v41 = vadd.f32 %v6690_v1, %v6373_v42  ;;  %v6735_v8 = vmul.f32 %v6373_v42, %v6373_v42  ;;  %v6157_v14 = vpop.f32.mrb[12].mxu0 }
 0x30c   : > { %v6792_v38 = vadd.f32 %v6791_v55, %v6734_v5  ;;  %v7542_v57 = vadd.f32 %v6157_v14, %v10131_v3  ;;  %v6159_v50 = vpop.f32.mrb[13].mxu0 }
 0x30d   : > { %6623 = vst [vmem:[%s10184_s27 + $0x28] sm:$0xff] %v7487_v4  ;;  %v6829_v59 = vadd.f32 %v6828_v43, %v6735_v8  ;;  %v7543_v46 = vadd.f32 %v6159_v50, %v10133_v34  ;;  %v6161_v51 = vpop.f32.mrb[14].mxu0 }
 0x30e   : > { %v6374_v62 = vadd.f32 %v7542_v57, %v10171_v9  ;;  %v7544_v40 = vadd.f32 %v6161_v51, %v10135_v7  ;;  %v6163_v10 = vpop.f32.mrb[15].mxu0 }
 0x30f   : > { %v6375_v27 = vadd.f32 %v7543_v46, %v10175_v19  ;;  %v7545_v63 = vadd.f32 %v6163_v10, %v10137_v52 }
 0x310   : > { %v6655_v60 = vadd.f32 %v6654_v13, %v6374_v62  ;;  %v6736_v18 = vmul.f32 %v6374_v62, %v6374_v62  ;;  %v6376_v3 = vadd.f32 %v7544_v40, %v10171_v9 }
 0x311   : > { %v7488_v26 = vpack.c.bf16 %v6375_v27, %v6374_v62  ;;  %v6692_v37 = vadd.f32 %v6691_v41, %v6375_v27  ;;  %v6737_v36 = vmul.f32 %v6375_v27, %v6375_v27  ;;  %v6377_v34 = vadd.f32 %v7545_v63, %v10175_v19 }
 0x312   : > { %v6793_v2 = vadd.f32 %v6792_v38, %v6736_v18  ;;  %v6656_v58 = vadd.f32 %v6655_v60, %v6376_v3  ;;  %v6738_v56 = vmul.f32 %v6376_v3, %v6376_v3 }
 0x313   : > { %6624 = vst [vmem:[%s10184_s27 + $0x30] sm:$0xff] %v7488_v26  ;;  %v6830_v7 = vadd.f32 %v6829_v59, %v6737_v36  ;;  %v7489_v23 = vpack.c.bf16 %v6377_v34, %v6376_v3  ;;  %v6693_v16 = vadd.f32 %v6692_v37, %v6377_v34  ;;  %v6739_v33 = vmul.f32 %v6377_v34, %v6377_v34  ;;  %v6167_v35 = vpop.f32.mrb[16].mxu0 }
 0x314   : > { %v6794_v52 = vadd.f32 %v6793_v2, %v6738_v56  ;;  %v7546_v48 = vadd.f32 %v6167_v35, %v10139_v12  ;;  %v6169_v22 = vpop.f32.mrb[17].mxu0 }
 0x315   : > { %6625 = vst [vmem:[%s10184_s27 + $0x38] sm:$0xff] %v7489_v23  ;;  %v6831_v54 = vadd.f32 %v6830_v7, %v6739_v33  ;;  %v7547_v49 = vadd.f32 %v6169_v22, %v10141_v17  ;;  %v6171_v31 = vpop.f32.mrb[18].mxu0 }
 0x316   : > { %v6378_v21 = vadd.f32 %v7546_v48, %v10171_v9  ;;  %v7548_v30 = vadd.f32 %v6171_v31, %v10143_v11  ;;  %v6173_v20 = vpop.f32.mrb[19].mxu0 }
 0x317   : > { %v6379_v1 = vadd.f32 %v7547_v49, %v10175_v19  ;;  %v7549_v45 = vadd.f32 %v6173_v20, %v10145_v15 }
 0x318   : > { %v6657_v42 = vadd.f32 %v6656_v58, %v6378_v21  ;;  %v6740_v55 = vmul.f32 %v6378_v21, %v6378_v21  ;;  %v6380_v12 = vadd.f32 %v7548_v30, %v10171_v9 }
 0x319   : > { %v7490_v13 = vpack.c.bf16 %v6379_v1, %v6378_v21  ;;  %v6694_v5 = vadd.f32 %v6693_v16, %v6379_v1  ;;  %v6741_v43 = vmul.f32 %v6379_v1, %v6379_v1  ;;  %v6381_v17 = vadd.f32 %v7549_v45, %v10175_v19 }
 0x31a   : > { %v6795_v4 = vadd.f32 %v6794_v52, %v6740_v55  ;;  %v6658_v41 = vadd.f32 %v6657_v42, %v6380_v12  ;;  %v6742_v8 = vmul.f32 %v6380_v12, %v6380_v12 }
 0x31b   : > { %6626 = vst [vmem:[%s10184_s27 + $0x40] sm:$0xff] %v7490_v13  ;;  %v6832_v11 = vadd.f32 %v6831_v54, %v6741_v43  ;;  %v7491_v14 = vpack.c.bf16 %v6381_v17, %v6380_v12  ;;  %v6695_v38 = vadd.f32 %v6694_v5, %v6381_v17  ;;  %v6743_v57 = vmul.f32 %v6381_v17, %v6381_v17  ;;  %v6177_v50 = vpop.f32.mrb[20].mxu0 }
 0x31c   : > { %v6796_v15 = vadd.f32 %v6795_v4, %v6742_v8  ;;  %v7550_v59 = vadd.f32 %v6177_v50, %v10147_v39  ;;  %v6179_v46 = vpop.f32.mrb[21].mxu0 }
 0x31d   : > { %6627 = vst [vmem:[%s10184_s27 + $0x48] sm:$0xff] %v7491_v14  ;;  %v6833_v51 = vadd.f32 %v6832_v11, %v6743_v57  ;;  %v7551_v62 = vadd.f32 %v6179_v46, %v10149_v25  ;;  %v6181_v40 = vpop.f32.mrb[22].mxu0 }
 0x31e   : > { %v6382_v10 = vadd.f32 %v7550_v59, %v10171_v9  ;;  %v7552_v27 = vadd.f32 %v6181_v40, %v10151_v0  ;;  %v6183_v63 = vpop.f32.mrb[23].mxu0 }
 0x31f   : > { %v6383_v60 = vadd.f32 %v7551_v62, %v10175_v19  ;;  %v7553_v18 = vadd.f32 %v6183_v63, %v10153_v24 }
 0x320   : > { %v6659_v3 = vadd.f32 %v6658_v41, %v6382_v10  ;;  %v6744_v26 = vmul.f32 %v6382_v10, %v6382_v10  ;;  %v6384_v39 = vadd.f32 %v7552_v27, %v10171_v9 }
 0x321   : > { %v7492_v37 = vpack.c.bf16 %v6383_v60, %v6382_v10  ;;  %v6696_v36 = vadd.f32 %v6695_v38, %v6383_v60  ;;  %v6745_v34 = vmul.f32 %v6383_v60, %v6383_v60  ;;  %v6385_v25 = vadd.f32 %v7553_v18, %v10175_v19 }
 0x322   : > { %v6797_v2 = vadd.f32 %v6796_v15, %v6744_v26  ;;  %v6660_v58 = vadd.f32 %v6659_v3, %v6384_v39  ;;  %v6746_v56 = vmul.f32 %v6384_v39, %v6384_v39 }
 0x323   : > { %6628 = vst [vmem:[%s10184_s27 + $0x50] sm:$0xff] %v7492_v37  ;;  %v6834_v0 = vadd.f32 %v6833_v51, %v6745_v34  ;;  %v7493_v7 = vpack.c.bf16 %v6385_v25, %v6384_v39  ;;  %v6697_v23 = vadd.f32 %v6696_v36, %v6385_v25  ;;  %v6747_v16 = vmul.f32 %v6385_v25, %v6385_v25  ;;  %v6187_v33 = vpop.f32.mrb[24].mxu0 }
 0x324   : > { %v6798_v24 = vadd.f32 %v6797_v2, %v6746_v56  ;;  %v7554_v35 = vadd.f32 %v6187_v33, %v10155_v6  ;;  %v6189_v52 = vpop.f32.mrb[25].mxu0 }
 0x325   : > { %6629 = vst [vmem:[%s10184_s27 + $0x58] sm:$0xff] %v7493_v7  ;;  %v6835_v48 = vadd.f32 %v6834_v0, %v6747_v16  ;;  %v7555_v22 = vadd.f32 %v6189_v52, %v10157_v61  ;;  %v6191_v54 = vpop.f32.mrb[26].mxu0 }
 0x326   : > { %v6386_v49 = vadd.f32 %v7554_v35, %v10171_v9  ;;  %v7556_v31 = vadd.f32 %v6191_v54, %v10160_v44  ;;  %v6193_v21 = vpop.f32.mrb[27].mxu0 }
 0x327   : > { %v6387_v30 = vadd.f32 %v7555_v22, %v10175_v19  ;;  %v7557_v20 = vadd.f32 %v6193_v21, %v10162_v32 }
 0x328   : > { %v6661_v1 = vadd.f32 %v6660_v58, %v6386_v49  ;;  %v6748_v45 = vmul.f32 %v6386_v49, %v6386_v49  ;;  %v6388_v6 = vadd.f32 %v7556_v31, %v10171_v9 }
 0x329   : > { %v7494_v42 = vpack.c.bf16 %v6387_v30, %v6386_v49  ;;  %v6698_v55 = vadd.f32 %v6697_v23, %v6387_v30  ;;  %v6749_v12 = vmul.f32 %v6387_v30, %v6387_v30  ;;  %v6389_v61 = vadd.f32 %v7557_v20, %v10175_v19 }
 0x32a   : > { %v6799_v13 = vadd.f32 %v6798_v24, %v6748_v45  ;;  %v6662_v5 = vadd.f32 %v6661_v1, %v6388_v6  ;;  %v6750_v43 = vmul.f32 %v6388_v6, %v6388_v6 }
 0x32b   : > { %6630 = vst [vmem:[%s10184_s27 + $0x60] sm:$0xff] %v7494_v42  ;;  %v6836_v44 = vadd.f32 %v6835_v48, %v6749_v12  ;;  %v7495_v17 = vpack.c.bf16 %v6389_v61, %v6388_v6  ;;  %v6699_v4 = vadd.f32 %v6698_v55, %v6389_v61  ;;  %v6751_v41 = vmul.f32 %v6389_v61, %v6389_v61  ;;  %v6197_v8 = vpop.f32.mrb[28].mxu0 }
 0x32c   : > { %v6800_v32 = vadd.f32 %v6799_v13, %v6750_v43  ;;  %v7558_v11 = vadd.f32 %v6197_v8, %v10167_v47  ;;  %v6199_v14 = vpop.f32.mrb[29].mxu0 }
 0x32d   : > { %6631 = vst [vmem:[%s10184_s27 + $0x68] sm:$0xff] %v7495_v17  ;;  %v6837_v38 = vadd.f32 %v6836_v44, %v6751_v41  ;;  %v7559_v57 = vadd.f32 %v6199_v14, %v10169_v29  ;;  %v6201_v50 = vpop.f32.mrb[30].mxu0 }
 0x32e   : > { %v6390_v15 = vadd.f32 %v7558_v11, %v10171_v9  ;;  %v7560_v59 = vadd.f32 %v6201_v50, %v10173_v53  ;;  %v6203_v46 = vpop.f32.mrb[31].mxu0 }
 0x32f   : > { %v6391_v51 = vadd.f32 %v7559_v57, %v10175_v19  ;;  %v7561_v62 = vadd.f32 %v6203_v46, %v10177_v28 }
 0x330   : > { %v6663_v40 = vadd.f32 %v6662_v5, %v6390_v15  ;;  %v6752_v10 = vmul.f32 %v6390_v15, %v6390_v15  ;;  %v6392_v47 = vadd.f32 %v7560_v59, %v10171_v9 }
 0x331   : > { %v7496_v27 = vpack.c.bf16 %v6391_v51, %v6390_v15  ;;  %v6700_v63 = vadd.f32 %v6699_v4, %v6391_v51  ;;  %v6753_v60 = vmul.f32 %v6391_v51, %v6391_v51  ;;  %v6393_v29 = vadd.f32 %v7561_v62, %v10175_v19 }
 0x332   : > { %v6801_v18 = vadd.f32 %v6800_v32, %v6752_v10  ;;  %v6664_v3 = vadd.f32 %v6663_v40, %v6392_v47  ;;  %v6754_v26 = vmul.f32 %v6392_v47, %v6392_v47 }
 0x333   : > { %6632 = vst [vmem:[%s10184_s27 + $0x70] sm:$0xff] %v7496_v27  ;;  %v6838_v53 = vadd.f32 %v6837_v38, %v6753_v60  ;;  %v7497_v39 = vpack.c.bf16 %v6393_v29, %v6392_v47  ;;  %v6701_v37 = vadd.f32 %v6700_v63, %v6393_v29  ;;  %v6755_v36 = vmul.f32 %v6393_v29, %v6393_v29  ;;  %v6207_v34 = vpop.f32.mrb[32].mxu0 }
 0x334   : > { %v6802_v28 = vadd.f32 %v6801_v18, %v6754_v26  ;;  %v6209_v25 = vpop.f32.mrb[33].mxu0 }
 0x335   : > { %6633 = vst [vmem:[%s10184_s27 + $0x78] sm:$0xff] %v7497_v39  ;;  %v6839_v2 = vadd.f32 %v6838_v53, %v6755_v36  ;;  %v6211_v58 = vpop.f32.mrb[34].mxu0 }
 0x336   : > { %v6213_v56 = vpop.f32.mrb[35].mxu0 }
 0x339   : > { %v3686_v0 = vpop.f32.mrb[32].mxu1 }
 0x33a   : > { %v7562_v7 = vadd.f32 %v6207_v34, %v3686_v0  ;;  %v3688_v23 = vpop.f32.mrb[33].mxu1 }
 0x33b   : > { %v7563_v16 = vadd.f32 %v6209_v25, %v3688_v23  ;;  %v3690_v33 = vpop.f32.mrb[34].mxu1  ;;  %v6217_v24 = vpop.f32.mrb[36].mxu0 }
 0x33c   : > { %v6394_v35 = vadd.f32 %v7562_v7, %v10171_v9  ;;  %v7564_v52 = vadd.f32 %v6211_v58, %v3690_v33  ;;  %v3692_v48 = vpop.f32.mrb[35].mxu1  ;;  %v6219_v22 = vpop.f32.mrb[37].mxu0 }
 0x33d   : > { %v6395_v54 = vadd.f32 %v7563_v16, %v10175_v19  ;;  %v7565_v49 = vadd.f32 %v6213_v56, %v3692_v48  ;;  %v6221_v31 = vpop.f32.mrb[38].mxu0 }
 0x33e   : > { %v6665_v21 = vadd.f32 %v6664_v3, %v6394_v35  ;;  %v6756_v30 = vmul.f32 %v6394_v35, %v6394_v35  ;;  %v6396_v20 = vadd.f32 %v7564_v52, %v10171_v9  ;;  %v6223_v1 = vpop.f32.mrb[39].mxu0 }
 0x33f   : > { %v7498_v45 = vpack.c.bf16 %v6395_v54, %v6394_v35  ;;  %v6702_v6 = vadd.f32 %v6701_v37, %v6395_v54  ;;  %v6757_v42 = vmul.f32 %v6395_v54, %v6395_v54  ;;  %v6397_v55 = vadd.f32 %v7565_v49, %v10175_v19 }
 0x340   : > { %v6803_v12 = vadd.f32 %v6802_v28, %v6756_v30  ;;  %v6666_v61 = vadd.f32 %v6665_v21, %v6396_v20  ;;  %v6758_v13 = vmul.f32 %v6396_v20, %v6396_v20 }
 0x341   : > { %6634 = vst [vmem:[%s10184_s27 + $0x80] sm:$0xff] %v7498_v45  ;;  %v6840_v5 = vadd.f32 %v6839_v2, %v6757_v42  ;;  %v7499_v43 = vpack.c.bf16 %v6397_v55, %v6396_v20  ;;  %v6703_v44 = vadd.f32 %v6702_v6, %v6397_v55  ;;  %v6759_v17 = vmul.f32 %v6397_v55, %v6397_v55  ;;  %v3696_v4 = vpop.f32.mrb[36].mxu1 }
 0x342   : > { %v6804_v41 = vadd.f32 %v6803_v12, %v6758_v13  ;;  %v7566_v8 = vadd.f32 %v6217_v24, %v3696_v4  ;;  %v3698_v32 = vpop.f32.mrb[37].mxu1 }
 0x343   : > { %6635 = vst [vmem:[%s10184_s27 + $0x88] sm:$0xff] %v7499_v43  ;;  %v6841_v11 = vadd.f32 %v6840_v5, %v6759_v17  ;;  %v7567_v14 = vadd.f32 %v6219_v22, %v3698_v32  ;;  %v3700_v38 = vpop.f32.mrb[38].mxu1  ;;  %v6227_v57 = vpop.f32.mrb[40].mxu0 }
 0x344   : > { %v6398_v50 = vadd.f32 %v7566_v8, %v10171_v9  ;;  %v7568_v15 = vadd.f32 %v6221_v31, %v3700_v38  ;;  %v3702_v59 = vpop.f32.mrb[39].mxu1  ;;  %v6229_v46 = vpop.f32.mrb[41].mxu0 }
 0x345   : > { %v6399_v51 = vadd.f32 %v7567_v14, %v10175_v19  ;;  %v7569_v62 = vadd.f32 %v6223_v1, %v3702_v59  ;;  %v6231_v40 = vpop.f32.mrb[42].mxu0 }
 0x346   : > { %v6667_v10 = vadd.f32 %v6666_v61, %v6398_v50  ;;  %v6760_v47 = vmul.f32 %v6398_v50, %v6398_v50  ;;  %v6400_v27 = vadd.f32 %v7568_v15, %v10171_v9  ;;  %v6233_v63 = vpop.f32.mrb[43].mxu0 }
 0x347   : > { %v7500_v60 = vpack.c.bf16 %v6399_v51, %v6398_v50  ;;  %v6704_v29 = vadd.f32 %v6703_v44, %v6399_v51  ;;  %v6761_v18 = vmul.f32 %v6399_v51, %v6399_v51  ;;  %v6401_v3 = vadd.f32 %v7569_v62, %v10175_v19 }
 0x348   : > { %v6805_v26 = vadd.f32 %v6804_v41, %v6760_v47  ;;  %v6668_v53 = vadd.f32 %v6667_v10, %v6400_v27  ;;  %v6762_v39 = vmul.f32 %v6400_v27, %v6400_v27 }
 0x349   : > { %6636 = vst [vmem:[%s10184_s27 + $0x90] sm:$0xff] %v7500_v60  ;;  %v6842_v37 = vadd.f32 %v6841_v11, %v6761_v18  ;;  %v7501_v36 = vpack.c.bf16 %v6401_v3, %v6400_v27  ;;  %v6705_v34 = vadd.f32 %v6704_v29, %v6401_v3  ;;  %v6763_v28 = vmul.f32 %v6401_v3, %v6401_v3  ;;  %v3706_v25 = vpop.f32.mrb[40].mxu1 }
 0x34a   : > { %v6806_v2 = vadd.f32 %v6805_v26, %v6762_v39  ;;  %v7570_v58 = vadd.f32 %v6227_v57, %v3706_v25  ;;  %v3708_v56 = vpop.f32.mrb[41].mxu1 }
 0x34b   : > { %6637 = vst [vmem:[%s10184_s27 + $0x98] sm:$0xff] %v7501_v36  ;;  %v6843_v0 = vadd.f32 %v6842_v37, %v6763_v28  ;;  %v7571_v7 = vadd.f32 %v6229_v46, %v3708_v56  ;;  %v3710_v23 = vpop.f32.mrb[42].mxu1  ;;  %v6237_v16 = vpop.f32.mrb[44].mxu0 }
 0x34c   : > { %v6402_v33 = vadd.f32 %v7570_v58, %v10171_v9  ;;  %v7572_v24 = vadd.f32 %v6231_v40, %v3710_v23  ;;  %v3712_v35 = vpop.f32.mrb[43].mxu1  ;;  %v6239_v52 = vpop.f32.mrb[45].mxu0 }
 0x34d   : > { %v6403_v48 = vadd.f32 %v7571_v7, %v10175_v19  ;;  %v7573_v22 = vadd.f32 %v6233_v63, %v3712_v35  ;;  %v6241_v54 = vpop.f32.mrb[46].mxu0 }
 0x34e   : > { %v6669_v49 = vadd.f32 %v6668_v53, %v6402_v33  ;;  %v6764_v31 = vmul.f32 %v6402_v33, %v6402_v33  ;;  %v6404_v21 = vadd.f32 %v7572_v24, %v10171_v9  ;;  %v6243_v30 = vpop.f32.mrb[47].mxu0 }
 0x34f   : > { %v7502_v20 = vpack.c.bf16 %v6403_v48, %v6402_v33  ;;  %v6706_v1 = vadd.f32 %v6705_v34, %v6403_v48  ;;  %v6765_v45 = vmul.f32 %v6403_v48, %v6403_v48  ;;  %v6405_v6 = vadd.f32 %v7573_v22, %v10175_v19 }
 0x350   : > { %v6807_v42 = vadd.f32 %v6806_v2, %v6764_v31  ;;  %v6670_v55 = vadd.f32 %v6669_v49, %v6404_v21  ;;  %v6766_v12 = vmul.f32 %v6404_v21, %v6404_v21 }
 0x351   : > { %6638 = vst [vmem:[%s10184_s27 + $0xa0] sm:$0xff] %v7502_v20  ;;  %v6844_v61 = vadd.f32 %v6843_v0, %v6765_v45  ;;  %v7503_v13 = vpack.c.bf16 %v6405_v6, %v6404_v21  ;;  %v6707_v5 = vadd.f32 %v6706_v1, %v6405_v6  ;;  %v6767_v43 = vmul.f32 %v6405_v6, %v6405_v6  ;;  %v3716_v44 = vpop.f32.mrb[44].mxu1 }
 0x352   : > { %v6808_v17 = vadd.f32 %v6807_v42, %v6766_v12  ;;  %v7574_v4 = vadd.f32 %v6237_v16, %v3716_v44  ;;  %v3718_v41 = vpop.f32.mrb[45].mxu1 }
 0x353   : > { %6639 = vst [vmem:[%s10184_s27 + $0xa8] sm:$0xff] %v7503_v13  ;;  %v6845_v8 = vadd.f32 %v6844_v61, %v6767_v43  ;;  %v7575_v32 = vadd.f32 %v6239_v52, %v3718_v41  ;;  %v3720_v11 = vpop.f32.mrb[46].mxu1  ;;  %v6247_v14 = vpop.f32.mrb[48].mxu0 }
 0x354   : > { %v6406_v38 = vadd.f32 %v7574_v4, %v10171_v9  ;;  %v7576_v57 = vadd.f32 %v6241_v54, %v3720_v11  ;;  %v3722_v50 = vpop.f32.mrb[47].mxu1  ;;  %v6249_v15 = vpop.f32.mrb[49].mxu0 }
 0x355   : > { %v6407_v59 = vadd.f32 %v7575_v32, %v10175_v19  ;;  %v7577_v46 = vadd.f32 %v6243_v30, %v3722_v50  ;;  %v6251_v51 = vpop.f32.mrb[50].mxu0 }
 0x356   : > { %v6671_v62 = vadd.f32 %v6670_v55, %v6406_v38  ;;  %v6768_v40 = vmul.f32 %v6406_v38, %v6406_v38  ;;  %v6408_v10 = vadd.f32 %v7576_v57, %v10171_v9  ;;  %v6253_v47 = vpop.f32.mrb[51].mxu0 }
 0x357   : > { %v7504_v27 = vpack.c.bf16 %v6407_v59, %v6406_v38  ;;  %v6708_v63 = vadd.f32 %v6707_v5, %v6407_v59  ;;  %v6769_v60 = vmul.f32 %v6407_v59, %v6407_v59  ;;  %v6409_v29 = vadd.f32 %v7577_v46, %v10175_v19 }
 0x358   : > { %v6809_v18 = vadd.f32 %v6808_v17, %v6768_v40  ;;  %v6672_v3 = vadd.f32 %v6671_v62, %v6408_v10  ;;  %v6770_v26 = vmul.f32 %v6408_v10, %v6408_v10 }
 0x359   : > { %6640 = vst [vmem:[%s10184_s27 + $0xb0] sm:$0xff] %v7504_v27  ;;  %v6846_v53 = vadd.f32 %v6845_v8, %v6769_v60  ;;  %v7505_v39 = vpack.c.bf16 %v6409_v29, %v6408_v10  ;;  %v6709_v37 = vadd.f32 %v6708_v63, %v6409_v29  ;;  %v6771_v36 = vmul.f32 %v6409_v29, %v6409_v29  ;;  %v3726_v34 = vpop.f32.mrb[48].mxu1 }
 0x35a   : > { %v6810_v28 = vadd.f32 %v6809_v18, %v6770_v26  ;;  %v7578_v25 = vadd.f32 %v6247_v14, %v3726_v34  ;;  %v3728_v2 = vpop.f32.mrb[49].mxu1 }
 0x35b   : > { %6641 = vst [vmem:[%s10184_s27 + $0xb8] sm:$0xff] %v7505_v39  ;;  %v6847_v58 = vadd.f32 %v6846_v53, %v6771_v36  ;;  %v7579_v56 = vadd.f32 %v6249_v15, %v3728_v2  ;;  %v3730_v0 = vpop.f32.mrb[50].mxu1  ;;  %v6257_v7 = vpop.f32.mrb[52].mxu0 }
 0x35c   : > { %v6410_v23 = vadd.f32 %v7578_v25, %v10171_v9  ;;  %v7580_v16 = vadd.f32 %v6251_v51, %v3730_v0  ;;  %v3732_v33 = vpop.f32.mrb[51].mxu1  ;;  %v6259_v24 = vpop.f32.mrb[53].mxu0 }
 0x35d   : > { %v6411_v35 = vadd.f32 %v7579_v56, %v10175_v19  ;;  %v7581_v52 = vadd.f32 %v6253_v47, %v3732_v33  ;;  %v6261_v48 = vpop.f32.mrb[54].mxu0 }
 0x35e   : > { %v6673_v22 = vadd.f32 %v6672_v3, %v6410_v23  ;;  %v6772_v54 = vmul.f32 %v6410_v23, %v6410_v23  ;;  %v6412_v49 = vadd.f32 %v7580_v16, %v10171_v9  ;;  %v6263_v31 = vpop.f32.mrb[55].mxu0 }
 0x35f   : > { %v7506_v21 = vpack.c.bf16 %v6411_v35, %v6410_v23  ;;  %v6710_v30 = vadd.f32 %v6709_v37, %v6411_v35  ;;  %v6773_v20 = vmul.f32 %v6411_v35, %v6411_v35  ;;  %v6413_v1 = vadd.f32 %v7581_v52, %v10175_v19 }
 0x360   : > { %v6811_v45 = vadd.f32 %v6810_v28, %v6772_v54  ;;  %v6674_v6 = vadd.f32 %v6673_v22, %v6412_v49  ;;  %v6774_v42 = vmul.f32 %v6412_v49, %v6412_v49 }
 0x361   : > { %6642 = vst [vmem:[%s10184_s27 + $0xc0] sm:$0xff] %v7506_v21  ;;  %v6848_v55 = vadd.f32 %v6847_v58, %v6773_v20  ;;  %v7507_v12 = vpack.c.bf16 %v6413_v1, %v6412_v49  ;;  %v6711_v61 = vadd.f32 %v6710_v30, %v6413_v1  ;;  %v6775_v13 = vmul.f32 %v6413_v1, %v6413_v1  ;;  %v3736_v5 = vpop.f32.mrb[52].mxu1 }
 0x362   : > { %v6812_v43 = vadd.f32 %v6811_v45, %v6774_v42  ;;  %v7582_v44 = vadd.f32 %v6257_v7, %v3736_v5  ;;  %v3738_v17 = vpop.f32.mrb[53].mxu1 }
 0x363   : > { %6643 = vst [vmem:[%s10184_s27 + $0xc8] sm:$0xff] %v7507_v12  ;;  %v6849_v4 = vadd.f32 %v6848_v55, %v6775_v13  ;;  %v7583_v41 = vadd.f32 %v6259_v24, %v3738_v17  ;;  %v3740_v8 = vpop.f32.mrb[54].mxu1  ;;  %v6267_v32 = vpop.f32.mrb[56].mxu0 }
 0x364   : > { %v6414_v11 = vadd.f32 %v7582_v44, %v10171_v9  ;;  %v7584_v14 = vadd.f32 %v6261_v48, %v3740_v8  ;;  %v3742_v38 = vpop.f32.mrb[55].mxu1  ;;  %v6269_v57 = vpop.f32.mrb[57].mxu0 }
 0x365   : > { %v6415_v50 = vadd.f32 %v7583_v41, %v10175_v19  ;;  %v7585_v15 = vadd.f32 %v6263_v31, %v3742_v38  ;;  %v6271_v59 = vpop.f32.mrb[58].mxu0 }
 0x366   : > { %v6675_v46 = vadd.f32 %v6674_v6, %v6414_v11  ;;  %v6776_v51 = vmul.f32 %v6414_v11, %v6414_v11  ;;  %v6416_v62 = vadd.f32 %v7584_v14, %v10171_v9  ;;  %v6273_v40 = vpop.f32.mrb[59].mxu0 }
 0x367   : > { %v7508_v10 = vpack.c.bf16 %v6415_v50, %v6414_v11  ;;  %v6712_v47 = vadd.f32 %v6711_v61, %v6415_v50  ;;  %v6777_v27 = vmul.f32 %v6415_v50, %v6415_v50  ;;  %v6417_v63 = vadd.f32 %v7585_v15, %v10175_v19 }
 0x368   : > { %v6813_v60 = vadd.f32 %v6812_v43, %v6776_v51  ;;  %v6676_v29 = vadd.f32 %v6675_v46, %v6416_v62  ;;  %v6778_v18 = vmul.f32 %v6416_v62, %v6416_v62 }
 0x369   : > { %6644 = vst [vmem:[%s10184_s27 + $0xd0] sm:$0xff] %v7508_v10  ;;  %v6850_v3 = vadd.f32 %v6849_v4, %v6777_v27  ;;  %v7509_v26 = vpack.c.bf16 %v6417_v63, %v6416_v62  ;;  %v6713_v53 = vadd.f32 %v6712_v47, %v6417_v63  ;;  %v6779_v39 = vmul.f32 %v6417_v63, %v6417_v63  ;;  %v3746_v37 = vpop.f32.mrb[56].mxu1 }
 0x36a   : > { %v6814_v36 = vadd.f32 %v6813_v60, %v6778_v18  ;;  %v7586_v34 = vadd.f32 %v6267_v32, %v3746_v37  ;;  %v3748_v28 = vpop.f32.mrb[57].mxu1 }
 0x36b   : > { %6645 = vst [vmem:[%s10184_s27 + $0xd8] sm:$0xff] %v7509_v26  ;;  %v6851_v25 = vadd.f32 %v6850_v3, %v6779_v39  ;;  %v7587_v2 = vadd.f32 %v6269_v57, %v3748_v28  ;;  %v3750_v58 = vpop.f32.mrb[58].mxu1  ;;  %v6277_v56 = vpop.f32.mrb[60].mxu0 }
 0x36c   : > { %v6418_v0 = vadd.f32 %v7586_v34, %v10171_v9  ;;  %v7588_v7 = vadd.f32 %v6271_v59, %v3750_v58  ;;  %v3752_v23 = vpop.f32.mrb[59].mxu1  ;;  %v6279_v16 = vpop.f32.mrb[61].mxu0 }
 0x36d   : > { %v6419_v33 = vadd.f32 %v7587_v2, %v10175_v19  ;;  %v7589_v24 = vadd.f32 %v6273_v40, %v3752_v23  ;;  %v6281_v35 = vpop.f32.mrb[62].mxu0 }
 0x36e   : > { %v6677_v52 = vadd.f32 %v6676_v29, %v6418_v0  ;;  %v6780_v48 = vmul.f32 %v6418_v0, %v6418_v0  ;;  %v6420_v22 = vadd.f32 %v7588_v7, %v10171_v9  ;;  %v6283_v54 = vpop.f32.mrb[63].mxu0 }
 0x36f   : > { %v7510_v49 = vpack.c.bf16 %v6419_v33, %v6418_v0  ;;  %v6714_v31 = vadd.f32 %v6713_v53, %v6419_v33  ;;  %v6781_v21 = vmul.f32 %v6419_v33, %v6419_v33  ;;  %v6421_v30 = vadd.f32 %v7589_v24, %v10175_v19 }
 0x370   : > { %v6815_v20 = vadd.f32 %v6814_v36, %v6780_v48  ;;  %v6678_v1 = vadd.f32 %v6677_v52, %v6420_v22  ;;  %v6782_v45 = vmul.f32 %v6420_v22, %v6420_v22 }
 0x371   : > { %6646 = vst [vmem:[%s10184_s27 + $0xe0] sm:$0xff] %v7510_v49  ;;  %v6852_v6 = vadd.f32 %v6851_v25, %v6781_v21  ;;  %v7511_v42 = vpack.c.bf16 %v6421_v30, %v6420_v22  ;;  %v6715_v55 = vadd.f32 %v6714_v31, %v6421_v30  ;;  %v6783_v12 = vmul.f32 %v6421_v30, %v6421_v30  ;;  %v3756_v61 = vpop.f32.mrb[60].mxu1 }
 0x372   : > { %v6816_v13 = vadd.f32 %v6815_v20, %v6782_v45  ;;  %v7590_v5 = vadd.f32 %v6277_v56, %v3756_v61  ;;  %v3758_v43 = vpop.f32.mrb[61].mxu1 }
 0x373   : > { %6647 = vst [vmem:[%s10184_s27 + $0xe8] sm:$0xff] %v7511_v42  ;;  %v6853_v44 = vadd.f32 %v6852_v6, %v6783_v12  ;;  %v7591_v17 = vadd.f32 %v6279_v16, %v3758_v43  ;;  %v3760_v4 = vpop.f32.mrb[62].mxu1 }
 0x374   : > { %v6422_v41 = vadd.f32 %v7590_v5, %v10171_v9  ;;  %v7592_v8 = vadd.f32 %v6281_v35, %v3760_v4  ;;  %v3762_v32 = vpop.f32.mrb[63].mxu1 }
 0x375   : > { %v6423_v11 = vadd.f32 %v7591_v17, %v10175_v19  ;;  %v7593_v14 = vadd.f32 %v6283_v54, %v3762_v32 }
 0x376   : > { %v6679_v38 = vadd.f32 %v6678_v1, %v6422_v41  ;;  %v6784_v57 = vmul.f32 %v6422_v41, %v6422_v41  ;;  %v6424_v50 = vadd.f32 %v7592_v8, %v10171_v9 }
 0x377   : > { %v7512_v15 = vpack.c.bf16 %v6423_v11, %v6422_v41  ;;  %v6716_v59 = vadd.f32 %v6715_v55, %v6423_v11  ;;  %v6785_v46 = vmul.f32 %v6423_v11, %v6423_v11  ;;  %v6425_v51 = vadd.f32 %v7593_v14, %v10175_v19 }
 0x378   : > { %v6817_v62 = vadd.f32 %v6816_v13, %v6784_v57  ;;  %v6680_v40 = vadd.f32 %v6679_v38, %v6424_v50  ;;  %v6786_v10 = vmul.f32 %v6424_v50, %v6424_v50 }
 0x379   : > { %6648 = vst [vmem:[%s10184_s27 + $0xf0] sm:$0xff] %v7512_v15  ;;  %v6854_v47 = vadd.f32 %v6853_v44, %v6785_v46  ;;  %v7513_v27 = vpack.c.bf16 %v6425_v51, %v6424_v50  ;;  %v6717_v63 = vadd.f32 %v6716_v59, %v6425_v51  ;;  %v6787_v60 = vmul.f32 %v6425_v51, %v6425_v51 }
 0x37a   : > { %v6681_v29 = vrot.slane %v6680_v40, 4  ;;  %v6818_v18 = vadd.f32 %v6817_v62, %v6786_v10 }
 0x37b   : > { %6649 = vst [vmem:[%s10184_s27 + $0xf8] sm:$0xff] %v7513_v27  ;;  %v6718_v3 = vrot.slane %v6717_v63, 4  ;;  %v6855_v26 = vadd.f32 %v6854_v47, %v6787_v60 }
 0x37c   : > { %v6682_v53 = vadd.f32 %v6681_v29, %v6680_v40  ;;  %v6819_v9 = vrot.slane %v6818_v18, 4 }
 0x37d   : > { %v6719_v39 = vadd.f32 %v6718_v3, %v6717_v63  ;;  %v6856_v37 = vrot.slane %v6855_v26, 4 }
 0x37e   : > { %v6683_v36 = vrot.slane %v6682_v53, 2  ;;  %v6820_v19 = vadd.f32 %v6819_v9, %v6818_v18 }
 0x37f   : > { %v6720_v34 = vrot.slane %v6719_v39, 2  ;;  %v6857_v28 = vadd.f32 %v6856_v37, %v6855_v26 }
 0x380   : > { %v6684_v25 = vadd.f32 %v6683_v36, %v6682_v53  ;;  %v6821_v2 = vrot.slane %v6820_v19, 2 }
 0x381   : > { %v6721_v58 = vadd.f32 %v6720_v34, %v6719_v39  ;;  %v6858_v56 = vrot.slane %v6857_v28, 2 }
 0x382   : > { %v6685_v0 = vrot.slane %v6684_v25, 1  ;;  %v6822_v7 = vadd.f32 %v6821_v2, %v6820_v19 }
 0x383   : > { %v6722_v23 = vrot.slane %v6721_v58, 1  ;;  %v6859_v16 = vadd.f32 %v6858_v56, %v6857_v28 }
 0x384   : > { %v6823_v33 = vrot.slane %v6822_v7, 1  ;;  %v6686_v35 = vadd.f32 %v6685_v0, %v6684_v25 }
 0x385   : > { %v6860_v24 = vrot.slane %v6859_v16, 1  ;;  %v6723_v48 = vadd.f32 %v6722_v23, %v6721_v58 }
 0x386   : > { %v6824_v52 = vadd.f32 %v6823_v33, %v6822_v7 }
 0x387   : > { %v6861_v22 = vadd.f32 %v6860_v24, %v6859_v16 }
 0x388   : > { %v6863_v54 = vsel %vm632_vm7, %v6686_v35, %v6824_v52 }
 0x389   : > { %v6864_v49 = vsel %vm632_vm7, %v6723_v48, %v6861_v22 }
 0x38a   : > { %v6867_v31 = vcombine.low %v6863_v54, %v6864_v49 }
 0x38c   : > { %7476 = vst.sshfl [vmem:[%s213_s6] sm:$0x33 pattern:$0x76325410] %v6867_v31 }
 0x38d PF: > { %s15_s15 = sadd.s32 1, %s8406_s15  }
 0x38e   : > { %p12_p5 = scmp.ge.s32.totalorder %s15_s15, 4  }
 0x390   :  { %14 = sbr.rel (!%p12_p5) target bundleno = 1 (0x1), region = 84 }

// kernel: residual_block_pallas.4
= control target key start
LH: loop header
LB: loop body
LE: loop exit
PB: predicated region body
PF: predicated region fallthrough
CT: control target
= control target key end

     0   :  { %s8324_s21 = smov 0   ;;  %s8326_s22 = smov 0   ;;  %s10291_s0 = inlined_call_operand.vmem [shape: bf16[2,16,16,256], index: 0, kind: input, shape index: {}]   ;;  %s10292_s1 = inlined_call_operand.vmem [shape: bf16[9,128,128], index: 1, kind: input, shape index: {}]   ;;  %s10293_s2 = inlined_call_operand.vmem [shape: f32[1,128], index: 2, kind: input, shape index: {}]   ;;  %s10294_s3 = inlined_call_operand.vmem [shape: f32[1,128], index: 3, kind: input, shape index: {}]   ;;  %s10295_s4 = inlined_call_operand.vmem [shape: f32[1,128], index: 4, kind: input, shape index: {}]   ;;  %s10296_s5 = inlined_call_operand.vmem [shape: bf16[512,128], index: 5, kind: output, shape index: {0}]   ;;  %s10297_s6 = inlined_call_operand.vmem [shape: f32[2,2,128], index: 6, kind: output, shape index: {1}]  }
   0x1   :  { %s8328_s23 = smov 0  }
   0x2 LB: > { %s8340_s24 = sadd.s32 4294967295, %s8286_s23   ;;  %s8343_s25 = sadd.s32 1, %s8286_s23   ;;  %s8286_s23 = sphi %s8328_s23, %s10372_s23   ;;  %s8282_s22 = sphi %s8326_s22, %s10371_s22   ;;  %s8278_s21 = sphi %s8324_s21, %s10370_s21  }
   0x3   : > { %s21_s26 = ssub.s32 %s8286_s23, %s8343_s25  ;;  %s24_s27 = sadd.s32 1, %s8282_s22 }
   0x4   : > { %p22_p0 = scmp.eq.s32.totalorder %s21_s26, 0  ;;  %p31_p1 = scmp.ne.s32.totalorder %s8282_s22, %s8278_s21 }
   0x5   : > { %p32_p2 = scmp.eq.s32.totalorder %s8286_s23, 0  ;;  %p6408_p4 = scmp.ge.s32.totalorder %s8286_s23, 2 }
   0x6   : > { %s8352_s28 = scalar_select %p22_p0, %s8282_s22, %s24_s27  }
   0x7   : > { %p33_p3 = por %p32_p2, %p31_p1  ;;  %205 = sbr.rel (%p6408_p4) target bundleno = 39 (0x27), region = 32 }
   0xe   : > { %208 = sbr.rel (!%p33_p3) target bundleno = 39 (0x27), region = 36  ;;  %s210_s29 = sand.u32 (%p33_p3), 1, %s8282_s22  }
   0xf   : > { %s6878_s30 = sshll.u32 (%p33_p3), %s8286_s23, 8  ;;  %s6409_s7 = sshll.u32 (%p33_p3), %s210_s29, 7 }
  0x10   : > { %s8360_s10 = scalar_lea.vmem (%p33_p3), %s10291_s0, %s6878_s30  ;;  %s8364_s11 = scalar_lea.vmem (%p33_p3), [#allocation3], %s6409_s7 }
  0x11   : > { %v231_v0 = vld [vmem:[%s8360_s10] sm:$0xf] (%p33_p3)  ;;  %v233_v1 = vld [vmem:[%s8360_s10 + $0x8] sm:$0xf] (%p33_p3)  ;;  %v235_v2 = vld [vmem:[%s8360_s10 + $0x10] sm:$0xf] (%p33_p3) }
  0x12   : > { %232 = vst [vmem:[%s8364_s11] sm:$0xf] (%p33_p3), %v231_v0  ;;  %234 = vst [vmem:[%s8364_s11 + $0x4] sm:$0xf] (%p33_p3), %v233_v1  ;;  %v237_v3 = vld [vmem:[%s8360_s10 + $0x18] sm:$0xf] (%p33_p3) }
  0x13   : > { %v239_v4 = vld [vmem:[%s8360_s10 + $0x20] sm:$0xf] (%p33_p3)  ;;  %236 = vst [vmem:[%s8364_s11 + $0x8] sm:$0xf] (%p33_p3), %v235_v2  ;;  %238 = vst [vmem:[%s8364_s11 + $0xc] sm:$0xf] (%p33_p3), %v237_v3 }
  0x14   : > { %240 = vst [vmem:[%s8364_s11 + $0x10] sm:$0xf] (%p33_p3), %v239_v4  ;;  %v241_v5 = vld [vmem:[%s8360_s10 + $0x28] sm:$0xf] (%p33_p3)  ;;  %v243_v6 = vld [vmem:[%s8360_s10 + $0x30] sm:$0xf] (%p33_p3) }
  0x15   : > { %v245_v7 = vld [vmem:[%s8360_s10 + $0x38] sm:$0xf]  ;;  %242 = vst [vmem:[%s8364_s11 + $0x14] sm:$0xf] %v241_v5  ;;  %244 = vst [vmem:[%s8364_s11 + $0x18] sm:$0xf] %v243_v6 }
  0x16   : > { %246 = vst [vmem:[%s8364_s11 + $0x1c] sm:$0xf] %v245_v7  ;;  %v247_v8 = vld [vmem:[%s8360_s10 + $0x40] sm:$0xf]  ;;  %v249_v9 = vld [vmem:[%s8360_s10 + $0x48] sm:$0xf] }
  0x17   : > { %v251_v10 = vld [vmem:[%s8360_s10 + $0x50] sm:$0xf]  ;;  %248 = vst [vmem:[%s8364_s11 + $0x20] sm:$0xf] %v247_v8  ;;  %250 = vst [vmem:[%s8364_s11 + $0x24] sm:$0xf] %v249_v9 }
  0x18   : > { %252 = vst [vmem:[%s8364_s11 + $0x28] sm:$0xf] %v251_v10  ;;  %v253_v11 = vld [vmem:[%s8360_s10 + $0x58] sm:$0xf]  ;;  %v255_v12 = vld [vmem:[%s8360_s10 + $0x60] sm:$0xf] }
  0x19   : > { %v257_v13 = vld [vmem:[%s8360_s10 + $0x68] sm:$0xf]  ;;  %254 = vst [vmem:[%s8364_s11 + $0x2c] sm:$0xf] %v253_v11  ;;  %256 = vst [vmem:[%s8364_s11 + $0x30] sm:$0xf] %v255_v12 }
  0x1a   : > { %258 = vst [vmem:[%s8364_s11 + $0x34] sm:$0xf] %v257_v13  ;;  %v259_v14 = vld [vmem:[%s8360_s10 + $0x70] sm:$0xf]  ;;  %v261_v15 = vld [vmem:[%s8360_s10 + $0x78] sm:$0xf] }
  0x1b   : > { %v263_v16 = vld [vmem:[%s8360_s10 + $0x80] sm:$0xf]  ;;  %260 = vst [vmem:[%s8364_s11 + $0x38] sm:$0xf] %v259_v14  ;;  %262 = vst [vmem:[%s8364_s11 + $0x3c] sm:$0xf] %v261_v15 }
  0x1c   : > { %264 = vst [vmem:[%s8364_s11 + $0x40] sm:$0xf] %v263_v16  ;;  %v265_v17 = vld [vmem:[%s8360_s10 + $0x88] sm:$0xf]  ;;  %v267_v18 = vld [vmem:[%s8360_s10 + $0x90] sm:$0xf] }
  0x1d   : > { %v269_v19 = vld [vmem:[%s8360_s10 + $0x98] sm:$0xf]  ;;  %266 = vst [vmem:[%s8364_s11 + $0x44] sm:$0xf] %v265_v17  ;;  %268 = vst [vmem:[%s8364_s11 + $0x48] sm:$0xf] %v267_v18 }
  0x1e   : > { %270 = vst [vmem:[%s8364_s11 + $0x4c] sm:$0xf] %v269_v19  ;;  %v271_v20 = vld [vmem:[%s8360_s10 + $0xa0] sm:$0xf]  ;;  %v273_v21 = vld [vmem:[%s8360_s10 + $0xa8] sm:$0xf] }
  0x1f   : > { %v275_v22 = vld [vmem:[%s8360_s10 + $0xb0] sm:$0xf]  ;;  %272 = vst [vmem:[%s8364_s11 + $0x50] sm:$0xf] %v271_v20  ;;  %274 = vst [vmem:[%s8364_s11 + $0x54] sm:$0xf] %v273_v21 }
  0x20   : > { %276 = vst [vmem:[%s8364_s11 + $0x58] sm:$0xf] %v275_v22  ;;  %v277_v23 = vld [vmem:[%s8360_s10 + $0xb8] sm:$0xf]  ;;  %v279_v24 = vld [vmem:[%s8360_s10 + $0xc0] sm:$0xf] }
  0x21   : > { %v281_v25 = vld [vmem:[%s8360_s10 + $0xc8] sm:$0xf]  ;;  %278 = vst [vmem:[%s8364_s11 + $0x5c] sm:$0xf] %v277_v23  ;;  %280 = vst [vmem:[%s8364_s11 + $0x60] sm:$0xf] %v279_v24 }
  0x22   : > { %282 = vst [vmem:[%s8364_s11 + $0x64] sm:$0xf] %v281_v25  ;;  %v283_v26 = vld [vmem:[%s8360_s10 + $0xd0] sm:$0xf]  ;;  %v285_v27 = vld [vmem:[%s8360_s10 + $0xd8] sm:$0xf] }
  0x23   : > { %v287_v28 = vld [vmem:[%s8360_s10 + $0xe0] sm:$0xf]  ;;  %284 = vst [vmem:[%s8364_s11 + $0x68] sm:$0xf] %v283_v26  ;;  %286 = vst [vmem:[%s8364_s11 + $0x6c] sm:$0xf] %v285_v27 }
  0x24   : > { %288 = vst [vmem:[%s8364_s11 + $0x70] sm:$0xf] %v287_v28  ;;  %v289_v29 = vld [vmem:[%s8360_s10 + $0xe8] sm:$0xf]  ;;  %v291_v30 = vld [vmem:[%s8360_s10 + $0xf0] sm:$0xf] }
  0x25   : > { %v293_v31 = vld [vmem:[%s8360_s10 + $0xf8] sm:$0xf]  ;;  %290 = vst [vmem:[%s8364_s11 + $0x74] sm:$0xf] %v289_v29  ;;  %292 = vst [vmem:[%s8364_s11 + $0x78] sm:$0xf] %v291_v30 }
  0x26   : > { %294 = vst [vmem:[%s8364_s11 + $0x7c] sm:$0xf] %v293_v31 }
  0x27 PF: > { %p6412_p5 = scmp.ge.s32.totalorder %s8286_s23, 1  ;;  %p380_p6 = scmp.lt.s32.totalorder %s8286_s23, 3 }
  0x29   : > { %p381_p7 = pnand %p6412_p5, %p380_p6 }
  0x2b   : > { %384 = sbr.rel (%p381_p7) target bundleno = 753 (0x2f1), region = 77 }
  0x32   : > { %v8062_v32 = vld [vmem:[%s10292_s1 + $0x40] sm:$0xff]   ;;  %v8288_v34 = vmov 0   ;;  %v8064_v35 = vld [vmem:[%s10292_s1 + $0x48] sm:$0xff]   ;;  %v8066_v37 = vld [vmem:[%s10292_s1 + $0x50] sm:$0xff]   ;;  %s387_s9 = sand.u32 1, %s8278_s21   ;;  %vm1079_vm3 = vcmask 1043456  }
  0x33   : > { %v8063_v33 = vld [vmem:[%s10292_s1 + $0x100] sm:$0xff]   ;;  %621 = vst [vmem:[#allocation2] sm:$0xf] %v8288_v34  ;;  %622 = vst [vmem:[#allocation2 + $0x4] sm:$0xf] %v8288_v34  ;;  %7333 = vmatprep.subr.bf16.mxu1 %v8062_v32  ;;  %v8065_v36 = vld [vmem:[%s10292_s1 + $0x108] sm:$0xff]  }
  0x34   : > { %623 = vst [vmem:[#allocation2 + $0x8] sm:$0x1] %v8288_v34  ;;  %624 = vst [vmem:[#allocation2 + $0xc] sm:$0xf] %v8288_v34  ;;  %7525 = vmatprep.subr.bf16.mxu0 %v8063_v33  ;;  %7334 = vmatpush3.bf16.msra.mxu1 %v8062_v32  ;;  %v8067_v38 = vld [vmem:[%s10292_s1 + $0x110] sm:$0xff]   ;;  %v8068_v39 = vld [vmem:[%s10292_s1 + $0x58] sm:$0xff]  }
  0x35   : > { %625 = vst [vmem:[#allocation2 + $0x10] sm:$0xf] %v8288_v34  ;;  %626 = vst [vmem:[#allocation2 + $0x14] sm:$0x1] %v8288_v34  ;;  %7526 = vmatpush3.bf16.msra.mxu0 %v8063_v33  ;;  %7335 = vmatprep.subr.bf16.mxu1 %v8064_v35  ;;  %v8069_v40 = vld [vmem:[%s10292_s1 + $0x118] sm:$0xff]   ;;  %v8070_v41 = vld [vmem:[%s10292_s1 + $0x60] sm:$0xff]  }
  0x36   : > { %627 = vst [vmem:[#allocation2 + $0x18] sm:$0xf] %v8288_v34  ;;  %628 = vst [vmem:[#allocation2 + $0x1c] sm:$0xf] %v8288_v34  ;;  %7527 = vmatprep.subr.bf16.mxu0 %v8065_v36  ;;  %s6413_s12 = sshll.u32 %s387_s9, 7  ;;  %v8071_v42 = vld [vmem:[%s10292_s1 + $0x120] sm:$0xff]  }
  0x37   : > { %629 = vst [vmem:[#allocation2 + $0x20] sm:$0x1] %v8288_v34  ;;  %630 = vst [vmem:[#allocation2 + $0x24] sm:$0xf] %v8288_v34  ;;  %v8072_v43 = vld [vmem:[%s10292_s1 + $0x68] sm:$0xff]   ;;  %s8467_s18 = scalar_lea.vmem [#allocation3], %s6413_s12 }
  0x38   : > { %631 = vst [vmem:[#allocation2 + $0x28] sm:$0xf] %v8288_v34  ;;  %632 = vst [vmem:[#allocation2 + $0x2c] sm:$0x1] %v8288_v34  ;;  %7336 = vmatpush3.bf16.msra.mxu1 %v8064_v35  ;;  %v8073_v47 = vld [vmem:[%s10292_s1 + $0x128] sm:$0xff]   ;;  %v6944_v53 = vld [vmem:[%s8467_s18] sm:$0xff]  }
  0x39   : > { %633 = vst [vmem:[#allocation2 + $0x30] sm:$0xf] %v8288_v34  ;;  %634 = vst [vmem:[#allocation2 + $0x34] sm:$0xf] %v8288_v34  ;;  %7528 = vmatpush3.bf16.msra.mxu0 %v8065_v36  ;;  %7337 = vmatprep.subr.bf16.mxu1 %v8066_v37  ;;  %vm1260_vm0 = vsmask.f32 3328  ;;  %v6945_v56 = vunpack.c.l.bf16 %v6944_v53  ;;  %v6946_v57 = vunpack.c.h.bf16 %v6944_v53 }
  0x3a   : > { %635 = vst [vmem:[#allocation2 + $0x38] sm:$0x1] %v8288_v34  ;;  %636 = vst [vmem:[#allocation2 + $0x3c] sm:$0xf] %v8288_v34  ;;  %7529 = vmatprep.subr.bf16.mxu0 %v8067_v38  ;;  %v1196_v44 = vld [vmem:[#allocation2] sm:$0xf] }
  0x3b   : > { %637 = vst [vmem:[#allocation2 + $0x40] sm:$0xf] %v8288_v34  ;;  %638 = vst [vmem:[#allocation2 + $0x44] sm:$0x1] %v8288_v34  ;;  %v1197_v45 = vld [vmem:[#allocation2 + $0x4] sm:$0xf] }
  0x3c   : > { %639 = vst [vmem:[#allocation2 + $0x48] sm:$0xf] %v8288_v34  ;;  %640 = vst [vmem:[#allocation2 + $0x4c] sm:$0xf] %v8288_v34  ;;  %7338 = vmatpush3.bf16.msra.mxu1 %v8066_v37  ;;  %v1244_v46 = vld [vmem:[#allocation2 + $0x8] sm:$0x1] }
  0x3d   : > { %641 = vst [vmem:[#allocation2 + $0x50] sm:$0x1] %v8288_v34  ;;  %642 = vst [vmem:[#allocation2 + $0x54] sm:$0xf] %v8288_v34  ;;  %7530 = vmatpush3.bf16.msra.mxu0 %v8067_v38  ;;  %7339 = vmatprep.subr.bf16.mxu1 %v8068_v39  ;;  %v1264_v48 = vshrl.u32 %v1196_v44, 16  ;;  %v1267_v49 = vshll.u32 %v1196_v44, 16 }
  0x3e   : > { %643 = vst [vmem:[#allocation2 + $0x58] sm:$0xf] %v8288_v34  ;;  %644 = vst [vmem:[#allocation2 + $0x5c] sm:$0x1] %v8288_v34  ;;  %7531 = vmatprep.subr.bf16.mxu0 %v8069_v40  ;;  %vm1261_vm1 = vsmask.f32 7440 }
  0x3f   : > { %645 = vst [vmem:[#allocation2 + $0x60] sm:$0xf] %v8288_v34  ;;  %646 = vst [vmem:[#allocation2 + $0x64] sm:$0xf] %v8288_v34  ;;  %v1273_v50 = vshll.u32 %v1197_v45, 16  ;;  %v1277_v51 = vshrl.u32 %v1197_v45, 16 }
  0x40   : > { %647 = vst [vmem:[#allocation2 + $0x68] sm:$0x1] %v8288_v34  ;;  %648 = vst [vmem:[#allocation2 + $0x6c] sm:$0xf] %v8288_v34  ;;  %7340 = vmatpush3.bf16.msra.mxu1 %v8068_v39  ;;  %v1283_v52 = vshll.u32 %v1244_v46, 16  ;;  %v1266_v54 = vrot.slane %v1264_v48, 4 }
  0x41   : > { %649 = vst [vmem:[#allocation2 + $0x70] sm:$0xf] %v8288_v34  ;;  %650 = vst [vmem:[#allocation2 + $0x74] sm:$0x1] %v8288_v34  ;;  %7532 = vmatpush3.bf16.msra.mxu0 %v8069_v40  ;;  %7341 = vmatprep.subr.bf16.mxu1 %v8070_v41  ;;  %v1269_v55 = vrot.slane %v1267_v49, 5  ;;  %v8074_v59 = vld [vmem:[%s10292_s1 + $0x70] sm:$0xff]  }
  0x42   : > { %651 = vst [vmem:[#allocation2 + $0x78] sm:$0xf] %v8288_v34  ;;  %652 = vst [vmem:[#allocation2 + $0x7c] sm:$0xf] %v8288_v34  ;;  %7533 = vmatprep.subr.bf16.mxu0 %v8071_v42  ;;  %v8473_v58 = vld [vmem:[%s10294_s3] ss:$0 sm:$0xff] }
  0x43   : > { %653 = vst [vmem:[#allocation2 + $0x80] sm:$0x1] %v8288_v34  ;;  %654 = vst [vmem:[#allocation2 + $0x84] sm:$0xf] %v8288_v34  ;;  %v1275_v60 = vrot.slane %v1273_v50, 5  ;;  %v1279_v61 = vrot.slane %v1277_v51, 4  ;;  %v1270_v0 = vor.u32 %v1269_v55, %v1266_v54  ;;  %v503_v1 = vmul.f32 %v6945_v56, %v8473_v58 }
  0x44   : > { %655 = vst [vmem:[#allocation2 + $0x88] sm:$0xf] %v8288_v34  ;;  %656 = vst [vmem:[#allocation2 + $0x8c] sm:$0x1] %v8288_v34  ;;  %7342 = vmatpush3.bf16.msra.mxu1 %v8070_v41  ;;  %v8481_v62 = vld [vmem:[%s10295_s4] ss:$0 sm:$0xff]  ;;  %v504_v2 = vmul.f32 %v6946_v57, %v8473_v58 }
  0x45   : > { %657 = vst [vmem:[#allocation2 + $0x90] sm:$0xf] %v8288_v34  ;;  %658 = vst [vmem:[#allocation2 + $0x94] sm:$0xf] %v8288_v34  ;;  %7534 = vmatpush3.bf16.msra.mxu0 %v8071_v42  ;;  %7343 = vmatprep.subr.bf16.mxu1 %v8072_v43  ;;  %v8075_v63 = vld [vmem:[%s10292_s1 + $0x130] sm:$0xff]   ;;  %v1280_v4 = vor.u32 %v1279_v61, %v1275_v60  ;;  %v1285_v5 = vrot.slane %v1283_v52, 5  ;;  %v541_v7 = vadd.f32 %v8481_v62, %v503_v1 }
  0x46   : > { %659 = vst [vmem:[#allocation2 + $0x98] sm:$0x1] %v8288_v34  ;;  %660 = vst [vmem:[#allocation2 + $0x9c] sm:$0xf] %v8288_v34  ;;  %7535 = vmatprep.subr.bf16.mxu0 %v8073_v47  ;;  %v1271_v6 = vrot.slane %v1270_v0, 4  ;;  %v542_v8 = vadd.f32 %v8481_v62, %v504_v2  ;;  %v8076_v9 = vld [vmem:[%s10292_s1 + $0x78] sm:$0xff]  }
  0x47   : > { %661 = vst [vmem:[#allocation2 + $0xa0] sm:$0xf] %v8288_v34  ;;  %662 = vst [vmem:[#allocation2 + $0xa4] sm:$0x1] %v8288_v34  ;;  %v8077_v10 = vld [vmem:[%s10292_s1 + $0x138] sm:$0xff]   ;;  %v1281_v11 = vrot.slane %v1280_v4, 4 }
  0x48   : > { %663 = vst [vmem:[#allocation2 + $0xa8] sm:$0xf] %v8288_v34  ;;  %664 = vst [vmem:[#allocation2 + $0xac] sm:$0xf] %v8288_v34  ;;  %7344 = vmatpush3.bf16.msra.mxu1 %v8072_v43  ;;  %vm1086_vm4 = vcmask 1040384   ;;  %v7087_v12 = vld [vmem:[%s8467_s18 + $0x8] sm:$0xff]  }
  0x49   : > { %665 = vst [vmem:[#allocation2 + $0xb0] sm:$0x1] %v8288_v34  ;;  %666 = vst [vmem:[#allocation2 + $0xb4] sm:$0xf] %v8288_v34  ;;  %7536 = vmatpush3.bf16.msra.mxu0 %v8073_v47  ;;  %7345 = vmatprep.subr.bf16.mxu1 %v8074_v59  ;;  %v573_v14 = vmax.f32 %v541_v7, 0.0  ;;  %v574_v15 = vmax.f32 %v542_v8, 0.0  ;;  %v6949_v16 = vunpack.c.l.bf16 %v7087_v12  ;;  %v6950_v18 = vunpack.c.h.bf16 %v7087_v12 }
  0x4a   : > { %667 = vst [vmem:[#allocation2 + $0xb8] sm:$0xf] %v8288_v34  ;;  %668 = vst [vmem:[#allocation2 + $0xbc] sm:$0x1] %v8288_v34  ;;  %7537 = vmatprep.subr.bf16.mxu0 %v8075_v63  ;;  %vm755_vm5 = vsmask.f32 256 }
  0x4b   : > { %669 = vst [vmem:[#allocation2 + $0xc0] sm:$0xf] %v8288_v34  ;;  %670 = vst [vmem:[#allocation2 + $0xc4] sm:$0xf] %v8288_v34  ;;  %vm756_vm6 = vsmask.f32 4368  ;;  %v6879_v21 = vpack.c.bf16 %v573_v14, %v573_v14  ;;  %v6880_v22 = vpack.c.bf16 %v574_v15, %v574_v15  ;;  %v505_v24 = vmul.f32 %v6949_v16, %v8473_v58 }
  0x4c   : > { %671 = vst [vmem:[#allocation2 + $0xc8] sm:$0x1] %v8288_v34  ;;  %672 = vst [vmem:[#allocation2 + $0xcc] sm:$0xf] %v8288_v34  ;;  %v7088_v19 = vld [vmem:[%s8467_s18 + $0x10] sm:$0xff]   ;;  %7346 = vmatpush3.bf16.msra.mxu1 %v8074_v59  ;;  %v8511_v23 = vld [vmem:[%s10292_s1] sm:$0xff]   ;;  %v506_v25 = vmul.f32 %v6950_v18, %v8473_v58 }
  0x4d   : > { %673 = vst [vmem:[#allocation2 + $0xd0] sm:$0xf] %v8288_v34  ;;  %674 = vst [vmem:[#allocation2 + $0xd4] sm:$0x1] %v8288_v34  ;;  %7538 = vmatpush3.bf16.msra.mxu0 %v8075_v63  ;;  %7347 = vmatprep.subr.bf16.mxu1 %v8076_v9  ;;  %vm1080_vm7 = vsmask.f32 7938  ;;  %v6953_v26 = vunpack.c.l.bf16 %v7088_v19  ;;  %v6954_v27 = vunpack.c.h.bf16 %v7088_v19  ;;  %v543_v35 = vadd.f32 %v8481_v62, %v505_v24 }
  0x4e   : > { %vm8490_vm2 = vmor %vm1260_vm0, %vm1261_vm1  ;;  %7539 = vmatprep.subr.bf16.mxu0 %v8077_v10  ;;  %v759_v28 = vshrl.u32 %v6879_v21, 16  ;;  %v762_v29 = vshll.u32 %v6879_v21, 16  ;;  %v767_v30 = vshrl.u32 %v6880_v22, 16  ;;  %v770_v31 = vshll.u32 %v6880_v22, 16  ;;  %v8518_v32 = vld [vmem:[%s10292_s1 + $0x140] sm:$0xff]   ;;  %v7089_v33 = vld [vmem:[%s8467_s18 + $0x18] sm:$0xff]  }
  0x4f   : > { %v1276_v13 = vsel %vm8490_vm2, %v1271_v6, %v1275_v60  ;;  %v1286_v17 = vsel %vm8490_vm2, %v1281_v11, %v1285_v5  ;;  %vm8523_vm8 = vmand %vm1086_vm4, %vm755_vm5  ;;  %v544_v36 = vadd.f32 %v8481_v62, %v506_v25  ;;  %v507_v37 = vmul.f32 %v6953_v26, %v8473_v58  ;;  %v1082_v45 = vld [vmem:[#allocation2 + $0xc] sm:$0xf]  ;;  %v1088_v46 = vld [vmem:[#allocation2 + $0x14] sm:$0x1]  ;;  %s6414_s13 = sshll.u32 %s8340_s24, 5  ;;  %p426_p9 = scmp.lt.s32.totalorder %s8340_s24, 1 }
  0x50   : > { %v6467_v20 = vcombine.low %v1276_v13, %v1286_v17  ;;  %v508_v38 = vmul.f32 %v6954_v27, %v8473_v58  ;;  %7348 = vmatpush3.bf16.msra.mxu1 %v8076_v9  ;;  %vm8533_vm9 = vmor %vm755_vm5, %vm756_vm6  ;;  %v761_v40 = vrot.slane %v759_v28, 7  ;;  %v769_v41 = vrot.slane %v767_v30, 7  ;;  %v7090_v1 = vld [vmem:[%s8467_s18 + $0x20] sm:$0xff]   ;;  %v1095_v15 = vld [vmem:[#allocation2 + $0x20] sm:$0x1]  ;;  %p421_p8 = scmp.lt.s32.totalorder %s6414_s13, 63 }
  0x51   : > { %v6957_v42 = vunpack.c.l.bf16 %v7089_v33  ;;  %v6958_v43 = vunpack.c.h.bf16 %v7089_v33  ;;  %7540 = vmatpush3.bf16.msra.mxu0 %v8077_v10  ;;  %vm8539_vm10 = vmand %vm1079_vm3, %vm1080_vm7  ;;  %7381 = vmatprep.subr.bf16.mxu1 %v8511_v23  ;;  %v575_v47 = vmax.f32 %v543_v35, 0.0  ;;  %v576_v48 = vmax.f32 %v544_v36, 0.0  ;;  %v1091_v12 = vld [vmem:[#allocation2 + $0x18] sm:$0xf]  ;;  %v1098_v33 = vld [vmem:[#allocation2 + $0x24] sm:$0xf] }
  0x52   : > { %7349 = vmatprep.mubr.bf16.mxu1 %v6467_v20  ;;  %v545_v49 = vadd.f32 %v8481_v62, %v507_v37  ;;  %v546_v50 = vadd.f32 %v8481_v62, %v508_v38  ;;  %v764_v51 = vor.u32 %v762_v29, %v761_v40  ;;  %v765_v52 = vrot.slane %v761_v40, 4  ;;  %7573 = vmatprep.subr.bf16.mxu0 %v8518_v32  ;;  %v8122_v34 = vld [vmem:[%s10292_s1 + $0xa8] sm:$0xff]   ;;  %s10374_s13 = smov (!%p421_p8, %s6414_s13), 63  ;;  %s10376_s24 = smov (!%p426_p9, %s8340_s24), 1 }
  0x53   : > { %v772_v53 = vor.u32 %v770_v31, %v769_v41  ;;  %v774_v54 = vrot.slane %v769_v41, 4  ;;  %v6881_v55 = vpack.c.bf16 %v575_v47, %v575_v47  ;;  %v6882_v56 = vpack.c.bf16 %v576_v48, %v576_v48  ;;  %s6415_s15 = sshll.u32 %s10374_s13, 2  ;;  %s6416_s19 = sshll.u32 %s10376_s24, 1 }
  0x54   : > { %v577_v57 = vmax.f32 %v545_v49, 0.0  ;;  %v578_v59 = vmax.f32 %v546_v50, 0.0  ;;  %v1083_v61 = vsel %vm8539_vm10, %v764_v51, %v1082_v45  ;;  %v509_v0 = vmul.f32 %v6957_v42, %v8473_v58  ;;  %s10221_s17 = scalar_lea.vmem %s10296_s5, %s6415_s15  ;;  %s429_s26 = scalar_lea.vmem %s10297_s6, %s6416_s19 }
  0x55   : > { %v773_v60 = vsel %vm8533_vm9, %v765_v52, %v772_v53  ;;  %v1089_v63 = vsel %vm8523_vm8, %v774_v54, %v1088_v46  ;;  %1084 = vst [vmem:[#allocation2 + $0xc] sm:$0xf] %v1083_v61  ;;  %v776_v2 = vshrl.u32 %v6881_v55, 16  ;;  %v779_v4 = vshll.u32 %v6881_v55, 16 }
  0x56   : > { %1085 = vst [vmem:[#allocation2 + $0x10] sm:$0xf] %v773_v60  ;;  %1090 = vst [vmem:[#allocation2 + $0x14] sm:$0x1] %v1089_v63  ;;  %v784_v5 = vshrl.u32 %v6882_v56, 16  ;;  %v787_v6 = vshll.u32 %v6882_v56, 16  ;;  %v6883_v7 = vpack.c.bf16 %v577_v57, %v577_v57  ;;  %v6884_v8 = vpack.c.bf16 %v578_v59, %v578_v59 }
  0x57   : > { %v547_v9 = vadd.f32 %v8481_v62, %v509_v0  ;;  %v778_v10 = vrot.slane %v776_v2, 7  ;;  %v510_v13 = vmul.f32 %v6958_v43, %v8473_v58  ;;  %v6961_v14 = vunpack.c.l.bf16 %v7090_v1 }
  0x58   : > { %v786_v11 = vrot.slane %v784_v5, 7  ;;  %v793_v16 = vshrl.u32 %v6883_v7, 16  ;;  %v796_v17 = vshll.u32 %v6883_v7, 16  ;;  %v801_v18 = vshrl.u32 %v6884_v8, 16 }
  0x59   : > { %v804_v19 = vshll.u32 %v6884_v8, 16  ;;  %v781_v20 = vor.u32 %v779_v4, %v778_v10  ;;  %v782_v21 = vrot.slane %v778_v10, 4  ;;  %v579_v27 = vmax.f32 %v547_v9, 0.0 }
  0x5a   : > { %v789_v22 = vor.u32 %v787_v6, %v786_v11  ;;  %v791_v24 = vrot.slane %v786_v11, 4  ;;  %v8557_v25 = vrot.slane %v793_v16, 7  ;;  %v8559_v26 = vrot.slane %v801_v18, 7 }
  0x5b   : > { %v6962_v28 = vunpack.c.h.bf16 %v7090_v1  ;;  %v1092_v30 = vsel %vm8539_vm10, %v781_v20, %v1091_v12  ;;  %v511_v35 = vmul.f32 %v6961_v14, %v8473_v58  ;;  %v8573_v42 = vadd.f32 %v8481_v62, %v510_v13 }
  0x5c   : > { %v790_v29 = vsel %vm8533_vm9, %v782_v21, %v789_v22  ;;  %v1096_v31 = vsel %vm8523_vm8, %v791_v24, %v1095_v15  ;;  %v1198_v36 = vld [vmem:[#allocation2 + $0xc] sm:$0xf]  ;;  %1093 = vst [vmem:[#allocation2 + $0x18] sm:$0xf] %v1092_v30  ;;  %v798_v40 = vor.u32 %v796_v17, %v8557_v25  ;;  %v8570_v41 = vor.u32 %v804_v19, %v8559_v26 }
  0x5d   : > { %v1199_v37 = vld [vmem:[#allocation2 + $0x10] sm:$0xf]  ;;  %v1245_v38 = vld [vmem:[#allocation2 + $0x14] sm:$0x1]  ;;  %1094 = vst [vmem:[#allocation2 + $0x1c] sm:$0xf] %v790_v29  ;;  %v8575_v43 = vpack.c.bf16 %v579_v27, %v579_v27  ;;  %v512_v54 = vmul.f32 %v6962_v28, %v8473_v58  ;;  %v8583_v55 = vadd.f32 %v8481_v62, %v511_v35 }
  0x5e   : > { %1097 = vst [vmem:[#allocation2 + $0x20] sm:$0x1] %v1096_v31  ;;  %v1288_v45 = vshrl.u32 %v1198_v36, 16  ;;  %v1291_v46 = vshll.u32 %v1198_v36, 16  ;;  %v1297_v47 = vshll.u32 %v1199_v37, 16  ;;  %v1301_v48 = vshrl.u32 %v1199_v37, 16 }
  0x5f   : > { %v3113_v49 = vld [vmem:[#allocation2 + $0xc] sm:$0xf]  ;;  %v1307_v50 = vshll.u32 %v1245_v38, 16  ;;  %v3114_v51 = vld [vmem:[#allocation2 + $0x10] sm:$0xf]  ;;  %v1099_v53 = vsel %vm8539_vm10, %v798_v40, %v1098_v33  ;;  %v8592_v21 = vadd.f32 %v8481_v62, %v512_v54  ;;  %vm2290_vm11 = vcmask 1042432  }
  0x60   : > { %v8577_v52 = vld [vmem:[#allocation2 + $0x14] sm:$0x1]  ;;  %v1290_v56 = vrot.slane %v1288_v45, 4  ;;  %v1293_v57 = vrot.slane %v1291_v46, 5  ;;  %v1299_v59 = vrot.slane %v1297_v47, 5  ;;  %v1303_v60 = vrot.slane %v1301_v48, 4 }
  0x61   : > { %1100 = vst [vmem:[#allocation2 + $0x24] sm:$0xf] %v1099_v53  ;;  %v1309_v61 = vrot.slane %v1307_v50, 5  ;;  %v3162_v63 = vshrl.u32 %v3113_v49, 16  ;;  %v3165_v0 = vshll.u32 %v3113_v49, 16  ;;  %v3171_v1 = vshll.u32 %v3114_v51, 16 }
  0x62   : > { %v1294_v2 = vor.u32 %v1293_v57, %v1290_v56  ;;  %v1304_v4 = vor.u32 %v1303_v60, %v1299_v59  ;;  %v3175_v5 = vshrl.u32 %v3114_v51, 16  ;;  %v3181_v6 = vshll.u32 %v8577_v52, 16  ;;  %v8081_v36 = vld [vmem:[%s10292_s1 + $0x8] sm:$0xff]  }
  0x63   : > { %v3164_v7 = vrot.slane %v3162_v63, 4  ;;  %v3167_v8 = vrot.slane %v3165_v0, 5  ;;  %v3173_v9 = vrot.slane %v3171_v1, 5  ;;  %v3936_v10 = vrot.slane %v8577_v52, 5  ;;  %v3116_v15 = vld [vmem:[#allocation2 + $0x18] sm:$0xf] }
  0x64   : > { %v1295_v11 = vrot.slane %v1294_v2, 4  ;;  %v1305_v12 = vrot.slane %v1304_v4, 4  ;;  %v3177_v13 = vrot.slane %v3175_v5, 4  ;;  %v3183_v14 = vrot.slane %v3181_v6, 5  ;;  %v8587_v17 = vld [vmem:[#allocation2 + $0x1c] sm:$0xf] }
  0x65   : > { %v3168_v16 = vor.u32 %v3167_v8, %v3164_v7  ;;  %v8589_v18 = vld [vmem:[#allocation2 + $0x20] sm:$0x1]  ;;  %v3186_v19 = vshrl.u32 %v3116_v15, 16  ;;  %v3189_v20 = vshll.u32 %v3116_v15, 16  ;;  %v3195_v28 = vshll.u32 %v8587_v17, 16  ;;  %v8084_v2 = vld [vmem:[%s10292_s1 + $0x10] sm:$0xff]  }
  0x66   : > { %v1300_v22 = vsel %vm8490_vm2, %v1295_v11, %v1299_v59  ;;  %v1310_v24 = vsel %vm8490_vm2, %v1305_v12, %v1309_v61  ;;  %v3178_v27 = vor.u32 %v3177_v13, %v3173_v9  ;;  %v1200_v35 = vld [vmem:[#allocation2 + $0x18] sm:$0xf]  ;;  %v3199_v40 = vshrl.u32 %v8587_v17, 16  ;;  %v1201_v50 = vld [vmem:[#allocation2 + $0x1c] sm:$0xf] }
  0x67   : > { %v6468_v29 = vcombine.low %v1300_v22, %v1310_v24  ;;  %v3169_v30 = vrot.slane %v3168_v16, 4  ;;  %v3188_v31 = vrot.slane %v3186_v19, 4  ;;  %v3191_v33 = vrot.slane %v3189_v20, 5  ;;  %v1246_v51 = vld [vmem:[#allocation2 + $0x20] sm:$0x1] }
  0x68   : > { %v3179_v37 = vrot.slane %v3178_v27, 4  ;;  %v3197_v38 = vrot.slane %v3195_v28, 5  ;;  %v3205_v45 = vshll.u32 %v8589_v18, 16  ;;  %v3940_v48 = vrot.slane %v8587_v17, 5  ;;  %v1202_v59 = vld [vmem:[#allocation2 + $0x24] sm:$0xf] }
  0x69   : > { %7350 = vmatmul.mubr.bf16.vlgmr.msra.gmra.mrb[0].mxu1 %v6468_v29  ;;  %v3174_v46 = vsel %vm8490_vm2, %v3169_v30, %v3173_v9  ;;  %v3192_v47 = vor.u32 %v3191_v33, %v3188_v31  ;;  %v3943_v49 = vrot.slane %v8589_v18, 5  ;;  %v3201_v54 = vrot.slane %v3199_v40, 4  ;;  %v1102_v1 = vld [vmem:[#allocation2 + $0x2c] sm:$0x1]  ;;  %v3119_v7 = vld [vmem:[#allocation2 + $0x24] sm:$0xf] }
  0x6a   : > { %v3184_v53 = vsel %vm8490_vm2, %v3179_v37, %v3183_v14  ;;  %7382 = vmatpush3.bf16.msra.mxu1 %v8511_v23  ;;  %v3207_v56 = vrot.slane %v3205_v45, 5  ;;  %v1312_v57 = vshrl.u32 %v1200_v35, 16  ;;  %v8613_v63 = vrot.slane %v3940_v48, 4  ;;  %v8087_v27 = vld [vmem:[%s10292_s1 + $0x18] sm:$0xff]   ;;  %v1144_v17 = vld [vmem:[#allocation2 + $0x74] sm:$0x1] }
  0x6b   : > { %v6627_v60 = vcombine.low %v3174_v46, %v3184_v53  ;;  %v3193_v61 = vrot.slane %v3192_v47, 4  ;;  %v1315_v0 = vshll.u32 %v1200_v35, 16  ;;  %7383 = vmatprep.subr.bf16.mxu1 %v8081_v36  ;;  %v3202_v4 = vor.u32 %v3201_v54, %v3197_v38 }
  0x6c   : > { %v1314_v5 = vrot.slane %v1312_v57, 4  ;;  %v1321_v23 = vshll.u32 %v1201_v50, 16  ;;  %v1325_v6 = vshrl.u32 %v1201_v50, 16  ;;  %v1331_v11 = vshll.u32 %v1246_v51, 16  ;;  %v8090_v51 = vld [vmem:[%s10292_s1 + $0x20] sm:$0xff]  }
  0x6d   : > { %7541 = vmatprep.mubr.bf16.mxu0 %v6627_v60  ;;  %v3198_v8 = vsel %vm8490_vm2, %v3193_v61, %v3197_v38  ;;  %v1317_v9 = vrot.slane %v1315_v0, 5  ;;  %v799_v12 = vrot.slane %v8557_v25, 4  ;;  %v3203_v13 = vrot.slane %v3202_v4, 4  ;;  %v8652_v0 = vld [vmem:[%s8467_s18 + $0x28] sm:$0xff]  }
  0x6e   : > { %v1323_v14 = vrot.slane %v1321_v23, 5  ;;  %v1327_v15 = vrot.slane %v1325_v6, 4  ;;  %v808_v16 = vrot.slane %v8559_v26, 4  ;;  %7384 = vmatpush3.bf16.msra.mxu1 %v8081_v36  ;;  %v1333_v20 = vrot.slane %v1331_v11, 5 }
  0x6f   : > { %v1318_v19 = vor.u32 %v1317_v9, %v1314_v5  ;;  %v807_v22 = vsel %vm8533_vm9, %v799_v12, %v8570_v41  ;;  %v1336_v24 = vshrl.u32 %v1202_v59, 16  ;;  %7385 = vmatprep.subr.bf16.mxu1 %v8084_v2  ;;  %v3208_v25 = vsel %vm8490_vm2, %v3203_v13, %v3207_v56  ;;  %v8080_v41 = vld [vmem:[%s10292_s1 + $0x148] sm:$0xff]   ;;  %v8082_v56 = vld [vmem:[%s10292_s1 + $0x150] sm:$0xff]  }
  0x70   : > { %v1328_v28 = vor.u32 %v1327_v15, %v1323_v14  ;;  %1101 = vst [vmem:[#allocation2 + $0x28] sm:$0xf] %v807_v22  ;;  %v1103_v26 = vsel %vm8523_vm8, %v808_v16, %v1102_v1  ;;  %v1339_v29 = vshll.u32 %v1202_v59, 16  ;;  %v6628_v30 = vcombine.low %v3198_v8, %v3208_v25  ;;  %v1105_v5 = vld [vmem:[#allocation2 + $0x30] sm:$0xf] }
  0x71   : > { %v1319_v31 = vrot.slane %v1318_v19, 4  ;;  %1104 = vst [vmem:[#allocation2 + $0x2c] sm:$0x1] %v1103_v26  ;;  %v1338_v33 = vrot.slane %v1336_v24, 4  ;;  %v3210_v35 = vshrl.u32 %v3119_v7, 16  ;;  %v3213_v38 = vshll.u32 %v3119_v7, 16 }
  0x72   : > { %v1329_v36 = vrot.slane %v1328_v28, 4  ;;  %v1341_v37 = vrot.slane %v1339_v29, 5  ;;  %v580_v40 = vmax.f32 %v8573_v42, 0.0  ;;  %7386 = vmatpush3.bf16.msra.mxu1 %v8084_v2  ;;  %7542 = vmatmul.mubr.bf16.vlgmr.msra.gmra.mrb[0].mxu0 %v6628_v30  ;;  %v810_v47 = vshrl.u32 %v8575_v43, 16 }
  0x73   : > { %v1324_v45 = vsel %vm8490_vm2, %v1319_v31, %v1323_v14  ;;  %v3212_v46 = vrot.slane %v3210_v35, 4  ;;  %v813_v50 = vshll.u32 %v8575_v43, 16  ;;  %7387 = vmatprep.subr.bf16.mxu1 %v8087_v27  ;;  %7574 = vmatpush3.bf16.msra.mxu0 %v8518_v32  ;;  %v3215_v54 = vrot.slane %v3213_v38, 5  ;;  %v1109_v35 = vld [vmem:[#allocation2 + $0x38] sm:$0x1] }
  0x74   : > { %v1334_v42 = vsel %vm8490_vm2, %v1329_v36, %v1333_v20  ;;  %v1342_v53 = vor.u32 %v1341_v37, %v1338_v33  ;;  %v6886_v57 = vpack.c.bf16 %v580_v40, %v580_v40  ;;  %7575 = vmatprep.subr.bf16.mxu0 %v8080_v41  ;;  %v812_v43 = vrot.slane %v810_v47, 7 }
  0x75   : > { %v6469_v59 = vcombine.low %v1324_v45, %v1334_v42  ;;  %v581_v60 = vmax.f32 %v8583_v55, 0.0  ;;  %v582_v61 = vmax.f32 %v8592_v21, 0.0  ;;  %v3216_v1 = vor.u32 %v3215_v54, %v3212_v46  ;;  %v8092_v55 = vld [vmem:[%s10292_s1 + $0x28] sm:$0xff]   ;;  %v8085_v45 = vld [vmem:[%s10292_s1 + $0x160] sm:$0xff]  }
  0x76   : > { %v8654_v32 = vrot.slane %v1342_v53, 4  ;;  %v818_v2 = vshrl.u32 %v6886_v57, 16  ;;  %v821_v4 = vshll.u32 %v6886_v57, 16  ;;  %7388 = vmatpush3.bf16.msra.mxu1 %v8087_v27  ;;  %v815_v7 = vor.u32 %v813_v50, %v812_v43  ;;  %v8083_v27 = vld [vmem:[%s10292_s1 + $0x158] sm:$0xff]  }
  0x77   : > { %7353 = vmatprep.mubr.bf16.mxu1 %v6469_v59  ;;  %v1203_v23 = vld [vmem:[#allocation2 + $0x28] sm:$0xf]  ;;  %v816_v8 = vrot.slane %v812_v43, 4  ;;  %v6887_v9 = vpack.c.bf16 %v581_v60, %v581_v60  ;;  %v8656_v11 = vpack.c.bf16 %v582_v61, %v582_v61  ;;  %7389 = vmatprep.subr.bf16.mxu1 %v8090_v51  ;;  %v6965_v15 = vunpack.c.l.bf16 %v8652_v0 }
  0x78   : > { %v3120_v6 = vld [vmem:[#allocation2 + $0x28] sm:$0xf]  ;;  %7576 = vmatpush3.bf16.msra.mxu0 %v8080_v41  ;;  %v1247_v21 = vld [vmem:[#allocation2 + $0x2c] sm:$0x1]  ;;  %v1345_v12 = vshll.u32 %v1203_v23, 16  ;;  %v1349_v13 = vshrl.u32 %v1203_v23, 16  ;;  %v6966_v16 = vunpack.c.h.bf16 %v8652_v0  ;;  %v1106_v33 = vsel %vm8539_vm10, %v815_v7, %v1105_v5 }
  0x79   : > { %v3121_v14 = vld [vmem:[#allocation2 + $0x2c] sm:$0x1]  ;;  %v1355_v19 = vshll.u32 %v1247_v21, 16  ;;  %v3217_v20 = vrot.slane %v3216_v1, 4  ;;  %v3219_v22 = vshll.u32 %v3120_v6, 16  ;;  %v3223_v24 = vshrl.u32 %v3120_v6, 16  ;;  %7577 = vmatprep.subr.bf16.mxu0 %v8082_v56 }
  0x7a   : > { %v1347_v25 = vrot.slane %v1345_v12, 5  ;;  %v1351_v28 = vrot.slane %v1349_v13, 4  ;;  %v3229_v26 = vshll.u32 %v3121_v14, 16  ;;  %v820_v29 = vrot.slane %v818_v2, 7  ;;  %7390 = vmatpush3.bf16.msra.mxu1 %v8090_v51  ;;  %1107 = vst [vmem:[#allocation2 + $0x30] sm:$0xf] %v1106_v33 }
  0x7b   : > { %v1357_v30 = vrot.slane %v1355_v19, 5  ;;  %v3221_v41 = vrot.slane %v3219_v22, 5  ;;  %v3225_v31 = vrot.slane %v3223_v24, 4  ;;  %7391 = vmatprep.subr.bf16.mxu1 %v8092_v55  ;;  %v827_v51 = vshrl.u32 %v6887_v9, 16 }
  0x7c   : > { %v1348_v36 = vsel %vm8490_vm2, %v8654_v32, %v1347_v25  ;;  %v1352_v37 = vor.u32 %v1351_v28, %v1347_v25  ;;  %v3231_v38 = vrot.slane %v3229_v26, 5  ;;  %v823_v40 = vor.u32 %v821_v4, %v820_v29  ;;  %7578 = vmatpush3.bf16.msra.mxu0 %v8082_v56  ;;  %v1112_v56 = vld [vmem:[#allocation2 + $0x3c] sm:$0xf]  ;;  %v7092_v4 = vld [vmem:[%s8467_s18 + $0x30] sm:$0xff]  }
  0x7d   : > { %v3222_v46 = vsel %vm8490_vm2, %v3217_v20, %v3221_v41  ;;  %v3226_v47 = vor.u32 %v3225_v31, %v3221_v41  ;;  %v825_v50 = vrot.slane %v820_v29, 4  ;;  %7579 = vmatprep.subr.bf16.mxu0 %v8083_v27  ;;  %v830_v54 = vshll.u32 %v6887_v9, 16  ;;  %v8086_v9 = vld [vmem:[%s10292_s1 + $0x168] sm:$0xff]   ;;  %v8088_v41 = vld [vmem:[%s10292_s1 + $0x170] sm:$0xff]  }
  0x7e   : > { %v1353_v42 = vrot.slane %v1352_v37, 4  ;;  %v824_v53 = vsel %vm8533_vm9, %v816_v8, %v823_v40  ;;  %v835_v57 = vshrl.u32 %v8656_v11, 16  ;;  %7392 = vmatpush3.bf16.msra.mxu1 %v8092_v55  ;;  %v829_v60 = vrot.slane %v827_v51, 7  ;;  %v1116_v8 = vld [vmem:[#allocation2 + $0x44] sm:$0x1] }
  0x7f   : > { %v3227_v59 = vrot.slane %v3226_v47, 4  ;;  %1108 = vst [vmem:[#allocation2 + $0x34] sm:$0xf] %v824_v53  ;;  %v1110_v43 = vsel %vm8523_vm8, %v825_v50, %v1109_v35  ;;  %v838_v61 = vshll.u32 %v8656_v11, 16  ;;  %v513_v1 = vmul.f32 %v6965_v15, %v8473_v58 }
  0x80   : > { %v1358_v0 = vsel %vm8490_vm2, %v1353_v42, %v1357_v30  ;;  %1111 = vst [vmem:[#allocation2 + $0x38] sm:$0x1] %v1110_v43  ;;  %7580 = vmatpush3.bf16.msra.mxu0 %v8083_v27  ;;  %v837_v32 = vrot.slane %v835_v57, 7  ;;  %v514_v2 = vmul.f32 %v6966_v16, %v8473_v58  ;;  %v832_v6 = vor.u32 %v830_v54, %v829_v60 }
  0x81   : > { %v6470_v5 = vcombine.low %v1348_v36, %v1358_v0  ;;  %v3232_v23 = vsel %vm8490_vm2, %v3227_v59, %v3231_v38  ;;  %v833_v7 = vrot.slane %v829_v60, 4  ;;  %7581 = vmatprep.subr.bf16.mxu0 %v8085_v45  ;;  %v551_v12 = vadd.f32 %v8481_v62, %v513_v1  ;;  %v3122_v13 = vld [vmem:[#allocation2 + $0x30] sm:$0xf] }
  0x82   : > { %v6629_v11 = vcombine.low %v3222_v46, %v3232_v23  ;;  %v840_v55 = vor.u32 %v838_v61, %v837_v32  ;;  %v842_v21 = vrot.slane %v837_v32, 4  ;;  %v1204_v14 = vld [vmem:[#allocation2 + $0x30] sm:$0xf]  ;;  %v1113_v15 = vsel %vm8539_vm10, %v832_v6, %v1112_v56  ;;  %v8089_v61 = vld [vmem:[%s10292_s1 + $0x178] sm:$0xff]  }
  0x83   : > { %7354 = vmatmul.mubr.bf16.gmra.mrb[4].mxu1 %v6470_v5  ;;  %v552_v16 = vadd.f32 %v8481_v62, %v514_v2  ;;  %v6969_v19 = vunpack.c.l.bf16 %v7092_v4  ;;  %v6970_v20 = vunpack.c.h.bf16 %v7092_v4  ;;  %v3234_v22 = vshrl.u32 %v3122_v13, 16  ;;  %1114 = vst [vmem:[#allocation2 + $0x3c] sm:$0xf] %v1113_v15 }
  0x84   : > { %7545 = vmatprep.mubr.bf16.mxu0 %v6629_v11  ;;  %v3237_v24 = vshll.u32 %v3122_v13, 16  ;;  %v1360_v27 = vshrl.u32 %v1204_v14, 16  ;;  %v1363_v25 = vshll.u32 %v1204_v14, 16  ;;  %7582 = vmatpush3.bf16.msra.mxu0 %v8085_v45  ;;  %v841_v28 = vsel %vm8533_vm9, %v833_v7, %v840_v55 }
  0x85   : > { %v1117_v26 = vsel %vm8523_vm8, %v842_v21, %v1116_v8  ;;  %v583_v29 = vmax.f32 %v551_v12, 0.0  ;;  %v584_v30 = vmax.f32 %v552_v16, 0.0  ;;  %7583 = vmatprep.subr.bf16.mxu0 %v8086_v9  ;;  %v3236_v33 = vrot.slane %v3234_v22, 4  ;;  %1115 = vst [vmem:[#allocation2 + $0x40] sm:$0xf] %v841_v28  ;;  %v8730_v12 = vld [vmem:[%s10292_s1 + $0x180] sm:$0xff]  }
  0x86   : > { %v8703_v31 = vld [vmem:[#allocation2 + $0x34] sm:$0xf]  ;;  %v3239_v35 = vrot.slane %v3237_v24, 5  ;;  %1118 = vst [vmem:[#allocation2 + $0x44] sm:$0x1] %v1117_v26  ;;  %v515_v37 = vmul.f32 %v6969_v19, %v8473_v58  ;;  %v516_v38 = vmul.f32 %v6970_v20, %v8473_v58  ;;  %v1362_v54 = vrot.slane %v1360_v27, 4 }
  0x87   : > { %v1205_v36 = vld [vmem:[#allocation2 + $0x34] sm:$0xf]  ;;  %v8707_v40 = vld [vmem:[#allocation2 + $0x38] sm:$0x1]  ;;  %v3243_v45 = vshll.u32 %v8703_v31, 16  ;;  %v3247_v46 = vshrl.u32 %v8703_v31, 16  ;;  %v8711_v50 = vpack.c.bf16 %v583_v29, %v583_v29  ;;  %v8713_v51 = vpack.c.bf16 %v584_v30, %v584_v30 }
  0x88   : > { %v1248_v47 = vld [vmem:[#allocation2 + $0x38] sm:$0x1]  ;;  %v3240_v42 = vor.u32 %v3239_v35, %v3236_v33  ;;  %v3253_v53 = vshll.u32 %v8707_v40, 16  ;;  %v1365_v57 = vrot.slane %v1363_v25, 5  ;;  %7584 = vmatpush3.bf16.msra.mxu0 %v8086_v9  ;;  %v8094_v58 = vld [vmem:[%s10292_s1 + $0x30] sm:$0xff]   ;;  %v1369_v43 = vshll.u32 %v1205_v36, 16 }
  0x89   : > { %v3245_v56 = vrot.slane %v3243_v45, 5  ;;  %v3249_v59 = vrot.slane %v3247_v46, 4  ;;  %v1373_v60 = vshrl.u32 %v1205_v36, 16  ;;  %7585 = vmatprep.subr.bf16.mxu0 %v8088_v41  ;;  %v1379_v2 = vshll.u32 %v1248_v47, 16  ;;  %7393 = vmatprep.subr.bf16.mxu1 %v8094_v58 }
  0x8a   : > { %v3241_v0 = vrot.slane %v3240_v42, 4  ;;  %v3255_v32 = vrot.slane %v3253_v53, 5  ;;  %v1366_v1 = vor.u32 %v1365_v57, %v1362_v54  ;;  %v1371_v5 = vrot.slane %v1369_v43, 5  ;;  %v1206_v6 = vld [vmem:[#allocation2 + $0x3c] sm:$0xf]  ;;  %7394 = vmatpush3.bf16.msra.mxu1 %v8094_v58 }
  0x8b   : > { %v3250_v4 = vor.u32 %v3249_v59, %v3245_v56  ;;  %v1375_v23 = vrot.slane %v1373_v60, 4  ;;  %v8723_v7 = vadd.f32 %v8481_v62, %v515_v37  ;;  %v1381_v11 = vrot.slane %v1379_v2, 5  ;;  %v3125_v21 = vld [vmem:[#allocation2 + $0x3c] sm:$0xf] }
  0x8c   : > { %v3246_v8 = vsel %vm8490_vm2, %v3241_v0, %v3245_v56  ;;  %v1367_v9 = vrot.slane %v1366_v1, 4  ;;  %v1384_v55 = vshrl.u32 %v1206_v6, 16  ;;  %7586 = vmatpush3.bf16.msra.mxu0 %v8088_v41  ;;  %v1207_v15 = vld [vmem:[#allocation2 + $0x40] sm:$0xf]  ;;  %v1387_v19 = vshll.u32 %v1206_v6, 16 }
  0x8d   : > { %v3251_v13 = vrot.slane %v3250_v4, 4  ;;  %v1376_v14 = vor.u32 %v1375_v23, %v1371_v5  ;;  %v1249_v16 = vld [vmem:[#allocation2 + $0x44] sm:$0x1]  ;;  %v8733_v20 = vadd.f32 %v8481_v62, %v516_v38  ;;  %7587 = vmatprep.subr.bf16.mxu0 %v8089_v61  ;;  %v1393_v27 = vshll.u32 %v1207_v15, 16  ;;  %v8739_v41 = vld [vmem:[#allocation2 + $0x40] sm:$0xf] }
  0x8e   : > { %v1372_v22 = vsel %vm8490_vm2, %v1367_v9, %v1371_v5  ;;  %v1386_v24 = vrot.slane %v1384_v55, 4  ;;  %v1397_v25 = vshrl.u32 %v1207_v15, 16  ;;  %v1389_v29 = vrot.slane %v1387_v19, 5  ;;  %v8741_v62 = vld [vmem:[#allocation2 + $0x44] sm:$0x1]  ;;  %v7093_v55 = vld [vmem:[%s8467_s18 + $0x38] sm:$0xff]  }
  0x8f   : > { %v3256_v28 = vsel %vm8490_vm2, %v3251_v13, %v3255_v32  ;;  %v1377_v26 = vrot.slane %v1376_v14, 4  ;;  %v1403_v30 = vshll.u32 %v1249_v16, 16  ;;  %v1395_v35 = vrot.slane %v1393_v27, 5  ;;  %v1119_v23 = vld [vmem:[#allocation2 + $0x48] sm:$0xf] }
  0x90   : > { %v6630_v33 = vcombine.low %v3246_v8, %v3256_v28  ;;  %v1399_v36 = vrot.slane %v1397_v25, 4  ;;  %v3258_v37 = vshrl.u32 %v3125_v21, 16  ;;  %7588 = vmatpush3.bf16.msra.mxu0 %v8089_v61  ;;  %v1390_v45 = vor.u32 %v1389_v29, %v1386_v24 }
  0x91   : > { %v1382_v38 = vsel %vm8490_vm2, %v1377_v26, %v1381_v11  ;;  %v1405_v46 = vrot.slane %v1403_v30, 5  ;;  %v3261_v47 = vshll.u32 %v3125_v21, 16  ;;  %7621 = vmatprep.subr.bf16.mxu0 %v8730_v12  ;;  %v3267_v57 = vshll.u32 %v8739_v41, 16 }
  0x92   : > { %7546 = vmatmul.mubr.bf16.gmra.mrb[4].mxu0 %v6630_v33  ;;  %v6471_v42 = vcombine.low %v1372_v22, %v1382_v38  ;;  %v1400_v53 = vor.u32 %v1399_v36, %v1395_v35  ;;  %v3260_v54 = vrot.slane %v3258_v37, 4  ;;  %v1391_v58 = vrot.slane %v1390_v45, 4 }
  0x93   : > { %v3263_v56 = vrot.slane %v3261_v47, 5  ;;  %v3271_v59 = vshrl.u32 %v8739_v41, 16  ;;  %v3277_v43 = vshll.u32 %v8741_v62, 16  ;;  %v3269_v61 = vrot.slane %v3267_v57, 5  ;;  %v8774_v57 = vld [vmem:[%s10294_s3] ss:$0 sm:$0xff] }
  0x94   : > { %7357 = vmatprep.mubr.bf16.mxu1 %v6471_v42  ;;  %v1401_v60 = vrot.slane %v1400_v53, 4  ;;  %v844_v0 = vshrl.u32 %v8711_v50, 16  ;;  %v847_v32 = vshll.u32 %v8711_v50, 16  ;;  %v1396_v1 = vsel %vm8490_vm2, %v1391_v58, %v1395_v35  ;;  %v1123_v50 = vld [vmem:[#allocation2 + $0x50] sm:$0x1]  ;;  %v7094_v35 = vld [vmem:[%s8467_s18 + $0x40] sm:$0xff]  }
  0x95   : > { %v3264_v2 = vor.u32 %v3263_v56, %v3260_v54  ;;  %v3273_v4 = vrot.slane %v3271_v59, 4  ;;  %v3279_v5 = vrot.slane %v3277_v43, 5  ;;  %v852_v9 = vshrl.u32 %v8713_v51, 16  ;;  %v1126_v42 = vld [vmem:[#allocation2 + $0x54] sm:$0xf] }
  0x96   : > { %v1406_v6 = vsel %vm8490_vm2, %v1401_v60, %v1405_v46  ;;  %v846_v8 = vrot.slane %v844_v0, 7  ;;  %v855_v11 = vshll.u32 %v8713_v51, 16  ;;  %v585_v15 = vmax.f32 %v8723_v7, 0.0  ;;  %v1130_v43 = vld [vmem:[#allocation2 + $0x5c] sm:$0x1] }
  0x97   : > { %v6472_v21 = vcombine.low %v1396_v1, %v1406_v6  ;;  %v3265_v13 = vrot.slane %v3264_v2, 4  ;;  %v3274_v14 = vor.u32 %v3273_v4, %v3269_v61  ;;  %v854_v22 = vrot.slane %v852_v9, 7  ;;  %v8096_v0 = vld [vmem:[%s10292_s1 + $0x38] sm:$0xff]   ;;  %v8784_v2 = vld [vmem:[%s10295_s4] ss:$0 sm:$0xff] }
  0x98   : > { %v849_v16 = vor.u32 %v847_v32, %v846_v8  ;;  %v850_v19 = vrot.slane %v846_v8, 4  ;;  %v586_v24 = vmax.f32 %v8733_v20, 0.0  ;;  %v6891_v28 = vpack.c.bf16 %v585_v15, %v585_v15  ;;  %7395 = vmatprep.subr.bf16.mxu1 %v8096_v0 }
  0x99   : > { %7358 = vmatmul.mubr.bf16.gmra.mrb[8].mxu1 %v6472_v21  ;;  %v3270_v27 = vsel %vm8490_vm2, %v3265_v13, %v3269_v61  ;;  %v3275_v25 = vrot.slane %v3274_v14, 4  ;;  %v6973_v51 = vunpack.c.l.bf16 %v7093_v55  ;;  %v857_v26 = vor.u32 %v855_v11, %v854_v22  ;;  %v8793_v13 = vld [vmem:[%s8467_s18 + $0x48] sm:$0xff]  }
  0x9a   : > { %v859_v29 = vrot.slane %v854_v22, 4  ;;  %v1120_v30 = vsel %vm8539_vm10, %v849_v16, %v1119_v23  ;;  %v6892_v33 = vpack.c.bf16 %v586_v24, %v586_v24  ;;  %v861_v36 = vshrl.u32 %v6891_v28, 16  ;;  %7396 = vmatpush3.bf16.msra.mxu1 %v8096_v0 }
  0x9b   : > { %v3280_v7 = vsel %vm8490_vm2, %v3275_v25, %v3279_v5  ;;  %1121 = vst [vmem:[#allocation2 + $0x48] sm:$0xf] %v1120_v30  ;;  %v864_v20 = vshll.u32 %v6891_v28, 16  ;;  %v6974_v37 = vunpack.c.h.bf16 %v7093_v55  ;;  %v858_v45 = vsel %vm8533_vm9, %v850_v19, %v857_v26 }
  0x9c   : > { %v6631_v38 = vcombine.low %v3270_v27, %v3280_v7  ;;  %v1124_v46 = vsel %vm8523_vm8, %v859_v29, %v1123_v50  ;;  %v869_v47 = vshrl.u32 %v6892_v33, 16  ;;  %1122 = vst [vmem:[#allocation2 + $0x4c] sm:$0xf] %v858_v45  ;;  %v863_v53 = vrot.slane %v861_v36, 7 }
  0x9d   : > { %1125 = vst [vmem:[#allocation2 + $0x50] sm:$0x1] %v1124_v46  ;;  %v872_v54 = vshll.u32 %v6892_v33, 16  ;;  %v517_v58 = vmul.f32 %v8774_v57, %v6973_v51  ;;  %v518_v56 = vmul.f32 %v8774_v57, %v6974_v37  ;;  %v6977_v60 = vunpack.c.l.bf16 %v7094_v35 }
  0x9e   : > { %7549 = vmatprep.mubr.bf16.mxu0 %v6631_v38  ;;  %v871_v59 = vrot.slane %v869_v47, 7  ;;  %v6978_v61 = vunpack.c.h.bf16 %v7094_v35  ;;  %v866_v32 = vor.u32 %v864_v20, %v863_v53  ;;  %v867_v1 = vrot.slane %v863_v53, 4 }
  0x9f   : > { %v555_v4 = vadd.f32 %v8784_v2, %v517_v58  ;;  %v556_v5 = vadd.f32 %v8784_v2, %v518_v56  ;;  %v519_v8 = vmul.f32 %v8774_v57, %v6977_v60  ;;  %vm2291_vm12 = vcmask 1046532  }
  0xa0   : > { %v874_v23 = vor.u32 %v872_v54, %v871_v59  ;;  %v876_v6 = vrot.slane %v871_v59, 4  ;;  %v520_v9 = vmul.f32 %v8774_v57, %v6978_v61  ;;  %v1127_v11 = vsel %vm8539_vm10, %v866_v32, %v1126_v42  ;;  %vm8806_vm13 = vmor %vm2290_vm11, %vm2291_vm12  ;;  %v8833_v59 = vld [vmem:[%s8467_s18 + $0x50] sm:$0xff]  }
  0xa1   : > { %v587_v55 = vmax.f32 %v555_v4, 0.0  ;;  %v588_v21 = vmax.f32 %v556_v5, 0.0  ;;  %1128 = vst [vmem:[#allocation2 + $0x54] sm:$0xf] %v1127_v11  ;;  %v8800_v19 = vadd.f32 %v8784_v2, %v519_v8  ;;  %v8823_v7 = vsel %vm8806_vm13, %v8613_v63, %v3943_v49  ;;  %v8100_v49 = vld [vmem:[%s10292_s1 + $0x80] sm:$0xff]  }
  0xa2   : > { %v3128_v14 = vld [vmem:[#allocation2 + $0x48] sm:$0xf]  ;;  %v875_v15 = vsel %vm8533_vm9, %v867_v1, %v874_v23  ;;  %v1131_v16 = vsel %vm8523_vm8, %v876_v6, %v1130_v43  ;;  %v8803_v22 = vadd.f32 %v8784_v2, %v520_v9  ;;  %v6981_v36 = vunpack.c.l.bf16 %v8793_v13  ;;  %7429 = vmatprep.subr.bf16.mxu1 %v8100_v49 }
  0xa3   : > { %v1208_v50 = vld [vmem:[#allocation2 + $0x48] sm:$0xf]  ;;  %v3282_v27 = vshrl.u32 %v3128_v14, 16  ;;  %v3285_v25 = vshll.u32 %v3128_v14, 16  ;;  %1129 = vst [vmem:[#allocation2 + $0x58] sm:$0xf] %v875_v15  ;;  %v8814_v33 = vpack.c.bf16 %v587_v55, %v587_v55  ;;  %v8816_v35 = vpack.c.bf16 %v588_v21, %v588_v21 }
  0xa4   : > { %v1408_v28 = vshrl.u32 %v1208_v50, 16  ;;  %v1411_v51 = vshll.u32 %v1208_v50, 16  ;;  %1132 = vst [vmem:[#allocation2 + $0x5c] sm:$0x1] %v1131_v16  ;;  %v8810_v26 = vld [vmem:[#allocation2 + $0x4c] sm:$0xf]  ;;  %v6982_v23 = vunpack.c.h.bf16 %v8793_v13  ;;  %v8837_v55 = vmul.f32 %v8774_v57, %v6981_v36 }
  0xa5   : > { %v8812_v29 = vld [vmem:[#allocation2 + $0x50] sm:$0x1]  ;;  %v1209_v30 = vld [vmem:[#allocation2 + $0x4c] sm:$0xf]  ;;  %v3284_v20 = vrot.slane %v3282_v27, 4  ;;  %v3287_v37 = vrot.slane %v3285_v25, 5  ;;  %v6985_v21 = vunpack.c.l.bf16 %v8833_v59 }
  0xa6   : > { %v3291_v38 = vshll.u32 %v8810_v26, 16  ;;  %v3295_v45 = vshrl.u32 %v8810_v26, 16  ;;  %v1250_v46 = vld [vmem:[#allocation2 + $0x50] sm:$0x1]  ;;  %v3301_v47 = vshll.u32 %v8812_v29, 16  ;;  %v1410_v42 = vrot.slane %v1408_v28, 4 }
  0xa7   : > { %v1413_v53 = vrot.slane %v1411_v51, 5  ;;  %v1417_v18 = vshll.u32 %v1209_v30, 16  ;;  %v3288_v63 = vor.u32 %v3287_v37, %v3284_v20  ;;  %v1421_v56 = vshrl.u32 %v1209_v30, 16  ;;  %v8204_v39 = vld [vmem:[#allocation2 + $0x48] sm:$0xf] }
  0xa8   : > { %v3293_v54 = vrot.slane %v3291_v38, 5  ;;  %v3297_v58 = vrot.slane %v3295_v45, 4  ;;  %v3303_v43 = vrot.slane %v3301_v47, 5  ;;  %v1427_v0 = vshll.u32 %v1250_v46, 16  ;;  %v1210_v5 = vld [vmem:[#allocation2 + $0x54] sm:$0xf] }
  0xa9   : > { %v1414_v60 = vor.u32 %v1413_v53, %v1410_v42  ;;  %v1419_v61 = vrot.slane %v1417_v18, 5  ;;  %v3289_v32 = vrot.slane %v3288_v63, 4  ;;  %v1423_v4 = vrot.slane %v1421_v56, 4  ;;  %v3131_v27 = vld [vmem:[#allocation2 + $0x54] sm:$0xf] }
  0xaa   : > { %v3298_v1 = vor.u32 %v3297_v58, %v3293_v54  ;;  %v1429_v8 = vrot.slane %v1427_v0, 5  ;;  %v1211_v9 = vld [vmem:[#allocation2 + $0x58] sm:$0xf]  ;;  %v1432_v16 = vshrl.u32 %v1210_v5, 16  ;;  %v1435_v28 = vshll.u32 %v1210_v5, 16 }
  0xab   : > { %v1415_v6 = vrot.slane %v1414_v60, 4  ;;  %v1251_v11 = vld [vmem:[#allocation2 + $0x5c] sm:$0x1]  ;;  %v3294_v14 = vsel %vm8490_vm2, %v3289_v32, %v3293_v54  ;;  %v1424_v15 = vor.u32 %v1423_v4, %v1419_v61  ;;  %v1441_v51 = vshll.u32 %v1211_v9, 16  ;;  %v3132_v20 = vld [vmem:[#allocation2 + $0x58] sm:$0xf] }
  0xac   : > { %v3299_v50 = vrot.slane %v3298_v1, 4  ;;  %v1445_v30 = vshrl.u32 %v1211_v9, 16  ;;  %v1434_v38 = vrot.slane %v1432_v16, 4  ;;  %v1451_v45 = vshll.u32 %v1251_v11, 16  ;;  %v3133_v18 = vld [vmem:[#allocation2 + $0x5c] sm:$0x1] }
  0xad   : > { %v1420_v25 = vsel %vm8490_vm2, %v1415_v6, %v1419_v61  ;;  %v1425_v37 = vrot.slane %v1424_v15, 4  ;;  %v1437_v47 = vrot.slane %v1435_v28, 5  ;;  %v1443_v42 = vrot.slane %v1441_v51, 5 }
  0xae   : > { %v3304_v36 = vsel %vm8490_vm2, %v3299_v50, %v3303_v43  ;;  %v1447_v53 = vrot.slane %v1445_v30, 4  ;;  %v1453_v63 = vrot.slane %v1451_v45, 5  ;;  %v3306_v54 = vshrl.u32 %v3131_v27, 16  ;;  %v1137_v45 = vld [vmem:[#allocation2 + $0x68] sm:$0x1] }
  0xaf   : > { %v6632_v46 = vcombine.low %v3294_v14, %v3304_v36  ;;  %v1430_v49 = vsel %vm8490_vm2, %v1425_v37, %v1429_v8  ;;  %v3309_v58 = vshll.u32 %v3131_v27, 16  ;;  %v1438_v60 = vor.u32 %v1437_v47, %v1434_v38  ;;  %v3867_v14 = vld [vmem:[#allocation2 + $0xc] sm:$0xe]  ;;  %v1133_v27 = vld [vmem:[#allocation2 + $0x60] sm:$0xf] }
  0xb0   : > { %v6473_v56 = vcombine.low %v1420_v25, %v1430_v49  ;;  %v1448_v61 = vor.u32 %v1447_v53, %v1443_v42  ;;  %v3315_v0 = vshll.u32 %v3132_v20, 16  ;;  %v3308_v43 = vrot.slane %v3306_v54, 4 }
  0xb1   : > { %7550 = vmatmul.mubr.bf16.gmra.mrb[8].mxu0 %v6632_v46  ;;  %v3311_v32 = vrot.slane %v3309_v58, 5  ;;  %v3319_v1 = vshrl.u32 %v3132_v20, 16  ;;  %v3325_v4 = vshll.u32 %v3133_v18, 16  ;;  %v1439_v5 = vrot.slane %v1438_v60, 4  ;;  %v3868_v18 = vld [vmem:[#allocation2 + $0x18] sm:$0xe] }
  0xb2   : > { %7361 = vmatprep.mubr.bf16.mxu1 %v6473_v56  ;;  %v1449_v6 = vrot.slane %v1448_v61, 4  ;;  %v3317_v9 = vrot.slane %v3315_v0, 5  ;;  %v878_v11 = vshrl.u32 %v8814_v33, 16  ;;  %v881_v16 = vshll.u32 %v8814_v33, 16  ;;  %v8184_v0 = vld [vmem:[#allocation2 + $0x10] sm:$0xf] }
  0xb3   : > { %v3312_v8 = vor.u32 %v3311_v32, %v3308_v43  ;;  %v3321_v50 = vrot.slane %v3319_v1, 4  ;;  %v3327_v15 = vrot.slane %v3325_v4, 5  ;;  %v1444_v25 = vsel %vm8490_vm2, %v1439_v5, %v1443_v42 }
  0xb4   : > { %v1454_v28 = vsel %vm8490_vm2, %v1449_v6, %v1453_v63  ;;  %v880_v51 = vrot.slane %v878_v11, 7  ;;  %v886_v30 = vshrl.u32 %v8816_v35, 16  ;;  %v889_v38 = vshll.u32 %v8816_v35, 16 }
  0xb5   : > { %v6474_v20 = vcombine.low %v1444_v25, %v1454_v28  ;;  %v3313_v36 = vrot.slane %v3312_v8, 4  ;;  %v3322_v37 = vor.u32 %v3321_v50, %v3317_v9  ;;  %v589_v33 = vmax.f32 %v8800_v19, 0.0 }
  0xb6   : > { %v883_v46 = vor.u32 %v881_v16, %v880_v51  ;;  %v884_v47 = vrot.slane %v880_v51, 4  ;;  %v888_v53 = vrot.slane %v886_v30, 7  ;;  %v590_v63 = vmax.f32 %v8803_v22, 0.0 }
  0xb7   : > { %7362 = vmatmul.mubr.bf16.gmra.mrb[12].mxu1 %v6474_v20  ;;  %v3318_v42 = vsel %vm8490_vm2, %v3313_v36, %v3317_v9  ;;  %v3323_v49 = vrot.slane %v3322_v37, 4  ;;  %v6651_v54 = vrot.slane %v3867_v14, 9  ;;  %v6895_v60 = vpack.c.bf16 %v589_v33, %v589_v33  ;;  %v1140_v14 = vld [vmem:[#allocation2 + $0x6c] sm:$0xf] }
  0xb8   : > { %v891_v58 = vor.u32 %v889_v38, %v888_v53  ;;  %v893_v56 = vrot.slane %v888_v53, 4  ;;  %v1134_v35 = vsel %vm8539_vm10, %v883_v46, %v1133_v27  ;;  %v6896_v19 = vpack.c.bf16 %v590_v63, %v590_v63 }
  0xb9   : > { %v3328_v61 = vsel %vm8490_vm2, %v3323_v49, %v3327_v15  ;;  %1135 = vst [vmem:[#allocation2 + $0x60] sm:$0xf] %v1134_v35  ;;  %v3933_v43 = vrot.slane %v8184_v0, 5  ;;  %v6652_v32 = vrot.slane %v3868_v18, 9  ;;  %v895_v5 = vshrl.u32 %v6895_v60, 16 }
  0xba   : > { %v6633_v1 = vcombine.low %v3318_v42, %v3328_v61  ;;  %v892_v4 = vsel %vm8533_vm9, %v884_v47, %v891_v58  ;;  %v1138_v22 = vsel %vm8523_vm8, %v893_v56, %v1137_v45  ;;  %v898_v6 = vshll.u32 %v6895_v60, 16 }
  0xbb   : > { %1136 = vst [vmem:[#allocation2 + $0x64] sm:$0xf] %v892_v4  ;;  %1139 = vst [vmem:[#allocation2 + $0x68] sm:$0x1] %v1138_v22  ;;  %v903_v9 = vshrl.u32 %v6896_v19, 16  ;;  %v906_v11 = vshll.u32 %v6896_v19, 16  ;;  %v8870_v8 = vsel %vm8806_vm13, %v6651_v54, %v3933_v43  ;;  %v8876_v16 = vsel %vm8806_vm13, %v6652_v32, %v3940_v48 }
  0xbc   : > { %7553 = vmatprep.mubr.bf16.mxu0 %v6633_v1  ;;  %v897_v50 = vrot.slane %v895_v5, 7  ;;  %v3935_v15 = vrot.slane %v3933_v43, 4  ;;  %v522_v27 = vmul.f32 %v8774_v57, %v6982_v23  ;;  %v6684_v28 = vcombine.low %v8876_v16, %v8823_v7 }
  0xbd   : > { %v905_v25 = vrot.slane %v903_v9, 7  ;;  %v559_v51 = vadd.f32 %v8784_v2, %v8837_v55  ;;  %v6986_v30 = vunpack.c.h.bf16 %v8833_v59  ;;  %v523_v52 = vmul.f32 %v8774_v57, %v6985_v21 }
  0xbe   : > { %v900_v20 = vor.u32 %v898_v6, %v897_v50  ;;  %v901_v36 = vrot.slane %v897_v50, 4  ;;  %v8890_v48 = vsel %vm8806_vm13, %v3935_v15, %v3936_v10  ;;  %v560_v13 = vadd.f32 %v8784_v2, %v522_v27 }
  0xbf   : > { %v908_v23 = vor.u32 %v906_v11, %v905_v25  ;;  %v910_v37 = vrot.slane %v905_v25, 4  ;;  %v6683_v38 = vcombine.low %v8870_v8, %v8890_v48  ;;  %v591_v45 = vmax.f32 %v559_v51, 0.0 }
  0xc0   : > { %v3134_v55 = vld [vmem:[#allocation2 + $0x60] sm:$0xf]  ;;  %v1141_v47 = vsel %vm8539_vm10, %v900_v20, %v1140_v14  ;;  %v592_v53 = vmax.f32 %v560_v13, 0.0  ;;  %v8901_v10 = vmul.f32 %v8774_v57, %v6986_v30 }
  0xc1   : > { %v1212_v46 = vld [vmem:[#allocation2 + $0x60] sm:$0xf]  ;;  %v3330_v33 = vshrl.u32 %v3134_v55, 16  ;;  %v3333_v18 = vshll.u32 %v3134_v55, 16  ;;  %1142 = vst [vmem:[#allocation2 + $0x6c] sm:$0xf] %v1141_v47  ;;  %v909_v56 = vsel %vm8533_vm9, %v901_v36, %v908_v23  ;;  %v1145_v59 = vsel %vm8523_vm8, %v910_v37, %v1144_v17 }
  0xc2   : > { %v1456_v42 = vshrl.u32 %v1212_v46, 16  ;;  %v1459_v49 = vshll.u32 %v1212_v46, 16  ;;  %v8903_v63 = vld [vmem:[#allocation2 + $0x64] sm:$0xf]  ;;  %v8905_v54 = vld [vmem:[#allocation2 + $0x68] sm:$0x1]  ;;  %v6897_v21 = vpack.c.bf16 %v591_v45, %v591_v45  ;;  %v8911_v35 = vpack.c.bf16 %v592_v53, %v592_v53 }
  0xc3   : > { %v1213_v58 = vld [vmem:[#allocation2 + $0x64] sm:$0xf]  ;;  %v3332_v60 = vrot.slane %v3330_v33, 4  ;;  %v3335_v61 = vrot.slane %v3333_v18, 5  ;;  %v3339_v19 = vshll.u32 %v8903_v63, 16  ;;  %v3343_v0 = vshrl.u32 %v8903_v63, 16 }
  0xc4   : > { %v1252_v43 = vld [vmem:[#allocation2 + $0x68] sm:$0x1]  ;;  %1143 = vst [vmem:[#allocation2 + $0x70] sm:$0xf] %v909_v56  ;;  %1146 = vst [vmem:[#allocation2 + $0x74] sm:$0x1] %v1145_v59 }
  0xc5   : > { %v3349_v32 = vshll.u32 %v8905_v54, 16  ;;  %v1458_v1 = vrot.slane %v1456_v42, 4  ;;  %v1461_v4 = vrot.slane %v1459_v49, 5  ;;  %v1465_v22 = vshll.u32 %v1213_v58, 16 }
  0xc6   : > { %v3336_v5 = vor.u32 %v3335_v61, %v3332_v60  ;;  %v3341_v6 = vrot.slane %v3339_v19, 5  ;;  %v3345_v9 = vrot.slane %v3343_v0, 4  ;;  %v1469_v11 = vshrl.u32 %v1213_v58, 16 }
  0xc7   : > { %v3351_v14 = vrot.slane %v3349_v32, 5  ;;  %v1462_v50 = vor.u32 %v1461_v4, %v1458_v1  ;;  %v1467_v15 = vrot.slane %v1465_v22, 5  ;;  %v1475_v27 = vshll.u32 %v1252_v43, 16  ;;  %v1147_v32 = vld [vmem:[#allocation2 + $0x78] sm:$0xf] }
  0xc8   : > { %v3337_v25 = vrot.slane %v3336_v5, 4  ;;  %v3346_v51 = vor.u32 %v3345_v9, %v3341_v6  ;;  %v1471_v30 = vrot.slane %v1469_v11, 4  ;;  %v912_v20 = vshrl.u32 %v6897_v21, 16  ;;  %v1214_v13 = vld [vmem:[#allocation2 + $0x6c] sm:$0xf] }
  0xc9   : > { %v1463_v36 = vrot.slane %v1462_v50, 4  ;;  %v1477_v17 = vrot.slane %v1475_v27, 5  ;;  %v915_v23 = vshll.u32 %v6897_v21, 16  ;;  %v920_v37 = vshrl.u32 %v8911_v35, 16  ;;  %v1151_v50 = vld [vmem:[#allocation2 + $0x80] sm:$0x1] }
  0xca   : > { %v3342_v45 = vsel %vm8490_vm2, %v3337_v25, %v3341_v6  ;;  %v3347_v55 = vrot.slane %v3346_v51, 4  ;;  %v1472_v46 = vor.u32 %v1471_v30, %v1467_v15  ;;  %v1480_v47 = vshrl.u32 %v1214_v13, 16  ;;  %v3869_v6 = vld [vmem:[#allocation2 + $0x24] sm:$0xe] }
  0xcb   : > { %v1468_v53 = vsel %vm8490_vm2, %v1463_v36, %v1467_v15  ;;  %v1215_v33 = vld [vmem:[#allocation2 + $0x70] sm:$0xf]  ;;  %v1253_v18 = vld [vmem:[#allocation2 + $0x74] sm:$0x1]  ;;  %v1483_v42 = vshll.u32 %v1214_v13, 16  ;;  %v914_v49 = vrot.slane %v912_v20, 7  ;;  %v561_v58 = vadd.f32 %v8784_v2, %v523_v52 }
  0xcc   : > { %v3352_v56 = vsel %vm8490_vm2, %v3347_v55, %v3351_v14  ;;  %v1473_v59 = vrot.slane %v1472_v46, 4  ;;  %v1482_v21 = vrot.slane %v1480_v47, 4  ;;  %v1489_v60 = vshll.u32 %v1215_v33, 16  ;;  %v3870_v13 = vld [vmem:[#allocation2 + $0x30] sm:$0xe] }
  0xcd   : > { %v6634_v61 = vcombine.low %v3342_v45, %v3352_v56  ;;  %v1485_v19 = vrot.slane %v1483_v42, 5  ;;  %v1493_v0 = vshrl.u32 %v1215_v33, 16  ;;  %v1499_v43 = vshll.u32 %v1253_v18, 16  ;;  %v8186_v46 = vld [vmem:[#allocation2 + $0x2c] sm:$0x1]  ;;  %v7097_v47 = vld [vmem:[%s8467_s18 + $0x58] sm:$0xff]  }
  0xce   : > { %v1478_v1 = vsel %vm8490_vm2, %v1473_v59, %v1477_v17  ;;  %v1491_v4 = vrot.slane %v1489_v60, 5  ;;  %v917_v22 = vor.u32 %v915_v23, %v914_v49  ;;  %v918_v5 = vrot.slane %v914_v49, 4 }
  0xcf   : > { %7554 = vmatmul.mubr.bf16.gmra.mrb[12].mxu0 %v6634_v61  ;;  %v6475_v52 = vcombine.low %v1468_v53, %v1478_v1  ;;  %v1486_v9 = vor.u32 %v1485_v19, %v1482_v21  ;;  %v1495_v11 = vrot.slane %v1493_v0, 4  ;;  %v1501_v14 = vrot.slane %v1499_v43, 5  ;;  %v8093_v21 = vld [vmem:[%s10292_s1 + $0x188] sm:$0xff]  }
  0xd0   : > { %7589 = vmatprep.mubr.bf16.mxu0 %v6683_v38  ;;  %v922_v15 = vrot.slane %v920_v37, 7  ;;  %v923_v27 = vshll.u32 %v8911_v35, 16  ;;  %v1148_v25 = vsel %vm8539_vm10, %v917_v22, %v1147_v32  ;;  %v562_v51 = vadd.f32 %v8784_v2, %v8901_v10  ;;  %v8185_v38 = vld [vmem:[#allocation2 + $0x28] sm:$0xf]  ;;  %v1154_v32 = vld [vmem:[#allocation2 + $0x84] sm:$0xf] }
  0xd1   : > { %7365 = vmatprep.mubr.bf16.mxu1 %v6475_v52  ;;  %v1487_v30 = vrot.slane %v1486_v9, 4  ;;  %v1496_v20 = vor.u32 %v1495_v11, %v1491_v4  ;;  %1149 = vst [vmem:[#allocation2 + $0x78] sm:$0xf] %v1148_v25  ;;  %v593_v36 = vmax.f32 %v561_v58, 0.0  ;;  %v6653_v17 = vrot.slane %v3869_v6, 9 }
  0xd2   : > { %v925_v23 = vor.u32 %v923_v27, %v922_v15  ;;  %v927_v8 = vrot.slane %v922_v15, 4  ;;  %v594_v48 = vmax.f32 %v562_v51, 0.0  ;;  %v3947_v37 = vrot.slane %v8185_v38, 5  ;;  %v1158_v52 = vld [vmem:[#allocation2 + $0x8c] sm:$0x1]  ;;  %v7098_v15 = vld [vmem:[%s8467_s18 + $0x60] sm:$0xff]  }
  0xd3   : > { %v1492_v35 = vsel %vm8490_vm2, %v1487_v30, %v1491_v4  ;;  %v1497_v45 = vrot.slane %v1496_v20, 4  ;;  %v6899_v55 = vpack.c.bf16 %v593_v36, %v593_v36  ;;  %v3950_v10 = vrot.slane %v8186_v46, 5  ;;  %v3871_v46 = vld [vmem:[#allocation2 + $0x3c] sm:$0xe] }
  0xd4   : > { %v926_v53 = vsel %vm8533_vm9, %v918_v5, %v925_v23  ;;  %v1152_v33 = vsel %vm8523_vm8, %v927_v8, %v1151_v50  ;;  %v6900_v18 = vpack.c.bf16 %v594_v48, %v594_v48  ;;  %v3948_v42 = vsel %vm8806_vm13, %v6653_v17, %v3947_v37 }
  0xd5   : > { %v1502_v49 = vsel %vm8490_vm2, %v1497_v45, %v1501_v14  ;;  %1150 = vst [vmem:[#allocation2 + $0x7c] sm:$0xf] %v926_v53  ;;  %1153 = vst [vmem:[#allocation2 + $0x80] sm:$0x1] %v1152_v33  ;;  %v929_v58 = vshrl.u32 %v6899_v55, 16  ;;  %v932_v56 = vshll.u32 %v6899_v55, 16  ;;  %v6989_v11 = vunpack.c.l.bf16 %v7097_v47 }
  0xd6   : > { %v3949_v59 = vrot.slane %v3947_v37, 4  ;;  %v6476_v60 = vcombine.low %v1492_v35, %v1502_v49  ;;  %v937_v61 = vshrl.u32 %v6900_v18, 16  ;;  %v940_v19 = vshll.u32 %v6900_v18, 16  ;;  %v8097_v18 = vld [vmem:[%s10292_s1 + $0x198] sm:$0xff]  }
  0xd7   : > { %v6654_v0 = vrot.slane %v3870_v13, 9  ;;  %7590 = vmatmul.mubr.bf16.vlgmr.msra.gmra.mrb[0].mxu0 %v6684_v28  ;;  %v931_v43 = vrot.slane %v929_v58, 7  ;;  %v3954_v4 = vrot.slane %v8703_v31, 5  ;;  %v3957_v22 = vrot.slane %v8707_v40, 5  ;;  %v8095_v31 = vld [vmem:[%s10292_s1 + $0x190] sm:$0xff]  }
  0xd8   : > { %v3951_v1 = vsel %vm8806_vm13, %v3949_v59, %v3950_v10  ;;  %7366 = vmatmul.mubr.bf16.gmra.mrb[16].mxu1 %v6476_v60  ;;  %7622 = vmatpush3.bf16.msra.mxu0 %v8730_v12  ;;  %v1216_v5 = vld [vmem:[#allocation2 + $0x78] sm:$0xf]  ;;  %v939_v6 = vrot.slane %v937_v61, 7  ;;  %v6990_v7 = vunpack.c.h.bf16 %v7097_v47  ;;  %v525_v36 = vmul.f32 %v8774_v57, %v6989_v11 }
  0xd9   : > { %v6685_v9 = vcombine.low %v3948_v42, %v3951_v1  ;;  %v1504_v16 = vshrl.u32 %v1216_v5, 16  ;;  %v1507_v28 = vshll.u32 %v1216_v5, 16  ;;  %v934_v14 = vor.u32 %v932_v56, %v931_v43  ;;  %7623 = vmatprep.subr.bf16.mxu0 %v8093_v21  ;;  %v8982_v1 = vld [vmem:[%s8467_s18 + $0x68] sm:$0xff]  }
  0xda   : > { %v935_v50 = vrot.slane %v931_v43, 4  ;;  %v942_v40 = vor.u32 %v940_v19, %v939_v6  ;;  %v944_v27 = vrot.slane %v939_v6, 4  ;;  %v3955_v12 = vsel %vm8806_vm13, %v6654_v0, %v3954_v4 }
  0xdb   : > { %7593 = vmatprep.mubr.bf16.mxu0 %v6685_v9  ;;  %v3956_v25 = vrot.slane %v3954_v4, 4  ;;  %v1506_v51 = vrot.slane %v1504_v16, 4  ;;  %v1509_v30 = vrot.slane %v1507_v28, 5  ;;  %v1155_v20 = vsel %vm8539_vm10, %v934_v14, %v1154_v32  ;;  %v8101_v4 = vld [vmem:[%s10292_s1 + $0x1a0] sm:$0xff]  }
  0xdc   : > { %v1217_v17 = vld [vmem:[#allocation2 + $0x7c] sm:$0xf]  ;;  %v1254_v13 = vld [vmem:[#allocation2 + $0x80] sm:$0x1]  ;;  %v943_v23 = vsel %vm8533_vm9, %v935_v50, %v942_v40  ;;  %1156 = vst [vmem:[#allocation2 + $0x84] sm:$0xf] %v1155_v20  ;;  %v1159_v8 = vsel %vm8523_vm8, %v944_v27, %v1158_v52  ;;  %7624 = vmatpush3.bf16.msra.mxu0 %v8093_v21  ;;  %v526_v38 = vmul.f32 %v8774_v57, %v6990_v7  ;;  %v6993_v33 = vunpack.c.l.bf16 %v7098_v15 }
  0xdd   : > { %v3958_v48 = vsel %vm8806_vm13, %v3956_v25, %v3957_v22  ;;  %v1510_v37 = vor.u32 %v1509_v30, %v1506_v51  ;;  %v1513_v35 = vshll.u32 %v1217_v17, 16  ;;  %v1517_v45 = vshrl.u32 %v1217_v17, 16  ;;  %1157 = vst [vmem:[#allocation2 + $0x88] sm:$0xf] %v943_v23  ;;  %1160 = vst [vmem:[#allocation2 + $0x8c] sm:$0x1] %v1159_v8  ;;  %7625 = vmatprep.subr.bf16.mxu0 %v8095_v31 }
  0xde   : > { %v1523_v55 = vshll.u32 %v1254_v13, 16  ;;  %v6686_v10 = vcombine.low %v3955_v12, %v3958_v48  ;;  %v563_v47 = vadd.f32 %v8784_v2, %v525_v36  ;;  %v564_v53 = vadd.f32 %v8784_v2, %v526_v38  ;;  %v8105_v17 = vld [vmem:[%s10292_s1 + $0x1a8] sm:$0xff]  }
  0xdf   : > { %v1511_v42 = vrot.slane %v1510_v37, 4  ;;  %v1515_v49 = vrot.slane %v1513_v35, 5  ;;  %v1519_v58 = vrot.slane %v1517_v45, 4  ;;  %v6994_v60 = vunpack.c.h.bf16 %v7098_v15 }
  0xe0   : > { %v1525_v56 = vrot.slane %v1523_v55, 5  ;;  %7594 = vmatmul.mubr.bf16.gmra.mrb[4].mxu0 %v6686_v10  ;;  %v595_v59 = vmax.f32 %v563_v47, 0.0  ;;  %v596_v21 = vmax.f32 %v564_v53, 0.0  ;;  %v527_v61 = vmul.f32 %v8774_v57, %v6993_v33  ;;  %v1161_v55 = vld [vmem:[#allocation2 + $0x90] sm:$0xf] }
  0xe1   : > { %v1516_v19 = vsel %vm8490_vm2, %v1511_v42, %v1515_v49  ;;  %v1520_v0 = vor.u32 %v1519_v58, %v1515_v49  ;;  %v6655_v43 = vrot.slane %v3871_v46, 9  ;;  %v3961_v32 = vrot.slane %v8739_v41, 5  ;;  %7626 = vmatpush3.bf16.msra.mxu0 %v8095_v31  ;;  %v1165_v58 = vld [vmem:[#allocation2 + $0x98] sm:$0x1] }
  0xe2   : > { %v6901_v22 = vpack.c.bf16 %v595_v59, %v595_v59  ;;  %v6902_v5 = vpack.c.bf16 %v596_v21, %v596_v21  ;;  %v528_v6 = vmul.f32 %v8774_v57, %v6994_v60  ;;  %v565_v52 = vadd.f32 %v8784_v2, %v527_v61  ;;  %7627 = vmatprep.subr.bf16.mxu0 %v8097_v18 }
  0xe3   : > { %v1521_v9 = vrot.slane %v1520_v0, 4  ;;  %v8989_v11 = vld [vmem:[#allocation2 + $0x84] sm:$0xf]  ;;  %v3962_v41 = vsel %vm8806_vm13, %v6655_v43, %v3961_v32  ;;  %v3963_v7 = vrot.slane %v3961_v32, 4  ;;  %v3964_v16 = vrot.slane %v8741_v62, 5 }
  0xe4   : > { %v8994_v28 = vld [vmem:[#allocation2 + $0x88] sm:$0xf]  ;;  %v1255_v14 = vld [vmem:[#allocation2 + $0x8c] sm:$0x1]  ;;  %v1528_v50 = vshrl.u32 %v8989_v11, 16  ;;  %v1531_v15 = vshll.u32 %v8989_v11, 16  ;;  %v566_v31 = vadd.f32 %v8784_v2, %v528_v6  ;;  %v6997_v40 = vunpack.c.l.bf16 %v8982_v1 }
  0xe5   : > { %v1526_v27 = vsel %vm8490_vm2, %v1521_v9, %v1525_v56  ;;  %v1537_v12 = vshll.u32 %v8994_v28, 16  ;;  %v1541_v25 = vshrl.u32 %v8994_v28, 16  ;;  %v1547_v51 = vshll.u32 %v1255_v14, 16  ;;  %7628 = vmatpush3.bf16.msra.mxu0 %v8097_v18  ;;  %v8109_v56 = vld [vmem:[%s10292_s1 + $0x1b0] sm:$0xff]   ;;  %v7100_v9 = vld [vmem:[%s8467_s18 + $0x70] sm:$0xff]  }
  0xe6   : > { %v6477_v62 = vcombine.low %v1516_v19, %v1526_v27  ;;  %v1530_v30 = vrot.slane %v1528_v50, 4  ;;  %v1533_v20 = vrot.slane %v1531_v15, 5  ;;  %v946_v36 = vshrl.u32 %v6901_v22, 16  ;;  %7629 = vmatprep.subr.bf16.mxu0 %v8101_v4  ;;  %v3872_v19 = vld [vmem:[#allocation2 + $0x48] sm:$0xe]  ;;  %v8113_v15 = vld [vmem:[%s10292_s1 + $0x1b8] sm:$0xff]  }
  0xe7   : > { %v1539_v13 = vrot.slane %v1537_v12, 5  ;;  %v1543_v23 = vrot.slane %v1541_v25, 4  ;;  %v1549_v8 = vrot.slane %v1547_v51, 5  ;;  %v949_v48 = vshll.u32 %v6901_v22, 16  ;;  %v1168_v50 = vld [vmem:[#allocation2 + $0x9c] sm:$0xf] }
  0xe8   : > { %7369 = vmatprep.mubr.bf16.mxu1 %v6477_v62  ;;  %v1534_v38 = vor.u32 %v1533_v20, %v1530_v30  ;;  %v948_v37 = vrot.slane %v946_v36, 7  ;;  %v954_v35 = vshrl.u32 %v6902_v5, 16  ;;  %v957_v45 = vshll.u32 %v6902_v5, 16  ;;  %v1172_v12 = vld [vmem:[#allocation2 + $0xa4] sm:$0x1] }
  0xe9   : > { %v1544_v46 = vor.u32 %v1543_v23, %v1539_v13  ;;  %v597_v10 = vmax.f32 %v565_v52, 0.0  ;;  %v598_v47 = vmax.f32 %v566_v31, 0.0  ;;  %v3965_v53 = vsel %vm8806_vm13, %v3963_v7, %v3964_v16  ;;  %7630 = vmatpush3.bf16.msra.mxu0 %v8101_v4 }
  0xea   : > { %v1535_v33 = vrot.slane %v1534_v38, 4  ;;  %v951_v18 = vor.u32 %v949_v48, %v948_v37  ;;  %v952_v42 = vrot.slane %v948_v37, 4  ;;  %v956_v49 = vrot.slane %v954_v35, 7  ;;  %7631 = vmatprep.subr.bf16.mxu0 %v8105_v17 }
  0xeb   : > { %v1545_v59 = vrot.slane %v1544_v46, 4  ;;  %v6903_v21 = vpack.c.bf16 %v597_v10, %v597_v10  ;;  %v6904_v60 = vpack.c.bf16 %v598_v47, %v598_v47  ;;  %v6687_v61 = vcombine.low %v3962_v41, %v3965_v53  ;;  %v9059_v46 = vld [vmem:[%s10295_s4] ss:$0 sm:$0xff] }
  0xec   : > { %v1540_v0 = vsel %vm8490_vm2, %v1535_v33, %v1539_v13  ;;  %v959_v43 = vor.u32 %v957_v45, %v956_v49  ;;  %v961_v32 = vrot.slane %v956_v49, 4  ;;  %v1162_v4 = vsel %vm8539_vm10, %v951_v18, %v1161_v55 }
  0xed   : > { %v1550_v22 = vsel %vm8490_vm2, %v1545_v59, %v1549_v8  ;;  %1163 = vst [vmem:[#allocation2 + $0x90] sm:$0xf] %v1162_v4  ;;  %v963_v5 = vshrl.u32 %v6903_v21, 16  ;;  %v966_v6 = vshll.u32 %v6903_v21, 16  ;;  %v971_v52 = vshrl.u32 %v6904_v60, 16  ;;  %7597 = vmatprep.mubr.bf16.mxu0 %v6687_v61  ;;  %7632 = vmatpush3.bf16.msra.mxu0 %v8105_v17 }
  0xee   : > { %v6478_v41 = vcombine.low %v1540_v0, %v1550_v22  ;;  %v960_v7 = vsel %vm8533_vm9, %v952_v42, %v959_v43  ;;  %v1166_v16 = vsel %vm8523_vm8, %v961_v32, %v1165_v58  ;;  %v974_v14 = vshll.u32 %v6904_v60, 16  ;;  %7633 = vmatprep.subr.bf16.mxu0 %v8109_v56 }
  0xef   : > { %1164 = vst [vmem:[#allocation2 + $0x94] sm:$0xf] %v960_v7  ;;  %1167 = vst [vmem:[#allocation2 + $0x98] sm:$0x1] %v1166_v16  ;;  %v965_v31 = vrot.slane %v963_v5, 7  ;;  %v973_v27 = vrot.slane %v971_v52, 7  ;;  %v6998_v30 = vunpack.c.h.bf16 %v8982_v1  ;;  %v529_v20 = vmul.f32 %v8774_v57, %v6997_v40 }
  0xf0   : > { %v6656_v25 = vrot.slane %v3872_v19, 9  ;;  %v3968_v51 = vrot.slane %v8810_v26, 5  ;;  %7370 = vmatmul.mubr.bf16.gmra.mrb[20].mxu1 %v6478_v41  ;;  %v3971_v62 = vrot.slane %v8812_v29, 5  ;;  %v7001_v36 = vunpack.c.l.bf16 %v7100_v9  ;;  %v9037_v26 = vld [vmem:[%s10294_s3] ss:$0 sm:$0xff] }
  0xf1   : > { %v968_v17 = vor.u32 %v966_v6, %v965_v31  ;;  %v969_v13 = vrot.slane %v965_v31, 4  ;;  %v976_v23 = vor.u32 %v974_v14, %v973_v27  ;;  %v978_v8 = vrot.slane %v973_v27, 4  ;;  %7634 = vmatpush3.bf16.msra.mxu0 %v8109_v56  ;;  %v9044_v57 = vld [vmem:[%s10292_s1 + $0x1c0] sm:$0xff]  }
  0xf2   : > { %v3969_v48 = vsel %vm8806_vm13, %v6656_v25, %v3968_v51  ;;  %v3970_v38 = vrot.slane %v3968_v51, 4  ;;  %v530_v29 = vmul.f32 %v9037_v26, %v6998_v30  ;;  %v567_v1 = vadd.f32 %v8784_v2, %v529_v20  ;;  %7635 = vmatprep.subr.bf16.mxu0 %v8113_v15 }
  0xf3   : > { %v977_v40 = vsel %vm8533_vm9, %v969_v13, %v976_v23  ;;  %v1169_v37 = vsel %vm8539_vm10, %v968_v17, %v1168_v50  ;;  %v1173_v35 = vsel %vm8523_vm8, %v978_v8, %v1172_v12  ;;  %v7002_v45 = vunpack.c.h.bf16 %v7100_v9 }
  0xf4   : > { %v9052_v55 = vld [vmem:[#allocation2 + $0x90] sm:$0xf]  ;;  %1170 = vst [vmem:[#allocation2 + $0x9c] sm:$0xf] %v1169_v37  ;;  %1171 = vst [vmem:[#allocation2 + $0xa0] sm:$0xf] %v977_v40  ;;  %v3972_v2 = vsel %vm8806_vm13, %v3970_v38, %v3971_v62  ;;  %v568_v10 = vadd.f32 %v9059_v46, %v530_v29  ;;  %v531_v53 = vmul.f32 %v9037_v26, %v7001_v36 }
  0xf5   : > { %1174 = vst [vmem:[#allocation2 + $0xa4] sm:$0x1] %v1173_v35  ;;  %v599_v47 = vmax.f32 %v567_v1, 0.0  ;;  %v1552_v33 = vshrl.u32 %v9052_v55, 16  ;;  %v1555_v18 = vshll.u32 %v9052_v55, 16  ;;  %v6688_v42 = vcombine.low %v3969_v48, %v3972_v2  ;;  %7636 = vmatpush3.bf16.msra.mxu0 %v8113_v15 }
  0xf6   : > { %v9065_v49 = vld [vmem:[#allocation2 + $0x94] sm:$0xf]  ;;  %v1256_v58 = vld [vmem:[#allocation2 + $0x98] sm:$0x1]  ;;  %v600_v56 = vmax.f32 %v568_v10, 0.0  ;;  %v532_v21 = vmul.f32 %v9037_v26, %v7002_v45  ;;  %v569_v60 = vadd.f32 %v9059_v46, %v531_v53  ;;  %7669 = vmatprep.subr.bf16.mxu0 %v9044_v57 }
  0xf7   : > { %v6905_v59 = vpack.c.bf16 %v599_v47, %v599_v47  ;;  %v1554_v61 = vrot.slane %v1552_v33, 4  ;;  %v1557_v19 = vrot.slane %v1555_v18, 5  ;;  %v1561_v0 = vshll.u32 %v9065_v49, 16  ;;  %7598 = vmatmul.mubr.bf16.gmra.mrb[8].mxu0 %v6688_v42  ;;  %v1175_v48 = vld [vmem:[#allocation2 + $0xa8] sm:$0xf] }
  0xf8   : > { %v1565_v43 = vshrl.u32 %v9065_v49, 16  ;;  %v1571_v32 = vshll.u32 %v1256_v58, 16  ;;  %v6906_v4 = vpack.c.bf16 %v600_v56, %v600_v56  ;;  %v570_v12 = vadd.f32 %v9059_v46, %v532_v21  ;;  %v3873_v37 = vld [vmem:[#allocation2 + $0x54] sm:$0xe]  ;;  %v1179_v42 = vld [vmem:[#allocation2 + $0xb0] sm:$0x1] }
  0xf9   : > { %v980_v22 = vshrl.u32 %v6905_v59, 16  ;;  %v1558_v5 = vor.u32 %v1557_v19, %v1554_v61  ;;  %v1563_v6 = vrot.slane %v1561_v0, 5  ;;  %v983_v9 = vshll.u32 %v6905_v59, 16  ;;  %v8189_v0 = vld [vmem:[#allocation2 + $0x58] sm:$0xf] }
  0xfa   : > { %v1567_v52 = vrot.slane %v1565_v43, 4  ;;  %v1573_v41 = vrot.slane %v1571_v32, 5  ;;  %v988_v16 = vshrl.u32 %v6906_v4, 16  ;;  %v991_v14 = vshll.u32 %v6906_v4, 16 }
  0xfb   : > { %v982_v7 = vrot.slane %v980_v22, 7  ;;  %v1559_v50 = vrot.slane %v1558_v5, 4  ;;  %v9072_v31 = vld [vmem:[#allocation2 + $0x9c] sm:$0xf]  ;;  %v9074_v27 = vld [vmem:[#allocation2 + $0xa0] sm:$0xf] }
  0xfc   : > { %v1568_v15 = vor.u32 %v1567_v52, %v1563_v6  ;;  %v601_v25 = vmax.f32 %v569_v60, 0.0  ;;  %v1257_v51 = vld [vmem:[#allocation2 + $0xa4] sm:$0x1]  ;;  %v1576_v62 = vshrl.u32 %v9072_v31, 16  ;;  %v1579_v30 = vshll.u32 %v9072_v31, 16 }
  0xfd   : > { %v1585_v20 = vshll.u32 %v9074_v27, 16  ;;  %v1589_v36 = vshrl.u32 %v9074_v27, 16  ;;  %v1564_v17 = vsel %vm8490_vm2, %v1559_v50, %v1563_v6  ;;  %v1595_v23 = vshll.u32 %v1257_v51, 16  ;;  %v3874_v6 = vld [vmem:[#allocation2 + $0x60] sm:$0xe] }
  0xfe   : > { %v1569_v13 = vrot.slane %v1568_v15, 4  ;;  %v985_v8 = vor.u32 %v983_v9, %v982_v7  ;;  %v1578_v38 = vrot.slane %v1576_v62, 4  ;;  %v1581_v29 = vrot.slane %v1579_v30, 5 }
  0xff   : > { %v1587_v1 = vrot.slane %v1585_v20, 5  ;;  %v1591_v40 = vrot.slane %v1589_v36, 4  ;;  %v1597_v45 = vrot.slane %v1595_v23, 5  ;;  %v986_v2 = vrot.slane %v982_v7, 4  ;;  %v8190_v7 = vld [vmem:[#allocation2 + $0x5c] sm:$0x1] }
 0x100   : > { %v1574_v35 = vsel %vm8490_vm2, %v1569_v13, %v1573_v41  ;;  %v990_v10 = vrot.slane %v988_v16, 7  ;;  %v1582_v53 = vor.u32 %v1581_v29, %v1578_v38  ;;  %v1176_v18 = vsel %vm8539_vm10, %v985_v8, %v1175_v48  ;;  %v1182_v23 = vld [vmem:[#allocation2 + $0xb4] sm:$0xf]  ;;  %v3138_v48 = vld [vmem:[#allocation2 + $0x70] sm:$0xf] }
 0x101   : > { %v6479_v47 = vcombine.low %v1564_v17, %v1574_v35  ;;  %v1592_v33 = vor.u32 %v1591_v40, %v1587_v1  ;;  %1177 = vst [vmem:[#allocation2 + $0xa8] sm:$0xf] %v1176_v18  ;;  %v602_v59 = vmax.f32 %v570_v12, 0.0  ;;  %v6907_v21 = vpack.c.bf16 %v601_v25, %v601_v25  ;;  %v3875_v25 = vld [vmem:[#allocation2 + $0x6c] sm:$0xe] }
 0x102   : > { %v993_v58 = vor.u32 %v991_v14, %v990_v10  ;;  %v995_v56 = vrot.slane %v990_v10, 4  ;;  %v1583_v60 = vrot.slane %v1582_v53, 4  ;;  %v6657_v19 = vrot.slane %v3873_v37, 9  ;;  %v1186_v29 = vld [vmem:[#allocation2 + $0xbc] sm:$0x1] }
 0x103   : > { %7373 = vmatprep.mubr.bf16.mxu1 %v6479_v47  ;;  %v1593_v61 = vrot.slane %v1592_v33, 4  ;;  %v3975_v43 = vrot.slane %v8189_v0, 5  ;;  %v6908_v22 = vpack.c.bf16 %v602_v59, %v602_v59  ;;  %v997_v5 = vshrl.u32 %v6907_v21, 16  ;;  %v3139_v33 = vld [vmem:[#allocation2 + $0x74] sm:$0x1] }
 0x104   : > { %v994_v32 = vsel %vm8533_vm9, %v986_v2, %v993_v58  ;;  %v1180_v4 = vsel %vm8523_vm8, %v995_v56, %v1179_v42  ;;  %v1588_v52 = vsel %vm8490_vm2, %v1583_v60, %v1587_v1  ;;  %v1000_v41 = vshll.u32 %v6907_v21, 16 }
 0x105   : > { %v1598_v9 = vsel %vm8490_vm2, %v1593_v61, %v1597_v45  ;;  %1178 = vst [vmem:[#allocation2 + $0xac] sm:$0xf] %v994_v32  ;;  %1181 = vst [vmem:[#allocation2 + $0xb0] sm:$0x1] %v1180_v4  ;;  %v3978_v16 = vrot.slane %v8190_v7, 5  ;;  %v999_v50 = vrot.slane %v997_v5, 7  ;;  %v3976_v8 = vsel %vm8806_vm13, %v6657_v19, %v3975_v43 }
 0x106   : > { %v6480_v14 = vcombine.low %v1588_v52, %v1598_v9  ;;  %v1005_v15 = vshrl.u32 %v6908_v22, 16  ;;  %v1008_v12 = vshll.u32 %v6908_v22, 16  ;;  %v3977_v51 = vrot.slane %v3975_v43, 4  ;;  %v3876_v9 = vld [vmem:[#allocation2 + $0x78] sm:$0xe] }
 0x107   : > { %v6658_v62 = vrot.slane %v3874_v6, 9  ;;  %v3982_v30 = vrot.slane %v8903_v63, 5  ;;  %v3985_v20 = vrot.slane %v8905_v54, 5  ;;  %v1002_v36 = vor.u32 %v1000_v41, %v999_v50 }
 0x108   : > { %7374 = vmatmul.mubr.bf16.gmra.mrb[24].mxu1 %v6480_v14  ;;  %v1003_v17 = vrot.slane %v999_v50, 4  ;;  %v1007_v13 = vrot.slane %v1005_v15, 7  ;;  %v9099_v38 = vld [vmem:[#allocation2 + $0xa8] sm:$0xf]  ;;  %v3979_v1 = vsel %vm8806_vm13, %v3977_v51, %v3978_v16  ;;  %v6659_v54 = vrot.slane %v3875_v25, 9 }
 0x109   : > { %v3983_v63 = vsel %vm8806_vm13, %v6658_v62, %v3982_v30  ;;  %v3984_v40 = vrot.slane %v3982_v30, 4  ;;  %v1600_v37 = vshrl.u32 %v9099_v38, 16  ;;  %v1603_v35 = vshll.u32 %v9099_v38, 16  ;;  %v9123_v16 = vld [vmem:[#allocation2 + $0x7c] sm:$0xf] }
 0x10a   : > { %v1010_v45 = vor.u32 %v1008_v12, %v1007_v13  ;;  %v1012_v2 = vrot.slane %v1007_v13, 4  ;;  %v1183_v10 = vsel %vm8539_vm10, %v1002_v36, %v1182_v23  ;;  %v6689_v47 = vcombine.low %v3976_v8, %v3979_v1  ;;  %v9125_v14 = vld [vmem:[#allocation2 + $0x80] sm:$0x1]  ;;  %v3145_v13 = vld [vmem:[#allocation2 + $0x8c] sm:$0x1] }
 0x10b   : > { %v3986_v53 = vsel %vm8806_vm13, %v3984_v40, %v3985_v20  ;;  %v3989_v18 = vrot.slane %v3138_v48, 5  ;;  %v1602_v56 = vrot.slane %v1600_v37, 4  ;;  %v1605_v59 = vrot.slane %v1603_v35, 5  ;;  %1184 = vst [vmem:[#allocation2 + $0xb4] sm:$0xf] %v1183_v10 }
 0x10c   : > { %v9111_v42 = vld [vmem:[#allocation2 + $0xac] sm:$0xf]  ;;  %v1258_v58 = vld [vmem:[#allocation2 + $0xb0] sm:$0x1]  ;;  %v1011_v21 = vsel %vm8533_vm9, %v1003_v17, %v1010_v45  ;;  %v1187_v60 = vsel %vm8523_vm8, %v1012_v2, %v1186_v29  ;;  %7601 = vmatprep.mubr.bf16.mxu0 %v6689_v47  ;;  %v6690_v43 = vcombine.low %v3983_v63, %v3986_v53  ;;  %v3992_v5 = vrot.slane %v3139_v33, 5 }
 0x10d   : > { %v1609_v61 = vshll.u32 %v9111_v42, 16  ;;  %v1613_v19 = vshrl.u32 %v9111_v42, 16  ;;  %v1619_v0 = vshll.u32 %v1258_v58, 16  ;;  %1185 = vst [vmem:[#allocation2 + $0xb8] sm:$0xf] %v1011_v21  ;;  %v1606_v32 = vor.u32 %v1605_v59, %v1602_v56 }
 0x10e   : > { %1188 = vst [vmem:[#allocation2 + $0xbc] sm:$0x1] %v1187_v60  ;;  %v3990_v4 = vsel %vm8806_vm13, %v6659_v54, %v3989_v18  ;;  %v3991_v22 = vrot.slane %v3989_v18, 4  ;;  %7602 = vmatmul.mubr.bf16.gmra.mrb[12].mxu0 %v6690_v43  ;;  %v6660_v25 = vrot.slane %v3876_v9, 9  ;;  %v3996_v20 = vrot.slane %v9123_v16, 5 }
 0x10f   : > { %v1611_v6 = vrot.slane %v1609_v61, 5  ;;  %v1615_v52 = vrot.slane %v1613_v19, 4  ;;  %v1607_v41 = vrot.slane %v1606_v32, 4  ;;  %v1621_v15 = vrot.slane %v1619_v0, 5  ;;  %v3144_v17 = vld [vmem:[#allocation2 + $0x88] sm:$0xf] }
 0x110   : > { %v3993_v7 = vsel %vm8806_vm13, %v3991_v22, %v3992_v5  ;;  %v3999_v36 = vrot.slane %v9125_v14, 5  ;;  %v3877_v23 = vld [vmem:[#allocation2 + $0x84] sm:$0xe]  ;;  %v3878_v35 = vld [vmem:[#allocation2 + $0x90] sm:$0xe]  ;;  %v3997_v47 = vsel %vm8806_vm13, %v6660_v25, %v3996_v20  ;;  %v3998_v59 = vrot.slane %v3996_v20, 4 }
 0x111   : > { %v1616_v50 = vor.u32 %v1615_v52, %v1611_v6  ;;  %v6691_v12 = vcombine.low %v3990_v4, %v3993_v7  ;;  %v1612_v51 = vsel %vm8490_vm2, %v1607_v41, %v1611_v6  ;;  %v3147_v53 = vld [vmem:[#allocation2 + $0x94] sm:$0xf]  ;;  %v3148_v33 = vld [vmem:[#allocation2 + $0x98] sm:$0x1]  ;;  %v6661_v60 = vrot.slane %v3877_v23, 9 }
 0x112   : > { %v9129_v30 = vld [vmem:[#allocation2 + $0xb4] sm:$0xf]  ;;  %v4003_v61 = vrot.slane %v3144_v17, 5  ;;  %v4006_v19 = vrot.slane %v3145_v13, 5  ;;  %v4000_v43 = vsel %vm8806_vm13, %v3998_v59, %v3999_v36  ;;  %v6662_v32 = vrot.slane %v3878_v35, 9 }
 0x113   : > { %v1617_v62 = vrot.slane %v1616_v50, 4  ;;  %7605 = vmatprep.mubr.bf16.mxu0 %v6691_v12  ;;  %v1624_v29 = vshrl.u32 %v9129_v30, 16  ;;  %v1627_v1 = vshll.u32 %v9129_v30, 16  ;;  %v4010_v4 = vrot.slane %v3147_v53, 5  ;;  %v3150_v9 = vld [vmem:[#allocation2 + $0xa0] sm:$0xf] }
 0x114   : > { %v9133_v8 = vld [vmem:[#allocation2 + $0xb8] sm:$0xf]  ;;  %v6692_v5 = vcombine.low %v3997_v47, %v4000_v43  ;;  %v4004_v6 = vsel %vm8806_vm13, %v6661_v60, %v4003_v61  ;;  %v4005_v52 = vrot.slane %v4003_v61, 4  ;;  %v3879_v41 = vld [vmem:[#allocation2 + $0x9c] sm:$0xe]  ;;  %v7101_v53 = vld [vmem:[%s8467_s18 + $0x78] sm:$0xff]  }
 0x115   : > { %v1259_v48 = vld [vmem:[#allocation2 + $0xbc] sm:$0x1]  ;;  %v1622_v63 = vsel %vm8490_vm2, %v1617_v62, %v1621_v15  ;;  %v1633_v40 = vshll.u32 %v9133_v8, 16  ;;  %v1637_v54 = vshrl.u32 %v9133_v8, 16  ;;  %v1626_v2 = vrot.slane %v1624_v29, 4 }
 0x116   : > { %v1643_v37 = vshll.u32 %v1259_v48, 16  ;;  %v6481_v45 = vcombine.low %v1612_v51, %v1622_v63  ;;  %v1629_v10 = vrot.slane %v1627_v1, 5  ;;  %v4012_v50 = vrot.slane %v4010_v4, 4  ;;  %v3151_v12 = vld [vmem:[#allocation2 + $0xa4] sm:$0x1]  ;;  %7606 = vmatmul.mubr.bf16.gmra.mrb[16].mxu0 %v6692_v5 }
 0x117   : > { %v1635_v18 = vrot.slane %v1633_v40, 5  ;;  %v1639_v58 = vrot.slane %v1637_v54, 4  ;;  %v4013_v15 = vrot.slane %v3148_v33, 5  ;;  %v8191_v51 = vld [vmem:[#allocation2] sm:$0xf]  ;;  %v4007_v36 = vsel %vm8806_vm13, %v4005_v52, %v4006_v19 }
 0x118   : > { %v1645_v56 = vrot.slane %v1643_v37, 5  ;;  %7377 = vmatprep.mubr.bf16.mxu1 %v6481_v45  ;;  %v1630_v21 = vor.u32 %v1629_v10, %v1626_v2  ;;  %v9149_v62 = vld [vmem:[#allocation2 + $0x4] sm:$0xf]  ;;  %v4011_v17 = vsel %vm8806_vm13, %v6662_v32, %v4010_v4  ;;  %v3153_v13 = vld [vmem:[#allocation2 + $0xac] sm:$0xf]  ;;  %v6693_v48 = vcombine.low %v4004_v6, %v4007_v36 }
 0x119   : > { %v1640_v0 = vor.u32 %v1639_v58, %v1635_v18  ;;  %v6491_v20 = vcombine.low %v8191_v51, %v9149_v62  ;;  %v4014_v29 = vsel %vm8806_vm13, %v4012_v50, %v4013_v15  ;;  %v6663_v1 = vrot.slane %v3879_v41, 9  ;;  %v3154_v63 = vld [vmem:[#allocation2 + $0xb0] sm:$0x1]  ;;  %v3880_v40 = vld [vmem:[#allocation2 + $0xa8] sm:$0xe] }
 0x11a   : > { %v1631_v22 = vrot.slane %v1630_v21, 4  ;;  %v4017_v37 = vrot.slane %v3150_v9, 5  ;;  %v4020_v35 = vrot.slane %v3151_v12, 5  ;;  %v3156_v45 = vld [vmem:[#allocation2 + $0xb8] sm:$0xf]  ;;  %7609 = vmatprep.mubr.bf16.mxu0 %v6693_v48  ;;  %v4024_v10 = vrot.slane %v3153_v13, 5 }
 0x11b   : > { %v1641_v7 = vrot.slane %v1640_v0, 4  ;;  %v3881_v2 = vld [vmem:[#allocation2 + $0xb4] sm:$0xe]  ;;  %v3157_v47 = vld [vmem:[#allocation2 + $0xbc] sm:$0x1]  ;;  %v6694_v33 = vcombine.low %v4011_v17, %v4014_v29  ;;  %v4027_v21 = vrot.slane %v3154_v63, 5  ;;  %v7005_v43 = vunpack.c.l.bf16 %v7101_v53 }
 0x11c   : > { %v1636_v25 = vsel %vm8490_vm2, %v1631_v22, %v1635_v18  ;;  %v4018_v18 = vsel %vm8806_vm13, %v6663_v1, %v4017_v37  ;;  %v4019_v58 = vrot.slane %v4017_v37, 4  ;;  %v4026_v59 = vrot.slane %v4024_v10, 4  ;;  %v8193_v5 = vld [vmem:[#allocation2 + $0xc] sm:$0xf]  ;;  %v9165_v6 = vld [vmem:[#allocation2 + $0x10] sm:$0xf] }
 0x11d   : > { %v1646_v23 = vsel %vm8490_vm2, %v1641_v7, %v1645_v56  ;;  %v6664_v56 = vrot.slane %v3880_v40, 9  ;;  %v6665_v60 = vrot.slane %v3881_v2, 9  ;;  %v4031_v61 = vrot.slane %v3156_v45, 5  ;;  %v8195_v7 = vld [vmem:[#allocation2 + $0x18] sm:$0xf]  ;;  %v8104_v51 = vld [vmem:[%s10292_s1 + $0x88] sm:$0xff]  }
 0x11e   : > { %v6482_v54 = vcombine.low %v1636_v25, %v1646_v23  ;;  %v4021_v19 = vsel %vm8806_vm13, %v4019_v58, %v4020_v35  ;;  %v4034_v0 = vrot.slane %v3157_v47, 5  ;;  %v7006_v32 = vunpack.c.h.bf16 %v7101_v53  ;;  %7610 = vmatmul.mubr.bf16.gmra.mrb[20].mxu0 %v6694_v33  ;;  %v9170_v50 = vld [vmem:[#allocation2 + $0x1c] sm:$0xf]  ;;  %v8197_v29 = vld [vmem:[%s10292_s1 + $0x80] sm:$0xff]   ;;  %v8108_v63 = vld [vmem:[%s10292_s1 + $0x90] sm:$0xff]  }
 0x11f   : > { %v6695_v4 = vcombine.low %v4018_v18, %v4021_v19  ;;  %v4033_v22 = vrot.slane %v4031_v61, 4  ;;  %v6492_v52 = vcombine.low %v8193_v5, %v9165_v6  ;;  %v533_v9 = vmul.f32 %v9037_v26, %v7005_v43  ;;  %v8198_v37 = vld [vmem:[#allocation2 + $0x24] sm:$0xf]  ;;  %v8200_v53 = vld [vmem:[#allocation2 + $0x30] sm:$0xf]  ;;  %v8112_v58 = vld [vmem:[%s10292_s1 + $0x98] sm:$0xff]  }
 0x120   : > { %7378 = vmatmul.mubr.bf16.gmra.mrb[28].mxu1 %v6482_v54  ;;  %v534_v41 = vmul.f32 %v9037_v26, %v7006_v32  ;;  %v6493_v15 = vcombine.low %v8195_v7, %v9170_v50  ;;  %v4025_v12 = vsel %vm8806_vm13, %v6664_v56, %v4024_v10  ;;  %v4028_v25 = vsel %vm8806_vm13, %v4026_v59, %v4027_v21  ;;  %v9195_v33 = vld [vmem:[#allocation2 + $0x34] sm:$0xf]  ;;  %v1189_v21 = vld [vmem:[#allocation2 + $0xc0] sm:$0xf]  ;;  %v9213_v7 = vld [vmem:[#allocation2 + $0x4c] sm:$0xf] }
 0x121   : > { %7397 = vmatprep.mubr.bf16.mxu1 %v6491_v20  ;;  %7613 = vmatprep.mubr.bf16.mxu0 %v6695_v4  ;;  %v4032_v20 = vsel %vm8806_vm13, %v6665_v60, %v4031_v61  ;;  %v4035_v26 = vsel %vm8806_vm13, %v4033_v22, %v4034_v0  ;;  %v571_v36 = vadd.f32 %v9059_v46, %v533_v9  ;;  %v1193_v60 = vld [vmem:[#allocation2 + $0xc8] sm:$0x1]  ;;  %v8116_v5 = vld [vmem:[%s10292_s1 + $0xa0] sm:$0xff]  }
 0x122   : > { %v572_v17 = vadd.f32 %v9059_v46, %v534_v41  ;;  %v6696_v13 = vcombine.low %v4025_v12, %v4028_v25  ;;  %v6697_v1 = vcombine.low %v4032_v20, %v4035_v26  ;;  %v9192_v46 = vld [vmem:[#allocation2 + $0x28] sm:$0xf]  ;;  %v6495_v18 = vcombine.low %v8200_v53, %v9195_v33  ;;  %v9210_v9 = vld [vmem:[#allocation2 + $0x40] sm:$0xf] }
 0x123   : > { %v603_v23 = vmax.f32 %v571_v36, 0.0  ;;  %v6494_v35 = vcombine.low %v8198_v37, %v9192_v46  ;;  %v6497_v44 = vcombine.low %v8204_v39, %v9213_v7  ;;  %v2295_v37 = vrot.slane %v9149_v62, 5  ;;  %v8210_v53 = vld [vmem:[#allocation2 + $0x8] sm:$0x1] }
 0x124   : > { %v604_v48 = vmax.f32 %v572_v17, 0.0  ;;  %v8206_v17 = vld [vmem:[#allocation2 + $0x54] sm:$0xf]  ;;  %v2302_v62 = vrot.slane %v9165_v6, 5  ;;  %v2323_v39 = vrot.slane %v9195_v33, 5 }
 0x125   : > { %v6909_v40 = vpack.c.bf16 %v603_v23, %v603_v23 }
 0x126   : > { %v6910_v54 = vpack.c.bf16 %v604_v48, %v604_v48  ;;  %7614 = vmatmul.mubr.bf16.gmra.mrb[24].mxu0 %v6696_v13  ;;  %v9222_v13 = vld [vmem:[#allocation2 + $0x58] sm:$0xf] }
 0x127   : > { %v1014_v45 = vshrl.u32 %v6909_v40, 16  ;;  %v1017_v2 = vshll.u32 %v6909_v40, 16  ;;  %7617 = vmatprep.mubr.bf16.mxu0 %v6697_v1  ;;  %v6498_v23 = vcombine.low %v8206_v17, %v9222_v13  ;;  %v8208_v1 = vld [vmem:[#allocation2 + $0x60] sm:$0xf] }
 0x128   : > { %7398 = vmatmul.mubr.bf16.vlgmr.msra.gmra.mrb[0].mxu1 %v6492_v52  ;;  %v1022_v10 = vshrl.u32 %v6910_v54, 16  ;;  %v1025_v47 = vshll.u32 %v6910_v54, 16  ;;  %v8202_v52 = vld [vmem:[#allocation2 + $0x3c] sm:$0xf] }
 0x129   : > { %7430 = vmatpush3.bf16.msra.mxu1 %v8197_v29  ;;  %7401 = vmatprep.mubr.bf16.mxu1 %v6493_v15  ;;  %v1016_v56 = vrot.slane %v1014_v45, 7  ;;  %v6496_v41 = vcombine.low %v8202_v52, %v9210_v9  ;;  %v8128_v15 = vld [vmem:[%s10292_s1 + $0xb0] sm:$0xff]   ;;  %v8134_v54 = vld [vmem:[%s10292_s1 + $0xb8] sm:$0xff]   ;;  %v3391_v45 = vshrl.u32 %v9123_v16, 16 }
 0x12a   : > { %7431 = vmatprep.subr.bf16.mxu1 %v8104_v51  ;;  %v1024_v59 = vrot.slane %v1022_v10, 7  ;;  %v8117_v10 = vld [vmem:[#allocation2 + $0x18] sm:$0xff]   ;;  %v9254_v52 = vld [vmem:[#allocation2 + $0x70] sm:$0xf] }
 0x12b   : > { %v1019_v61 = vor.u32 %v1017_v2, %v1016_v56  ;;  %v1020_v19 = vrot.slane %v1016_v56, 4 }
 0x12c   : > { %v1027_v0 = vor.u32 %v1025_v47, %v1024_v59  ;;  %v1029_v43 = vrot.slane %v1024_v59, 4  ;;  %v2242_v47 = vld [vmem:[#allocation2] sm:$0xe] }
 0x12d   : > { %7432 = vmatpush3.bf16.msra.mxu1 %v8104_v51  ;;  %v1190_v4 = vsel %vm8539_vm10, %v1019_v61, %v1189_v21  ;;  %v2243_v21 = vld [vmem:[#allocation2 + $0xc] sm:$0xe]  ;;  %v2309_v61 = vrot.slane %v9170_v50, 5  ;;  %v2246_v50 = vld [vmem:[#allocation2 + $0x30] sm:$0xe] }
 0x12e   : > { %7433 = vmatprep.subr.bf16.mxu1 %v8108_v63  ;;  %v1028_v32 = vsel %vm8533_vm9, %v1020_v19, %v1027_v0  ;;  %v1194_v22 = vsel %vm8523_vm8, %v1029_v43, %v1193_v60  ;;  %1191 = vst [vmem:[#allocation2 + $0xc0] sm:$0xf] %v1190_v4  ;;  %v2244_v60 = vld [vmem:[#allocation2 + $0x18] sm:$0xe]  ;;  %v6515_v0 = vrot.slane %v2242_v47, 9  ;;  %v2297_v43 = vrot.slane %v2295_v37, 4 }
 0x12f   : > { %1192 = vst [vmem:[#allocation2 + $0xc4] sm:$0xf] %v1028_v32  ;;  %1195 = vst [vmem:[#allocation2 + $0xc8] sm:$0x1] %v1194_v22  ;;  %v2245_v32 = vld [vmem:[#allocation2 + $0x24] sm:$0xe] }
 0x130   : > { %7402 = vmatmul.mubr.bf16.gmra.mrb[4].mxu1 %v6494_v35  ;;  %v3387_v35 = vshll.u32 %v9123_v16, 16  ;;  %v9245_v16 = vld [vmem:[%s10292_s1 + $0xc0] sm:$0xff]   ;;  %v2316_v4 = vrot.slane %v9192_v46, 5  ;;  %v9252_v22 = vrot.slane %v3391_v45, 4  ;;  %v6516_v46 = vrot.slane %v2243_v21, 9 }
 0x131   : > { %7405 = vmatprep.mubr.bf16.mxu1 %v6495_v18  ;;  %7434 = vmatpush3.bf16.msra.mxu1 %v8108_v63  ;;  %v9227_v63 = vld [vmem:[#allocation2 + $0x64] sm:$0xf]  ;;  %v2298_v18 = vrot.slane %v8210_v53, 5  ;;  %v9263_v33 = vsel %vm8806_vm13, %v6515_v0, %v2295_v37  ;;  %v6519_v45 = vrot.slane %v2246_v50, 9  ;;  %v8218_v47 = vld [vmem:[#allocation2 + $0x38] sm:$0x1] }
 0x132   : > { %7435 = vmatprep.subr.bf16.mxu1 %v8112_v58  ;;  %v6499_v40 = vcombine.low %v8208_v1, %v9227_v63  ;;  %v9250_v6 = vrot.slane %v3387_v35, 5  ;;  %v2247_v1 = vld [vmem:[#allocation2 + $0x3c] sm:$0xe]  ;;  %v2318_v35 = vrot.slane %v2316_v4, 4  ;;  %v2326_v53 = vrot.slane %v8218_v47, 5  ;;  %v8124_v37 = vld [vmem:[%s10292_s1 + $0x1c8] sm:$0xff]  }
 0x133   : > { %v4752_v0 = vld [vmem:[#allocation2 + $0x18] sm:$0xf]  ;;  %v2330_v50 = vrot.slane %v9210_v9, 5  ;;  %v2337_v9 = vrot.slane %v9213_v7, 5  ;;  %v8220_v47 = vld [vmem:[#allocation2 + $0x50] sm:$0x1] }
 0x134   : > { %v8136_v7 = vld [vmem:[%s10292_s1 + $0x1d8] sm:$0xff]   ;;  %v4754_v19 = vld [vmem:[#allocation2 + $0x20] sm:$0x1]  ;;  %v2251_v21 = vld [vmem:[#allocation2 + $0x6c] sm:$0xe] }
 0x135   : > { %7436 = vmatpush3.bf16.msra.mxu1 %v8112_v58  ;;  %v3882_v51 = vld [vmem:[#allocation2 + $0xc0] sm:$0xe]  ;;  %v9238_v58 = vld [vmem:[#allocation2 + $0x14] sm:$0x1] }
 0x136   : > { %7437 = vmatprep.subr.bf16.mxu1 %v8116_v5  ;;  %v3159_v12 = vld [vmem:[#allocation2 + $0xc4] sm:$0xf]  ;;  %v3160_v25 = vld [vmem:[#allocation2 + $0xc8] sm:$0x1]  ;;  %v6666_v20 = vrot.slane %v3882_v51, 9  ;;  %v2305_v56 = vrot.slane %v9238_v58, 5  ;;  %v6504_v58 = vcombine.low %v9072_v31, %v9074_v27 }
 0x137   : > { %v4038_v26 = vrot.slane %v3159_v12, 5  ;;  %v4041_v36 = vrot.slane %v3160_v25, 5  ;;  %v2304_v25 = vrot.slane %v2302_v62, 4  ;;  %v6517_v51 = vrot.slane %v2244_v60, 9  ;;  %v4762_v31 = vld [vmem:[#allocation2 + $0x40] sm:$0xf] }
 0x138   : > { %7406 = vmatmul.mubr.bf16.gmra.mrb[8].mxu1 %v6496_v41  ;;  %v9289_v60 = vsel %vm8806_vm13, %v6516_v46, %v2302_v62  ;;  %v9309_v62 = vsel %vm8806_vm13, %v6519_v45, %v2323_v39  ;;  %v8125_v46 = vld [vmem:[#allocation2 + $0x3c] sm:$0xff]   ;;  %v2332_v45 = vrot.slane %v2330_v50, 4 }
 0x139   : > { %7409 = vmatprep.mubr.bf16.mxu1 %v6497_v44  ;;  %7438 = vmatpush3.bf16.msra.mxu1 %v8116_v5  ;;  %v4039_v48 = vsel %vm8806_vm13, %v6666_v20, %v4038_v26  ;;  %v4040_v29 = vrot.slane %v4038_v26, 4  ;;  %v8212_v5 = vld [vmem:[#allocation2 + $0x6c] sm:$0xf]  ;;  %v8119_v44 = vld [vmem:[#allocation2 + $0x24] sm:$0xff]   ;;  %v8123_v20 = vld [vmem:[#allocation2 + $0x30] sm:$0xff]   ;;  %v2311_v26 = vrot.slane %v2309_v61, 4 }
 0x13a   : > { %7439 = vmatprep.subr.bf16.mxu1 %v8122_v34  ;;  %v6500_v41 = vcombine.low %v8212_v5, %v9254_v52 }
 0x13b   : > { %v4042_v2 = vsel %vm8806_vm13, %v4040_v29, %v4041_v36  ;;  %v8216_v36 = vld [vmem:[#allocation2 + $0x20] sm:$0x1] }
 0x13c   : > { %v6698_v59 = vcombine.low %v4039_v48, %v4042_v2  ;;  %v2312_v17 = vrot.slane %v8216_v36, 5  ;;  %v8217_v48 = vld [vmem:[#allocation2 + $0x2c] sm:$0x1]  ;;  %v6502_v2 = vcombine.low %v8989_v11, %v8994_v28  ;;  %v6506_v11 = vcombine.low %v9129_v30, %v9133_v8  ;;  %v2248_v28 = vld [vmem:[#allocation2 + $0x48] sm:$0xe] }
 0x13d   : > { %7440 = vmatpush3.bf16.msra.mxu1 %v8122_v34  ;;  %v8214_v34 = vld [vmem:[#allocation2 + $0x78] sm:$0xf]  ;;  %v2319_v29 = vrot.slane %v8217_v48, 5  ;;  %v8129_v36 = vld [vmem:[#allocation2 + $0x48] sm:$0xff]  }
 0x13e   : > { %7441 = vmatprep.subr.bf16.mxu1 %v8128_v15  ;;  %7618 = vmatmul.mubr.bf16.gmra.mrb[28].mxu0 %v6698_v59  ;;  %v6505_v59 = vcombine.low %v9099_v38, %v9111_v42 }
 0x13f   : > { %7637 = vmatprep.mubr.bf16.mxu0 %v8117_v10  ;;  %v2325_v10 = vrot.slane %v2323_v39, 4  ;;  %v8130_v39 = vld [vmem:[%s10292_s1 + $0x1d0] sm:$0xff]  }
 0x140   : > { %7410 = vmatmul.mubr.bf16.gmra.mrb[12].mxu1 %v6498_v23  ;;  %v6518_v23 = vrot.slane %v2245_v32, 9  ;;  %v9301_v32 = vsel %vm8806_vm13, %v2311_v26, %v2312_v17 }
 0x141   : > { %7413 = vmatprep.mubr.bf16.mxu1 %v6499_v40  ;;  %7442 = vmatpush3.bf16.msra.mxu1 %v8128_v15  ;;  %v9258_v15 = vld [vmem:[#allocation2 + $0x7c] sm:$0xf]  ;;  %v9267_v40 = vsel %vm8806_vm13, %v2297_v43, %v2298_v18  ;;  %v6503_v18 = vcombine.low %v9052_v55, %v9065_v49  ;;  %v9293_v55 = vsel %vm8806_vm13, %v2304_v25, %v2305_v56  ;;  %v6520_v56 = vrot.slane %v2247_v1, 9 }
 0x142   : > { %7443 = vmatprep.subr.bf16.mxu1 %v8134_v54  ;;  %v6501_v12 = vcombine.low %v8214_v34, %v9258_v15  ;;  %v9297_v49 = vsel %vm8806_vm13, %v6517_v51, %v2309_v61  ;;  %v4753_v43 = vld [vmem:[#allocation2 + $0x1c] sm:$0xf]  ;;  %v9305_v5 = vsel %vm8806_vm13, %v6518_v23, %v2316_v4  ;;  %v9314_v61 = vsel %vm8806_vm13, %v2318_v35, %v2319_v29  ;;  %v2249_v29 = vld [vmem:[#allocation2 + $0x54] sm:$0xe]  ;;  %v4755_v35 = vld [vmem:[#allocation2 + $0x24] sm:$0xf] }
 0x143   : > { %v6521_v4 = vrot.slane %v2248_v28, 9  ;;  %v4804_v34 = vshll.u32 %v4752_v0, 16  ;;  %v9335_v48 = vsel %vm8806_vm13, %v6520_v56, %v2330_v50  ;;  %v2344_v1 = vrot.slane %v9222_v13, 5 }
 0x144   : > { %v2351_v28 = vrot.slane %v9227_v63, 5  ;;  %v6522_v50 = vrot.slane %v2249_v29, 9  ;;  %v4825_v23 = vshrl.u32 %v4755_v35, 16  ;;  %v10320_v30 = vcombine.low %v9263_v33, %v9267_v40  ;;  %v9447_v33 = vld [vmem:[%s10292_s1 + $0x200] sm:$0xff]  }
 0x145   : > { %7444 = vmatpush3.bf16.msra.mxu1 %v8134_v54  ;;  %v4806_v56 = vrot.slane %v4804_v34, 5  ;;  %v2339_v54 = vrot.slane %v2337_v9, 4  ;;  %v2346_v17 = vrot.slane %v2344_v1, 4  ;;  %v8222_v34 = vld [vmem:[#allocation2 + $0x68] sm:$0x1]  ;;  %10322 = vst [vmem:[#allocation5_spill] sm:$0xff] %v9447_v33 }
 0x146   : > { %7477 = vmatprep.subr.bf16.mxu1 %v9245_v16  ;;  %7638 = vmatmul.mubr.bf16.vlgmr.msra.gmra.mrb[0].mxu0 %v8119_v44  ;;  %v4801_v44 = vshrl.u32 %v4752_v0, 16  ;;  %v4756_v0 = vld [vmem:[#allocation2 + $0x28] sm:$0xf] }
 0x147   : > { %7670 = vmatpush3.bf16.msra.mxu0 %v9044_v57  ;;  %7641 = vmatprep.mubr.bf16.mxu0 %v8123_v20  ;;  %v4810_v57 = vshll.u32 %v4753_v43, 16  ;;  %v8219_v20 = vld [vmem:[#allocation2 + $0x44] sm:$0x1]  ;;  %v4834_v63 = vshll.u32 %v4756_v0, 16  ;;  %v4838_v25 = vshrl.u32 %v4756_v0, 16 }
 0x148   : > { %7414 = vmatmul.mubr.bf16.gmra.mrb[16].mxu1 %v6500_v41  ;;  %v9318_v41 = vsel %vm8806_vm13, %v2325_v10, %v2326_v53  ;;  %7671 = vmatprep.subr.bf16.mxu0 %v8124_v37  ;;  %v2333_v26 = vrot.slane %v8219_v20, 5  ;;  %v9343_v10 = vsel %vm8806_vm13, %v6521_v4, %v2337_v9  ;;  %v2340_v53 = vrot.slane %v8220_v47, 5  ;;  %v8221_v47 = vld [vmem:[#allocation2 + $0x5c] sm:$0x1] }
 0x149   : > { %7417 = vmatprep.mubr.bf16.mxu1 %v6501_v12  ;;  %v4814_v12 = vshrl.u32 %v4753_v43, 16  ;;  %v2250_v43 = vld [vmem:[#allocation2 + $0x60] sm:$0xe]  ;;  %v4803_v13 = vrot.slane %v4801_v44, 4  ;;  %v4828_v4 = vshll.u32 %v4755_v35, 16  ;;  %v2347_v51 = vrot.slane %v8221_v47, 5 }
 0x14a   : > { %v2353_v44 = vrot.slane %v2351_v28, 4  ;;  %v9359_v29 = vsel %vm8806_vm13, %v2339_v54, %v2340_v53  ;;  %v4827_v35 = vrot.slane %v4825_v23, 4  ;;  %v8135_v47 = vld [vmem:[#allocation2 + $0x60] sm:$0xff]   ;;  %v4840_v54 = vrot.slane %v4838_v25, 4 }
 0x14b   : > { %7672 = vmatpush3.bf16.msra.mxu0 %v8124_v37  ;;  %v9346_v37 = vrot.slane %v4810_v57, 5  ;;  %v4816_v20 = vrot.slane %v4814_v12, 4  ;;  %v2354_v57 = vrot.slane %v8222_v34, 5  ;;  %v8140_v12 = vld [vmem:[%s10292_s1 + $0x1e0] sm:$0xff]   ;;  %v4807_v9 = vor.u32 %v4806_v56, %v4803_v13  ;;  %v8223_v56 = vld [vmem:[#allocation2 + $0x74] sm:$0x1] }
 0x14c   : > { %7673 = vmatprep.subr.bf16.mxu0 %v8130_v39  ;;  %v4830_v0 = vrot.slane %v4828_v4, 5  ;;  %v9372_v13 = vrot.slane %v4834_v63, 5  ;;  %v4758_v4 = vld [vmem:[#allocation2 + $0x30] sm:$0xf]  ;;  %v2253_v34 = vld [vmem:[#allocation2 + $0x84] sm:$0xe] }
 0x14d   : > { %v9380_v23 = vsel %vm8806_vm13, %v2353_v44, %v2354_v57  ;;  %v4849_v57 = vshrl.u32 %v4758_v4, 16 }
 0x14e   : > { %7642 = vmatmul.mubr.bf16.gmra.mrb[4].mxu0 %v8125_v46  ;;  %v9354_v46 = vsel %vm8806_vm13, %v2332_v45, %v2333_v26  ;;  %v8144_v26 = vld [vmem:[%s10292_s1 + $0x1e8] sm:$0xff]   ;;  %v9370_v45 = vsel %vm8806_vm13, %v2346_v17, %v2347_v51  ;;  %v2252_v17 = vld [vmem:[#allocation2 + $0x78] sm:$0xe]  ;;  %v4831_v27 = vor.u32 %v4830_v0, %v4827_v35  ;;  %v4841_v38 = vor.u32 %v4840_v54, %v9372_v13  ;;  %v8224_v35 = vld [vmem:[#allocation2 + $0x80] sm:$0x1] }
 0x14f   : > { %7645 = vmatprep.mubr.bf16.mxu0 %v8129_v36  ;;  %7674 = vmatpush3.bf16.msra.mxu0 %v8130_v39  ;;  %v4817_v36 = vor.u32 %v4816_v20, %v9346_v37  ;;  %v4820_v39 = vshll.u32 %v4754_v19, 16  ;;  %v6524_v19 = vrot.slane %v2251_v21, 9  ;;  %v2361_v20 = vrot.slane %v8223_v56, 5  ;;  %v8225_v54 = vld [vmem:[#allocation2 + $0x88] sm:$0xf] }
 0x150   : > { %7418 = vmatmul.mubr.bf16.gmra.mrb[20].mxu1 %v6502_v2  ;;  %v6523_v2 = vrot.slane %v2250_v43, 9  ;;  %7675 = vmatprep.subr.bf16.mxu0 %v8136_v7  ;;  %v8131_v43 = vld [vmem:[#allocation2 + $0x54] sm:$0xff]   ;;  %v4808_v21 = vrot.slane %v4807_v9, 4  ;;  %v6525_v44 = vrot.slane %v2252_v17, 9  ;;  %v4852_v9 = vshll.u32 %v4758_v4, 16 }
 0x151   : > { %7421 = vmatprep.mubr.bf16.mxu1 %v6503_v18  ;;  %v2358_v18 = vrot.slane %v9254_v52, 5  ;;  %v9363_v52 = vsel %vm8806_vm13, %v6522_v50, %v2344_v1  ;;  %v4757_v50 = vld [vmem:[#allocation2 + $0x2c] sm:$0x1]  ;;  %v4818_v25 = vrot.slane %v4817_v36, 4  ;;  %v4822_v51 = vrot.slane %v4820_v39, 5 }
 0x152   : > { %v9376_v1 = vsel %vm8806_vm13, %v6523_v2, %v2351_v28  ;;  %v4844_v42 = vshll.u32 %v4757_v50, 16  ;;  %v4813_v36 = vsel %vm8490_vm2, %v4808_v21, %v9346_v37  ;;  %v2368_v0 = vrot.slane %v8224_v35, 5  ;;  %v8139_v50 = vld [vmem:[#allocation2 + $0x78] sm:$0xff]   ;;  %v2254_v4 = vld [vmem:[#allocation2 + $0x90] sm:$0xe] }
 0x153   : > { %7676 = vmatpush3.bf16.msra.mxu0 %v8136_v7  ;;  %v2360_v53 = vrot.slane %v2358_v18, 4  ;;  %v2365_v7 = vrot.slane %v9258_v15, 5  ;;  %v9399_v15 = vsel %vm8806_vm13, %v6524_v19, %v2358_v18  ;;  %v8148_v18 = vld [vmem:[%s10292_s1 + $0x1f0] sm:$0xff]   ;;  %v4832_v19 = vrot.slane %v4831_v27, 4  ;;  %v4760_v21 = vld [vmem:[#allocation2 + $0x38] sm:$0x1] }
 0x154   : > { %7677 = vmatprep.subr.bf16.mxu0 %v8140_v12  ;;  %v4842_v17 = vrot.slane %v4841_v38, 4  ;;  %v6526_v37 = vrot.slane %v2253_v34, 9  ;;  %v8152_v27 = vld [vmem:[%s10292_s1 + $0x1f8] sm:$0xff]  }
 0x155   : > { %v9404_v2 = vsel %vm8806_vm13, %v2360_v53, %v2361_v20  ;;  %v2367_v39 = vrot.slane %v2365_v7, 4  ;;  %v2372_v53 = vrot.slane %v8225_v54, 5  ;;  %v9426_v38 = vsel %vm8806_vm13, %v6525_v44, %v2365_v7  ;;  %v9440_v44 = vld [vmem:[#allocation2 + $0x4c] sm:$0xf] }
 0x156   : > { %7646 = vmatmul.mubr.bf16.gmra.mrb[8].mxu0 %v8131_v43  ;;  %v4761_v43 = vld [vmem:[#allocation2 + $0x3c] sm:$0xf]  ;;  %10321 = vst [vmem:[#allocation4_spill] sm:$0xff] %v9440_v44 }
 0x157   : > { %7649 = vmatprep.mubr.bf16.mxu0 %v8135_v47  ;;  %7678 = vmatpush3.bf16.msra.mxu0 %v8140_v12  ;;  %v4823_v12 = vsel %vm8490_vm2, %v4818_v25, %v4822_v51  ;;  %v8137_v47 = vld [vmem:[#allocation2 + $0x6c] sm:$0xff]   ;;  %v4851_v25 = vrot.slane %v4849_v57, 4  ;;  %v4854_v51 = vrot.slane %v4852_v9, 5  ;;  %v4873_v35 = vshrl.u32 %v4761_v43, 16  ;;  %v4764_v57 = vld [vmem:[#allocation2 + $0x48] sm:$0xf] }
 0x158   : > { %7422 = vmatmul.mubr.bf16.gmra.mrb[24].mxu1 %v6504_v58  ;;  %7679 = vmatprep.subr.bf16.mxu0 %v8144_v26  ;;  %v4846_v58 = vrot.slane %v4844_v42, 5  ;;  %v4876_v63 = vshll.u32 %v4761_v43, 16  ;;  %v8226_v42 = vld [vmem:[#allocation2 + $0x8c] sm:$0x1]  ;;  %v2374_v9 = vrot.slane %v2372_v53, 4  ;;  %v4886_v43 = vshrl.u32 %v4762_v31, 16 }
 0x159   : > { %7425 = vmatprep.mubr.bf16.mxu1 %v6505_v59  ;;  %v4759_v59 = vld [vmem:[#allocation2 + $0x34] sm:$0xf]  ;;  %v2375_v34 = vrot.slane %v8226_v42, 5  ;;  %v9451_v40 = vsel %vm8806_vm13, %v6526_v37, %v2372_v53 }
 0x15a   : > { %v4858_v56 = vshll.u32 %v4759_v59, 16  ;;  %v4862_v20 = vshrl.u32 %v4759_v59, 16  ;;  %v9422_v59 = vcombine.low %v4813_v36, %v4823_v12  ;;  %v4847_v12 = vsel %vm8490_vm2, %v4842_v17, %v4846_v58  ;;  %v8142_v17 = vld [vmem:[%s10292_s1 + $0xc8] sm:$0xff]  }
 0x15b   : > { %7680 = vmatpush3.bf16.msra.mxu0 %v8144_v26  ;;  %v9430_v26 = vsel %vm8806_vm13, %v2367_v39, %v2368_v0  ;;  %v4868_v39 = vshll.u32 %v4760_v21, 16  ;;  %v4882_v0 = vshll.u32 %v4762_v31, 16  ;;  %v4878_v54 = vrot.slane %v4876_v63, 5 }
 0x15c   : > { %7681 = vmatprep.subr.bf16.mxu0 %v8148_v18  ;;  %v9438_v36 = vrot.slane %v4858_v56, 5  ;;  %v4864_v7 = vrot.slane %v4862_v20, 4  ;;  %v4897_v58 = vshrl.u32 %v4764_v57, 16  ;;  %v4900_v56 = vshll.u32 %v4764_v57, 16  ;;  %v4767_v20 = vld [vmem:[#allocation2 + $0x54] sm:$0xf] }
 0x15d   : > { %v4906_v31 = vshll.u32 %v9440_v44, 16  ;;  %v9464_v63 = vsel %vm8806_vm13, %v2374_v9, %v2375_v34  ;;  %v9471_v57 = vld [vmem:[#allocation2 + $0x58] sm:$0xf]  ;;  %v4921_v53 = vshrl.u32 %v4767_v20, 16  ;;  %v4924_v28 = vshll.u32 %v4767_v20, 16 }
 0x15e   : > { %7650 = vmatmul.mubr.bf16.gmra.mrb[12].mxu0 %v8137_v47  ;;  %v4875_v47 = vrot.slane %v4873_v35, 4  ;;  %v4865_v37 = vor.u32 %v4864_v7, %v9438_v36  ;;  %v4888_v35 = vrot.slane %v4886_v43, 4  ;;  %10323 = vst [vmem:[#allocation6_spill] sm:$0xff] %v9471_v57  ;;  %v10324_v34 = vcombine.low %v9289_v60, %v9293_v55 }
 0x15f   : > { %7653 = vmatprep.mubr.bf16.mxu0 %v8139_v50  ;;  %7682 = vmatpush3.bf16.msra.mxu0 %v8148_v18  ;;  %v4910_v18 = vshrl.u32 %v9440_v44, 16  ;;  %v8141_v50 = vld [vmem:[#allocation2 + $0x84] sm:$0xff]   ;;  %v4899_v9 = vrot.slane %v4897_v58, 4  ;;  %v4902_v7 = vrot.slane %v4900_v56, 5  ;;  %v4930_v60 = vshll.u32 %v9471_v57, 16 }
 0x160   : > { %7426 = vmatmul.mubr.bf16.gmra.mrb[28].mxu1 %v6506_v11  ;;  %v4837_v11 = vsel %vm8490_vm2, %v4832_v19, %v9372_v13  ;;  %v4855_v13 = vor.u32 %v4854_v51, %v4851_v25  ;;  %v4763_v19 = vld [vmem:[#allocation2 + $0x44] sm:$0x1]  ;;  %7683 = vmatprep.subr.bf16.mxu0 %v8152_v27  ;;  %v9467_v25 = vrot.slane %v4868_v39, 5  ;;  %v9469_v51 = vrot.slane %v4882_v0, 5 }
 0x161   : > { %7445 = vmatprep.mubr.bf16.mxu1 %v10320_v30  ;;  %v9458_v21 = vcombine.low %v4837_v11, %v4847_v12  ;;  %v4892_v42 = vshll.u32 %v4763_v19, 16  ;;  %v8143_v30 = vld [vmem:[#allocation2 + $0x90] sm:$0xff]   ;;  %v4879_v12 = vor.u32 %v4878_v54, %v4875_v47  ;;  %v9477_v39 = vrot.slane %v4906_v31, 5 }
 0x162   : > { %v4856_v11 = vrot.slane %v4855_v13, 4  ;;  %v4912_v0 = vrot.slane %v4910_v18, 4  ;;  %v4866_v43 = vrot.slane %v4865_v37, 4  ;;  %v8227_v13 = vld [vmem:[#allocation2 + $0x94] sm:$0xf]  ;;  %v4934_v55 = vshrl.u32 %v9471_v57, 16 }
 0x163   : > { %7684 = vmatpush3.bf16.msra.mxu0 %v8152_v27  ;;  %v10325_v27 = vcombine.low %v9297_v49, %v9301_v32  ;;  %v2379_v19 = vrot.slane %v8227_v13, 5  ;;  %v9483_v47 = vld [vmem:[#allocation2 + $0x50] sm:$0x1]  ;;  %v9491_v58 = vrot.slane %v4892_v42, 5  ;;  %v6527_v49 = vrot.slane %v2254_v4, 9  ;;  %v8145_v4 = vld [vmem:[#allocation2 + $0x9c] sm:$0xff]  }
 0x164   : > { %7717 = vmatprep.subr.bf16.mxu0 %v9447_v33  ;;  %10326 = vst [vmem:[#allocation7_spill] sm:$0xff] %v9483_v47  ;;  %v8146_v54 = vld [vmem:[%s10292_s1 + $0xd0] sm:$0xff]   ;;  %v8228_v32 = vld [vmem:[#allocation2 + $0xa0] sm:$0xf]  ;;  %v4861_v31 = vsel %vm8490_vm2, %v4856_v11, %v9438_v36  ;;  %v8229_v18 = vld [vmem:[#allocation2 + $0x98] sm:$0x1]  ;;  %v4903_v13 = vor.u32 %v4902_v7, %v4899_v9  ;;  %v4871_v36 = vsel %vm8490_vm2, %v4866_v43, %v9467_v25 }
 0x165   : > { %v2386_v56 = vrot.slane %v8228_v32, 5  ;;  %v2382_v20 = vrot.slane %v8229_v18, 5  ;;  %v4923_v37 = vrot.slane %v4921_v53, 4  ;;  %v4916_v42 = vshll.u32 %v9483_v47, 16  ;;  %v8147_v18 = vld [vmem:[#allocation2 + $0xa8] sm:$0xff]  }
 0x166   : > { %7654 = vmatmul.mubr.bf16.gmra.mrb[16].mxu0 %v8141_v50  ;;  %v2255_v50 = vld [vmem:[#allocation2 + $0x9c] sm:$0xe]  ;;  %v2381_v11 = vrot.slane %v2379_v19, 4  ;;  %v9506_v53 = vrot.slane %v4930_v60, 5  ;;  %v9514_v47 = vsel %vm8806_vm13, %v6527_v49, %v2379_v19  ;;  %v8231_v43 = vld [vmem:[#allocation2 + $0xac] sm:$0xf]  ;;  %v10328_v57 = vcombine.low %v9309_v62, %v9318_v41 }
 0x167   : > { %7657 = vmatprep.mubr.bf16.mxu0 %v8143_v30  ;;  %v8150_v30 = vld [vmem:[%s10292_s1 + $0xd8] sm:$0xff]   ;;  %v6528_v9 = vrot.slane %v2255_v50, 9  ;;  %v2388_v7 = vrot.slane %v2386_v56, 4  ;;  %v2393_v60 = vrot.slane %v8231_v43, 5  ;;  %v4904_v50 = vrot.slane %v4903_v13, 4  ;;  %v8154_v62 = vld [vmem:[%s10292_s1 + $0xe0] sm:$0xff]  }
 0x168   : > { %7446 = vmatmul.mubr.bf16.vlgmr.msra.gmra.mrb[0].mxu1 %v10324_v34  ;;  %v4926_v34 = vrot.slane %v4924_v28, 5  ;;  %v4936_v28 = vrot.slane %v4934_v55, 4  ;;  %v10327_v55 = vcombine.low %v9305_v5, %v9314_v61  ;;  %v4918_v44 = vrot.slane %v4916_v42, 5  ;;  %v2256_v33 = vld [vmem:[#allocation2 + $0xa8] sm:$0xe] }
 0x169   : > { %7478 = vmatpush3.bf16.msra.mxu1 %v9245_v16  ;;  %7449 = vmatprep.mubr.bf16.mxu1 %v10325_v27  ;;  %v4889_v16 = vor.u32 %v4888_v35, %v9469_v51  ;;  %v9496_v27 = vrot.slane %v4879_v12, 4  ;;  %v4913_v35 = vor.u32 %v4912_v0, %v9477_v39  ;;  %v8230_v0 = vld [vmem:[#allocation2 + $0xa4] sm:$0x1]  ;;  %v9530_v5 = vsel %vm8806_vm13, %v2381_v11, %v2382_v20  ;;  %v8232_v13 = vld [vmem:[#allocation2 + $0xb0] sm:$0x1] }
 0x16a   : > { %7479 = vmatprep.subr.bf16.mxu1 %v8142_v17  ;;  %v2389_v32 = vrot.slane %v8230_v0, 5  ;;  %v4927_v25 = vor.u32 %v4926_v34, %v4923_v37  ;;  %v4937_v61 = vor.u32 %v4936_v28, %v9506_v53  ;;  %v10329_v37 = vshll.u32 %v9125_v14, 16  ;;  %v4770_v14 = vld [vmem:[#allocation2 + $0x60] sm:$0xf]  ;;  %v9554_v42 = vld [vmem:[#allocation2 + $0x64] sm:$0xf] }
 0x16b   : > { %v4890_v12 = vrot.slane %v4889_v16, 4  ;;  %v9519_v16 = vcombine.low %v4861_v31, %v4871_v36  ;;  %v4914_v0 = vrot.slane %v4913_v35, 4  ;;  %v4885_v19 = vsel %vm8490_vm2, %v9496_v27, %v9469_v51  ;;  %v2257_v31 = vld [vmem:[#allocation2 + $0xb4] sm:$0xe] }
 0x16c   : > { %v9536_v34 = vrot.slane %v10329_v37, 5  ;;  %v9546_v51 = vsel %vm8806_vm13, %v6528_v9, %v2386_v56  ;;  %v6529_v20 = vrot.slane %v2256_v33, 9  ;;  %v2395_v27 = vrot.slane %v2393_v60, 4  ;;  %v8149_v9 = vld [vmem:[#allocation2 + $0xb4] sm:$0xff]  }
 0x16d   : > { %7480 = vmatpush3.bf16.msra.mxu1 %v8142_v17  ;;  %v9508_v17 = vld [vmem:[#allocation2 + $0x5c] sm:$0x1]  ;;  %v4895_v41 = vsel %vm8490_vm2, %v4890_v12, %v9491_v58  ;;  %10331 = vst [vmem:[#allocation9_spill] sm:$0xff] %v9546_v51  ;;  %v2396_v35 = vrot.slane %v8232_v13, 5  ;;  %v4909_v58 = vsel %vm8490_vm2, %v4904_v50, %v9477_v39  ;;  %v4919_v56 = vsel %vm8490_vm2, %v4914_v0, %v4918_v44  ;;  %v4773_v0 = vld [vmem:[#allocation2 + $0x6c] sm:$0xf] }
 0x16e   : > { %7481 = vmatprep.subr.bf16.mxu1 %v8146_v54  ;;  %v4940_v49 = vshll.u32 %v9508_v17, 16  ;;  %10330 = vst [vmem:[#allocation8_spill] sm:$0xff] %v9536_v34  ;;  %7658 = vmatmul.mubr.bf16.gmra.mrb[20].mxu0 %v8145_v4  ;;  %v6530_v4 = vrot.slane %v2257_v31, 9  ;;  %v2400_v36 = vrot.slane %v9133_v8, 5  ;;  %v9562_v11 = vrot.slane %v4937_v61, 4 }
 0x16f   : > { %7661 = vmatprep.mubr.bf16.mxu0 %v8147_v18  ;;  %v4945_v33 = vshrl.u32 %v4770_v14, 16  ;;  %v4948_v12 = vshll.u32 %v4770_v14, 16  ;;  %v9569_v39 = vcombine.low %v4885_v19, %v4895_v41  ;;  %v4954_v8 = vshll.u32 %v9554_v42, 16  ;;  %v8151_v18 = vld [vmem:[#allocation2 + $0xc0] sm:$0xff]   ;;  %v9589_v19 = vld [vmem:[#allocation2 + $0x70] sm:$0xf] }
 0x170   : > { %7450 = vmatmul.mubr.bf16.gmra.mrb[4].mxu1 %v10327_v55  ;;  %v9564_v28 = vrot.slane %v4940_v49, 5  ;;  %v9579_v43 = vcombine.low %v4909_v58, %v4919_v56  ;;  %v9587_v50 = vsel %vm8806_vm13, %v6529_v20, %v2393_v60  ;;  %10334 = vst [vmem:[#allocation12_spill] sm:$0xff] %v9589_v19  ;;  %v10335_v61 = vcombine.low %v9335_v48, %v9354_v46  ;;  %v8233_v41 = vld [vmem:[#allocation2 + $0xbc] sm:$0x1]  ;;  %v4776_v60 = vld [vmem:[#allocation2 + $0x78] sm:$0xf] }
 0x171   : > { %7453 = vmatprep.mubr.bf16.mxu1 %v10328_v57  ;;  %7482 = vmatpush3.bf16.msra.mxu1 %v8146_v54  ;;  %v9550_v57 = vsel %vm8806_vm13, %v2388_v7, %v2389_v32  ;;  %v9552_v54 = vrot.slane %v4927_v25, 4  ;;  %v8156_v7 = vld [vmem:[%s10292_s1 + $0xe8] sm:$0xff]   ;;  %v9596_v49 = vsel %vm8806_vm13, %v2395_v27, %v2396_v35  ;;  %v9600_v31 = vsel %vm8806_vm13, %v6530_v4, %v2400_v36  ;;  %v9602_v20 = vld [vmem:[#allocation2 + $0x7c] sm:$0xf]  ;;  %v8158_v48 = vld [vmem:[%s10292_s1 + $0xf0] sm:$0xff]  }
 0x172   : > { %7483 = vmatprep.subr.bf16.mxu1 %v8150_v30  ;;  %10332 = vst [vmem:[#allocation10_spill] sm:$0xff] %v9550_v57  ;;  %v9573_v32 = vld [vmem:[#allocation2 + $0x68] sm:$0x1]  ;;  %v2402_v37 = vrot.slane %v2400_v36, 4  ;;  %v2403_v14 = vrot.slane %v8233_v41, 5  ;;  %10336 = vst [vmem:[#allocation13_spill] sm:$0xff] %v9602_v20  ;;  %v10337_v13 = vcombine.low %v9343_v10, %v9359_v29 }
 0x173   : > { %10333 = vst [vmem:[#allocation11_spill] sm:$0xff] %v9573_v32  ;;  %v4947_v27 = vrot.slane %v4945_v33, 4  ;;  %v4950_v35 = vrot.slane %v4948_v12, 5  ;;  %v4964_v58 = vshll.u32 %v9573_v32, 16  ;;  %v4779_v56 = vld [vmem:[#allocation2 + $0x84] sm:$0xf] }
 0x174   : > { %v9615_v4 = vrot.slane %v4954_v8, 5  ;;  %v4969_v29 = vshrl.u32 %v4773_v0, 16  ;;  %v9617_v36 = vld [vmem:[#allocation2 + $0x88] sm:$0xf]  ;;  %v4978_v41 = vshll.u32 %v9589_v19, 16  ;;  %v4982_v33 = vshrl.u32 %v9589_v19, 16 }
 0x175   : > { %7484 = vmatpush3.bf16.msra.mxu1 %v8150_v30  ;;  %v4958_v30 = vshrl.u32 %v9554_v42, 16  ;;  %10338 = vst [vmem:[#allocation14_spill] sm:$0xff] %v9617_v36  ;;  %v4993_v12 = vshrl.u32 %v4776_v60, 16  ;;  %v5002_v25 = vshll.u32 %v9602_v20, 16  ;;  %v5017_v8 = vshrl.u32 %v4779_v56, 16 }
 0x176   : > { %7485 = vmatprep.subr.bf16.mxu1 %v8154_v62  ;;  %7662 = vmatmul.mubr.bf16.gmra.mrb[24].mxu0 %v8149_v9  ;;  %v5006_v9 = vshrl.u32 %v9602_v20, 16  ;;  %v5020_v44 = vshll.u32 %v4779_v56, 16  ;;  %v5026_v55 = vshll.u32 %v9617_v36, 16  ;;  %v5030_v46 = vshrl.u32 %v9617_v36, 16  ;;  %v4782_v19 = vld [vmem:[#allocation2 + $0x90] sm:$0xf] }
 0x177   : > { %v4960_v10 = vrot.slane %v4958_v30, 4  ;;  %7665 = vmatprep.mubr.bf16.mxu0 %v8151_v18  ;;  %v8153_v30 = vld [vmem:[#allocation2 + $0xcc] sm:$0xff]   ;;  %v4951_v18 = vor.u32 %v4950_v35, %v4947_v27  ;;  %v4971_v34 = vrot.slane %v4969_v29, 4  ;;  %v9636_v32 = vrot.slane %v4978_v41, 5  ;;  %v9638_v35 = vld [vmem:[#allocation2 + $0x94] sm:$0xf] }
 0x178   : > { %7454 = vmatmul.mubr.bf16.gmra.mrb[8].mxu1 %v10335_v61  ;;  %v9619_v61 = vld [vmem:[#allocation2 + $0x74] sm:$0x1]  ;;  %10340 = vst [vmem:[#allocation16_spill] sm:$0xff] %v9638_v35  ;;  %v10341_v36 = vcombine.low %v9363_v52, %v9370_v45  ;;  %v9643_v57 = vld [vmem:[#allocation2 + $0x80] sm:$0x1]  ;;  %v9645_v51 = vrot.slane %v5002_v25, 5  ;;  %v10342_v41 = vcombine.low %v9376_v1, %v9380_v23 }
 0x179   : > { %7457 = vmatprep.mubr.bf16.mxu1 %v10337_v13  ;;  %7486 = vmatpush3.bf16.msra.mxu1 %v8154_v62  ;;  %v4972_v62 = vshll.u32 %v4773_v0, 16  ;;  %10339 = vst [vmem:[#allocation15_spill] sm:$0xff] %v9619_v61  ;;  %v4996_v13 = vshll.u32 %v4776_v60, 16  ;;  %v9627_v0 = vsel %vm8806_vm13, %v2402_v37, %v2403_v14  ;;  %v8160_v60 = vld [vmem:[%s10292_s1 + $0xf8] sm:$0xff]   ;;  %v4961_v20 = vor.u32 %v4960_v10, %v9615_v4 }
 0x17a   : > { %7487 = vmatprep.subr.bf16.mxu1 %v8156_v7  ;;  %v4984_v37 = vrot.slane %v4982_v33, 4  ;;  %v4995_v14 = vrot.slane %v4993_v12, 4  ;;  %v5008_v10 = vrot.slane %v5006_v9, 4  ;;  %v5019_v29 = vrot.slane %v5017_v8, 4  ;;  %v9650_v33 = vld [vmem:[#allocation2 + $0x8c] sm:$0x1] }
 0x17b   : > { %v4974_v56 = vrot.slane %v4972_v62, 5  ;;  %v4998_v27 = vrot.slane %v4996_v13, 5  ;;  %v5022_v62 = vrot.slane %v5020_v44, 5  ;;  %v9652_v12 = vrot.slane %v5026_v55, 5 }
 0x17c   : > { %v5032_v13 = vrot.slane %v5030_v46, 4  ;;  %v5044_v52 = vshll.u32 %v4782_v19, 16  ;;  %v9654_v45 = vrot.slane %v4951_v18, 4  ;;  %v9656_v25 = vrot.slane %v4964_v58, 5  ;;  %v4785_v46 = vld [vmem:[#allocation2 + $0x9c] sm:$0xf] }
 0x17d   : > { %7488 = vmatpush3.bf16.msra.mxu1 %v8156_v7  ;;  %v4988_v7 = vshll.u32 %v9619_v61, 16  ;;  %v5041_v61 = vshrl.u32 %v4782_v19, 16  ;;  %v5050_v44 = vshll.u32 %v9638_v35, 16  ;;  %v4975_v1 = vor.u32 %v4974_v56, %v4971_v34  ;;  %v9670_v56 = vld [vmem:[#allocation2 + $0xa0] sm:$0xf] }
 0x17e   : > { %7489 = vmatprep.subr.bf16.mxu1 %v8158_v48  ;;  %7666 = vmatmul.mubr.bf16.gmra.mrb[28].mxu0 %v8153_v30  ;;  %v4985_v23 = vor.u32 %v4984_v37, %v9636_v32  ;;  %v4999_v55 = vor.u32 %v4998_v27, %v4995_v14  ;;  %v9663_v19 = vrot.slane %v4961_v20, 4  ;;  %v5009_v58 = vor.u32 %v5008_v10, %v9645_v51  ;;  %v9675_v37 = vld [vmem:[%s10292_s1 + $0x100] sm:$0xff]   ;;  %v9678_v20 = vld [vmem:[#allocation2 + $0x98] sm:$0x1] }
 0x17f   : > { %7685 = vmatprep.mubr.bf16.mxu0 %v9422_v59  ;;  %v9665_v9 = vrot.slane %v4988_v7, 5  ;;  %v5036_v8 = vshll.u32 %v9650_v33, 16  ;;  %v5023_v30 = vor.u32 %v5022_v62, %v5019_v29  ;;  %v5033_v18 = vor.u32 %v5032_v13, %v9652_v12  ;;  %v8157_v13 = vld [vmem:[%s10292_s1 + $0x208] sm:$0xff]  }
 0x180   : > { %7458 = vmatmul.mubr.bf16.gmra.mrb[12].mxu1 %v10341_v36  ;;  %v5054_v36 = vshrl.u32 %v9638_v35, 16  ;;  %v5043_v59 = vrot.slane %v5041_v61, 4  ;;  %v5046_v34 = vrot.slane %v5044_v52, 5  ;;  %v9680_v7 = vrot.slane %v5050_v44, 5 }
 0x181   : > { %7461 = vmatprep.mubr.bf16.mxu1 %v10342_v41  ;;  %7490 = vmatpush3.bf16.msra.mxu1 %v8158_v48  ;;  %v5012_v48 = vshll.u32 %v9643_v57, 16  ;;  %v5068_v27 = vshll.u32 %v4785_v46, 16  ;;  %v4976_v10 = vrot.slane %v4975_v1, 4  ;;  %v4986_v29 = vrot.slane %v4985_v23, 4 }
 0x182   : > { %7491 = vmatprep.subr.bf16.mxu1 %v8160_v60  ;;  %v5056_v14 = vrot.slane %v5054_v36, 4  ;;  %v5000_v61 = vrot.slane %v4999_v55, 4  ;;  %v10343_v41 = vcombine.low %v9399_v15, %v9404_v2  ;;  %v5010_v52 = vrot.slane %v5009_v58, 4 }
 0x183   : > { %v5014_v62 = vrot.slane %v5012_v48, 5  ;;  %v5038_v35 = vrot.slane %v5036_v8, 5  ;;  %v5074_v44 = vshll.u32 %v9670_v56, 16  ;;  %v5078_v36 = vshrl.u32 %v9670_v56, 16 }
 0x184   : > { %v10344_v1 = vcombine.low %v9426_v38, %v9430_v26  ;;  %v5024_v23 = vrot.slane %v5023_v30, 4  ;;  %v5034_v55 = vrot.slane %v5033_v18, 4  ;;  %v5047_v48 = vor.u32 %v5046_v34, %v5043_v59  ;;  %v10346_v30 = vld [vmem:[#allocation5_spill] sm:$0xff]  ;;  %v4788_v18 = vld [vmem:[#allocation2 + $0xa8] sm:$0xf] }
 0x185   : > { %7492 = vmatpush3.bf16.msra.mxu1 %v8160_v60  ;;  %v5065_v60 = vshrl.u32 %v4785_v46, 16  ;;  %v5060_v15 = vshll.u32 %v9678_v20, 16  ;;  %v4957_v2 = vsel %vm8490_vm2, %v9654_v45, %v9615_v4  ;;  %v5057_v46 = vor.u32 %v5056_v14, %v9680_v7  ;;  %v9729_v34 = vld [vmem:[#allocation2 + $0xac] sm:$0xf] }
 0x186   : > { %7765 = vmatprep.subr.bf16.mxu1 %v9675_v37  ;;  %7686 = vmatmul.mubr.bf16.vlgmr.msra.gmra.mrb[0].mxu0 %v9458_v21  ;;  %v5070_v8 = vrot.slane %v5068_v27, 5  ;;  %v10345_v38 = vor.u32 %v9252_v22, %v9250_v6  ;;  %v4967_v21 = vsel %vm8490_vm2, %v9663_v19, %v9656_v25  ;;  %v4981_v4 = vsel %vm8490_vm2, %v4976_v10, %v9636_v32  ;;  %v9717_v22 = vld [vmem:[#allocation2 + $0xa4] sm:$0x1] }
 0x187   : > { %v5067_v58 = vrot.slane %v5065_v60, 4  ;;  %7718 = vmatpush3.bf16.msra.mxu0 %v10346_v30  ;;  %7689 = vmatprep.mubr.bf16.mxu0 %v9519_v16  ;;  %v4991_v45 = vsel %vm8490_vm2, %v4986_v29, %v9665_v9  ;;  %v8159_v16 = vld [vmem:[%s10292_s1 + $0x210] sm:$0xff]   ;;  %v5005_v25 = vsel %vm8490_vm2, %v5000_v61, %v9645_v51  ;;  %v5015_v19 = vsel %vm8490_vm2, %v5010_v52, %v5014_v62 }
 0x188   : > { %7462 = vmatmul.mubr.bf16.gmra.mrb[16].mxu1 %v10343_v41  ;;  %v9703_v26 = vrot.slane %v10345_v38, 4  ;;  %7719 = vmatprep.subr.bf16.mxu0 %v8157_v13  ;;  %v9727_v32 = vrot.slane %v5074_v44, 5  ;;  %v5080_v59 = vrot.slane %v5078_v36, 4  ;;  %v5029_v9 = vsel %vm8490_vm2, %v5024_v23, %v9652_v12  ;;  %v10351_v38 = vld [vmem:[#allocation4_spill] sm:$0xff] }
 0x189   : > { %7465 = vmatprep.mubr.bf16.mxu1 %v10344_v1  ;;  %v5039_v14 = vsel %vm8490_vm2, %v5034_v55, %v5038_v35  ;;  %v9736_v60 = vrot.slane %v5047_v48, 4  ;;  %v9738_v27 = vrot.slane %v5060_v15, 5  ;;  %v9740_v51 = vrot.slane %v5057_v46, 4  ;;  %v9783_v55 = vld [vmem:[#allocation2 + $0xb0] sm:$0x1] }
 0x18a   : > { %v5071_v10 = vor.u32 %v5070_v8, %v5067_v58  ;;  %v5084_v29 = vshll.u32 %v9717_v22, 16  ;;  %v5089_v61 = vshrl.u32 %v4788_v18, 16  ;;  %v10347_v62 = vsel %vm8490_vm2, %v9562_v11, %v9564_v28  ;;  %v9785_v48 = vld [vmem:[#allocation2 + $0xb4] sm:$0xf] }
 0x18b   : > { %7720 = vmatpush3.bf16.msra.mxu0 %v8157_v13  ;;  %v10348_v35 = vsel %vm8490_vm2, %v9552_v54, %v9506_v53  ;;  %v6561_v41 = vcombine.low %v9587_v50, %v9596_v49  ;;  %v5092_v52 = vshll.u32 %v4788_v18, 16  ;;  %v5098_v44 = vshll.u32 %v9729_v34, 16  ;;  %v8161_v53 = vld [vmem:[%s10292_s1 + $0x218] sm:$0xff]   ;;  %v5510_v49 = vld [vmem:[#allocation2 + $0x48] sm:$0xe] }
 0x18c   : > { %v9753_v12 = vcombine.low %v10348_v35, %v10347_v62  ;;  %v10349_v13 = vcombine.low %v9451_v40, %v9464_v63  ;;  %7721 = vmatprep.subr.bf16.mxu0 %v8159_v16  ;;  %v6562_v11 = vcombine.low %v9600_v31, %v9627_v0  ;;  %v9763_v28 = vcombine.low %v4957_v2, %v4967_v21  ;;  %v5511_v46 = vld [vmem:[#allocation2 + $0x54] sm:$0xe]  ;;  %v5512_v21 = vld [vmem:[#allocation2 + $0x60] sm:$0xe] }
 0x18d   : > { %v5081_v54 = vor.u32 %v5080_v59, %v9727_v32  ;;  %v5102_v50 = vshrl.u32 %v9729_v34, 16  ;;  %v10350_v36 = vcombine.low %v9514_v47, %v9530_v5  ;;  %v9773_v40 = vcombine.low %v4981_v4, %v4991_v45  ;;  %v8164_v4 = vld [vmem:[%s10292_s1 + $0x220] sm:$0xff]  }
 0x18e   : > { %v9775_v63 = vcombine.low %v5005_v25, %v5015_v19  ;;  %v9777_v1 = vcombine.low %v5029_v9, %v5039_v14  ;;  %v5053_v23 = vsel %vm8490_vm2, %v9736_v60, %v9680_v7  ;;  %7690 = vmatmul.mubr.bf16.gmra.mrb[4].mxu0 %v9569_v39  ;;  %v5063_v47 = vsel %vm8490_vm2, %v9740_v51, %v9738_v27  ;;  %v10353_v14 = vld [vmem:[#allocation6_spill] sm:$0xff]  ;;  %v5516_v27 = vld [vmem:[#allocation2 + $0x90] sm:$0xe] }
 0x18f   : > { %v9792_v5 = vrot.slane %v5071_v10, 4  ;;  %v9794_v15 = vrot.slane %v5084_v29, 5  ;;  %v9796_v2 = vrot.slane %v5089_v61, 4  ;;  %7693 = vmatprep.mubr.bf16.mxu0 %v9579_v43  ;;  %7722 = vmatpush3.bf16.msra.mxu0 %v8159_v16  ;;  %v9799_v58 = vrot.slane %v5092_v52, 5  ;;  %v10352_v43 = vld [vmem:[#allocation7_spill] sm:$0xff] }
 0x190   : > { %7466 = vmatmul.mubr.bf16.gmra.mrb[20].mxu1 %v10349_v13  ;;  %v9801_v8 = vrot.slane %v5098_v44, 5  ;;  %v6791_v39 = vrot.slane %v5510_v49, 9  ;;  %v5600_v30 = vrot.slane %v10351_v38, 5  ;;  %7723 = vmatprep.subr.bf16.mxu0 %v8161_v53  ;;  %v9807_v45 = vrot.slane %v5081_v54, 4  ;;  %v5513_v52 = vld [vmem:[#allocation2 + $0x6c] sm:$0xe] }
 0x191   : > { %7469 = vmatprep.mubr.bf16.mxu1 %v10350_v36  ;;  %v5104_v18 = vrot.slane %v5102_v50, 4  ;;  %v5108_v25 = vshll.u32 %v9783_v55, 16  ;;  %v5603_v16 = vrot.slane %v10352_v43, 5  ;;  %v6792_v9 = vrot.slane %v5511_v46, 9  ;;  %v10354_v49 = vld [vmem:[#allocation9_spill] sm:$0xff]  ;;  %v10355_v36 = vld [vmem:[#allocation10_spill] sm:$0xff] }
 0x192   : > { %v9813_v19 = vsel %vm8806_vm13, %v6791_v39, %v5600_v30  ;;  %v5602_v59 = vrot.slane %v5600_v30, 4  ;;  %v5607_v10 = vrot.slane %v10353_v14, 5  ;;  %v5113_v29 = vshrl.u32 %v9785_v48, 16  ;;  %v10357_v39 = vld [vmem:[#allocation11_spill] sm:$0xff]  ;;  %v9841_v30 = vld [vmem:[#allocation2 + $0xb8] sm:$0xf] }
 0x193   : > { %v5610_v61 = vrot.slane %v9508_v17, 5  ;;  %v6793_v62 = vrot.slane %v5512_v21, 9  ;;  %v5614_v35 = vrot.slane %v9554_v42, 5  ;;  %7724 = vmatpush3.bf16.msra.mxu0 %v8161_v53  ;;  %v5116_v44 = vshll.u32 %v9785_v48, 16  ;;  %v8167_v17 = vld [vmem:[%s10292_s1 + $0x228] sm:$0xff]  }
 0x194   : > { %v9822_v13 = vsel %vm8806_vm13, %v5602_v59, %v5603_v16  ;;  %v9826_v54 = vsel %vm8806_vm13, %v6792_v9, %v5607_v10  ;;  %v5609_v50 = vrot.slane %v5607_v10, 4  ;;  %v10356_v46 = vcombine.low %v10354_v49, %v10355_v36  ;;  %7725 = vmatprep.subr.bf16.mxu0 %v8164_v4  ;;  %v10358_v16 = vld [vmem:[#allocation12_spill] sm:$0xff]  ;;  %v10359_v9 = vld [vmem:[#allocation15_spill] sm:$0xff] }
 0x195   : > { %v9838_v53 = vsel %vm8806_vm13, %v6793_v62, %v5614_v35  ;;  %v5616_v48 = vrot.slane %v5614_v35, 4  ;;  %v5617_v38 = vrot.slane %v10357_v39, 5  ;;  %v6794_v43 = vrot.slane %v5513_v52, 9  ;;  %v8170_v52 = vld [vmem:[%s10292_s1 + $0x230] sm:$0xff]   ;;  %v5514_v36 = vld [vmem:[#allocation2 + $0x78] sm:$0xe] }
 0x196   : > { %v9845_v21 = vsel %vm8806_vm13, %v5609_v50, %v5610_v61  ;;  %v5621_v59 = vrot.slane %v10358_v16, 5  ;;  %v5624_v14 = vrot.slane %v10359_v9, 5  ;;  %7694 = vmatmul.mubr.bf16.gmra.mrb[8].mxu0 %v9753_v12  ;;  %v5095_v10 = vor.u32 %v9799_v58, %v9796_v2  ;;  %v3140_v61 = vld [vmem:[#allocation2 + $0x78] sm:$0xf]  ;;  %v4794_v39 = vld [vmem:[#allocation2 + $0xc0] sm:$0xf] }
 0x197   : > { %v5105_v62 = vor.u32 %v5104_v18, %v9801_v8  ;;  %v9857_v35 = vsel %vm8806_vm13, %v5616_v48, %v5617_v38  ;;  %7697 = vmatprep.mubr.bf16.mxu0 %v9763_v28  ;;  %7726 = vmatpush3.bf16.msra.mxu0 %v8164_v4  ;;  %v9874_v4 = vrot.slane %v5108_v25, 5  ;;  %v9879_v50 = vrot.slane %v5113_v29, 4  ;;  %v5515_v2 = vld [vmem:[#allocation2 + $0x84] sm:$0xe]  ;;  %v10360_v12 = vld [vmem:[#allocation8_spill] sm:$0xff] }
 0x198   : > { %7470 = vmatmul.mubr.bf16.gmra.mrb[24].mxu1 %v10356_v46  ;;  %v9868_v58 = vsel %vm8806_vm13, %v6794_v43, %v5621_v59  ;;  %v5623_v18 = vrot.slane %v5621_v59, 4  ;;  %7727 = vmatprep.subr.bf16.mxu0 %v8167_v17  ;;  %v5122_v49 = vshll.u32 %v9841_v30, 16  ;;  %v8162_v46 = vld [vmem:[#allocation2 + $0xc] sm:$0xff]   ;;  %v9882_v48 = vrot.slane %v5116_v44, 5  ;;  %v9895_v44 = vld [vmem:[#allocation2 + $0xc4] sm:$0xf] }
 0x199   : > { %7473 = vmatprep.mubr.bf16.mxu1 %v6561_v41  ;;  %v3378_v43 = vshrl.u32 %v3140_v61, 16  ;;  %v3381_v25 = vshll.u32 %v3140_v61, 16  ;;  %v9888_v16 = vrot.slane %v5095_v10, 4  ;;  %v9890_v59 = vrot.slane %v5105_v62, 4 }
 0x19a   : > { %v9886_v38 = vsel %vm8806_vm13, %v5623_v18, %v5624_v14  ;;  %v5126_v29 = vshrl.u32 %v9841_v30, 16  ;;  %v3400_v14 = vsel %vm8490_vm2, %v9703_v26, %v10360_v12  ;;  %v6795_v10 = vrot.slane %v5514_v36, 9  ;;  %v10361_v18 = vld [vmem:[#allocation13_spill] sm:$0xff]  ;;  %v10362_v12 = vld [vmem:[#allocation14_spill] sm:$0xff] }
 0x19b   : > { %7728 = vmatpush3.bf16.msra.mxu0 %v8167_v17  ;;  %v3380_v41 = vrot.slane %v3378_v43, 4  ;;  %v3383_v42 = vrot.slane %v3381_v25, 5  ;;  %v9904_v62 = vrot.slane %v5122_v49, 5  ;;  %v5137_v61 = vshrl.u32 %v4794_v39, 16  ;;  %v8173_v17 = vld [vmem:[%s10292_s1 + $0x238] sm:$0xff]  }
 0x19c   : > { %7729 = vmatprep.subr.bf16.mxu0 %v8170_v52  ;;  %v5628_v43 = vrot.slane %v10361_v18, 5  ;;  %v5631_v25 = vrot.slane %v9643_v57, 5  ;;  %v6796_v26 = vrot.slane %v5515_v2, 9  ;;  %v5635_v36 = vrot.slane %v10362_v12, 5  ;;  %v9941_v18 = vld [vmem:[#allocation2 + $0xc8] sm:$0x1] }
 0x19d   : > { %v3384_v9 = vor.u32 %v3383_v42, %v3380_v41  ;;  %v5638_v31 = vrot.slane %v9650_v33, 5  ;;  %v5140_v0 = vshll.u32 %v4794_v39, 16  ;;  %v5150_v57 = vshrl.u32 %v9895_v44, 16 }
 0x19e   : > { %7698 = vmatmul.mubr.bf16.gmra.mrb[12].mxu0 %v9773_v40  ;;  %v9917_v49 = vsel %vm8806_vm13, %v6795_v10, %v5628_v43  ;;  %v5630_v28 = vrot.slane %v5628_v43, 4  ;;  %v9923_v41 = vsel %vm8806_vm13, %v6796_v26, %v5635_v36  ;;  %v5637_v33 = vrot.slane %v5635_v36, 4  ;;  %v8163_v40 = vld [vmem:[#allocation2 + $0x18] sm:$0xff]  }
 0x19f   : > { %7701 = vmatprep.mubr.bf16.mxu0 %v9775_v63  ;;  %7730 = vmatpush3.bf16.msra.mxu0 %v8170_v52  ;;  %v3385_v42 = vrot.slane %v3384_v9, 4  ;;  %v5101_v2 = vsel %vm8490_vm2, %v9888_v16, %v9801_v8  ;;  %v5128_v39 = vrot.slane %v5126_v29, 4  ;;  %v8165_v52 = vld [vmem:[#allocation2 + $0x24] sm:$0xff]   ;;  %v5111_v9 = vsel %vm8490_vm2, %v9890_v59, %v9874_v4  ;;  %v9939_v10 = vld [vmem:[#allocation2 + $0xbc] sm:$0x1] }
 0x1a0   : > { %7474 = vmatmul.mubr.bf16.gmra.mrb[28].mxu1 %v6562_v11  ;;  %v5146_v11 = vshll.u32 %v9895_v44, 16  ;;  %7731 = vmatprep.subr.bf16.mxu0 %v8173_v17  ;;  %v9933_v63 = vsel %vm8806_vm13, %v5630_v28, %v5631_v25  ;;  %v9950_v28 = vsel %vm8806_vm13, %v5637_v33, %v5638_v31  ;;  %v5142_v16 = vrot.slane %v5140_v0, 5  ;;  %v4797_v29 = vld [vmem:[#allocation2 + $0xcc] sm:$0xf]  ;;  %v9968_v25 = vld [vmem:[#allocation2 + $0xd0] sm:$0xf] }
 0x1a1   : > { %7493 = vmatprep.mubr.bf16.mxu1 %v8162_v46  ;;  %v5119_v46 = vor.u32 %v9882_v48, %v9879_v50  ;;  %v3390_v8 = vsel %vm8490_vm2, %v3385_v42, %v9250_v6  ;;  %v6827_v50 = vcombine.low %v9917_v49, %v9933_v63  ;;  %v5139_v48 = vrot.slane %v5137_v61, 4  ;;  %v8260_v63 = vld [vmem:[#allocation2 + $0xb0] sm:$0x1] }
 0x1a2   : > { %v9952_v43 = vcombine.low %v3390_v8, %v3400_v14  ;;  %v6828_v4 = vcombine.low %v9923_v41, %v9950_v28  ;;  %v6773_v6 = vcombine.low %v5053_v23, %v5063_v47  ;;  %v9966_v59 = vrot.slane %v5146_v11, 5  ;;  %v10365_v11 = vld [vmem:[#allocation16_spill] sm:$0xff] }
 0x1a3   : > { %v5152_v61 = vrot.slane %v5150_v57, 4  ;;  %7732 = vmatpush3.bf16.msra.mxu0 %v8173_v17  ;;  %v5129_v14 = vor.u32 %v5128_v39, %v9904_v62  ;;  %v5132_v26 = vshll.u32 %v9939_v10, 16  ;;  %v5156_v12 = vshll.u32 %v9941_v18, 16 }
 0x1a4   : > { %v10363_v7 = vsel %vm8490_vm2, %v9807_v45, %v9794_v15  ;;  %v10364_v60 = vsel %vm8490_vm2, %v9792_v5, %v9727_v32  ;;  %v6775_v23 = vcombine.low %v5101_v2, %v5111_v9  ;;  %v5161_v47 = vshrl.u32 %v4797_v29, 16  ;;  %v5517_v45 = vld [vmem:[#allocation2 + $0x9c] sm:$0xe] }
 0x1a5   : > { %v6774_v51 = vcombine.low %v10364_v60, %v10363_v7  ;;  %v5120_v17 = vrot.slane %v5119_v46, 4  ;;  %v5143_v36 = vor.u32 %v5142_v16, %v5139_v48  ;;  %v5164_v31 = vshll.u32 %v4797_v29, 16  ;;  %v8168_v46 = vld [vmem:[#allocation2 + $0x3c] sm:$0xff]   ;;  %v8236_v48 = vld [vmem:[%s10292_s1 + $0x110] sm:$0xff]  }
 0x1a6   : > { %7702 = vmatmul.mubr.bf16.gmra.mrb[16].mxu0 %v9777_v1  ;;  %v5170_v15 = vshll.u32 %v9968_v25, 16  ;;  %v5153_v0 = vor.u32 %v5152_v61, %v9966_v59  ;;  %v5174_v32 = vshrl.u32 %v9968_v25, 16  ;;  %v6797_v5 = vrot.slane %v5516_v27, 9  ;;  %v8166_v1 = vld [vmem:[#allocation2 + $0x30] sm:$0xff]  }
 0x1a7   : > { %7705 = vmatprep.mubr.bf16.mxu0 %v6773_v6  ;;  %v5642_v57 = vrot.slane %v10365_v11, 5  ;;  %v5130_v42 = vrot.slane %v5129_v14, 4  ;;  %v5134_v33 = vrot.slane %v5132_v26, 5  ;;  %v5645_v2 = vrot.slane %v9678_v20, 5  ;;  %v10003_v14 = vld [vmem:[#allocation2 + $0xd4] sm:$0x1] }
 0x1a8   : > { %7494 = vmatmul.mubr.bf16.vlgmr.msra.gmra.mrb[0].mxu1 %v8163_v40  ;;  %v5158_v40 = vrot.slane %v5156_v12, 5  ;;  %v5163_v39 = vrot.slane %v5161_v47, 4  ;;  %v6798_v8 = vrot.slane %v5517_v45, 9  ;;  %v5144_v16 = vrot.slane %v5143_v36, 4  ;;  %v5518_v11 = vld [vmem:[#allocation2 + $0xa8] sm:$0xe] }
 0x1a9   : > { %7773 = vmatpush3.bf16.msra.mxu1 %v9675_v37  ;;  %7497 = vmatprep.mubr.bf16.mxu1 %v8165_v52  ;;  %v8235_v37 = vld [vmem:[%s10292_s1 + $0x108] sm:$0xff]   ;;  %v9995_v52 = vsel %vm8806_vm13, %v6797_v5, %v5642_v57  ;;  %v5644_v9 = vrot.slane %v5642_v57, 4  ;;  %v5166_v29 = vrot.slane %v5164_v31, 5  ;;  %v10000_v6 = vrot.slane %v5170_v15, 5 }
 0x1aa   : > { %7766 = vmatprep.subr.bf16.mxu1 %v8235_v37  ;;  %v5649_v20 = vrot.slane %v9670_v56, 5  ;;  %v5154_v61 = vrot.slane %v5153_v0, 4  ;;  %v5176_v26 = vrot.slane %v5174_v32, 4  ;;  %v5652_v27 = vrot.slane %v9717_v22, 5  ;;  %v8237_v22 = vld [vmem:[%s10292_s1 + $0x118] sm:$0xff]   ;;  %v8169_v0 = vld [vmem:[#allocation2 + $0x48] sm:$0xff]  }
 0x1ab   : > { %v10007_v12 = vsel %vm8806_vm13, %v5644_v9, %v5645_v2  ;;  %v5125_v47 = vsel %vm8490_vm2, %v5120_v17, %v9904_v62  ;;  %v5167_v36 = vor.u32 %v5166_v29, %v5163_v39  ;;  %v5180_v31 = vshll.u32 %v10003_v14, 16  ;;  %v5506_v17 = vld [vmem:[#allocation2 + $0x18] sm:$0xe]  ;;  %v8238_v32 = vld [vmem:[#allocation2 + $0x1c] sm:$0xf] }
 0x1ac   : > { %v6829_v7 = vcombine.low %v9995_v52, %v10007_v12  ;;  %v10014_v60 = vsel %vm8806_vm13, %v6798_v8, %v5649_v20  ;;  %v5651_v56 = vrot.slane %v5649_v20, 4  ;;  %v5159_v15 = vsel %vm8490_vm2, %v5154_v61, %v5158_v40  ;;  %v8239_v40 = vld [vmem:[%s10292_s1 + $0x120] sm:$0xff]  }
 0x1ad   : > { %7774 = vmatpush3.bf16.msra.mxu1 %v8235_v37  ;;  %v5135_v37 = vsel %vm8490_vm2, %v5130_v42, %v5134_v33  ;;  %v5177_v62 = vor.u32 %v5176_v26, %v10000_v6  ;;  %v5572_v5 = vrot.slane %v8238_v32, 5  ;;  %v5168_v42 = vrot.slane %v5167_v36, 4  ;;  %v8240_v29 = vld [vmem:[#allocation2 + $0x20] sm:$0x1]  ;;  %v5507_v61 = vld [vmem:[#allocation2 + $0x24] sm:$0xe] }
 0x1ae   : > { %7767 = vmatprep.subr.bf16.mxu1 %v8236_v48  ;;  %7706 = vmatmul.mubr.bf16.gmra.mrb[20].mxu0 %v6774_v51  ;;  %v5149_v51 = vsel %vm8490_vm2, %v5144_v16, %v9966_v59  ;;  %v10033_v45 = vsel %vm8806_vm13, %v5651_v56, %v5652_v27  ;;  %v6776_v57 = vcombine.low %v5125_v47, %v5135_v37  ;;  %v5182_v33 = vrot.slane %v5180_v31, 5  ;;  %v8241_v26 = vld [vmem:[#allocation2 + $0x28] sm:$0xf]  ;;  %v8172_v32 = vld [vmem:[#allocation2 + $0x60] sm:$0xff]  }
 0x1af   : > { %7709 = vmatprep.mubr.bf16.mxu0 %v6775_v23  ;;  %v6830_v23 = vcombine.low %v10014_v60, %v10033_v45  ;;  %v6777_v59 = vcombine.low %v5149_v51, %v5159_v15  ;;  %v6787_v2 = vrot.slane %v5506_v17, 9  ;;  %v5178_v39 = vrot.slane %v5177_v62, 4 }
 0x1b0   : > { %7498 = vmatmul.mubr.bf16.gmra.mrb[4].mxu1 %v8166_v1  ;;  %v8171_v1 = vld [vmem:[#allocation2 + $0x54] sm:$0xff]   ;;  %v6799_v9 = vrot.slane %v5518_v11, 9  ;;  %v5656_v8 = vrot.slane %v9729_v34, 5  ;;  %v5574_v16 = vrot.slane %v5572_v5, 4  ;;  %v5575_v20 = vrot.slane %v8240_v29, 5  ;;  %v8242_v34 = vld [vmem:[%s10292_s1 + $0x128] sm:$0xff]  }
 0x1b1   : > { %7501 = vmatprep.mubr.bf16.mxu1 %v8168_v46  ;;  %7775 = vmatpush3.bf16.msra.mxu1 %v8236_v48  ;;  %v5519_v46 = vld [vmem:[#allocation2 + $0xb4] sm:$0xe]  ;;  %v5659_v48 = vrot.slane %v9783_v55, 5  ;;  %v5579_v27 = vrot.slane %v8241_v26, 5  ;;  %v5508_v55 = vld [vmem:[#allocation2 + $0x30] sm:$0xe]  ;;  %v5173_v15 = vsel %vm8490_vm2, %v5168_v42, %v10000_v6  ;;  %v5183_v62 = vsel %vm8490_vm2, %v5178_v39, %v5182_v33 }
 0x1b2   : > { %7768 = vmatprep.subr.bf16.mxu1 %v8237_v22  ;;  %v10044_v56 = vsel %vm8806_vm13, %v6799_v9, %v5656_v8  ;;  %v5658_v47 = vrot.slane %v5656_v8, 4  ;;  %v6800_v37 = vrot.slane %v5519_v46, 9  ;;  %v5663_v31 = vrot.slane %v9841_v30, 5  ;;  %v8245_v46 = vld [vmem:[#allocation2 + $0x38] sm:$0x1]  ;;  %v8246_v9 = vld [vmem:[%s10292_s1 + $0x130] sm:$0xff]  }
 0x1b3   : > { %v5666_v51 = vrot.slane %v9939_v10, 5  ;;  %v5573_v17 = vsel %vm8806_vm13, %v6787_v2, %v5572_v5  ;;  %v5576_v30 = vsel %vm8806_vm13, %v5574_v16, %v5575_v20  ;;  %v8244_v5 = vld [vmem:[#allocation2 + $0x2c] sm:$0x1]  ;;  %v6789_v33 = vrot.slane %v5508_v55, 9  ;;  %v5520_v29 = vld [vmem:[#allocation2 + $0xc0] sm:$0xe] }
 0x1b4   : > { %v10068_v6 = vsel %vm8806_vm13, %v6800_v37, %v5663_v31  ;;  %v5665_v11 = vrot.slane %v5663_v31, 4  ;;  %v5582_v42 = vrot.slane %v8244_v5, 5  ;;  %v5589_v39 = vrot.slane %v8245_v46, 5  ;;  %v5509_v26 = vld [vmem:[#allocation2 + $0x3c] sm:$0xe] }
 0x1b5   : > { %7776 = vmatpush3.bf16.msra.mxu1 %v8237_v22  ;;  %v8243_v22 = vld [vmem:[#allocation2 + $0x34] sm:$0xf]  ;;  %v6801_v55 = vrot.slane %v5520_v29, 9  ;;  %v8248_v31 = vld [vmem:[#allocation2 + $0x40] sm:$0xf] }
 0x1b6   : > { %7769 = vmatprep.subr.bf16.mxu1 %v8239_v40  ;;  %7710 = vmatmul.mubr.bf16.gmra.mrb[24].mxu0 %v6776_v57  ;;  %v5586_v36 = vrot.slane %v8243_v22, 5  ;;  %v8174_v57 = vld [vmem:[#allocation2 + $0x6c] sm:$0xff]   ;;  %v10075_v8 = vsel %vm8806_vm13, %v5665_v11, %v5666_v51  ;;  %v5593_v51 = vrot.slane %v8248_v31, 5  ;;  %v8178_v31 = vld [vmem:[#allocation2 + $0x9c] sm:$0xff]  }
 0x1b7   : > { %7713 = vmatprep.mubr.bf16.mxu0 %v6777_v59  ;;  %v5581_v59 = vrot.slane %v5579_v27, 4  ;;  %v6832_v16 = vcombine.low %v10068_v6, %v10075_v8  ;;  %v5521_v22 = vld [vmem:[#allocation2 + $0xcc] sm:$0xe] }
 0x1b8   : > { %7502 = vmatmul.mubr.bf16.gmra.mrb[8].mxu1 %v8169_v0  ;;  %v10060_v0 = vsel %vm8806_vm13, %v5658_v47, %v5659_v48  ;;  %v5588_v2 = vrot.slane %v5586_v36, 4  ;;  %v6819_v48 = vcombine.low %v5573_v17, %v5576_v30  ;;  %v5587_v47 = vsel %vm8806_vm13, %v6789_v33, %v5586_v36  ;;  %v8249_v36 = vld [vmem:[#allocation2 + $0x44] sm:$0x1] }
 0x1b9   : > { %7505 = vmatprep.mubr.bf16.mxu1 %v8171_v1  ;;  %7777 = vmatpush3.bf16.msra.mxu1 %v8239_v40  ;;  %v6831_v10 = vcombine.low %v10044_v56, %v10060_v0  ;;  %v6788_v1 = vrot.slane %v5507_v61, 9  ;;  %v6778_v40 = vcombine.low %v5173_v15, %v5183_v62  ;;  %v5583_v61 = vsel %vm8806_vm13, %v5581_v59, %v5582_v42  ;;  %v3137_v15 = vld [vmem:[#allocation2 + $0x6c] sm:$0xf]  ;;  %v8175_v62 = vld [vmem:[#allocation2 + $0x78] sm:$0xff]  }
 0x1ba   : > { %7770 = vmatprep.subr.bf16.mxu1 %v8242_v34  ;;  %v5590_v37 = vsel %vm8806_vm13, %v5588_v2, %v5589_v39  ;;  %v5596_v30 = vrot.slane %v8249_v36, 5  ;;  %v6802_v5 = vrot.slane %v5521_v22, 9  ;;  %v3354_v42 = vshrl.u32 %v3137_v15, 16  ;;  %v8250_v39 = vld [vmem:[#allocation2 + $0x70] sm:$0xf] }
 0x1bb   : > { %v5580_v20 = vsel %vm8806_vm13, %v6788_v1, %v5579_v27  ;;  %v5670_v27 = vrot.slane %v9895_v44, 5  ;;  %v6821_v1 = vcombine.low %v5587_v47, %v5590_v37  ;;  %v5673_v44 = vrot.slane %v9941_v18, 5  ;;  %v8177_v22 = vld [vmem:[#allocation2 + $0x90] sm:$0xff]  }
 0x1bc   : > { %v6820_v17 = vcombine.low %v5580_v20, %v5583_v61  ;;  %v3357_v33 = vshll.u32 %v3137_v15, 16  ;;  %v5680_v2 = vrot.slane %v10003_v14, 5  ;;  %v5595_v46 = vrot.slane %v5593_v51, 4  ;;  %v3143_v15 = vld [vmem:[#allocation2 + $0x84] sm:$0xf] }
 0x1bd   : > { %7778 = vmatpush3.bf16.msra.mxu1 %v8242_v34  ;;  %v8247_v34 = vld [vmem:[%s10292_s1 + $0x138] sm:$0xff]   ;;  %v5672_v11 = vrot.slane %v5670_v27, 4  ;;  %v10093_v59 = vsel %vm8806_vm13, %v6801_v55, %v5670_v27  ;;  %v3356_v14 = vrot.slane %v3354_v42, 4  ;;  %v10366_v42 = vcombine.low %v9813_v19, %v9822_v13  ;;  %v8253_v19 = vld [vmem:[#allocation2 + $0x8c] sm:$0x1] }
 0x1be   : > { %7771 = vmatprep.subr.bf16.mxu1 %v8246_v9  ;;  %7714 = vmatmul.mubr.bf16.gmra.mrb[28].mxu0 %v6778_v40  ;;  %v5677_v40 = vrot.slane %v9968_v25, 5  ;;  %v5597_v37 = vsel %vm8806_vm13, %v5595_v46, %v5596_v30  ;;  %v8180_v46 = vld [vmem:[#allocation2 + $0xb4] sm:$0xff]   ;;  %v3421_v13 = vshll.u32 %v8253_v19, 16 }
 0x1bf   : > { %7733 = vmatprep.mubr.bf16.mxu0 %v6819_v48  ;;  %v3367_v48 = vshrl.u32 %v8250_v39, 16  ;;  %v10100_v29 = vsel %vm8806_vm13, %v5672_v11, %v5673_v44  ;;  %v3402_v11 = vshrl.u32 %v3143_v15, 16 }
 0x1c0   : > { %7506 = vmatmul.mubr.bf16.gmra.mrb[12].mxu1 %v8172_v32  ;;  %v6790_v32 = vrot.slane %v5509_v26, 9  ;;  %v6833_v20 = vcombine.low %v10093_v59, %v10100_v29  ;;  %v10106_v18 = vsel %vm8806_vm13, %v6802_v5, %v5677_v40  ;;  %v5679_v61 = vrot.slane %v5677_v40, 4  ;;  %v3146_v5 = vld [vmem:[#allocation2 + $0x90] sm:$0xf] }
 0x1c1   : > { %7509 = vmatprep.mubr.bf16.mxu1 %v8174_v57  ;;  %7779 = vmatpush3.bf16.msra.mxu1 %v8246_v9  ;;  %v8176_v57 = vld [vmem:[#allocation2 + $0x84] sm:$0xff]   ;;  %v3363_v9 = vshll.u32 %v8250_v39, 16  ;;  %v3359_v26 = vrot.slane %v3357_v33, 5  ;;  %v3369_v55 = vrot.slane %v3367_v48, 4  ;;  %v3404_v39 = vrot.slane %v3402_v11, 4 }
 0x1c2   : > { %7772 = vmatprep.subr.bf16.mxu1 %v8247_v34  ;;  %v5594_v25 = vsel %vm8806_vm13, %v6790_v32, %v5593_v51  ;;  %v10112_v47 = vsel %vm8806_vm13, %v5679_v61, %v5680_v2  ;;  %v8251_v32 = vld [vmem:[#allocation2 + $0x74] sm:$0x1]  ;;  %v8179_v2 = vld [vmem:[#allocation2 + $0xa8] sm:$0xff]  }
 0x1c3   : > { %v6834_v27 = vcombine.low %v10106_v18, %v10112_v47  ;;  %v3360_v51 = vor.u32 %v3359_v26, %v3356_v14  ;;  %v3373_v36 = vshll.u32 %v8251_v32, 16  ;;  %v3429_v14 = vshll.u32 %v3146_v5, 16  ;;  %v3149_v26 = vld [vmem:[#allocation2 + $0x9c] sm:$0xf] }
 0x1c5   : > { %7780 = vmatpush3.bf16.msra.mxu1 %v8247_v34  ;;  %v3365_v34 = vrot.slane %v3363_v9, 5  ;;  %v3361_v44 = vrot.slane %v3360_v51, 4  ;;  %v3375_v40 = vrot.slane %v3373_v36, 5  ;;  %v3453_v51 = vshll.u32 %v3149_v26, 16 }
 0x1c6   : > { %7734 = vmatmul.mubr.bf16.vlgmr.msra.gmra.mrb[0].mxu0 %v6820_v17 }
 0x1c7   : > { %7737 = vmatprep.mubr.bf16.mxu0 %v6821_v1  ;;  %v3370_v17 = vor.u32 %v3369_v55, %v3365_v34  ;;  %v8252_v1 = vld [vmem:[#allocation2 + $0x88] sm:$0xf] }
 0x1c8   : > { %7510 = vmatmul.mubr.bf16.gmra.mrb[16].mxu1 %v8175_v62  ;;  %v6822_v62 = vcombine.low %v5594_v25, %v5597_v37  ;;  %v3411_v24 = vshll.u32 %v8252_v1, 16  ;;  %v3415_v30 = vshrl.u32 %v8252_v1, 16  ;;  %v3426_v25 = vshrl.u32 %v3146_v5, 16 }
 0x1c9   : > { %7513 = vmatprep.mubr.bf16.mxu1 %v8176_v57  ;;  %v3405_v57 = vshll.u32 %v3143_v15, 16  ;;  %v3371_v33 = vrot.slane %v3370_v17, 4  ;;  %v3366_v37 = vsel %vm8490_vm2, %v3361_v44, %v3365_v34  ;;  %v8255_v17 = vld [vmem:[#allocation2 + $0xa0] sm:$0xf]  ;;  %v3431_v34 = vrot.slane %v3429_v14, 5 }
 0x1ca   : > { %v10121_v48 = vrot.slane %v3411_v24, 5  ;;  %v3417_v61 = vrot.slane %v3415_v30, 4  ;;  %v3459_v32 = vshll.u32 %v8255_v17, 16  ;;  %v3463_v36 = vshrl.u32 %v8255_v17, 16  ;;  %v8181_v30 = vld [vmem:[#allocation2 + $0xc0] sm:$0xff]  }
 0x1cb   : > { %v3407_v9 = vrot.slane %v3405_v57, 5  ;;  %v3376_v55 = vsel %vm8490_vm2, %v3371_v33, %v3375_v40  ;;  %v3428_v1 = vrot.slane %v3426_v25, 4  ;;  %v10367_v24 = vcombine.low %v9826_v54, %v9845_v21  ;;  %v8256_v21 = vld [vmem:[#allocation2 + $0x98] sm:$0x1] }
 0x1cc   : > { %v3418_v57 = vor.u32 %v3417_v61, %v10121_v48  ;;  %v10368_v44 = vcombine.low %v9838_v53, %v9857_v35  ;;  %v6635_v5 = vcombine.low %v3366_v37, %v3376_v55  ;;  %v3152_v61 = vld [vmem:[#allocation2 + $0xa8] sm:$0xf]  ;;  %v8257_v53 = vld [vmem:[#allocation2 + $0xa4] sm:$0x1] }
 0x1cd   : > { %v3408_v11 = vor.u32 %v3407_v9, %v3404_v39  ;;  %v10136_v39 = vrot.slane %v3459_v32, 5  ;;  %v3465_v9 = vrot.slane %v3463_v36, 4  ;;  %v3432_v54 = vor.u32 %v3431_v34, %v3428_v1 }
 0x1ce   : > { %7738 = vmatmul.mubr.bf16.gmra.mrb[4].mxu0 %v6822_v62  ;;  %v3450_v62 = vshrl.u32 %v3149_v26, 16  ;;  %v3419_v14 = vrot.slane %v3418_v57, 4  ;;  %v3445_v26 = vshll.u32 %v8256_v21, 16  ;;  %v3469_v35 = vshll.u32 %v8257_v53, 16  ;;  %v3158_v21 = vld [vmem:[#allocation2 + $0xc0] sm:$0xf] }
 0x1cf   : > { %7741 = vmatprep.mubr.bf16.mxu0 %v10366_v42  ;;  %v3423_v42 = vrot.slane %v3421_v13, 5  ;;  %v3409_v25 = vrot.slane %v3408_v11, 4  ;;  %v3474_v37 = vshrl.u32 %v3152_v61, 16  ;;  %v3477_v55 = vshll.u32 %v3152_v61, 16  ;;  %v3155_v13 = vld [vmem:[#allocation2 + $0xb4] sm:$0xf] }
 0x1d0   : > { %7514 = vmatmul.mubr.bf16.gmra.mrb[20].mxu1 %v8177_v22  ;;  %v8254_v22 = vld [vmem:[#allocation2 + $0x94] sm:$0xf]  ;;  %v3433_v36 = vrot.slane %v3432_v54, 4  ;;  %v3447_v11 = vrot.slane %v3445_v26, 5  ;;  %v10369_v57 = vcombine.low %v9868_v58, %v9886_v38  ;;  %v3498_v1 = vshrl.u32 %v3155_v13, 16 }
 0x1d1   : > { %7517 = vmatprep.mubr.bf16.mxu1 %v8178_v31  ;;  %v3435_v31 = vshll.u32 %v8254_v22, 16  ;;  %v3439_v15 = vshrl.u32 %v8254_v22, 16  ;;  %v3414_v17 = vsel %vm8490_vm2, %v3409_v25, %v10121_v48  ;;  %v3424_v32 = vsel %vm8490_vm2, %v3419_v14, %v3423_v42 }
 0x1d2   : > { %v3501_v34 = vshll.u32 %v3155_v13, 16  ;;  %v3471_v48 = vrot.slane %v3469_v35, 5  ;;  %v6637_v25 = vcombine.low %v3414_v17, %v3424_v32  ;;  %v3500_v58 = vrot.slane %v3498_v1, 4 }
 0x1d3   : > { %v10134_v33 = vrot.slane %v3435_v31, 5  ;;  %v3441_v40 = vrot.slane %v3439_v15, 4  ;;  %v3466_v31 = vor.u32 %v3465_v9, %v10136_v39  ;;  %v8258_v15 = vld [vmem:[#allocation2 + $0xac] sm:$0xf]  ;;  %v3525_v13 = vshll.u32 %v3158_v21, 16 }
 0x1d4   : > { %v3503_v38 = vrot.slane %v3501_v34, 5 }
 0x1d5   : > { %v3442_v19 = vor.u32 %v3441_v40, %v10134_v33  ;;  %v3476_v40 = vrot.slane %v3474_v37, 4  ;;  %v3438_v26 = vsel %vm8490_vm2, %v3433_v36, %v10134_v33  ;;  %v8261_v33 = vld [vmem:[#allocation2 + $0xc4] sm:$0xf]  ;;  %v3527_v1 = vrot.slane %v3525_v13, 5 }
 0x1d6   : > { %7742 = vmatmul.mubr.bf16.gmra.mrb[8].mxu0 %v10367_v24  ;;  %v8259_v24 = vld [vmem:[#allocation2 + $0xb8] sm:$0xf] }
 0x1d7   : > { %7745 = vmatprep.mubr.bf16.mxu0 %v10368_v44  ;;  %v3511_v44 = vshrl.u32 %v8259_v24, 16 }
 0x1d8   : > { %7518 = vmatmul.mubr.bf16.gmra.mrb[24].mxu1 %v8179_v2  ;;  %v3452_v2 = vrot.slane %v3450_v62, 4  ;;  %v3483_v62 = vshll.u32 %v8258_v15, 16 }
 0x1d9   : > { %7521 = vmatprep.mubr.bf16.mxu1 %v8180_v46  ;;  %v3455_v46 = vrot.slane %v3453_v51, 5  ;;  %v3487_v51 = vshrl.u32 %v8258_v15, 16  ;;  %v3513_v54 = vrot.slane %v3511_v44, 4  ;;  %v8263_v44 = vld [vmem:[#allocation2 + $0xc8] sm:$0x1] }
 0x1da   : > { %v3485_v9 = vrot.slane %v3483_v62, 5  ;;  %v8262_v62 = vld [vmem:[#allocation2 + $0xbc] sm:$0x1] }
 0x1db   : > { %v3456_v22 = vor.u32 %v3455_v46, %v3452_v2  ;;  %v3479_v2 = vrot.slane %v3477_v55, 5  ;;  %v3467_v46 = vrot.slane %v3466_v31, 4  ;;  %v3489_v61 = vrot.slane %v3487_v51, 4 }
 0x1dc   : > { %v3522_v55 = vshrl.u32 %v3158_v21, 16  ;;  %v3535_v31 = vshrl.u32 %v8261_v33, 16  ;;  %v3517_v51 = vshll.u32 %v8262_v62, 16  ;;  %v10213_v21 = vld [vmem:[%s10293_s2] ss:$0 sm:$0xff] }
 0x1dd   : > { %v3457_v42 = vrot.slane %v3456_v22, 4  ;;  %v3472_v53 = vsel %vm8490_vm2, %v3467_v46, %v3471_v48  ;;  %v3480_v35 = vor.u32 %v3479_v2, %v3476_v40  ;;  %v3490_v37 = vor.u32 %v3489_v61, %v3485_v9 }
 0x1de   : > { %7746 = vmatmul.mubr.bf16.gmra.mrb[12].mxu0 %v10369_v57  ;;  %v3531_v22 = vshll.u32 %v8261_v33, 16  ;;  %v3524_v57 = vrot.slane %v3522_v55, 4  ;;  %v3519_v28 = vrot.slane %v3517_v51, 5 }
 0x1df   : > { %7749 = vmatprep.mubr.bf16.mxu0 %v6827_v50  ;;  %v3493_v50 = vshll.u32 %v8260_v63, 16  ;;  %v3481_v32 = vrot.slane %v3480_v35, 4  ;;  %v3491_v36 = vrot.slane %v3490_v37, 4 }
 0x1e0   : > { %7522 = vmatmul.mubr.bf16.gmra.mrb[28].mxu1 %v8181_v30  ;;  %v3507_v30 = vshll.u32 %v8259_v24, 16  ;;  %v3533_v34 = vrot.slane %v3531_v22, 5  ;;  %v3537_v24 = vrot.slane %v3535_v31, 4  ;;  %v3528_v12 = vor.u32 %v3527_v1, %v3524_v57 }
 0x1e1   : > { %7557 = vmatprep.mubr.bf16.mxu1 %v6635_v5  ;;  %v3443_v5 = vrot.slane %v3442_v19, 4  ;;  %v3462_v19 = vsel %vm8490_vm2, %v3457_v42, %v10136_v39 }
 0x1e2   : > { %v3509_v14 = vrot.slane %v3507_v30, 5  ;;  %v6639_v17 = vcombine.low %v3462_v19, %v3472_v53  ;;  %v3529_v46 = vrot.slane %v3528_v12, 4 }
 0x1e3   : > { %v3448_v49 = vsel %vm8490_vm2, %v3443_v5, %v3447_v11  ;;  %v3495_v11 = vrot.slane %v3493_v50, 5  ;;  %v3541_v5 = vshll.u32 %v8263_v44, 16 }
 0x1e4   : > { %v3514_v15 = vor.u32 %v3513_v54, %v3509_v14  ;;  %v6638_v39 = vcombine.low %v3438_v26, %v3448_v49  ;;  %v3534_v60 = vsel %vm8490_vm2, %v3529_v46, %v3533_v34 }
 0x1e5   : > { %v3496_v52 = vsel %vm8490_vm2, %v3491_v36, %v3495_v11  ;;  %v3543_v61 = vrot.slane %v3541_v5, 5 }
 0x1e6   : > { %7750 = vmatmul.mubr.bf16.gmra.mrb[16].mxu0 %v6828_v4  ;;  %v3515_v41 = vrot.slane %v3514_v15, 4  ;;  %v3486_v4 = vsel %vm8490_vm2, %v3481_v32, %v3485_v9 }
 0x1e7   : > { %7753 = vmatprep.mubr.bf16.mxu0 %v6829_v7  ;;  %v3538_v7 = vor.u32 %v3537_v24, %v3533_v34  ;;  %v6640_v2 = vcombine.low %v3486_v4, %v3496_v52 }
 0x1e8   : > { %7558 = vmatmul.mubr.bf16.vlgmr.msra.gmra.mrb[16].mxu1 %v9952_v43  ;;  %v3504_v43 = vor.u32 %v3503_v38, %v3500_v58  ;;  %v3520_v40 = vsel %vm8490_vm2, %v3515_v41, %v3519_v28 }
 0x1e9   : > { %7561 = vmatprep.mubr.bf16.mxu1 %v6637_v25  ;;  %v3539_v9 = vrot.slane %v3538_v7, 4 }
 0x1ea   : > { %v3505_v30 = vrot.slane %v3504_v43, 4 }
 0x1eb   : > { %v3544_v45 = vsel %vm8490_vm2, %v3539_v9, %v3543_v61 }
 0x1ec   : > { %v3510_v48 = vsel %vm8490_vm2, %v3505_v30, %v3509_v14 }
 0x1ed   : > { %v6641_v42 = vcombine.low %v3510_v48, %v3520_v40 }
 0x1ee   : > { %7754 = vmatmul.mubr.bf16.gmra.mrb[20].mxu0 %v6830_v23  ;;  %v6642_v23 = vcombine.low %v3534_v60, %v3544_v45 }
 0x1ef   : > { %7757 = vmatprep.mubr.bf16.mxu0 %v6831_v10 }
 0x1f0   : > { %7562 = vmatmul.mubr.bf16.gmra.mrb[20].mxu1 %v6638_v39 }
 0x1f1   : > { %7565 = vmatprep.mubr.bf16.mxu1 %v6639_v17 }
 0x1f6   : > { %7758 = vmatmul.mubr.bf16.gmra.mrb[24].mxu0 %v6832_v16 }
 0x1f7   : > { %7761 = vmatprep.mubr.bf16.mxu0 %v6833_v20 }
 0x1f8   : > { %7566 = vmatmul.mubr.bf16.gmra.mrb[24].mxu1 %v6640_v2 }
 0x1f9   : > { %7569 = vmatprep.mubr.bf16.mxu1 %v6641_v42 }
 0x1fe   : > { %7762 = vmatmul.mubr.bf16.gmra.mrb[28].mxu0 %v6834_v27 }
 0x200   : > { %7570 = vmatmul.mubr.bf16.gmra.mrb[28].mxu1 %v6642_v23 }
 0x27b   : > { %v7495_v56 = vpop.f32.mrb[0].mxu1 }
 0x27c   : > { %v2954_v0 = vpop.f32.mrb[1].mxu1 }
 0x27d   : > { %v7496_v10 = vpop.f32.mrb[2].mxu1 }
 0x27e   : > { %v2957_v3 = vpop.f32.mrb[3].mxu1 }
 0x283   : > { %v7499_v25 = vpop.f32.mrb[4].mxu1 }
 0x284   : > { %v2970_v58 = vpop.f32.mrb[5].mxu1 }
 0x285   : > { %v7500_v38 = vpop.f32.mrb[6].mxu1 }
 0x286   : > { %v2973_v6 = vpop.f32.mrb[7].mxu1 }
 0x28b   : > { %v7503_v8 = vpop.f32.mrb[8].mxu1 }
 0x28c   : > { %v10195_v16 = vpop.f32.mrb[9].mxu1 }
 0x28d   : > { %v10197_v59 = vpop.f32.mrb[10].mxu1 }
 0x28e   : > { %v10199_v29 = vpop.f32.mrb[11].mxu1 }
 0x293   : > { %v10201_v20 = vpop.f32.mrb[12].mxu1 }
 0x294   : > { %v10203_v18 = vpop.f32.mrb[13].mxu1 }
 0x295   : > { %v10205_v47 = vpop.f32.mrb[14].mxu1 }
 0x296   : > { %v10208_v27 = vpop.f32.mrb[15].mxu1 }
 0x299   : > { %v7735_v14 = vpop.f32.mrb[0].mxu0 }
 0x29a   : > { %v7781_v54 = vadd.f32 %v7735_v14, %v7495_v56  ;;  %v5845_v26 = vpop.f32.mrb[1].mxu0 }
 0x29b   : > { %v7782_v49 = vadd.f32 %v5845_v26, %v2954_v0  ;;  %v7736_v63 = vpop.f32.mrb[2].mxu0 }
 0x29c   : > { %v7783_v50 = vadd.f32 %v7736_v63, %v7496_v10  ;;  %v5848_v19 = vpop.f32.mrb[3].mxu0  ;;  %v6013_v37 = vadd.f32 %v7781_v54, %v10213_v21 }
 0x29d   : > { %v6011_v53 = vadd.f32 %v7782_v49, %v10213_v21  ;;  %v7784_v35 = vadd.f32 %v5848_v19, %v2957_v3 }
 0x29e   : > { %v6014_v55 = vadd.f32 %v7783_v50, %v10213_v21  ;;  %v6242_v17 = vmul.f32 %v6013_v37, %v6013_v37 }
 0x29f   : > { %v6012_v13 = vadd.f32 %v7784_v35, %v10213_v21  ;;  %v6240_v22 = vmul.f32 %v6011_v53, %v6011_v53 }
 0x2a0   : > { %v7015_v33 = vpack.c.bf16 %v6014_v55, %v6013_v37  ;;  %v6243_v1 = vmul.f32 %v6014_v55, %v6014_v55 }
 0x2a1   : > { %v7010_v31 = vpack.c.bf16 %v6012_v13, %v6011_v53  ;;  %v6203_v43 = vadd.f32 %v6012_v13, %v6011_v53  ;;  %v6241_v15 = vmul.f32 %v6012_v13, %v6012_v13  ;;  %v7739_v62 = vpop.f32.mrb[4].mxu0 }
 0x2a2   : > { %7102 = vst [vmem:[%s10221_s17 + $0x8] sm:$0xff] %v7015_v33   ;;  %v7785_v51 = vadd.f32 %v7739_v62, %v7499_v25  ;;  %v5861_v39 = vpop.f32.mrb[5].mxu0 }
 0x2a3   : > { %7011 = vst [vmem:[%s10221_s17] sm:$0xff] %v7010_v31   ;;  %v6204_v32 = vadd.f32 %v6203_v43, %v6013_v37  ;;  %v6272_v36 = vadd.f32 %v6241_v15, %v6240_v22  ;;  %v7786_v11 = vadd.f32 %v5861_v39, %v2970_v58  ;;  %v7740_v57 = vpop.f32.mrb[6].mxu0 }
 0x2a4   : > { %v7787_v34 = vadd.f32 %v7740_v57, %v7500_v38  ;;  %v5864_v24 = vpop.f32.mrb[7].mxu0  ;;  %v6017_v52 = vadd.f32 %v7785_v51, %v10213_v21 }
 0x2a5   : > { %v6273_v30 = vadd.f32 %v6272_v36, %v6242_v17  ;;  %v6015_v41 = vadd.f32 %v7786_v11, %v10213_v21  ;;  %v6205_v28 = vadd.f32 %v6204_v32, %v6014_v55  ;;  %v7788_v4 = vadd.f32 %v5864_v24, %v2973_v6 }
 0x2a6   : > { %v6018_v12 = vadd.f32 %v7787_v34, %v10213_v21  ;;  %v6246_v23 = vmul.f32 %v6017_v52, %v6017_v52 }
 0x2a7   : > { %v6206_v7 = vadd.f32 %v6205_v28, %v6015_v41  ;;  %v6244_v44 = vmul.f32 %v6015_v41, %v6015_v41  ;;  %v6274_v5 = vadd.f32 %v6273_v30, %v6243_v1  ;;  %v6016_v48 = vadd.f32 %v7788_v4, %v10213_v21 }
 0x2a8   : > { %v7025_v40 = vpack.c.bf16 %v6018_v12, %v6017_v52  ;;  %v6247_v25 = vmul.f32 %v6018_v12, %v6018_v12 }
 0x2a9   : > { %v6275_v2 = vadd.f32 %v6274_v5, %v6244_v44  ;;  %v7020_v42 = vpack.c.bf16 %v6016_v48, %v6015_v41  ;;  %v6207_v46 = vadd.f32 %v6206_v7, %v6016_v48  ;;  %v6245_v9 = vmul.f32 %v6016_v48, %v6016_v48  ;;  %v7743_v61 = vpop.f32.mrb[8].mxu0 }
 0x2aa   : > { %7104 = vst [vmem:[%s10221_s17 + $0x18] sm:$0xff] %v7025_v40   ;;  %v7789_v60 = vadd.f32 %v7743_v61, %v7503_v8  ;;  %v5877_v45 = vpop.f32.mrb[9].mxu0 }
 0x2ab   : > { %7103 = vst [vmem:[%s10221_s17 + $0x10] sm:$0xff] %v7020_v42   ;;  %v6208_v56 = vadd.f32 %v6207_v46, %v6017_v52  ;;  %v6276_v0 = vadd.f32 %v6275_v2, %v6245_v9  ;;  %v7790_v10 = vadd.f32 %v5877_v45, %v10195_v16  ;;  %v7744_v3 = vpop.f32.mrb[10].mxu0 }
 0x2ac   : > { %v7791_v58 = vadd.f32 %v7744_v3, %v10197_v59  ;;  %v5880_v38 = vpop.f32.mrb[11].mxu0  ;;  %v6021_v8 = vadd.f32 %v7789_v60, %v10213_v21 }
 0x2ad   : > { %v6277_v6 = vadd.f32 %v6276_v0, %v6246_v23  ;;  %v6019_v14 = vadd.f32 %v7790_v10, %v10213_v21  ;;  %v6209_v54 = vadd.f32 %v6208_v56, %v6018_v12  ;;  %v7792_v26 = vadd.f32 %v5880_v38, %v10199_v29 }
 0x2ae   : > { %v6022_v49 = vadd.f32 %v7791_v58, %v10213_v21  ;;  %v6250_v22 = vmul.f32 %v6021_v8, %v6021_v8 }
 0x2af   : > { %v6210_v63 = vadd.f32 %v6209_v54, %v6019_v14  ;;  %v6248_v50 = vmul.f32 %v6019_v14, %v6019_v14  ;;  %v6278_v16 = vadd.f32 %v6277_v6, %v6247_v25  ;;  %v6020_v19 = vadd.f32 %v7792_v26, %v10213_v21 }
 0x2b0   : > { %v7035_v53 = vpack.c.bf16 %v6022_v49, %v6021_v8  ;;  %v6251_v51 = vmul.f32 %v6022_v49, %v6022_v49 }
 0x2b1   : > { %v6279_v59 = vadd.f32 %v6278_v16, %v6248_v50  ;;  %v7030_v35 = vpack.c.bf16 %v6020_v19, %v6019_v14  ;;  %v6211_v37 = vadd.f32 %v6210_v63, %v6020_v19  ;;  %v6249_v55 = vmul.f32 %v6020_v19, %v6020_v19  ;;  %v7747_v13 = vpop.f32.mrb[12].mxu0 }
 0x2b2   : > { %7106 = vst [vmem:[%s10221_s17 + $0x28] sm:$0xff] %v7035_v53   ;;  %v7793_v33 = vadd.f32 %v7747_v13, %v10201_v20  ;;  %v5893_v29 = vpop.f32.mrb[13].mxu0 }
 0x2b3   : > { %7105 = vst [vmem:[%s10221_s17 + $0x20] sm:$0xff] %v7030_v35   ;;  %v6212_v31 = vadd.f32 %v6211_v37, %v6021_v8  ;;  %v6280_v43 = vadd.f32 %v6279_v59, %v6249_v55  ;;  %v7794_v15 = vadd.f32 %v5893_v29, %v10203_v18  ;;  %v7748_v62 = vpop.f32.mrb[14].mxu0 }
 0x2b4   : > { %v7795_v39 = vadd.f32 %v7748_v62, %v10205_v47  ;;  %v5896_v17 = vpop.f32.mrb[15].mxu0  ;;  %v6025_v20 = vadd.f32 %v7793_v33, %v10213_v21 }
 0x2b5   : > { %v6281_v32 = vadd.f32 %v6280_v43, %v6250_v22  ;;  %v6023_v36 = vadd.f32 %v7794_v15, %v10213_v21  ;;  %v6213_v11 = vadd.f32 %v6212_v31, %v6022_v49  ;;  %v7796_v57 = vadd.f32 %v5896_v17, %v10208_v27 }
 0x2b6   : > { %v6026_v1 = vadd.f32 %v7795_v39, %v10213_v21  ;;  %v6254_v2 = vmul.f32 %v6025_v20, %v6025_v20 }
 0x2b7   : > { %v6214_v34 = vadd.f32 %v6213_v11, %v6023_v36  ;;  %v6252_v24 = vmul.f32 %v6023_v36, %v6023_v36  ;;  %v6282_v30 = vadd.f32 %v6281_v32, %v6251_v51  ;;  %v6024_v18 = vadd.f32 %v7796_v57, %v10213_v21 }
 0x2b8   : > { %v7045_v47 = vpack.c.bf16 %v6026_v1, %v6025_v20  ;;  %v6255_v60 = vmul.f32 %v6026_v1, %v6026_v1 }
 0x2b9   : > { %v6283_v4 = vadd.f32 %v6282_v30, %v6252_v24  ;;  %v7040_v52 = vpack.c.bf16 %v6024_v18, %v6023_v36  ;;  %v6215_v12 = vadd.f32 %v6214_v34, %v6024_v18  ;;  %v6253_v7 = vmul.f32 %v6024_v18, %v6024_v18  ;;  %v7751_v44 = vpop.f32.mrb[16].mxu0 }
 0x2ba   : > { %7108 = vst [vmem:[%s10221_s17 + $0x38] sm:$0xff] %v7045_v47   ;;  %v5909_v48 = vpop.f32.mrb[17].mxu0 }
 0x2bb   : > { %v7559_v41 = vpop.f32.mrb[16].mxu1  ;;  %7107 = vst [vmem:[%s10221_s17 + $0x30] sm:$0xff] %v7040_v52   ;;  %v6216_v42 = vadd.f32 %v6215_v12, %v6025_v20  ;;  %v6284_v46 = vadd.f32 %v6283_v4, %v6253_v7  ;;  %v7752_v61 = vpop.f32.mrb[18].mxu0 }
 0x2bc   : > { %v3772_v28 = vpop.f32.mrb[17].mxu1  ;;  %v7797_v5 = vadd.f32 %v7751_v44, %v7559_v41  ;;  %v5912_v23 = vpop.f32.mrb[19].mxu0 }
 0x2bd   : > { %v7560_v27 = vpop.f32.mrb[18].mxu1  ;;  %v7798_v9 = vadd.f32 %v5909_v48, %v3772_v28  ;;  %v6285_v56 = vadd.f32 %v6284_v46, %v6254_v2  ;;  %v6217_v10 = vadd.f32 %v6216_v42, %v6026_v1 }
 0x2be   : > { %v3775_v40 = vpop.f32.mrb[19].mxu1  ;;  %v7799_v45 = vadd.f32 %v7752_v61, %v7560_v27  ;;  %v6029_v25 = vadd.f32 %v7797_v5, %v10213_v21 }
 0x2bf   : > { %v6027_v0 = vadd.f32 %v7798_v9, %v10213_v21  ;;  %v7800_v3 = vadd.f32 %v5912_v23, %v3775_v40  ;;  %v6286_v14 = vadd.f32 %v6285_v56, %v6255_v60 }
 0x2c0   : > { %v6030_v58 = vadd.f32 %v7799_v45, %v10213_v21  ;;  %v6258_v13 = vmul.f32 %v6029_v25, %v6029_v25 }
 0x2c1   : > { %v6218_v38 = vadd.f32 %v6217_v10, %v6027_v0  ;;  %v6256_v6 = vmul.f32 %v6027_v0, %v6027_v0  ;;  %v6028_v54 = vadd.f32 %v7800_v3, %v10213_v21  ;;  %v7755_v53 = vpop.f32.mrb[20].mxu0 }
 0x2c2   : > { %v7055_v8 = vpack.c.bf16 %v6030_v58, %v6029_v25  ;;  %v5925_v37 = vpop.f32.mrb[21].mxu0  ;;  %v6259_v43 = vmul.f32 %v6030_v58, %v6030_v58 }
 0x2c3   : > { %v7563_v26 = vpop.f32.mrb[20].mxu1  ;;  %v6287_v63 = vadd.f32 %v6286_v14, %v6256_v6  ;;  %v7050_v50 = vpack.c.bf16 %v6028_v54, %v6027_v0  ;;  %v6219_v16 = vadd.f32 %v6218_v38, %v6028_v54  ;;  %v6257_v19 = vmul.f32 %v6028_v54, %v6028_v54  ;;  %v7756_v31 = vpop.f32.mrb[22].mxu0 }
 0x2c4   : > { %v3788_v49 = vpop.f32.mrb[21].mxu1  ;;  %7110 = vst [vmem:[%s10221_s17 + $0x48] sm:$0xff] %v7055_v8   ;;  %v7801_v35 = vadd.f32 %v7755_v53, %v7563_v26  ;;  %v5928_v62 = vpop.f32.mrb[23].mxu0 }
 0x2c5   : > { %v7564_v59 = vpop.f32.mrb[22].mxu1  ;;  %7109 = vst [vmem:[%s10221_s17 + $0x40] sm:$0xff] %v7050_v50   ;;  %v6220_v33 = vadd.f32 %v6219_v16, %v6029_v25  ;;  %v6288_v29 = vadd.f32 %v6287_v63, %v6257_v19  ;;  %v7802_v22 = vadd.f32 %v5925_v37, %v3788_v49 }
 0x2c6   : > { %v3791_v55 = vpop.f32.mrb[23].mxu1  ;;  %v7803_v15 = vadd.f32 %v7756_v31, %v7564_v59  ;;  %v6033_v36 = vadd.f32 %v7801_v35, %v10213_v21 }
 0x2c7   : > { %v6289_v51 = vadd.f32 %v6288_v29, %v6258_v13  ;;  %v6031_v39 = vadd.f32 %v7802_v22, %v10213_v21  ;;  %v6221_v17 = vadd.f32 %v6220_v33, %v6030_v58  ;;  %v7804_v32 = vadd.f32 %v5928_v62, %v3791_v55 }
 0x2c8   : > { %v6034_v11 = vadd.f32 %v7803_v15, %v10213_v21  ;;  %v6262_v5 = vmul.f32 %v6033_v36, %v6033_v36 }
 0x2c9   : > { %v6222_v57 = vadd.f32 %v6221_v17, %v6031_v39  ;;  %v6260_v20 = vmul.f32 %v6031_v39, %v6031_v39  ;;  %v6290_v1 = vadd.f32 %v6289_v51, %v6259_v43  ;;  %v6032_v34 = vadd.f32 %v7804_v32, %v10213_v21  ;;  %v7759_v52 = vpop.f32.mrb[24].mxu0 }
 0x2ca   : > { %v7065_v30 = vpack.c.bf16 %v6034_v11, %v6033_v36  ;;  %v5941_v44 = vpop.f32.mrb[25].mxu0  ;;  %v6263_v46 = vmul.f32 %v6034_v11, %v6034_v11 }
 0x2cb   : > { %v7567_v24 = vpop.f32.mrb[24].mxu1  ;;  %v6291_v41 = vadd.f32 %v6290_v1, %v6260_v20  ;;  %v7060_v47 = vpack.c.bf16 %v6032_v34, %v6031_v39  ;;  %v6223_v28 = vadd.f32 %v6222_v57, %v6032_v34  ;;  %v6261_v4 = vmul.f32 %v6032_v34, %v6032_v34  ;;  %v7760_v42 = vpop.f32.mrb[26].mxu0 }
 0x2cc   : > { %v3804_v18 = vpop.f32.mrb[25].mxu1  ;;  %7112 = vst [vmem:[%s10221_s17 + $0x58] sm:$0xff] %v7065_v30   ;;  %v7805_v7 = vadd.f32 %v7759_v52, %v7567_v24  ;;  %v5944_v61 = vpop.f32.mrb[27].mxu0 }
 0x2cd   : > { %v7568_v12 = vpop.f32.mrb[26].mxu1  ;;  %7111 = vst [vmem:[%s10221_s17 + $0x50] sm:$0xff] %v7060_v47   ;;  %v6224_v48 = vadd.f32 %v6223_v28, %v6033_v36  ;;  %v6292_v40 = vadd.f32 %v6291_v41, %v6261_v4  ;;  %v7806_v2 = vadd.f32 %v5941_v44, %v3804_v18 }
 0x2ce   : > { %v3807_v27 = vpop.f32.mrb[27].mxu1  ;;  %v7807_v9 = vadd.f32 %v7760_v42, %v7568_v12  ;;  %v6037_v0 = vadd.f32 %v7805_v7, %v10213_v21 }
 0x2cf   : > { %v6293_v60 = vadd.f32 %v6292_v40, %v6262_v5  ;;  %v6035_v45 = vadd.f32 %v7806_v2, %v10213_v21  ;;  %v6225_v23 = vadd.f32 %v6224_v48, %v6034_v11  ;;  %v7808_v56 = vadd.f32 %v5944_v61, %v3807_v27 }
 0x2d0   : > { %v6038_v10 = vadd.f32 %v7807_v9, %v10213_v21  ;;  %v6266_v35 = vmul.f32 %v6037_v0, %v6037_v0 }
 0x2d1   : > { %v6226_v3 = vadd.f32 %v6225_v23, %v6035_v45  ;;  %v6264_v25 = vmul.f32 %v6035_v45, %v6035_v45  ;;  %v6294_v58 = vadd.f32 %v6293_v60, %v6263_v46  ;;  %v6036_v38 = vadd.f32 %v7808_v56, %v10213_v21  ;;  %v7763_v50 = vpop.f32.mrb[28].mxu0 }
 0x2d2   : > { %v7075_v14 = vpack.c.bf16 %v6038_v10, %v6037_v0  ;;  %v5957_v53 = vpop.f32.mrb[29].mxu0  ;;  %v6267_v29 = vmul.f32 %v6038_v10, %v6038_v10 }
 0x2d3   : > { %v7571_v6 = vpop.f32.mrb[28].mxu1  ;;  %v6295_v26 = vadd.f32 %v6294_v58, %v6264_v25  ;;  %v7070_v8 = vpack.c.bf16 %v6036_v38, %v6035_v45  ;;  %v6227_v49 = vadd.f32 %v6226_v3, %v6036_v38  ;;  %v6265_v63 = vmul.f32 %v6036_v38, %v6036_v38  ;;  %v7764_v33 = vpop.f32.mrb[30].mxu0 }
 0x2d4   : > { %v3820_v54 = vpop.f32.mrb[29].mxu1  ;;  %7114 = vst [vmem:[%s10221_s17 + $0x68] sm:$0xff] %v7075_v14   ;;  %v7809_v19 = vadd.f32 %v7763_v50, %v7571_v6  ;;  %v5960_v31 = vpop.f32.mrb[31].mxu0 }
 0x2d5   : > { %v7572_v16 = vpop.f32.mrb[30].mxu1  ;;  %7113 = vst [vmem:[%s10221_s17 + $0x60] sm:$0xff] %v7070_v8   ;;  %v6228_v37 = vadd.f32 %v6227_v49, %v6037_v0  ;;  %v6296_v55 = vadd.f32 %v6295_v26, %v6265_v63  ;;  %v7810_v13 = vadd.f32 %v5957_v53, %v3820_v54 }
 0x2d6   : > { %v3823_v59 = vpop.f32.mrb[31].mxu1  ;;  %v7811_v22 = vadd.f32 %v7764_v33, %v7572_v16  ;;  %v6041_v39 = vadd.f32 %v7809_v19, %v10213_v21 }
 0x2d7   : > { %v6297_v43 = vadd.f32 %v6296_v55, %v6266_v35  ;;  %v6039_v15 = vadd.f32 %v7810_v13, %v10213_v21  ;;  %v6229_v62 = vadd.f32 %v6228_v37, %v6038_v10  ;;  %v7812_v51 = vadd.f32 %v5960_v31, %v3823_v59 }
 0x2d8   : > { %v6042_v17 = vadd.f32 %v7811_v22, %v10213_v21  ;;  %v6270_v18 = vmul.f32 %v6041_v39, %v6041_v39 }
 0x2d9   : > { %v6230_v32 = vadd.f32 %v6229_v62, %v6039_v15  ;;  %v6268_v36 = vmul.f32 %v6039_v15, %v6039_v15  ;;  %v6298_v11 = vadd.f32 %v6297_v43, %v6267_v29  ;;  %v6040_v57 = vadd.f32 %v7812_v51, %v10213_v21 }
 0x2da   : > { %v7085_v20 = vpack.c.bf16 %v6042_v17, %v6041_v39  ;;  %v6271_v28 = vmul.f32 %v6042_v17, %v6042_v17 }
 0x2db   : > { %v6299_v1 = vadd.f32 %v6298_v11, %v6268_v36  ;;  %v7080_v34 = vpack.c.bf16 %v6040_v57, %v6039_v15  ;;  %v6231_v24 = vadd.f32 %v6230_v32, %v6040_v57  ;;  %v6269_v30 = vmul.f32 %v6040_v57, %v6040_v57 }
 0x2dc   : > { %7116 = vst [vmem:[%s10221_s17 + $0x78] sm:$0xff] %v7085_v20  }
 0x2dd   : > { %7115 = vst [vmem:[%s10221_s17 + $0x70] sm:$0xff] %v7080_v34   ;;  %v6232_v41 = vadd.f32 %v6231_v24, %v6041_v39  ;;  %v6300_v47 = vadd.f32 %v6299_v1, %v6269_v30 }
 0x2df   : > { %v6233_v4 = vadd.f32 %v6232_v41, %v6042_v17  ;;  %v6301_v52 = vadd.f32 %v6300_v47, %v6270_v18 }
 0x2e1   : > { %v6234_v12 = vrot.slane %v6233_v4, 4  ;;  %v6302_v7 = vadd.f32 %v6301_v52, %v6271_v28 }
 0x2e3   : > { %v6235_v44 = vadd.f32 %v6234_v12, %v6233_v4  ;;  %v6303_v21 = vrot.slane %v6302_v7, 4 }
 0x2e5   : > { %v6236_v27 = vrot.slane %v6235_v44, 2  ;;  %v6304_v5 = vadd.f32 %v6303_v21, %v6302_v7 }
 0x2e7   : > { %v6237_v48 = vadd.f32 %v6236_v27, %v6235_v44  ;;  %v6305_v40 = vrot.slane %v6304_v5, 2 }
 0x2e9   : > { %v6238_v2 = vrot.slane %v6237_v48, 1  ;;  %v6306_v42 = vadd.f32 %v6305_v40, %v6304_v5 }
 0x2eb   : > { %v6307_v46 = vrot.slane %v6306_v42, 1  ;;  %v6239_v9 = vadd.f32 %v6238_v2, %v6237_v48 }
 0x2ed   : > { %v6308_v61 = vadd.f32 %v6307_v46, %v6306_v42 }
 0x2ef   : > { %v6310_v60 = vsel %vm1086_vm4, %v6239_v9, %v6308_v61 }
 0x2f0   : > { %6311 = vst [vmem:[%s429_s26] sm:$0x3] %v6310_v60 }
 0x2f1 PF: > { %p14_p10 = scmp.ge.s32.totalorder %s8343_s25, 4   ;;  %s10370_s21 = smov %s8282_s22 }
 0x2f2   : > { %s10371_s22 = smov %s8352_s28  ;;  %s10372_s23 = smov %s8343_s25 }
 0x2f3   :  { %16 = sbr.rel (!%p14_p10) target bundleno = 2 (0x2), region = 138 }

</bundles_post_ra>
